<compile_context>
chip_gen: v5e
topology: v5e:2x2
jax: 0.10.0
libtpu: 0.0.40
codegen_flags: <defaults>
</compile_context>

<pallas_src>
import jax
import jax.numpy as jnp
from jax.experimental import pallas as pl
from jax.experimental.pallas import tpu as pltpu

CONV_K = 26
POOL_K = 13
OUT_PAD = 128          # pad Linear2's 2 output columns to a full lane width


def _vmem_specs(n):
    return [pl.BlockSpec(memory_space=pltpu.MemorySpace.VMEM) for _ in range(n)]


def _sigmoid(v):
    # exp and approx-reciprocal both run in the EUP slot (keeps VALU free).
    return pl.reciprocal(1.0 + jnp.exp(-v), approx=True)


# ----------------------------------------------------------------------------
# Kernel 1: Conv1d(k=26) + ReLU + MaxPool1d(13,13) via im2col, time-major out.
# ----------------------------------------------------------------------------
def conv_relu_pool_kernel(x_ref, w_ref, b_ref, o_ref):
    # x_ref: (L, B, Cin) f32 (time-major)   w_ref: (K*Cin, F) bf16
    # b_ref: (1, F) f32                     o_ref: (T_pool, B, F) f32
    L, B, Cin = x_ref.shape
    KC, F = w_ref.shape
    T_pool = o_ref.shape[0]
    T_conv = L - CONV_K + 1

    x = x_ref[...]
    # im2col: single (T_conv*B, K*Cin) patch matrix -> ONE MXU matmul
    # (vs. 26 tiny contraction-4 matmuls + per-step weight broadcasts).
    # TODO(synk): at production L~1000 pre-im2col in the wrapper / tile time.
    patches = jnp.concatenate([x[k:k + T_conv] for k in range(CONV_K)], axis=-1)
    acc = jnp.dot(patches.reshape(T_conv * B, KC).astype(jnp.bfloat16),
                  w_ref[...], preferred_element_type=jnp.float32)
    acc = jnp.maximum(acc.reshape(T_conv, B, F) + b_ref[...], 0.0)
    # Non-overlapping max pool over time; one dense store of the full output.
    o_ref[...] = jnp.max(
        acc[:T_pool * POOL_K].reshape(T_pool, POOL_K, B, F), axis=1)


# ----------------------------------------------------------------------------
# Kernel 2: 2-layer bidirectional LSTM + flatten + Linear1 + ReLU + Linear2.
# ----------------------------------------------------------------------------
def bilstm2_mlp_kernel(x_ref, wih1_ref, whh1_ref, bg1_ref,
                       wih2_ref, whh2_ref, bg2_ref,
                       w1_ref, b1_ref, w2_ref, b2_ref, o_ref,
                       xw1_sc, xw2_sc, y1f_sc, y1b_sc, y2f_sc, y2b_sc,
                       h_sc, c_sc):
    # x_ref:   (T, B, Din) f32 time-major
    # wihN:    (Din_N, 8H) bf16   [fwd i,f,g,o | bwd i,f,g,o]
    # whhN:    (2H, 8H)  bf16 block-diagonal
    # bgN:     (1, 8H)   f32  (b_ih + b_hh per direction)
    # w1_ref:  (T, 2H, D_mid) bf16   b1_ref: (1, D_mid) f32
    # w2_ref:  (D_mid, OUT_PAD) bf16 b2_ref: (1, OUT_PAD) f32
    # o_ref:   (B, OUT_PAD) f32
    T, B, _ = x_ref.shape
    H = y1f_sc.shape[-1]

    def run_bilstm(x_val, wih_ref, whh_ref, b_ref, xw_sc, yf_sc, yb_sc):
        Dx = x_val.shape[-1]
        # Hoisted input projection: ONE (T*B, Dx) matmul instead of T tiny
        # per-step matmuls on the serial recurrence path.
        xw = jnp.dot(x_val.reshape(T * B, Dx).astype(jnp.bfloat16),
                     wih_ref[...], preferred_element_type=jnp.float32)
        xw_sc[...] = xw.reshape(T, B, 8 * H)
        h_sc[...] = jnp.zeros_like(h_sc)
        c_sc[...] = jnp.zeros_like(c_sc)

        def step(t):
            h = h_sc[...]
            c = c_sc[...]
            # Single recurrent matmul for both directions (block-diag W_hh).
            gh = jnp.dot(h.astype(jnp.bfloat16), whh_ref[...],
                         preferred_element_type=jnp.float32) + b_ref[...]
            gf = gh[:, :4 * H] + xw_sc[t][:, :4 * H]            # fwd @ time t
            gb = gh[:, 4 * H:] + xw_sc[T - 1 - t][:, 4 * H:]    # bwd @ T-1-t

            def cell(g, c_prev):
                # PyTorch gate order i, f, g, o.  Gate math kept in f32.
                i_g = _sigmoid(g[:, 0:H])
                f_g = _sigmoid(g[:, H:2 * H])
                g_g = jnp.tanh(g[:, 2 * H:3 * H])
                o_g = _sigmoid(g[:, 3 * H:4 * H])
                c_new = f_g * c_prev + i_g * g_g
                return o_g * jnp.tanh(c_new), c_new

            hf, cf = cell(gf, c[:, :H])
            hb, cb = cell(gb, c[:, H:])
            h_sc[...] = jnp.concatenate([hf, hb], axis=-1)
            c_sc[...] = jnp.concatenate([cf, cb], axis=-1)
            yf_sc[t] = hf
            yb_sc[T - 1 - t] = hb

        if T <= 8:                         # static unroll (LLO visibility)
            for t in range(T):
                step(t)
        else:
            pl.loop(0, T)(step)

    # Layer 1
    run_bilstm(x_ref[...], wih1_ref, whh1_ref, bg1_ref, xw1_sc, y1f_sc, y1b_sc)
    y1 = jnp.concatenate([y1f_sc[...], y1b_sc[...]], axis=-1)   # (T, B, 2H)
    # Layer 2 (PyTorch inter-layer dropout p=0.5: identity at inference)
    run_bilstm(y1, wih2_ref, whh2_ref, bg2_ref, xw2_sc, y2f_sc, y2b_sc)

    # Flatten (batch-first, time-major, [fwd|bwd]) + Linear1 via per-t
    # accumulation (avoids an in-kernel transpose), then ReLU + Linear2.
    y2 = jnp.concatenate([y2f_sc[...], y2b_sc[...]], axis=-1)   # (T, B, 2H)
    D_mid = b1_ref.shape[-1]
    acc = jnp.zeros((B, D_mid), jnp.float32)
    for t in range(T):                                          # static
        acc = acc + jnp.dot(y2[t].astype(jnp.bfloat16), w1_ref[t],
                            preferred_element_type=jnp.float32)
    h1 = jnp.maximum(acc + b1_ref[...], 0.0)
    o_ref[...] = jnp.dot(h1.astype(jnp.bfloat16), w2_ref[...],
                         preferred_element_type=jnp.float32) + b2_ref[...]


# ----------------------------------------------------------------------------
# Wrappers (weight re-layout + pallas_call plumbing only).
# ----------------------------------------------------------------------------
def conv_relu_pool(x_lbc, conv_w, conv_b):
    L, B, _ = x_lbc.shape
    F = conv_w.shape[0]
    T_pool = (L - CONV_K + 1) // POOL_K
    # (F, Cin, K) -> (K*Cin, F) to match the im2col patch layout.
    w2d = jnp.transpose(conv_w, (2, 1, 0)).reshape(-1, F).astype(jnp.bfloat16)
    return pl.pallas_call(
        conv_relu_pool_kernel,
        out_shape=jax.ShapeDtypeStruct((T_pool, B, F), jnp.float32),
        in_specs=_vmem_specs(3),
        out_specs=pl.BlockSpec(memory_space=pltpu.MemorySpace.VMEM),
    )(x_lbc, w2d, conv_b.reshape(1, F))


def _fuse_bilstm_params(fwd, bwd):
    w_ih_f, w_hh_f, b_ih_f, b_hh_f = fwd
    w_ih_b, w_hh_b, b_ih_b, b_hh_b = bwd
    H4 = w_ih_f.shape[0]
    H = H4 // 4
    wih = jnp.concatenate([w_ih_f.T, w_ih_b.T], axis=1).astype(jnp.bfloat16)
    whh = jnp.zeros((2 * H, 2 * H4), jnp.float32)
    whh = whh.at[:H, :H4].set(w_hh_f.T).at[H:, H4:].set(w_hh_b.T)
    whh = whh.astype(jnp.bfloat16)
    bg = jnp.concatenate([b_ih_f + b_hh_f, b_ih_b + b_hh_b]).reshape(1, 2 * H4)
    return wih, whh, bg


def bilstm2_mlp(x_tbf, params):
    T, B, _ = x_tbf.shape
    wih1, whh1, bg1 = _fuse_bilstm_params(params['lstm1_fwd'], params['lstm1_bwd'])
    wih2, whh2, bg2 = _fuse_bilstm_params(params['lstm2_fwd'], params['lstm2_bwd'])
    H = whh1.shape[0] // 2
    D_mid = params['w1'].shape[0]
    n_out = params['w2'].shape[0]

    # Linear1 weight (D_mid, T*2H) -> time-major (T, 2H, D_mid).
    w1t = params['w1'].T.reshape(T, 2 * H, D_mid).astype(jnp.bfloat16)
    b1 = params['b1'].reshape(1, D_mid)
    # Pad Linear2 to 128 output lanes (dense store); slice afterwards.
    pad = OUT_PAD - n_out
    w2p = jnp.concatenate(
        [params['w2'].T, jnp.zeros((D_mid, pad), jnp.float32)], axis=1
    ).astype(jnp.bfloat16)
    b2p = jnp.concatenate(
        [params['b2'], jnp.zeros((pad,), jnp.float32)]).reshape(1, OUT_PAD)

    out = pl.pallas_call(
        bilstm2_mlp_kernel,
        out_shape=jax.ShapeDtypeStruct((B, OUT_PAD), jnp.float32),
        in_specs=_vmem_specs(11),
        out_specs=pl.BlockSpec(memory_space=pltpu.MemorySpace.VMEM),
        scratch_shapes=[
            pltpu.VMEM((T, B, 8 * H), jnp.float32),   # xw1
            pltpu.VMEM((T, B, 8 * H), jnp.float32),   # xw2
            pltpu.VMEM((T, B, H), jnp.float32),       # y1 fwd
            pltpu.VMEM((T, B, H), jnp.float32),       # y1 bwd
            pltpu.VMEM((T, B, H), jnp.float32),       # y2 fwd
            pltpu.VMEM((T, B, H), jnp.float32),       # y2 bwd
            pltpu.VMEM((B, 2 * H), jnp.float32),      # h state
            pltpu.VMEM((B, 2 * H), jnp.float32),      # c state
        ],
    )(x_tbf, wih1, whh1, bg1, wih2, whh2, bg2, w1t, b1, w2p, b2p)
    return out[:, :n_out]


def danq_forward(params, x_ncl):
    # x_ncl: (B, 4, L) -- PyTorch NCW layout for Conv1d.
    x_lbc = jnp.transpose(x_ncl, (2, 0, 1))              # (L, B, Cin) time-major
    h = conv_relu_pool(x_lbc, params['conv_w'], params['conv_b'])
    # Dropout (p=0.2 after pool, p=0.5 between LSTM layers): identity at
    # inference.  TODO(synk): training-mode dropout not implemented.
    return bilstm2_mlp(h, params)


# ----------------------------------------------------------------------------
# Deterministic parameter init (PyTorch-style uniform bounds).
# ----------------------------------------------------------------------------
def _uniform(key, shape, bound):
    return jax.random.uniform(key, shape, jnp.float32, -bound, bound)


def init_params(key, feat, hid, d_flat, d_mid):
    ks = list(jax.random.split(key, 32))
    kit = iter(ks)

    def nxt():
        return next(kit)

    cb = 1.0 / (4 * CONV_K) ** 0.5
    hb = 1.0 / hid ** 0.5
    params = {
        'conv_w': _uniform(nxt(), (feat, 4, CONV_K), cb),
        'conv_b': _uniform(nxt(), (feat,), cb),
        'w1': _uniform(nxt(), (d_mid, d_flat), 1.0 / d_flat ** 0.5),
        'b1': _uniform(nxt(), (d_mid,), 1.0 / d_flat ** 0.5),
        'w2': _uniform(nxt(), (2, d_mid), 1.0 / d_mid ** 0.5),
        'b2': _uniform(nxt(), (2,), 1.0 / d_mid ** 0.5),
    }

    def lstm_params(d_in):
        return (_uniform(nxt(), (4 * hid, d_in), hb),    # W_ih
                _uniform(nxt(), (4 * hid, hid), hb),     # W_hh
                _uniform(nxt(), (4 * hid,), hb),         # b_ih
                _uniform(nxt(), (4 * hid,), hb))         # b_hh

    params['lstm1_fwd'] = lstm_params(feat)
    params['lstm1_bwd'] = lstm_params(feat)
    params['lstm2_fwd'] = lstm_params(2 * hid)
    params['lstm2_bwd'] = lstm_params(2 * hid)
    return params


if __name__ == "__main__":
    B, C_IN, L = 2, 4, 64          # small sequence (original DanQ uses L ~ 1000)
    FEAT = 32                      # config['feature_multiplier'] (scaled down)
    HID = 16                       # LSTM hidden (scaled from 320)
    T_POOL = (L - CONV_K + 1) // POOL_K        # = 3
    D_FLAT = T_POOL * 2 * HID                  # analogue of 10880
    D_MID = 48                                 # analogue of 925

    key = jax.random.PRNGKey(0)
    k_x, k_p = jax.random.split(key)
    x = jax.random.normal(k_x, (B, C_IN, L), jnp.float32)
    params = init_params(k_p, FEAT, HID, D_FLAT, D_MID)

    fwd = jax.jit(danq_forward)
    out = jax.block_until_ready(fwd(params, x))
    assert out.shape == (B, 2), out.shape
    print("KERNEL_OK")
</pallas_src>

<mosaic_0001>
module attributes {stable_mosaic.version = 11 : i64} {
  func.func @conv_relu_pool_kernel(%arg0: memref<64x2x4xf32, #tpu.memory_space<vmem>>, %arg1: memref<104x32xbf16, #tpu.memory_space<vmem>>, %arg2: memref<1x32xf32, #tpu.memory_space<vmem>>, %arg3: memref<3x2x32xf32, #tpu.memory_space<vmem>>) attributes {dimension_semantics = [], scalar_prefetch = 0 : i64, scratch_operands = 0 : i64, tpu.core_type = #tpu.core_type<tc>} {
    %c0 = arith.constant 0 : index
    %c0_0 = arith.constant 0 : index
    %c0_1 = arith.constant 0 : index
    %0 = vector.load %arg0[%c0, %c0_0, %c0_1] : memref<64x2x4xf32, #tpu.memory_space<vmem>>, vector<64x2x4xf32>
    %1 = vector.extract_strided_slice %0 {offsets = [0, 0, 0], sizes = [39, 2, 4], strides = [1, 1, 1]} : vector<64x2x4xf32> to vector<39x2x4xf32>
    %2 = vector.extract_strided_slice %0 {offsets = [1, 0, 0], sizes = [39, 2, 4], strides = [1, 1, 1]} : vector<64x2x4xf32> to vector<39x2x4xf32>
    %3 = vector.extract_strided_slice %0 {offsets = [2, 0, 0], sizes = [39, 2, 4], strides = [1, 1, 1]} : vector<64x2x4xf32> to vector<39x2x4xf32>
    %4 = vector.extract_strided_slice %0 {offsets = [3, 0, 0], sizes = [39, 2, 4], strides = [1, 1, 1]} : vector<64x2x4xf32> to vector<39x2x4xf32>
    %5 = vector.extract_strided_slice %0 {offsets = [4, 0, 0], sizes = [39, 2, 4], strides = [1, 1, 1]} : vector<64x2x4xf32> to vector<39x2x4xf32>
    %6 = vector.extract_strided_slice %0 {offsets = [5, 0, 0], sizes = [39, 2, 4], strides = [1, 1, 1]} : vector<64x2x4xf32> to vector<39x2x4xf32>
    %7 = vector.extract_strided_slice %0 {offsets = [6, 0, 0], sizes = [39, 2, 4], strides = [1, 1, 1]} : vector<64x2x4xf32> to vector<39x2x4xf32>
    %8 = vector.extract_strided_slice %0 {offsets = [7, 0, 0], sizes = [39, 2, 4], strides = [1, 1, 1]} : vector<64x2x4xf32> to vector<39x2x4xf32>
    %9 = vector.extract_strided_slice %0 {offsets = [8, 0, 0], sizes = [39, 2, 4], strides = [1, 1, 1]} : vector<64x2x4xf32> to vector<39x2x4xf32>
    %10 = vector.extract_strided_slice %0 {offsets = [9, 0, 0], sizes = [39, 2, 4], strides = [1, 1, 1]} : vector<64x2x4xf32> to vector<39x2x4xf32>
    %11 = vector.extract_strided_slice %0 {offsets = [10, 0, 0], sizes = [39, 2, 4], strides = [1, 1, 1]} : vector<64x2x4xf32> to vector<39x2x4xf32>
    %12 = vector.extract_strided_slice %0 {offsets = [11, 0, 0], sizes = [39, 2, 4], strides = [1, 1, 1]} : vector<64x2x4xf32> to vector<39x2x4xf32>
    %13 = vector.extract_strided_slice %0 {offsets = [12, 0, 0], sizes = [39, 2, 4], strides = [1, 1, 1]} : vector<64x2x4xf32> to vector<39x2x4xf32>
    %14 = vector.extract_strided_slice %0 {offsets = [13, 0, 0], sizes = [39, 2, 4], strides = [1, 1, 1]} : vector<64x2x4xf32> to vector<39x2x4xf32>
    %15 = vector.extract_strided_slice %0 {offsets = [14, 0, 0], sizes = [39, 2, 4], strides = [1, 1, 1]} : vector<64x2x4xf32> to vector<39x2x4xf32>
    %16 = vector.extract_strided_slice %0 {offsets = [15, 0, 0], sizes = [39, 2, 4], strides = [1, 1, 1]} : vector<64x2x4xf32> to vector<39x2x4xf32>
    %17 = vector.extract_strided_slice %0 {offsets = [16, 0, 0], sizes = [39, 2, 4], strides = [1, 1, 1]} : vector<64x2x4xf32> to vector<39x2x4xf32>
    %18 = vector.extract_strided_slice %0 {offsets = [17, 0, 0], sizes = [39, 2, 4], strides = [1, 1, 1]} : vector<64x2x4xf32> to vector<39x2x4xf32>
    %19 = vector.extract_strided_slice %0 {offsets = [18, 0, 0], sizes = [39, 2, 4], strides = [1, 1, 1]} : vector<64x2x4xf32> to vector<39x2x4xf32>
    %20 = vector.extract_strided_slice %0 {offsets = [19, 0, 0], sizes = [39, 2, 4], strides = [1, 1, 1]} : vector<64x2x4xf32> to vector<39x2x4xf32>
    %21 = vector.extract_strided_slice %0 {offsets = [20, 0, 0], sizes = [39, 2, 4], strides = [1, 1, 1]} : vector<64x2x4xf32> to vector<39x2x4xf32>
    %22 = vector.extract_strided_slice %0 {offsets = [21, 0, 0], sizes = [39, 2, 4], strides = [1, 1, 1]} : vector<64x2x4xf32> to vector<39x2x4xf32>
    %23 = vector.extract_strided_slice %0 {offsets = [22, 0, 0], sizes = [39, 2, 4], strides = [1, 1, 1]} : vector<64x2x4xf32> to vector<39x2x4xf32>
    %24 = vector.extract_strided_slice %0 {offsets = [23, 0, 0], sizes = [39, 2, 4], strides = [1, 1, 1]} : vector<64x2x4xf32> to vector<39x2x4xf32>
    %25 = vector.extract_strided_slice %0 {offsets = [24, 0, 0], sizes = [39, 2, 4], strides = [1, 1, 1]} : vector<64x2x4xf32> to vector<39x2x4xf32>
    %26 = vector.extract_strided_slice %0 {offsets = [25, 0, 0], sizes = [39, 2, 4], strides = [1, 1, 1]} : vector<64x2x4xf32> to vector<39x2x4xf32>
    %27 = tpu.concatenate %1, %2, %3, %4, %5, %6, %7, %8, %9, %10, %11, %12, %13, %14, %15, %16 in 2 : vector<39x2x4xf32>, vector<39x2x4xf32>, vector<39x2x4xf32>, vector<39x2x4xf32>, vector<39x2x4xf32>, vector<39x2x4xf32>, vector<39x2x4xf32>, vector<39x2x4xf32>, vector<39x2x4xf32>, vector<39x2x4xf32>, vector<39x2x4xf32>, vector<39x2x4xf32>, vector<39x2x4xf32>, vector<39x2x4xf32>, vector<39x2x4xf32>, vector<39x2x4xf32> -> vector<39x2x64xf32>
    %28 = tpu.concatenate %17, %18, %19, %20, %21, %22, %23, %24, %25, %26 in 2 : vector<39x2x4xf32>, vector<39x2x4xf32>, vector<39x2x4xf32>, vector<39x2x4xf32>, vector<39x2x4xf32>, vector<39x2x4xf32>, vector<39x2x4xf32>, vector<39x2x4xf32>, vector<39x2x4xf32>, vector<39x2x4xf32> -> vector<39x2x40xf32>
    %29 = tpu.concatenate %27, %28 in 2 : vector<39x2x64xf32>, vector<39x2x40xf32> -> vector<39x2x104xf32>
    %30 = vector.shape_cast %29 : vector<39x2x104xf32> to vector<78x104xf32>
    %31 = arith.truncf %30 : vector<78x104xf32> to vector<78x104xbf16>
    %c0_2 = arith.constant 0 : index
    %c0_3 = arith.constant 0 : index
    %32 = vector.load %arg1[%c0_2, %c0_3] : memref<104x32xbf16, #tpu.memory_space<vmem>>, vector<104x32xbf16>
    %cst = arith.constant dense<0.000000e+00> : vector<78x32xf32>
    %33 = tpu.matmul %31, %32, %cst {dimension_numbers = #tpu.dot_dimension_numbers<[1], [0], [0], [1], [0, 0, 1, 1], [], []>} : vector<78x104xbf16>, vector<104x32xbf16>, vector<78x32xf32> -> vector<78x32xf32>
    %34 = vector.shape_cast %33 : vector<78x32xf32> to vector<39x2x32xf32>
    %c0_4 = arith.constant 0 : index
    %c0_5 = arith.constant 0 : index
    %35 = vector.load %arg2[%c0_4, %c0_5] : memref<1x32xf32, #tpu.memory_space<vmem>>, vector<1x32xf32>
    %36 = vector.shape_cast %35 : vector<1x32xf32> to vector<1x1x32xf32>
    %37 = vector.broadcast %36 : vector<1x1x32xf32> to vector<39x2x32xf32>
    %38 = arith.addf %34, %37 : vector<39x2x32xf32>
    %cst_6 = arith.constant 0.000000e+00 : f32
    %39 = vector.broadcast %cst_6 : f32 to vector<39x2x32xf32>
    %40 = arith.maximumf %38, %39 : vector<39x2x32xf32>
    %41 = vector.shape_cast %40 : vector<39x2x32xf32> to vector<3x13x2x32xf32>
    %cst_7 = arith.constant dense<0xFF800000> : vector<3x2x32xf32>
    %42 = vector.multi_reduction <maximumf>, %41, %cst_7 [1] : vector<3x13x2x32xf32> to vector<3x2x32xf32>
    %c0_8 = arith.constant 0 : index
    %c0_9 = arith.constant 0 : index
    %c0_10 = arith.constant 0 : index
    %43 = vector.load %arg3[%c0_8, %c0_9, %c0_10] : memref<3x2x32xf32, #tpu.memory_space<vmem>>, vector<3x2x32xf32>
    tpu.vector_store %arg3[%c0_8, %c0_9, %c0_10], %42 {strides = array<i32>} : memref<3x2x32xf32, #tpu.memory_space<vmem>>, vector<3x2x32xf32>,
    return
  }
}

module attributes {stable_mosaic.version = 11 : i64} {
  func.func @bilstm2_mlp_kernel(%arg0: memref<3x2x32xf32, #tpu.memory_space<vmem>>, %arg1: memref<32x128xbf16, #tpu.memory_space<vmem>>, %arg2: memref<32x128xbf16, #tpu.memory_space<vmem>>, %arg3: memref<1x128xf32, #tpu.memory_space<vmem>>, %arg4: memref<32x128xbf16, #tpu.memory_space<vmem>>, %arg5: memref<32x128xbf16, #tpu.memory_space<vmem>>, %arg6: memref<1x128xf32, #tpu.memory_space<vmem>>, %arg7: memref<3x32x48xbf16, #tpu.memory_space<vmem>>, %arg8: memref<1x48xf32, #tpu.memory_space<vmem>>, %arg9: memref<48x128xbf16, #tpu.memory_space<vmem>>, %arg10: memref<1x128xf32, #tpu.memory_space<vmem>>, %arg11: memref<2x128xf32, #tpu.memory_space<vmem>>, %arg12: memref<3x2x128xf32, #tpu.memory_space<vmem>>, %arg13: memref<3x2x128xf32, #tpu.memory_space<vmem>>, %arg14: memref<3x2x16xf32, #tpu.memory_space<vmem>>, %arg15: memref<3x2x16xf32, #tpu.memory_space<vmem>>, %arg16: memref<3x2x16xf32, #tpu.memory_space<vmem>>, %arg17: memref<3x2x16xf32, #tpu.memory_space<vmem>>, %arg18: memref<2x32xf32, #tpu.memory_space<vmem>>, %arg19: memref<2x32xf32, #tpu.memory_space<vmem>>) attributes {dimension_semantics = [], scalar_prefetch = 0 : i64, scratch_operands = 8 : i64, tpu.core_type = #tpu.core_type<tc>} {
    %c0 = arith.constant 0 : index
    %c0_0 = arith.constant 0 : index
    %c0_1 = arith.constant 0 : index
    %0 = vector.load %arg0[%c0, %c0_0, %c0_1] : memref<3x2x32xf32, #tpu.memory_space<vmem>>, vector<3x2x32xf32>
    %1 = vector.shape_cast %0 : vector<3x2x32xf32> to vector<6x32xf32>
    %2 = arith.truncf %1 : vector<6x32xf32> to vector<6x32xbf16>
    %c0_2 = arith.constant 0 : index
    %c0_3 = arith.constant 0 : index
    %3 = vector.load %arg1[%c0_2, %c0_3] : memref<32x128xbf16, #tpu.memory_space<vmem>>, vector<32x128xbf16>
    %cst = arith.constant dense<0.000000e+00> : vector<6x128xf32>
    %4 = tpu.matmul %2, %3, %cst {dimension_numbers = #tpu.dot_dimension_numbers<[1], [0], [0], [1], [0, 0, 1, 1], [], []>} : vector<6x32xbf16>, vector<32x128xbf16>, vector<6x128xf32> -> vector<6x128xf32>
    %5 = vector.shape_cast %4 : vector<6x128xf32> to vector<3x2x128xf32>
    %c0_4 = arith.constant 0 : index
    %c0_5 = arith.constant 0 : index
    %c0_6 = arith.constant 0 : index
    %6 = vector.load %arg12[%c0_4, %c0_5, %c0_6] : memref<3x2x128xf32, #tpu.memory_space<vmem>>, vector<3x2x128xf32>
    tpu.vector_store %arg12[%c0_4, %c0_5, %c0_6], %5 {strides = array<i32>} : memref<3x2x128xf32, #tpu.memory_space<vmem>>, vector<3x2x128xf32>,
    %cst_7 = arith.constant 0.000000e+00 : f32
    %7 = vector.broadcast %cst_7 : f32 to vector<2x32xf32>
    %c0_8 = arith.constant 0 : index
    %c0_9 = arith.constant 0 : index
    %8 = vector.load %arg18[%c0_8, %c0_9] : memref<2x32xf32, #tpu.memory_space<vmem>>, vector<2x32xf32>
    tpu.vector_store %arg18[%c0_8, %c0_9], %7 {strides = array<i32>} : memref<2x32xf32, #tpu.memory_space<vmem>>, vector<2x32xf32>,
    %cst_10 = arith.constant 0.000000e+00 : f32
    %9 = vector.broadcast %cst_10 : f32 to vector<2x32xf32>
    %c0_11 = arith.constant 0 : index
    %c0_12 = arith.constant 0 : index
    %10 = vector.load %arg19[%c0_11, %c0_12] : memref<2x32xf32, #tpu.memory_space<vmem>>, vector<2x32xf32>
    tpu.vector_store %arg19[%c0_11, %c0_12], %9 {strides = array<i32>} : memref<2x32xf32, #tpu.memory_space<vmem>>, vector<2x32xf32>,
    %c0_13 = arith.constant 0 : index
    %c0_14 = arith.constant 0 : index
    %11 = vector.load %arg18[%c0_13, %c0_14] : memref<2x32xf32, #tpu.memory_space<vmem>>, vector<2x32xf32>
    %c0_15 = arith.constant 0 : index
    %c0_16 = arith.constant 0 : index
    %12 = vector.load %arg19[%c0_15, %c0_16] : memref<2x32xf32, #tpu.memory_space<vmem>>, vector<2x32xf32>
    %13 = arith.truncf %11 : vector<2x32xf32> to vector<2x32xbf16>
    %c0_17 = arith.constant 0 : index
    %c0_18 = arith.constant 0 : index
    %14 = vector.load %arg2[%c0_17, %c0_18] : memref<32x128xbf16, #tpu.memory_space<vmem>>, vector<32x128xbf16>
    %cst_19 = arith.constant dense<0.000000e+00> : vector<2x128xf32>
    %15 = tpu.matmul %13, %14, %cst_19 {dimension_numbers = #tpu.dot_dimension_numbers<[1], [0], [0], [1], [0, 0, 1, 1], [], []>} : vector<2x32xbf16>, vector<32x128xbf16>, vector<2x128xf32> -> vector<2x128xf32>
    %c0_20 = arith.constant 0 : index
    %c0_21 = arith.constant 0 : index
    %16 = vector.load %arg3[%c0_20, %c0_21] : memref<1x128xf32, #tpu.memory_space<vmem>>, vector<1x128xf32>
    %17 = vector.broadcast %16 : vector<1x128xf32> to vector<2x128xf32>
    %18 = arith.addf %15, %17 : vector<2x128xf32>
    %19 = vector.extract_strided_slice %18 {offsets = [0, 0], sizes = [2, 64], strides = [1, 1]} : vector<2x128xf32> to vector<2x64xf32>
    %c0_22 = arith.constant 0 : index
    %c0_23 = arith.constant 0 : index
    %c0_24 = arith.constant 0 : index
    %20 = vector.load %arg12[%c0_22, %c0_23, %c0_24] : memref<3x2x128xf32, #tpu.memory_space<vmem>>, vector<1x2x128xf32>
    %21 = vector.shape_cast %20 : vector<1x2x128xf32> to vector<2x128xf32>
    %22 = vector.extract_strided_slice %21 {offsets = [0, 0], sizes = [2, 64], strides = [1, 1]} : vector<2x128xf32> to vector<2x64xf32>
    %23 = arith.addf %19, %22 : vector<2x64xf32>
    %24 = vector.extract_strided_slice %18 {offsets = [0, 64], sizes = [2, 64], strides = [1, 1]} : vector<2x128xf32> to vector<2x64xf32>
    %c2 = arith.constant 2 : index
    %c0_25 = arith.constant 0 : index
    %c0_26 = arith.constant 0 : index
    %25 = vector.load %arg12[%c2, %c0_25, %c0_26] : memref<3x2x128xf32, #tpu.memory_space<vmem>>, vector<1x2x128xf32>
    %26 = vector.shape_cast %25 : vector<1x2x128xf32> to vector<2x128xf32>
    %27 = vector.extract_strided_slice %26 {offsets = [0, 64], sizes = [2, 64], strides = [1, 1]} : vector<2x128xf32> to vector<2x64xf32>
    %28 = arith.addf %24, %27 : vector<2x64xf32>
    %29 = vector.extract_strided_slice %12 {offsets = [0, 0], sizes = [2, 16], strides = [1, 1]} : vector<2x32xf32> to vector<2x16xf32>
    %30 = vector.extract_strided_slice %23 {offsets = [0, 0], sizes = [2, 16], strides = [1, 1]} : vector<2x64xf32> to vector<2x16xf32>
    %cst_27 = arith.constant 0.000000e+00 : f32
    %31 = vector.broadcast %cst_27 : f32 to vector<2x16xf32>
    %32 = arith.subf %31, %30 : vector<2x16xf32>
    %33 = math.exp %32 : vector<2x16xf32>
    %cst_28 = arith.constant 1.000000e+00 : f32
    %34 = vector.broadcast %cst_28 : f32 to vector<2x16xf32>
    %35 = arith.addf %34, %33 : vector<2x16xf32>
    %36 = tpu.reciprocal %35 {approx = true} : vector<2x16xf32> -> vector<2x16xf32>
    %37 = vector.extract_strided_slice %23 {offsets = [0, 16], sizes = [2, 16], strides = [1, 1]} : vector<2x64xf32> to vector<2x16xf32>
    %cst_29 = arith.constant 0.000000e+00 : f32
    %38 = vector.broadcast %cst_29 : f32 to vector<2x16xf32>
    %39 = arith.subf %38, %37 : vector<2x16xf32>
    %40 = math.exp %39 : vector<2x16xf32>
    %cst_30 = arith.constant 1.000000e+00 : f32
    %41 = vector.broadcast %cst_30 : f32 to vector<2x16xf32>
    %42 = arith.addf %41, %40 : vector<2x16xf32>
    %43 = tpu.reciprocal %42 {approx = true} : vector<2x16xf32> -> vector<2x16xf32>
    %44 = vector.extract_strided_slice %23 {offsets = [0, 32], sizes = [2, 16], strides = [1, 1]} : vector<2x64xf32> to vector<2x16xf32>
    %45 = math.tanh %44 : vector<2x16xf32>
    %46 = vector.extract_strided_slice %23 {offsets = [0, 48], sizes = [2, 16], strides = [1, 1]} : vector<2x64xf32> to vector<2x16xf32>
    %cst_31 = arith.constant 0.000000e+00 : f32
    %47 = vector.broadcast %cst_31 : f32 to vector<2x16xf32>
    %48 = arith.subf %47, %46 : vector<2x16xf32>
    %49 = math.exp %48 : vector<2x16xf32>
    %cst_32 = arith.constant 1.000000e+00 : f32
    %50 = vector.broadcast %cst_32 : f32 to vector<2x16xf32>
    %51 = arith.addf %50, %49 : vector<2x16xf32>
    %52 = tpu.reciprocal %51 {approx = true} : vector<2x16xf32> -> vector<2x16xf32>
    %53 = arith.mulf %43, %29 : vector<2x16xf32>
    %54 = arith.mulf %36, %45 : vector<2x16xf32>
    %55 = arith.addf %53, %54 : vector<2x16xf32>
    %56 = math.tanh %55 : vector<2x16xf32>
    %57 = arith.mulf %52, %56 : vector<2x16xf32>
    %58 = vector.extract_strided_slice %12 {offsets = [0, 16], sizes = [2, 16], strides = [1, 1]} : vector<2x32xf32> to vector<2x16xf32>
    %59 = vector.extract_strided_slice %28 {offsets = [0, 0], sizes = [2, 16], strides = [1, 1]} : vector<2x64xf32> to vector<2x16xf32>
    %cst_33 = arith.constant 0.000000e+00 : f32
    %60 = vector.broadcast %cst_33 : f32 to vector<2x16xf32>
    %61 = arith.subf %60, %59 : vector<2x16xf32>
    %62 = math.exp %61 : vector<2x16xf32>
    %cst_34 = arith.constant 1.000000e+00 : f32
    %63 = vector.broadcast %cst_34 : f32 to vector<2x16xf32>
    %64 = arith.addf %63, %62 : vector<2x16xf32>
    %65 = tpu.reciprocal %64 {approx = true} : vector<2x16xf32> -> vector<2x16xf32>
    %66 = vector.extract_strided_slice %28 {offsets = [0, 16], sizes = [2, 16], strides = [1, 1]} : vector<2x64xf32> to vector<2x16xf32>
    %cst_35 = arith.constant 0.000000e+00 : f32
    %67 = vector.broadcast %cst_35 : f32 to vector<2x16xf32>
    %68 = arith.subf %67, %66 : vector<2x16xf32>
    %69 = math.exp %68 : vector<2x16xf32>
    %cst_36 = arith.constant 1.000000e+00 : f32
    %70 = vector.broadcast %cst_36 : f32 to vector<2x16xf32>
    %71 = arith.addf %70, %69 : vector<2x16xf32>
    %72 = tpu.reciprocal %71 {approx = true} : vector<2x16xf32> -> vector<2x16xf32>
    %73 = vector.extract_strided_slice %28 {offsets = [0, 32], sizes = [2, 16], strides = [1, 1]} : vector<2x64xf32> to vector<2x16xf32>
    %74 = math.tanh %73 : vector<2x16xf32>
    %75 = vector.extract_strided_slice %28 {offsets = [0, 48], sizes = [2, 16], strides = [1, 1]} : vector<2x64xf32> to vector<2x16xf32>
    %cst_37 = arith.constant 0.000000e+00 : f32
    %76 = vector.broadcast %cst_37 : f32 to vector<2x16xf32>
    %77 = arith.subf %76, %75 : vector<2x16xf32>
    %78 = math.exp %77 : vector<2x16xf32>
    %cst_38 = arith.constant 1.000000e+00 : f32
    %79 = vector.broadcast %cst_38 : f32 to vector<2x16xf32>
    %80 = arith.addf %79, %78 : vector<2x16xf32>
    %81 = tpu.reciprocal %80 {approx = true} : vector<2x16xf32> -> vector<2x16xf32>
    %82 = arith.mulf %72, %58 : vector<2x16xf32>
    %83 = arith.mulf %65, %74 : vector<2x16xf32>
    %84 = arith.addf %82, %83 : vector<2x16xf32>
    %85 = math.tanh %84 : vector<2x16xf32>
    %86 = arith.mulf %81, %85 : vector<2x16xf32>
    %87 = tpu.concatenate %57, %86 in 1 : vector<2x16xf32>, vector<2x16xf32> -> vector<2x32xf32>
    %c0_39 = arith.constant 0 : index
    %c0_40 = arith.constant 0 : index
    %88 = vector.load %arg18[%c0_39, %c0_40] : memref<2x32xf32, #tpu.memory_space<vmem>>, vector<2x32xf32>
    tpu.vector_store %arg18[%c0_39, %c0_40], %87 {strides = array<i32>} : memref<2x32xf32, #tpu.memory_space<vmem>>, vector<2x32xf32>,
    %89 = tpu.concatenate %55, %84 in 1 : vector<2x16xf32>, vector<2x16xf32> -> vector<2x32xf32>
    %c0_41 = arith.constant 0 : index
    %c0_42 = arith.constant 0 : index
    %90 = vector.load %arg19[%c0_41, %c0_42] : memref<2x32xf32, #tpu.memory_space<vmem>>, vector<2x32xf32>
    tpu.vector_store %arg19[%c0_41, %c0_42], %89 {strides = array<i32>} : memref<2x32xf32, #tpu.memory_space<vmem>>, vector<2x32xf32>,
    %c0_43 = arith.constant 0 : index
    %c0_44 = arith.constant 0 : index
    %c0_45 = arith.constant 0 : index
    %91 = vector.load %arg14[%c0_43, %c0_44, %c0_45] : memref<3x2x16xf32, #tpu.memory_space<vmem>>, vector<1x2x16xf32>
    %92 = vector.shape_cast %91 : vector<1x2x16xf32> to vector<2x16xf32>
    %93 = vector.shape_cast %57 : vector<2x16xf32> to vector<1x2x16xf32>
    tpu.vector_store %arg14[%c0_43, %c0_44, %c0_45], %93 {strides = array<i32>} : memref<3x2x16xf32, #tpu.memory_space<vmem>>, vector<1x2x16xf32>,
    %c2_46 = arith.constant 2 : index
    %c0_47 = arith.constant 0 : index
    %c0_48 = arith.constant 0 : index
    %94 = vector.load %arg15[%c2_46, %c0_47, %c0_48] : memref<3x2x16xf32, #tpu.memory_space<vmem>>, vector<1x2x16xf32>
    %95 = vector.shape_cast %94 : vector<1x2x16xf32> to vector<2x16xf32>
    %96 = vector.shape_cast %86 : vector<2x16xf32> to vector<1x2x16xf32>
    tpu.vector_store %arg15[%c2_46, %c0_47, %c0_48], %96 {strides = array<i32>} : memref<3x2x16xf32, #tpu.memory_space<vmem>>, vector<1x2x16xf32>,
    %c0_49 = arith.constant 0 : index
    %c0_50 = arith.constant 0 : index
    %97 = vector.load %arg18[%c0_49, %c0_50] : memref<2x32xf32, #tpu.memory_space<vmem>>, vector<2x32xf32>
    %c0_51 = arith.constant 0 : index
    %c0_52 = arith.constant 0 : index
    %98 = vector.load %arg19[%c0_51, %c0_52] : memref<2x32xf32, #tpu.memory_space<vmem>>, vector<2x32xf32>
    %99 = arith.truncf %97 : vector<2x32xf32> to vector<2x32xbf16>
    %c0_53 = arith.constant 0 : index
    %c0_54 = arith.constant 0 : index
    %100 = vector.load %arg2[%c0_53, %c0_54] : memref<32x128xbf16, #tpu.memory_space<vmem>>, vector<32x128xbf16>
    %cst_55 = arith.constant dense<0.000000e+00> : vector<2x128xf32>
    %101 = tpu.matmul %99, %100, %cst_55 {dimension_numbers = #tpu.dot_dimension_numbers<[1], [0], [0], [1], [0, 0, 1, 1], [], []>} : vector<2x32xbf16>, vector<32x128xbf16>, vector<2x128xf32> -> vector<2x128xf32>
    %c0_56 = arith.constant 0 : index
    %c0_57 = arith.constant 0 : index
    %102 = vector.load %arg3[%c0_56, %c0_57] : memref<1x128xf32, #tpu.memory_space<vmem>>, vector<1x128xf32>
    %103 = vector.broadcast %102 : vector<1x128xf32> to vector<2x128xf32>
    %104 = arith.addf %101, %103 : vector<2x128xf32>
    %105 = vector.extract_strided_slice %104 {offsets = [0, 0], sizes = [2, 64], strides = [1, 1]} : vector<2x128xf32> to vector<2x64xf32>
    %c1 = arith.constant 1 : index
    %c0_58 = arith.constant 0 : index
    %c0_59 = arith.constant 0 : index
    %106 = vector.load %arg12[%c1, %c0_58, %c0_59] : memref<3x2x128xf32, #tpu.memory_space<vmem>>, vector<1x2x128xf32>
    %107 = vector.shape_cast %106 : vector<1x2x128xf32> to vector<2x128xf32>
    %108 = vector.extract_strided_slice %107 {offsets = [0, 0], sizes = [2, 64], strides = [1, 1]} : vector<2x128xf32> to vector<2x64xf32>
    %109 = arith.addf %105, %108 : vector<2x64xf32>
    %110 = vector.extract_strided_slice %104 {offsets = [0, 64], sizes = [2, 64], strides = [1, 1]} : vector<2x128xf32> to vector<2x64xf32>
    %c1_60 = arith.constant 1 : index
    %c0_61 = arith.constant 0 : index
    %c0_62 = arith.constant 0 : index
    %111 = vector.load %arg12[%c1_60, %c0_61, %c0_62] : memref<3x2x128xf32, #tpu.memory_space<vmem>>, vector<1x2x128xf32>
    %112 = vector.shape_cast %111 : vector<1x2x128xf32> to vector<2x128xf32>
    %113 = vector.extract_strided_slice %112 {offsets = [0, 64], sizes = [2, 64], strides = [1, 1]} : vector<2x128xf32> to vector<2x64xf32>
    %114 = arith.addf %110, %113 : vector<2x64xf32>
    %115 = vector.extract_strided_slice %98 {offsets = [0, 0], sizes = [2, 16], strides = [1, 1]} : vector<2x32xf32> to vector<2x16xf32>
    %116 = vector.extract_strided_slice %109 {offsets = [0, 0], sizes = [2, 16], strides = [1, 1]} : vector<2x64xf32> to vector<2x16xf32>
    %cst_63 = arith.constant 0.000000e+00 : f32
    %117 = vector.broadcast %cst_63 : f32 to vector<2x16xf32>
    %118 = arith.subf %117, %116 : vector<2x16xf32>
    %119 = math.exp %118 : vector<2x16xf32>
    %cst_64 = arith.constant 1.000000e+00 : f32
    %120 = vector.broadcast %cst_64 : f32 to vector<2x16xf32>
    %121 = arith.addf %120, %119 : vector<2x16xf32>
    %122 = tpu.reciprocal %121 {approx = true} : vector<2x16xf32> -> vector<2x16xf32>
    %123 = vector.extract_strided_slice %109 {offsets = [0, 16], sizes = [2, 16], strides = [1, 1]} : vector<2x64xf32> to vector<2x16xf32>
    %cst_65 = arith.constant 0.000000e+00 : f32
    %124 = vector.broadcast %cst_65 : f32 to vector<2x16xf32>
    %125 = arith.subf %124, %123 : vector<2x16xf32>
    %126 = math.exp %125 : vector<2x16xf32>
    %cst_66 = arith.constant 1.000000e+00 : f32
    %127 = vector.broadcast %cst_66 : f32 to vector<2x16xf32>
    %128 = arith.addf %127, %126 : vector<2x16xf32>
    %129 = tpu.reciprocal %128 {approx = true} : vector<2x16xf32> -> vector<2x16xf32>
    %130 = vector.extract_strided_slice %109 {offsets = [0, 32], sizes = [2, 16], strides = [1, 1]} : vector<2x64xf32> to vector<2x16xf32>
    %131 = math.tanh %130 : vector<2x16xf32>
    %132 = vector.extract_strided_slice %109 {offsets = [0, 48], sizes = [2, 16], strides = [1, 1]} : vector<2x64xf32> to vector<2x16xf32>
    %cst_67 = arith.constant 0.000000e+00 : f32
    %133 = vector.broadcast %cst_67 : f32 to vector<2x16xf32>
    %134 = arith.subf %133, %132 : vector<2x16xf32>
    %135 = math.exp %134 : vector<2x16xf32>
    %cst_68 = arith.constant 1.000000e+00 : f32
    %136 = vector.broadcast %cst_68 : f32 to vector<2x16xf32>
    %137 = arith.addf %136, %135 : vector<2x16xf32>
    %138 = tpu.reciprocal %137 {approx = true} : vector<2x16xf32> -> vector<2x16xf32>
    %139 = arith.mulf %129, %115 : vector<2x16xf32>
    %140 = arith.mulf %122, %131 : vector<2x16xf32>
    %141 = arith.addf %139, %140 : vector<2x16xf32>
    %142 = math.tanh %141 : vector<2x16xf32>
    %143 = arith.mulf %138, %142 : vector<2x16xf32>
    %144 = vector.extract_strided_slice %98 {offsets = [0, 16], sizes = [2, 16], strides = [1, 1]} : vector<2x32xf32> to vector<2x16xf32>
    %145 = vector.extract_strided_slice %114 {offsets = [0, 0], sizes = [2, 16], strides = [1, 1]} : vector<2x64xf32> to vector<2x16xf32>
    %cst_69 = arith.constant 0.000000e+00 : f32
    %146 = vector.broadcast %cst_69 : f32 to vector<2x16xf32>
    %147 = arith.subf %146, %145 : vector<2x16xf32>
    %148 = math.exp %147 : vector<2x16xf32>
    %cst_70 = arith.constant 1.000000e+00 : f32
    %149 = vector.broadcast %cst_70 : f32 to vector<2x16xf32>
    %150 = arith.addf %149, %148 : vector<2x16xf32>
    %151 = tpu.reciprocal %150 {approx = true} : vector<2x16xf32> -> vector<2x16xf32>
    %152 = vector.extract_strided_slice %114 {offsets = [0, 16], sizes = [2, 16], strides = [1, 1]} : vector<2x64xf32> to vector<2x16xf32>
    %cst_71 = arith.constant 0.000000e+00 : f32
    %153 = vector.broadcast %cst_71 : f32 to vector<2x16xf32>
    %154 = arith.subf %153, %152 : vector<2x16xf32>
    %155 = math.exp %154 : vector<2x16xf32>
    %cst_72 = arith.constant 1.000000e+00 : f32
    %156 = vector.broadcast %cst_72 : f32 to vector<2x16xf32>
    %157 = arith.addf %156, %155 : vector<2x16xf32>
    %158 = tpu.reciprocal %157 {approx = true} : vector<2x16xf32> -> vector<2x16xf32>
    %159 = vector.extract_strided_slice %114 {offsets = [0, 32], sizes = [2, 16], strides = [1, 1]} : vector<2x64xf32> to vector<2x16xf32>
    %160 = math.tanh %159 : vector<2x16xf32>
    %161 = vector.extract_strided_slice %114 {offsets = [0, 48], sizes = [2, 16], strides = [1, 1]} : vector<2x64xf32> to vector<2x16xf32>
    %cst_73 = arith.constant 0.000000e+00 : f32
    %162 = vector.broadcast %cst_73 : f32 to vector<2x16xf32>
    %163 = arith.subf %162, %161 : vector<2x16xf32>
    %164 = math.exp %163 : vector<2x16xf32>
    %cst_74 = arith.constant 1.000000e+00 : f32
    %165 = vector.broadcast %cst_74 : f32 to vector<2x16xf32>
    %166 = arith.addf %165, %164 : vector<2x16xf32>
    %167 = tpu.reciprocal %166 {approx = true} : vector<2x16xf32> -> vector<2x16xf32>
    %168 = arith.mulf %158, %144 : vector<2x16xf32>
    %169 = arith.mulf %151, %160 : vector<2x16xf32>
    %170 = arith.addf %168, %169 : vector<2x16xf32>
    %171 = math.tanh %170 : vector<2x16xf32>
    %172 = arith.mulf %167, %171 : vector<2x16xf32>
    %173 = tpu.concatenate %143, %172 in 1 : vector<2x16xf32>, vector<2x16xf32> -> vector<2x32xf32>
    %c0_75 = arith.constant 0 : index
    %c0_76 = arith.constant 0 : index
    %174 = vector.load %arg18[%c0_75, %c0_76] : memref<2x32xf32, #tpu.memory_space<vmem>>, vector<2x32xf32>
    tpu.vector_store %arg18[%c0_75, %c0_76], %173 {strides = array<i32>} : memref<2x32xf32, #tpu.memory_space<vmem>>, vector<2x32xf32>,
    %175 = tpu.concatenate %141, %170 in 1 : vector<2x16xf32>, vector<2x16xf32> -> vector<2x32xf32>
    %c0_77 = arith.constant 0 : index
    %c0_78 = arith.constant 0 : index
    %176 = vector.load %arg19[%c0_77, %c0_78] : memref<2x32xf32, #tpu.memory_space<vmem>>, vector<2x32xf32>
    tpu.vector_store %arg19[%c0_77, %c0_78], %175 {strides = array<i32>} : memref<2x32xf32, #tpu.memory_space<vmem>>, vector<2x32xf32>,
    %c1_79 = arith.constant 1 : index
    %c0_80 = arith.constant 0 : index
    %c0_81 = arith.constant 0 : index
    %177 = vector.load %arg14[%c1_79, %c0_80, %c0_81] : memref<3x2x16xf32, #tpu.memory_space<vmem>>, vector<1x2x16xf32>
    %178 = vector.shape_cast %177 : vector<1x2x16xf32> to vector<2x16xf32>
    %179 = vector.shape_cast %143 : vector<2x16xf32> to vector<1x2x16xf32>
    tpu.vector_store %arg14[%c1_79, %c0_80, %c0_81], %179 {strides = array<i32>} : memref<3x2x16xf32, #tpu.memory_space<vmem>>, vector<1x2x16xf32>,
    %c1_82 = arith.constant 1 : index
    %c0_83 = arith.constant 0 : index
    %c0_84 = arith.constant 0 : index
    %180 = vector.load %arg15[%c1_82, %c0_83, %c0_84] : memref<3x2x16xf32, #tpu.memory_space<vmem>>, vector<1x2x16xf32>
    %181 = vector.shape_cast %180 : vector<1x2x16xf32> to vector<2x16xf32>
    %182 = vector.shape_cast %172 : vector<2x16xf32> to vector<1x2x16xf32>
    tpu.vector_store %arg15[%c1_82, %c0_83, %c0_84], %182 {strides = array<i32>} : memref<3x2x16xf32, #tpu.memory_space<vmem>>, vector<1x2x16xf32>,
    %c0_85 = arith.constant 0 : index
    %c0_86 = arith.constant 0 : index
    %183 = vector.load %arg18[%c0_85, %c0_86] : memref<2x32xf32, #tpu.memory_space<vmem>>, vector<2x32xf32>
    %c0_87 = arith.constant 0 : index
    %c0_88 = arith.constant 0 : index
    %184 = vector.load %arg19[%c0_87, %c0_88] : memref<2x32xf32, #tpu.memory_space<vmem>>, vector<2x32xf32>
    %185 = arith.truncf %183 : vector<2x32xf32> to vector<2x32xbf16>
    %c0_89 = arith.constant 0 : index
    %c0_90 = arith.constant 0 : index
    %186 = vector.load %arg2[%c0_89, %c0_90] : memref<32x128xbf16, #tpu.memory_space<vmem>>, vector<32x128xbf16>
    %cst_91 = arith.constant dense<0.000000e+00> : vector<2x128xf32>
    %187 = tpu.matmul %185, %186, %cst_91 {dimension_numbers = #tpu.dot_dimension_numbers<[1], [0], [0], [1], [0, 0, 1, 1], [], []>} : vector<2x32xbf16>, vector<32x128xbf16>, vector<2x128xf32> -> vector<2x128xf32>
    %c0_92 = arith.constant 0 : index
    %c0_93 = arith.constant 0 : index
    %188 = vector.load %arg3[%c0_92, %c0_93] : memref<1x128xf32, #tpu.memory_space<vmem>>, vector<1x128xf32>
    %189 = vector.broadcast %188 : vector<1x128xf32> to vector<2x128xf32>
    %190 = arith.addf %187, %189 : vector<2x128xf32>
    %191 = vector.extract_strided_slice %190 {offsets = [0, 0], sizes = [2, 64], strides = [1, 1]} : vector<2x128xf32> to vector<2x64xf32>
    %c2_94 = arith.constant 2 : index
    %c0_95 = arith.constant 0 : index
    %c0_96 = arith.constant 0 : index
    %192 = vector.load %arg12[%c2_94, %c0_95, %c0_96] : memref<3x2x128xf32, #tpu.memory_space<vmem>>, vector<1x2x128xf32>
    %193 = vector.shape_cast %192 : vector<1x2x128xf32> to vector<2x128xf32>
    %194 = vector.extract_strided_slice %193 {offsets = [0, 0], sizes = [2, 64], strides = [1, 1]} : vector<2x128xf32> to vector<2x64xf32>
    %195 = arith.addf %191, %194 : vector<2x64xf32>
    %196 = vector.extract_strided_slice %190 {offsets = [0, 64], sizes = [2, 64], strides = [1, 1]} : vector<2x128xf32> to vector<2x64xf32>
    %c0_97 = arith.constant 0 : index
    %c0_98 = arith.constant 0 : index
    %c0_99 = arith.constant 0 : index
    %197 = vector.load %arg12[%c0_97, %c0_98, %c0_99] : memref<3x2x128xf32, #tpu.memory_space<vmem>>, vector<1x2x128xf32>
    %198 = vector.shape_cast %197 : vector<1x2x128xf32> to vector<2x128xf32>
    %199 = vector.extract_strided_slice %198 {offsets = [0, 64], sizes = [2, 64], strides = [1, 1]} : vector<2x128xf32> to vector<2x64xf32>
    %200 = arith.addf %196, %199 : vector<2x64xf32>
    %201 = vector.extract_strided_slice %184 {offsets = [0, 0], sizes = [2, 16], strides = [1, 1]} : vector<2x32xf32> to vector<2x16xf32>
    %202 = vector.extract_strided_slice %195 {offsets = [0, 0], sizes = [2, 16], strides = [1, 1]} : vector<2x64xf32> to vector<2x16xf32>
    %cst_100 = arith.constant 0.000000e+00 : f32
    %203 = vector.broadcast %cst_100 : f32 to vector<2x16xf32>
    %204 = arith.subf %203, %202 : vector<2x16xf32>
    %205 = math.exp %204 : vector<2x16xf32>
    %cst_101 = arith.constant 1.000000e+00 : f32
    %206 = vector.broadcast %cst_101 : f32 to vector<2x16xf32>
    %207 = arith.addf %206, %205 : vector<2x16xf32>
    %208 = tpu.reciprocal %207 {approx = true} : vector<2x16xf32> -> vector<2x16xf32>
    %209 = vector.extract_strided_slice %195 {offsets = [0, 16], sizes = [2, 16], strides = [1, 1]} : vector<2x64xf32> to vector<2x16xf32>
    %cst_102 = arith.constant 0.000000e+00 : f32
    %210 = vector.broadcast %cst_102 : f32 to vector<2x16xf32>
    %211 = arith.subf %210, %209 : vector<2x16xf32>
    %212 = math.exp %211 : vector<2x16xf32>
    %cst_103 = arith.constant 1.000000e+00 : f32
    %213 = vector.broadcast %cst_103 : f32 to vector<2x16xf32>
    %214 = arith.addf %213, %212 : vector<2x16xf32>
    %215 = tpu.reciprocal %214 {approx = true} : vector<2x16xf32> -> vector<2x16xf32>
    %216 = vector.extract_strided_slice %195 {offsets = [0, 32], sizes = [2, 16], strides = [1, 1]} : vector<2x64xf32> to vector<2x16xf32>
    %217 = math.tanh %216 : vector<2x16xf32>
    %218 = vector.extract_strided_slice %195 {offsets = [0, 48], sizes = [2, 16], strides = [1, 1]} : vector<2x64xf32> to vector<2x16xf32>
    %cst_104 = arith.constant 0.000000e+00 : f32
    %219 = vector.broadcast %cst_104 : f32 to vector<2x16xf32>
    %220 = arith.subf %219, %218 : vector<2x16xf32>
    %221 = math.exp %220 : vector<2x16xf32>
    %cst_105 = arith.constant 1.000000e+00 : f32
    %222 = vector.broadcast %cst_105 : f32 to vector<2x16xf32>
    %223 = arith.addf %222, %221 : vector<2x16xf32>
    %224 = tpu.reciprocal %223 {approx = true} : vector<2x16xf32> -> vector<2x16xf32>
    %225 = arith.mulf %215, %201 : vector<2x16xf32>
    %226 = arith.mulf %208, %217 : vector<2x16xf32>
    %227 = arith.addf %225, %226 : vector<2x16xf32>
    %228 = math.tanh %227 : vector<2x16xf32>
    %229 = arith.mulf %224, %228 : vector<2x16xf32>
    %230 = vector.extract_strided_slice %184 {offsets = [0, 16], sizes = [2, 16], strides = [1, 1]} : vector<2x32xf32> to vector<2x16xf32>
    %231 = vector.extract_strided_slice %200 {offsets = [0, 0], sizes = [2, 16], strides = [1, 1]} : vector<2x64xf32> to vector<2x16xf32>
    %cst_106 = arith.constant 0.000000e+00 : f32
    %232 = vector.broadcast %cst_106 : f32 to vector<2x16xf32>
    %233 = arith.subf %232, %231 : vector<2x16xf32>
    %234 = math.exp %233 : vector<2x16xf32>
    %cst_107 = arith.constant 1.000000e+00 : f32
    %235 = vector.broadcast %cst_107 : f32 to vector<2x16xf32>
    %236 = arith.addf %235, %234 : vector<2x16xf32>
    %237 = tpu.reciprocal %236 {approx = true} : vector<2x16xf32> -> vector<2x16xf32>
    %238 = vector.extract_strided_slice %200 {offsets = [0, 16], sizes = [2, 16], strides = [1, 1]} : vector<2x64xf32> to vector<2x16xf32>
    %cst_108 = arith.constant 0.000000e+00 : f32
    %239 = vector.broadcast %cst_108 : f32 to vector<2x16xf32>
    %240 = arith.subf %239, %238 : vector<2x16xf32>
    %241 = math.exp %240 : vector<2x16xf32>
    %cst_109 = arith.constant 1.000000e+00 : f32
    %242 = vector.broadcast %cst_109 : f32 to vector<2x16xf32>
    %243 = arith.addf %242, %241 : vector<2x16xf32>
    %244 = tpu.reciprocal %243 {approx = true} : vector<2x16xf32> -> vector<2x16xf32>
    %245 = vector.extract_strided_slice %200 {offsets = [0, 32], sizes = [2, 16], strides = [1, 1]} : vector<2x64xf32> to vector<2x16xf32>
    %246 = math.tanh %245 : vector<2x16xf32>
    %247 = vector.extract_strided_slice %200 {offsets = [0, 48], sizes = [2, 16], strides = [1, 1]} : vector<2x64xf32> to vector<2x16xf32>
    %cst_110 = arith.constant 0.000000e+00 : f32
    %248 = vector.broadcast %cst_110 : f32 to vector<2x16xf32>
    %249 = arith.subf %248, %247 : vector<2x16xf32>
    %250 = math.exp %249 : vector<2x16xf32>
    %cst_111 = arith.constant 1.000000e+00 : f32
    %251 = vector.broadcast %cst_111 : f32 to vector<2x16xf32>
    %252 = arith.addf %251, %250 : vector<2x16xf32>
    %253 = tpu.reciprocal %252 {approx = true} : vector<2x16xf32> -> vector<2x16xf32>
    %254 = arith.mulf %244, %230 : vector<2x16xf32>
    %255 = arith.mulf %237, %246 : vector<2x16xf32>
    %256 = arith.addf %254, %255 : vector<2x16xf32>
    %257 = math.tanh %256 : vector<2x16xf32>
    %258 = arith.mulf %253, %257 : vector<2x16xf32>
    %259 = tpu.concatenate %229, %258 in 1 : vector<2x16xf32>, vector<2x16xf32> -> vector<2x32xf32>
    %c0_112 = arith.constant 0 : index
    %c0_113 = arith.constant 0 : index
    %260 = vector.load %arg18[%c0_112, %c0_113] : memref<2x32xf32, #tpu.memory_space<vmem>>, vector<2x32xf32>
    tpu.vector_store %arg18[%c0_112, %c0_113], %259 {strides = array<i32>} : memref<2x32xf32, #tpu.memory_space<vmem>>, vector<2x32xf32>,
    %261 = tpu.concatenate %227, %256 in 1 : vector<2x16xf32>, vector<2x16xf32> -> vector<2x32xf32>
    %c0_114 = arith.constant 0 : index
    %c0_115 = arith.constant 0 : index
    %262 = vector.load %arg19[%c0_114, %c0_115] : memref<2x32xf32, #tpu.memory_space<vmem>>, vector<2x32xf32>
    tpu.vector_store %arg19[%c0_114, %c0_115], %261 {strides = array<i32>} : memref<2x32xf32, #tpu.memory_space<vmem>>, vector<2x32xf32>,
    %c2_116 = arith.constant 2 : index
    %c0_117 = arith.constant 0 : index
    %c0_118 = arith.constant 0 : index
    %263 = vector.load %arg14[%c2_116, %c0_117, %c0_118] : memref<3x2x16xf32, #tpu.memory_space<vmem>>, vector<1x2x16xf32>
    %264 = vector.shape_cast %263 : vector<1x2x16xf32> to vector<2x16xf32>
    %265 = vector.shape_cast %229 : vector<2x16xf32> to vector<1x2x16xf32>
    tpu.vector_store %arg14[%c2_116, %c0_117, %c0_118], %265 {strides = array<i32>} : memref<3x2x16xf32, #tpu.memory_space<vmem>>, vector<1x2x16xf32>,
    %c0_119 = arith.constant 0 : index
    %c0_120 = arith.constant 0 : index
    %c0_121 = arith.constant 0 : index
    %266 = vector.load %arg15[%c0_119, %c0_120, %c0_121] : memref<3x2x16xf32, #tpu.memory_space<vmem>>, vector<1x2x16xf32>
    %267 = vector.shape_cast %266 : vector<1x2x16xf32> to vector<2x16xf32>
    %268 = vector.shape_cast %258 : vector<2x16xf32> to vector<1x2x16xf32>
    tpu.vector_store %arg15[%c0_119, %c0_120, %c0_121], %268 {strides = array<i32>} : memref<3x2x16xf32, #tpu.memory_space<vmem>>, vector<1x2x16xf32>,
    %c0_122 = arith.constant 0 : index
    %c0_123 = arith.constant 0 : index
    %c0_124 = arith.constant 0 : index
    %269 = vector.load %arg14[%c0_122, %c0_123, %c0_124] : memref<3x2x16xf32, #tpu.memory_space<vmem>>, vector<3x2x16xf32>
    %c0_125 = arith.constant 0 : index
    %c0_126 = arith.constant 0 : index
    %c0_127 = arith.constant 0 : index
    %270 = vector.load %arg15[%c0_125, %c0_126, %c0_127] : memref<3x2x16xf32, #tpu.memory_space<vmem>>, vector<3x2x16xf32>
    %271 = tpu.concatenate %269, %270 in 2 : vector<3x2x16xf32>, vector<3x2x16xf32> -> vector<3x2x32xf32>
    %272 = vector.shape_cast %271 : vector<3x2x32xf32> to vector<6x32xf32>
    %273 = arith.truncf %272 : vector<6x32xf32> to vector<6x32xbf16>
    %c0_128 = arith.constant 0 : index
    %c0_129 = arith.constant 0 : index
    %274 = vector.load %arg4[%c0_128, %c0_129] : memref<32x128xbf16, #tpu.memory_space<vmem>>, vector<32x128xbf16>
    %cst_130 = arith.constant dense<0.000000e+00> : vector<6x128xf32>
    %275 = tpu.matmul %273, %274, %cst_130 {dimension_numbers = #tpu.dot_dimension_numbers<[1], [0], [0], [1], [0, 0, 1, 1], [], []>} : vector<6x32xbf16>, vector<32x128xbf16>, vector<6x128xf32> -> vector<6x128xf32>
    %276 = vector.shape_cast %275 : vector<6x128xf32> to vector<3x2x128xf32>
    %c0_131 = arith.constant 0 : index
    %c0_132 = arith.constant 0 : index
    %c0_133 = arith.constant 0 : index
    %277 = vector.load %arg13[%c0_131, %c0_132, %c0_133] : memref<3x2x128xf32, #tpu.memory_space<vmem>>, vector<3x2x128xf32>
    tpu.vector_store %arg13[%c0_131, %c0_132, %c0_133], %276 {strides = array<i32>} : memref<3x2x128xf32, #tpu.memory_space<vmem>>, vector<3x2x128xf32>,
    %cst_134 = arith.constant 0.000000e+00 : f32
    %278 = vector.broadcast %cst_134 : f32 to vector<2x32xf32>
    %c0_135 = arith.constant 0 : index
    %c0_136 = arith.constant 0 : index
    %279 = vector.load %arg18[%c0_135, %c0_136] : memref<2x32xf32, #tpu.memory_space<vmem>>, vector<2x32xf32>
    tpu.vector_store %arg18[%c0_135, %c0_136], %278 {strides = array<i32>} : memref<2x32xf32, #tpu.memory_space<vmem>>, vector<2x32xf32>,
    %cst_137 = arith.constant 0.000000e+00 : f32
    %280 = vector.broadcast %cst_137 : f32 to vector<2x32xf32>
    %c0_138 = arith.constant 0 : index
    %c0_139 = arith.constant 0 : index
    %281 = vector.load %arg19[%c0_138, %c0_139] : memref<2x32xf32, #tpu.memory_space<vmem>>, vector<2x32xf32>
    tpu.vector_store %arg19[%c0_138, %c0_139], %280 {strides = array<i32>} : memref<2x32xf32, #tpu.memory_space<vmem>>, vector<2x32xf32>,
    %c0_140 = arith.constant 0 : index
    %c0_141 = arith.constant 0 : index
    %282 = vector.load %arg18[%c0_140, %c0_141] : memref<2x32xf32, #tpu.memory_space<vmem>>, vector<2x32xf32>
    %c0_142 = arith.constant 0 : index
    %c0_143 = arith.constant 0 : index
    %283 = vector.load %arg19[%c0_142, %c0_143] : memref<2x32xf32, #tpu.memory_space<vmem>>, vector<2x32xf32>
    %284 = arith.truncf %282 : vector<2x32xf32> to vector<2x32xbf16>
    %c0_144 = arith.constant 0 : index
    %c0_145 = arith.constant 0 : index
    %285 = vector.load %arg5[%c0_144, %c0_145] : memref<32x128xbf16, #tpu.memory_space<vmem>>, vector<32x128xbf16>
    %cst_146 = arith.constant dense<0.000000e+00> : vector<2x128xf32>
    %286 = tpu.matmul %284, %285, %cst_146 {dimension_numbers = #tpu.dot_dimension_numbers<[1], [0], [0], [1], [0, 0, 1, 1], [], []>} : vector<2x32xbf16>, vector<32x128xbf16>, vector<2x128xf32> -> vector<2x128xf32>
    %c0_147 = arith.constant 0 : index
    %c0_148 = arith.constant 0 : index
    %287 = vector.load %arg6[%c0_147, %c0_148] : memref<1x128xf32, #tpu.memory_space<vmem>>, vector<1x128xf32>
    %288 = vector.broadcast %287 : vector<1x128xf32> to vector<2x128xf32>
    %289 = arith.addf %286, %288 : vector<2x128xf32>
    %290 = vector.extract_strided_slice %289 {offsets = [0, 0], sizes = [2, 64], strides = [1, 1]} : vector<2x128xf32> to vector<2x64xf32>
    %c0_149 = arith.constant 0 : index
    %c0_150 = arith.constant 0 : index
    %c0_151 = arith.constant 0 : index
    %291 = vector.load %arg13[%c0_149, %c0_150, %c0_151] : memref<3x2x128xf32, #tpu.memory_space<vmem>>, vector<1x2x128xf32>
    %292 = vector.shape_cast %291 : vector<1x2x128xf32> to vector<2x128xf32>
    %293 = vector.extract_strided_slice %292 {offsets = [0, 0], sizes = [2, 64], strides = [1, 1]} : vector<2x128xf32> to vector<2x64xf32>
    %294 = arith.addf %290, %293 : vector<2x64xf32>
    %295 = vector.extract_strided_slice %289 {offsets = [0, 64], sizes = [2, 64], strides = [1, 1]} : vector<2x128xf32> to vector<2x64xf32>
    %c2_152 = arith.constant 2 : index
    %c0_153 = arith.constant 0 : index
    %c0_154 = arith.constant 0 : index
    %296 = vector.load %arg13[%c2_152, %c0_153, %c0_154] : memref<3x2x128xf32, #tpu.memory_space<vmem>>, vector<1x2x128xf32>
    %297 = vector.shape_cast %296 : vector<1x2x128xf32> to vector<2x128xf32>
    %298 = vector.extract_strided_slice %297 {offsets = [0, 64], sizes = [2, 64], strides = [1, 1]} : vector<2x128xf32> to vector<2x64xf32>
    %299 = arith.addf %295, %298 : vector<2x64xf32>
    %300 = vector.extract_strided_slice %283 {offsets = [0, 0], sizes = [2, 16], strides = [1, 1]} : vector<2x32xf32> to vector<2x16xf32>
    %301 = vector.extract_strided_slice %294 {offsets = [0, 0], sizes = [2, 16], strides = [1, 1]} : vector<2x64xf32> to vector<2x16xf32>
    %cst_155 = arith.constant 0.000000e+00 : f32
    %302 = vector.broadcast %cst_155 : f32 to vector<2x16xf32>
    %303 = arith.subf %302, %301 : vector<2x16xf32>
    %304 = math.exp %303 : vector<2x16xf32>
    %cst_156 = arith.constant 1.000000e+00 : f32
    %305 = vector.broadcast %cst_156 : f32 to vector<2x16xf32>
    %306 = arith.addf %305, %304 : vector<2x16xf32>
    %307 = tpu.reciprocal %306 {approx = true} : vector<2x16xf32> -> vector<2x16xf32>
    %308 = vector.extract_strided_slice %294 {offsets = [0, 16], sizes = [2, 16], strides = [1, 1]} : vector<2x64xf32> to vector<2x16xf32>
    %cst_157 = arith.constant 0.000000e+00 : f32
    %309 = vector.broadcast %cst_157 : f32 to vector<2x16xf32>
    %310 = arith.subf %309, %308 : vector<2x16xf32>
    %311 = math.exp %310 : vector<2x16xf32>
    %cst_158 = arith.constant 1.000000e+00 : f32
    %312 = vector.broadcast %cst_158 : f32 to vector<2x16xf32>
    %313 = arith.addf %312, %311 : vector<2x16xf32>
    %314 = tpu.reciprocal %313 {approx = true} : vector<2x16xf32> -> vector<2x16xf32>
    %315 = vector.extract_strided_slice %294 {offsets = [0, 32], sizes = [2, 16], strides = [1, 1]} : vector<2x64xf32> to vector<2x16xf32>
    %316 = math.tanh %315 : vector<2x16xf32>
    %317 = vector.extract_strided_slice %294 {offsets = [0, 48], sizes = [2, 16], strides = [1, 1]} : vector<2x64xf32> to vector<2x16xf32>
    %cst_159 = arith.constant 0.000000e+00 : f32
    %318 = vector.broadcast %cst_159 : f32 to vector<2x16xf32>
    %319 = arith.subf %318, %317 : vector<2x16xf32>
    %320 = math.exp %319 : vector<2x16xf32>
    %cst_160 = arith.constant 1.000000e+00 : f32
    %321 = vector.broadcast %cst_160 : f32 to vector<2x16xf32>
    %322 = arith.addf %321, %320 : vector<2x16xf32>
    %323 = tpu.reciprocal %322 {approx = true} : vector<2x16xf32> -> vector<2x16xf32>
    %324 = arith.mulf %314, %300 : vector<2x16xf32>
    %325 = arith.mulf %307, %316 : vector<2x16xf32>
    %326 = arith.addf %324, %325 : vector<2x16xf32>
    %327 = math.tanh %326 : vector<2x16xf32>
    %328 = arith.mulf %323, %327 : vector<2x16xf32>
    %329 = vector.extract_strided_slice %283 {offsets = [0, 16], sizes = [2, 16], strides = [1, 1]} : vector<2x32xf32> to vector<2x16xf32>
    %330 = vector.extract_strided_slice %299 {offsets = [0, 0], sizes = [2, 16], strides = [1, 1]} : vector<2x64xf32> to vector<2x16xf32>
    %cst_161 = arith.constant 0.000000e+00 : f32
    %331 = vector.broadcast %cst_161 : f32 to vector<2x16xf32>
    %332 = arith.subf %331, %330 : vector<2x16xf32>
    %333 = math.exp %332 : vector<2x16xf32>
    %cst_162 = arith.constant 1.000000e+00 : f32
    %334 = vector.broadcast %cst_162 : f32 to vector<2x16xf32>
    %335 = arith.addf %334, %333 : vector<2x16xf32>
    %336 = tpu.reciprocal %335 {approx = true} : vector<2x16xf32> -> vector<2x16xf32>
    %337 = vector.extract_strided_slice %299 {offsets = [0, 16], sizes = [2, 16], strides = [1, 1]} : vector<2x64xf32> to vector<2x16xf32>
    %cst_163 = arith.constant 0.000000e+00 : f32
    %338 = vector.broadcast %cst_163 : f32 to vector<2x16xf32>
    %339 = arith.subf %338, %337 : vector<2x16xf32>
    %340 = math.exp %339 : vector<2x16xf32>
    %cst_164 = arith.constant 1.000000e+00 : f32
    %341 = vector.broadcast %cst_164 : f32 to vector<2x16xf32>
    %342 = arith.addf %341, %340 : vector<2x16xf32>
    %343 = tpu.reciprocal %342 {approx = true} : vector<2x16xf32> -> vector<2x16xf32>
    %344 = vector.extract_strided_slice %299 {offsets = [0, 32], sizes = [2, 16], strides = [1, 1]} : vector<2x64xf32> to vector<2x16xf32>
    %345 = math.tanh %344 : vector<2x16xf32>
    %346 = vector.extract_strided_slice %299 {offsets = [0, 48], sizes = [2, 16], strides = [1, 1]} : vector<2x64xf32> to vector<2x16xf32>
    %cst_165 = arith.constant 0.000000e+00 : f32
    %347 = vector.broadcast %cst_165 : f32 to vector<2x16xf32>
    %348 = arith.subf %347, %346 : vector<2x16xf32>
    %349 = math.exp %348 : vector<2x16xf32>
    %cst_166 = arith.constant 1.000000e+00 : f32
    %350 = vector.broadcast %cst_166 : f32 to vector<2x16xf32>
    %351 = arith.addf %350, %349 : vector<2x16xf32>
    %352 = tpu.reciprocal %351 {approx = true} : vector<2x16xf32> -> vector<2x16xf32>
    %353 = arith.mulf %343, %329 : vector<2x16xf32>
    %354 = arith.mulf %336, %345 : vector<2x16xf32>
    %355 = arith.addf %353, %354 : vector<2x16xf32>
    %356 = math.tanh %355 : vector<2x16xf32>
    %357 = arith.mulf %352, %356 : vector<2x16xf32>
    %358 = tpu.concatenate %328, %357 in 1 : vector<2x16xf32>, vector<2x16xf32> -> vector<2x32xf32>
    %c0_167 = arith.constant 0 : index
    %c0_168 = arith.constant 0 : index
    %359 = vector.load %arg18[%c0_167, %c0_168] : memref<2x32xf32, #tpu.memory_space<vmem>>, vector<2x32xf32>
    tpu.vector_store %arg18[%c0_167, %c0_168], %358 {strides = array<i32>} : memref<2x32xf32, #tpu.memory_space<vmem>>, vector<2x32xf32>,
    %360 = tpu.concatenate %326, %355 in 1 : vector<2x16xf32>, vector<2x16xf32> -> vector<2x32xf32>
    %c0_169 = arith.constant 0 : index
    %c0_170 = arith.constant 0 : index
    %361 = vector.load %arg19[%c0_169, %c0_170] : memref<2x32xf32, #tpu.memory_space<vmem>>, vector<2x32xf32>
    tpu.vector_store %arg19[%c0_169, %c0_170], %360 {strides = array<i32>} : memref<2x32xf32, #tpu.memory_space<vmem>>, vector<2x32xf32>,
    %c0_171 = arith.constant 0 : index
    %c0_172 = arith.constant 0 : index
    %c0_173 = arith.constant 0 : index
    %362 = vector.load %arg16[%c0_171, %c0_172, %c0_173] : memref<3x2x16xf32, #tpu.memory_space<vmem>>, vector<1x2x16xf32>
    %363 = vector.shape_cast %362 : vector<1x2x16xf32> to vector<2x16xf32>
    %364 = vector.shape_cast %328 : vector<2x16xf32> to vector<1x2x16xf32>
    tpu.vector_store %arg16[%c0_171, %c0_172, %c0_173], %364 {strides = array<i32>} : memref<3x2x16xf32, #tpu.memory_space<vmem>>, vector<1x2x16xf32>,
    %c2_174 = arith.constant 2 : index
    %c0_175 = arith.constant 0 : index
    %c0_176 = arith.constant 0 : index
    %365 = vector.load %arg17[%c2_174, %c0_175, %c0_176] : memref<3x2x16xf32, #tpu.memory_space<vmem>>, vector<1x2x16xf32>
    %366 = vector.shape_cast %365 : vector<1x2x16xf32> to vector<2x16xf32>
    %367 = vector.shape_cast %357 : vector<2x16xf32> to vector<1x2x16xf32>
    tpu.vector_store %arg17[%c2_174, %c0_175, %c0_176], %367 {strides = array<i32>} : memref<3x2x16xf32, #tpu.memory_space<vmem>>, vector<1x2x16xf32>,
    %c0_177 = arith.constant 0 : index
    %c0_178 = arith.constant 0 : index
    %368 = vector.load %arg18[%c0_177, %c0_178] : memref<2x32xf32, #tpu.memory_space<vmem>>, vector<2x32xf32>
    %c0_179 = arith.constant 0 : index
    %c0_180 = arith.constant 0 : index
    %369 = vector.load %arg19[%c0_179, %c0_180] : memref<2x32xf32, #tpu.memory_space<vmem>>, vector<2x32xf32>
    %370 = arith.truncf %368 : vector<2x32xf32> to vector<2x32xbf16>
    %c0_181 = arith.constant 0 : index
    %c0_182 = arith.constant 0 : index
    %371 = vector.load %arg5[%c0_181, %c0_182] : memref<32x128xbf16, #tpu.memory_space<vmem>>, vector<32x128xbf16>
    %cst_183 = arith.constant dense<0.000000e+00> : vector<2x128xf32>
    %372 = tpu.matmul %370, %371, %cst_183 {dimension_numbers = #tpu.dot_dimension_numbers<[1], [0], [0], [1], [0, 0, 1, 1], [], []>} : vector<2x32xbf16>, vector<32x128xbf16>, vector<2x128xf32> -> vector<2x128xf32>
    %c0_184 = arith.constant 0 : index
    %c0_185 = arith.constant 0 : index
    %373 = vector.load %arg6[%c0_184, %c0_185] : memref<1x128xf32, #tpu.memory_space<vmem>>, vector<1x128xf32>
    %374 = vector.broadcast %373 : vector<1x128xf32> to vector<2x128xf32>
    %375 = arith.addf %372, %374 : vector<2x128xf32>
    %376 = vector.extract_strided_slice %375 {offsets = [0, 0], sizes = [2, 64], strides = [1, 1]} : vector<2x128xf32> to vector<2x64xf32>
    %c1_186 = arith.constant 1 : index
    %c0_187 = arith.constant 0 : index
    %c0_188 = arith.constant 0 : index
    %377 = vector.load %arg13[%c1_186, %c0_187, %c0_188] : memref<3x2x128xf32, #tpu.memory_space<vmem>>, vector<1x2x128xf32>
    %378 = vector.shape_cast %377 : vector<1x2x128xf32> to vector<2x128xf32>
    %379 = vector.extract_strided_slice %378 {offsets = [0, 0], sizes = [2, 64], strides = [1, 1]} : vector<2x128xf32> to vector<2x64xf32>
    %380 = arith.addf %376, %379 : vector<2x64xf32>
    %381 = vector.extract_strided_slice %375 {offsets = [0, 64], sizes = [2, 64], strides = [1, 1]} : vector<2x128xf32> to vector<2x64xf32>
    %c1_189 = arith.constant 1 : index
    %c0_190 = arith.constant 0 : index
    %c0_191 = arith.constant 0 : index
    %382 = vector.load %arg13[%c1_189, %c0_190, %c0_191] : memref<3x2x128xf32, #tpu.memory_space<vmem>>, vector<1x2x128xf32>
    %383 = vector.shape_cast %382 : vector<1x2x128xf32> to vector<2x128xf32>
    %384 = vector.extract_strided_slice %383 {offsets = [0, 64], sizes = [2, 64], strides = [1, 1]} : vector<2x128xf32> to vector<2x64xf32>
    %385 = arith.addf %381, %384 : vector<2x64xf32>
    %386 = vector.extract_strided_slice %369 {offsets = [0, 0], sizes = [2, 16], strides = [1, 1]} : vector<2x32xf32> to vector<2x16xf32>
    %387 = vector.extract_strided_slice %380 {offsets = [0, 0], sizes = [2, 16], strides = [1, 1]} : vector<2x64xf32> to vector<2x16xf32>
    %cst_192 = arith.constant 0.000000e+00 : f32
    %388 = vector.broadcast %cst_192 : f32 to vector<2x16xf32>
    %389 = arith.subf %388, %387 : vector<2x16xf32>
    %390 = math.exp %389 : vector<2x16xf32>
    %cst_193 = arith.constant 1.000000e+00 : f32
    %391 = vector.broadcast %cst_193 : f32 to vector<2x16xf32>
    %392 = arith.addf %391, %390 : vector<2x16xf32>
    %393 = tpu.reciprocal %392 {approx = true} : vector<2x16xf32> -> vector<2x16xf32>
    %394 = vector.extract_strided_slice %380 {offsets = [0, 16], sizes = [2, 16], strides = [1, 1]} : vector<2x64xf32> to vector<2x16xf32>
    %cst_194 = arith.constant 0.000000e+00 : f32
    %395 = vector.broadcast %cst_194 : f32 to vector<2x16xf32>
    %396 = arith.subf %395, %394 : vector<2x16xf32>
    %397 = math.exp %396 : vector<2x16xf32>
    %cst_195 = arith.constant 1.000000e+00 : f32
    %398 = vector.broadcast %cst_195 : f32 to vector<2x16xf32>
    %399 = arith.addf %398, %397 : vector<2x16xf32>
    %400 = tpu.reciprocal %399 {approx = true} : vector<2x16xf32> -> vector<2x16xf32>
    %401 = vector.extract_strided_slice %380 {offsets = [0, 32], sizes = [2, 16], strides = [1, 1]} : vector<2x64xf32> to vector<2x16xf32>
    %402 = math.tanh %401 : vector<2x16xf32>
    %403 = vector.extract_strided_slice %380 {offsets = [0, 48], sizes = [2, 16], strides = [1, 1]} : vector<2x64xf32> to vector<2x16xf32>
    %cst_196 = arith.constant 0.000000e+00 : f32
    %404 = vector.broadcast %cst_196 : f32 to vector<2x16xf32>
    %405 = arith.subf %404, %403 : vector<2x16xf32>
    %406 = math.exp %405 : vector<2x16xf32>
    %cst_197 = arith.constant 1.000000e+00 : f32
    %407 = vector.broadcast %cst_197 : f32 to vector<2x16xf32>
    %408 = arith.addf %407, %406 : vector<2x16xf32>
    %409 = tpu.reciprocal %408 {approx = true} : vector<2x16xf32> -> vector<2x16xf32>
    %410 = arith.mulf %400, %386 : vector<2x16xf32>
    %411 = arith.mulf %393, %402 : vector<2x16xf32>
    %412 = arith.addf %410, %411 : vector<2x16xf32>
    %413 = math.tanh %412 : vector<2x16xf32>
    %414 = arith.mulf %409, %413 : vector<2x16xf32>
    %415 = vector.extract_strided_slice %369 {offsets = [0, 16], sizes = [2, 16], strides = [1, 1]} : vector<2x32xf32> to vector<2x16xf32>
    %416 = vector.extract_strided_slice %385 {offsets = [0, 0], sizes = [2, 16], strides = [1, 1]} : vector<2x64xf32> to vector<2x16xf32>
    %cst_198 = arith.constant 0.000000e+00 : f32
    %417 = vector.broadcast %cst_198 : f32 to vector<2x16xf32>
    %418 = arith.subf %417, %416 : vector<2x16xf32>
    %419 = math.exp %418 : vector<2x16xf32>
    %cst_199 = arith.constant 1.000000e+00 : f32
    %420 = vector.broadcast %cst_199 : f32 to vector<2x16xf32>
    %421 = arith.addf %420, %419 : vector<2x16xf32>
    %422 = tpu.reciprocal %421 {approx = true} : vector<2x16xf32> -> vector<2x16xf32>
    %423 = vector.extract_strided_slice %385 {offsets = [0, 16], sizes = [2, 16], strides = [1, 1]} : vector<2x64xf32> to vector<2x16xf32>
    %cst_200 = arith.constant 0.000000e+00 : f32
    %424 = vector.broadcast %cst_200 : f32 to vector<2x16xf32>
    %425 = arith.subf %424, %423 : vector<2x16xf32>
    %426 = math.exp %425 : vector<2x16xf32>
    %cst_201 = arith.constant 1.000000e+00 : f32
    %427 = vector.broadcast %cst_201 : f32 to vector<2x16xf32>
    %428 = arith.addf %427, %426 : vector<2x16xf32>
    %429 = tpu.reciprocal %428 {approx = true} : vector<2x16xf32> -> vector<2x16xf32>
    %430 = vector.extract_strided_slice %385 {offsets = [0, 32], sizes = [2, 16], strides = [1, 1]} : vector<2x64xf32> to vector<2x16xf32>
    %431 = math.tanh %430 : vector<2x16xf32>
    %432 = vector.extract_strided_slice %385 {offsets = [0, 48], sizes = [2, 16], strides = [1, 1]} : vector<2x64xf32> to vector<2x16xf32>
    %cst_202 = arith.constant 0.000000e+00 : f32
    %433 = vector.broadcast %cst_202 : f32 to vector<2x16xf32>
    %434 = arith.subf %433, %432 : vector<2x16xf32>
    %435 = math.exp %434 : vector<2x16xf32>
    %cst_203 = arith.constant 1.000000e+00 : f32
    %436 = vector.broadcast %cst_203 : f32 to vector<2x16xf32>
    %437 = arith.addf %436, %435 : vector<2x16xf32>
    %438 = tpu.reciprocal %437 {approx = true} : vector<2x16xf32> -> vector<2x16xf32>
    %439 = arith.mulf %429, %415 : vector<2x16xf32>
    %440 = arith.mulf %422, %431 : vector<2x16xf32>
    %441 = arith.addf %439, %440 : vector<2x16xf32>
    %442 = math.tanh %441 : vector<2x16xf32>
    %443 = arith.mulf %438, %442 : vector<2x16xf32>
    %444 = tpu.concatenate %414, %443 in 1 : vector<2x16xf32>, vector<2x16xf32> -> vector<2x32xf32>
    %c0_204 = arith.constant 0 : index
    %c0_205 = arith.constant 0 : index
    %445 = vector.load %arg18[%c0_204, %c0_205] : memref<2x32xf32, #tpu.memory_space<vmem>>, vector<2x32xf32>
    tpu.vector_store %arg18[%c0_204, %c0_205], %444 {strides = array<i32>} : memref<2x32xf32, #tpu.memory_space<vmem>>, vector<2x32xf32>,
    %446 = tpu.concatenate %412, %441 in 1 : vector<2x16xf32>, vector<2x16xf32> -> vector<2x32xf32>
    %c0_206 = arith.constant 0 : index
    %c0_207 = arith.constant 0 : index
    %447 = vector.load %arg19[%c0_206, %c0_207] : memref<2x32xf32, #tpu.memory_space<vmem>>, vector<2x32xf32>
    tpu.vector_store %arg19[%c0_206, %c0_207], %446 {strides = array<i32>} : memref<2x32xf32, #tpu.memory_space<vmem>>, vector<2x32xf32>,
    %c1_208 = arith.constant 1 : index
    %c0_209 = arith.constant 0 : index
    %c0_210 = arith.constant 0 : index
    %448 = vector.load %arg16[%c1_208, %c0_209, %c0_210] : memref<3x2x16xf32, #tpu.memory_space<vmem>>, vector<1x2x16xf32>
    %449 = vector.shape_cast %448 : vector<1x2x16xf32> to vector<2x16xf32>
    %450 = vector.shape_cast %414 : vector<2x16xf32> to vector<1x2x16xf32>
    tpu.vector_store %arg16[%c1_208, %c0_209, %c0_210], %450 {strides = array<i32>} : memref<3x2x16xf32, #tpu.memory_space<vmem>>, vector<1x2x16xf32>,
    %c1_211 = arith.constant 1 : index
    %c0_212 = arith.constant 0 : index
    %c0_213 = arith.constant 0 : index
    %451 = vector.load %arg17[%c1_211, %c0_212, %c0_213] : memref<3x2x16xf32, #tpu.memory_space<vmem>>, vector<1x2x16xf32>
    %452 = vector.shape_cast %451 : vector<1x2x16xf32> to vector<2x16xf32>
    %453 = vector.shape_cast %443 : vector<2x16xf32> to vector<1x2x16xf32>
    tpu.vector_store %arg17[%c1_211, %c0_212, %c0_213], %453 {strides = array<i32>} : memref<3x2x16xf32, #tpu.memory_space<vmem>>, vector<1x2x16xf32>,
    %c0_214 = arith.constant 0 : index
    %c0_215 = arith.constant 0 : index
    %454 = vector.load %arg18[%c0_214, %c0_215] : memref<2x32xf32, #tpu.memory_space<vmem>>, vector<2x32xf32>
    %c0_216 = arith.constant 0 : index
    %c0_217 = arith.constant 0 : index
    %455 = vector.load %arg19[%c0_216, %c0_217] : memref<2x32xf32, #tpu.memory_space<vmem>>, vector<2x32xf32>
    %456 = arith.truncf %454 : vector<2x32xf32> to vector<2x32xbf16>
    %c0_218 = arith.constant 0 : index
    %c0_219 = arith.constant 0 : index
    %457 = vector.load %arg5[%c0_218, %c0_219] : memref<32x128xbf16, #tpu.memory_space<vmem>>, vector<32x128xbf16>
    %cst_220 = arith.constant dense<0.000000e+00> : vector<2x128xf32>
    %458 = tpu.matmul %456, %457, %cst_220 {dimension_numbers = #tpu.dot_dimension_numbers<[1], [0], [0], [1], [0, 0, 1, 1], [], []>} : vector<2x32xbf16>, vector<32x128xbf16>, vector<2x128xf32> -> vector<2x128xf32>
    %c0_221 = arith.constant 0 : index
    %c0_222 = arith.constant 0 : index
    %459 = vector.load %arg6[%c0_221, %c0_222] : memref<1x128xf32, #tpu.memory_space<vmem>>, vector<1x128xf32>
    %460 = vector.broadcast %459 : vector<1x128xf32> to vector<2x128xf32>
    %461 = arith.addf %458, %460 : vector<2x128xf32>
    %462 = vector.extract_strided_slice %461 {offsets = [0, 0], sizes = [2, 64], strides = [1, 1]} : vector<2x128xf32> to vector<2x64xf32>
    %c2_223 = arith.constant 2 : index
    %c0_224 = arith.constant 0 : index
    %c0_225 = arith.constant 0 : index
    %463 = vector.load %arg13[%c2_223, %c0_224, %c0_225] : memref<3x2x128xf32, #tpu.memory_space<vmem>>, vector<1x2x128xf32>
    %464 = vector.shape_cast %463 : vector<1x2x128xf32> to vector<2x128xf32>
    %465 = vector.extract_strided_slice %464 {offsets = [0, 0], sizes = [2, 64], strides = [1, 1]} : vector<2x128xf32> to vector<2x64xf32>
    %466 = arith.addf %462, %465 : vector<2x64xf32>
    %467 = vector.extract_strided_slice %461 {offsets = [0, 64], sizes = [2, 64], strides = [1, 1]} : vector<2x128xf32> to vector<2x64xf32>
    %c0_226 = arith.constant 0 : index
    %c0_227 = arith.constant 0 : index
    %c0_228 = arith.constant 0 : index
    %468 = vector.load %arg13[%c0_226, %c0_227, %c0_228] : memref<3x2x128xf32, #tpu.memory_space<vmem>>, vector<1x2x128xf32>
    %469 = vector.shape_cast %468 : vector<1x2x128xf32> to vector<2x128xf32>
    %470 = vector.extract_strided_slice %469 {offsets = [0, 64], sizes = [2, 64], strides = [1, 1]} : vector<2x128xf32> to vector<2x64xf32>
    %471 = arith.addf %467, %470 : vector<2x64xf32>
    %472 = vector.extract_strided_slice %455 {offsets = [0, 0], sizes = [2, 16], strides = [1, 1]} : vector<2x32xf32> to vector<2x16xf32>
    %473 = vector.extract_strided_slice %466 {offsets = [0, 0], sizes = [2, 16], strides = [1, 1]} : vector<2x64xf32> to vector<2x16xf32>
    %cst_229 = arith.constant 0.000000e+00 : f32
    %474 = vector.broadcast %cst_229 : f32 to vector<2x16xf32>
    %475 = arith.subf %474, %473 : vector<2x16xf32>
    %476 = math.exp %475 : vector<2x16xf32>
    %cst_230 = arith.constant 1.000000e+00 : f32
    %477 = vector.broadcast %cst_230 : f32 to vector<2x16xf32>
    %478 = arith.addf %477, %476 : vector<2x16xf32>
    %479 = tpu.reciprocal %478 {approx = true} : vector<2x16xf32> -> vector<2x16xf32>
    %480 = vector.extract_strided_slice %466 {offsets = [0, 16], sizes = [2, 16], strides = [1, 1]} : vector<2x64xf32> to vector<2x16xf32>
    %cst_231 = arith.constant 0.000000e+00 : f32
    %481 = vector.broadcast %cst_231 : f32 to vector<2x16xf32>
    %482 = arith.subf %481, %480 : vector<2x16xf32>
    %483 = math.exp %482 : vector<2x16xf32>
    %cst_232 = arith.constant 1.000000e+00 : f32
    %484 = vector.broadcast %cst_232 : f32 to vector<2x16xf32>
    %485 = arith.addf %484, %483 : vector<2x16xf32>
    %486 = tpu.reciprocal %485 {approx = true} : vector<2x16xf32> -> vector<2x16xf32>
    %487 = vector.extract_strided_slice %466 {offsets = [0, 32], sizes = [2, 16], strides = [1, 1]} : vector<2x64xf32> to vector<2x16xf32>
    %488 = math.tanh %487 : vector<2x16xf32>
    %489 = vector.extract_strided_slice %466 {offsets = [0, 48], sizes = [2, 16], strides = [1, 1]} : vector<2x64xf32> to vector<2x16xf32>
    %cst_233 = arith.constant 0.000000e+00 : f32
    %490 = vector.broadcast %cst_233 : f32 to vector<2x16xf32>
    %491 = arith.subf %490, %489 : vector<2x16xf32>
    %492 = math.exp %491 : vector<2x16xf32>
    %cst_234 = arith.constant 1.000000e+00 : f32
    %493 = vector.broadcast %cst_234 : f32 to vector<2x16xf32>
    %494 = arith.addf %493, %492 : vector<2x16xf32>
    %495 = tpu.reciprocal %494 {approx = true} : vector<2x16xf32> -> vector<2x16xf32>
    %496 = arith.mulf %486, %472 : vector<2x16xf32>
    %497 = arith.mulf %479, %488 : vector<2x16xf32>
    %498 = arith.addf %496, %497 : vector<2x16xf32>
    %499 = math.tanh %498 : vector<2x16xf32>
    %500 = arith.mulf %495, %499 : vector<2x16xf32>
    %501 = vector.extract_strided_slice %455 {offsets = [0, 16], sizes = [2, 16], strides = [1, 1]} : vector<2x32xf32> to vector<2x16xf32>
    %502 = vector.extract_strided_slice %471 {offsets = [0, 0], sizes = [2, 16], strides = [1, 1]} : vector<2x64xf32> to vector<2x16xf32>
    %cst_235 = arith.constant 0.000000e+00 : f32
    %503 = vector.broadcast %cst_235 : f32 to vector<2x16xf32>
    %504 = arith.subf %503, %502 : vector<2x16xf32>
    %505 = math.exp %504 : vector<2x16xf32>
    %cst_236 = arith.constant 1.000000e+00 : f32
    %506 = vector.broadcast %cst_236 : f32 to vector<2x16xf32>
    %507 = arith.addf %506, %505 : vector<2x16xf32>
    %508 = tpu.reciprocal %507 {approx = true} : vector<2x16xf32> -> vector<2x16xf32>
    %509 = vector.extract_strided_slice %471 {offsets = [0, 16], sizes = [2, 16], strides = [1, 1]} : vector<2x64xf32> to vector<2x16xf32>
    %cst_237 = arith.constant 0.000000e+00 : f32
    %510 = vector.broadcast %cst_237 : f32 to vector<2x16xf32>
    %511 = arith.subf %510, %509 : vector<2x16xf32>
    %512 = math.exp %511 : vector<2x16xf32>
    %cst_238 = arith.constant 1.000000e+00 : f32
    %513 = vector.broadcast %cst_238 : f32 to vector<2x16xf32>
    %514 = arith.addf %513, %512 : vector<2x16xf32>
    %515 = tpu.reciprocal %514 {approx = true} : vector<2x16xf32> -> vector<2x16xf32>
    %516 = vector.extract_strided_slice %471 {offsets = [0, 32], sizes = [2, 16], strides = [1, 1]} : vector<2x64xf32> to vector<2x16xf32>
    %517 = math.tanh %516 : vector<2x16xf32>
    %518 = vector.extract_strided_slice %471 {offsets = [0, 48], sizes = [2, 16], strides = [1, 1]} : vector<2x64xf32> to vector<2x16xf32>
    %cst_239 = arith.constant 0.000000e+00 : f32
    %519 = vector.broadcast %cst_239 : f32 to vector<2x16xf32>
    %520 = arith.subf %519, %518 : vector<2x16xf32>
    %521 = math.exp %520 : vector<2x16xf32>
    %cst_240 = arith.constant 1.000000e+00 : f32
    %522 = vector.broadcast %cst_240 : f32 to vector<2x16xf32>
    %523 = arith.addf %522, %521 : vector<2x16xf32>
    %524 = tpu.reciprocal %523 {approx = true} : vector<2x16xf32> -> vector<2x16xf32>
    %525 = arith.mulf %515, %501 : vector<2x16xf32>
    %526 = arith.mulf %508, %517 : vector<2x16xf32>
    %527 = arith.addf %525, %526 : vector<2x16xf32>
    %528 = math.tanh %527 : vector<2x16xf32>
    %529 = arith.mulf %524, %528 : vector<2x16xf32>
    %530 = tpu.concatenate %500, %529 in 1 : vector<2x16xf32>, vector<2x16xf32> -> vector<2x32xf32>
    %c0_241 = arith.constant 0 : index
    %c0_242 = arith.constant 0 : index
    %531 = vector.load %arg18[%c0_241, %c0_242] : memref<2x32xf32, #tpu.memory_space<vmem>>, vector<2x32xf32>
    tpu.vector_store %arg18[%c0_241, %c0_242], %530 {strides = array<i32>} : memref<2x32xf32, #tpu.memory_space<vmem>>, vector<2x32xf32>,
    %532 = tpu.concatenate %498, %527 in 1 : vector<2x16xf32>, vector<2x16xf32> -> vector<2x32xf32>
    %c0_243 = arith.constant 0 : index
    %c0_244 = arith.constant 0 : index
    %533 = vector.load %arg19[%c0_243, %c0_244] : memref<2x32xf32, #tpu.memory_space<vmem>>, vector<2x32xf32>
    tpu.vector_store %arg19[%c0_243, %c0_244], %532 {strides = array<i32>} : memref<2x32xf32, #tpu.memory_space<vmem>>, vector<2x32xf32>,
    %c2_245 = arith.constant 2 : index
    %c0_246 = arith.constant 0 : index
    %c0_247 = arith.constant 0 : index
    %534 = vector.load %arg16[%c2_245, %c0_246, %c0_247] : memref<3x2x16xf32, #tpu.memory_space<vmem>>, vector<1x2x16xf32>
    %535 = vector.shape_cast %534 : vector<1x2x16xf32> to vector<2x16xf32>
    %536 = vector.shape_cast %500 : vector<2x16xf32> to vector<1x2x16xf32>
    tpu.vector_store %arg16[%c2_245, %c0_246, %c0_247], %536 {strides = array<i32>} : memref<3x2x16xf32, #tpu.memory_space<vmem>>, vector<1x2x16xf32>,
    %c0_248 = arith.constant 0 : index
    %c0_249 = arith.constant 0 : index
    %c0_250 = arith.constant 0 : index
    %537 = vector.load %arg17[%c0_248, %c0_249, %c0_250] : memref<3x2x16xf32, #tpu.memory_space<vmem>>, vector<1x2x16xf32>
    %538 = vector.shape_cast %537 : vector<1x2x16xf32> to vector<2x16xf32>
    %539 = vector.shape_cast %529 : vector<2x16xf32> to vector<1x2x16xf32>
    tpu.vector_store %arg17[%c0_248, %c0_249, %c0_250], %539 {strides = array<i32>} : memref<3x2x16xf32, #tpu.memory_space<vmem>>, vector<1x2x16xf32>,
    %c0_251 = arith.constant 0 : index
    %c0_252 = arith.constant 0 : index
    %c0_253 = arith.constant 0 : index
    %540 = vector.load %arg16[%c0_251, %c0_252, %c0_253] : memref<3x2x16xf32, #tpu.memory_space<vmem>>, vector<3x2x16xf32>
    %c0_254 = arith.constant 0 : index
    %c0_255 = arith.constant 0 : index
    %c0_256 = arith.constant 0 : index
    %541 = vector.load %arg17[%c0_254, %c0_255, %c0_256] : memref<3x2x16xf32, #tpu.memory_space<vmem>>, vector<3x2x16xf32>
    %542 = tpu.concatenate %540, %541 in 2 : vector<3x2x16xf32>, vector<3x2x16xf32> -> vector<3x2x32xf32>
    %cst_257 = arith.constant 0.000000e+00 : f32
    %543 = vector.broadcast %cst_257 : f32 to vector<2x48xf32>
    %544 = vector.extract_strided_slice %542 {offsets = [0, 0, 0], sizes = [1, 2, 32], strides = [1, 1, 1]} : vector<3x2x32xf32> to vector<1x2x32xf32>
    %545 = vector.shape_cast %544 : vector<1x2x32xf32> to vector<2x32xf32>
    %546 = arith.truncf %545 : vector<2x32xf32> to vector<2x32xbf16>
    %c0_258 = arith.constant 0 : index
    %c0_259 = arith.constant 0 : index
    %c0_260 = arith.constant 0 : index
    %547 = vector.load %arg7[%c0_258, %c0_259, %c0_260] : memref<3x32x48xbf16, #tpu.memory_space<vmem>>, vector<1x32x48xbf16>
    %548 = vector.shape_cast %547 : vector<1x32x48xbf16> to vector<32x48xbf16>
    %cst_261 = arith.constant dense<0.000000e+00> : vector<2x48xf32>
    %549 = tpu.matmul %546, %548, %cst_261 {dimension_numbers = #tpu.dot_dimension_numbers<[1], [0], [0], [1], [0, 0, 1, 1], [], []>} : vector<2x32xbf16>, vector<32x48xbf16>, vector<2x48xf32> -> vector<2x48xf32>
    %550 = arith.addf %543, %549 : vector<2x48xf32>
    %551 = vector.extract_strided_slice %542 {offsets = [1, 0, 0], sizes = [1, 2, 32], strides = [1, 1, 1]} : vector<3x2x32xf32> to vector<1x2x32xf32>
    %552 = vector.shape_cast %551 : vector<1x2x32xf32> to vector<2x32xf32>
    %553 = arith.truncf %552 : vector<2x32xf32> to vector<2x32xbf16>
    %c1_262 = arith.constant 1 : index
    %c0_263 = arith.constant 0 : index
    %c0_264 = arith.constant 0 : index
    %554 = vector.load %arg7[%c1_262, %c0_263, %c0_264] : memref<3x32x48xbf16, #tpu.memory_space<vmem>>, vector<1x32x48xbf16>
    %555 = vector.shape_cast %554 : vector<1x32x48xbf16> to vector<32x48xbf16>
    %cst_265 = arith.constant dense<0.000000e+00> : vector<2x48xf32>
    %556 = tpu.matmul %553, %555, %cst_265 {dimension_numbers = #tpu.dot_dimension_numbers<[1], [0], [0], [1], [0, 0, 1, 1], [], []>} : vector<2x32xbf16>, vector<32x48xbf16>, vector<2x48xf32> -> vector<2x48xf32>
    %557 = arith.addf %550, %556 : vector<2x48xf32>
    %558 = vector.extract_strided_slice %542 {offsets = [2, 0, 0], sizes = [1, 2, 32], strides = [1, 1, 1]} : vector<3x2x32xf32> to vector<1x2x32xf32>
    %559 = vector.shape_cast %558 : vector<1x2x32xf32> to vector<2x32xf32>
    %560 = arith.truncf %559 : vector<2x32xf32> to vector<2x32xbf16>
    %c2_266 = arith.constant 2 : index
    %c0_267 = arith.constant 0 : index
    %c0_268 = arith.constant 0 : index
    %561 = vector.load %arg7[%c2_266, %c0_267, %c0_268] : memref<3x32x48xbf16, #tpu.memory_space<vmem>>, vector<1x32x48xbf16>
    %562 = vector.shape_cast %561 : vector<1x32x48xbf16> to vector<32x48xbf16>
    %cst_269 = arith.constant dense<0.000000e+00> : vector<2x48xf32>
    %563 = tpu.matmul %560, %562, %cst_269 {dimension_numbers = #tpu.dot_dimension_numbers<[1], [0], [0], [1], [0, 0, 1, 1], [], []>} : vector<2x32xbf16>, vector<32x48xbf16>, vector<2x48xf32> -> vector<2x48xf32>
    %564 = arith.addf %557, %563 : vector<2x48xf32>
    %c0_270 = arith.constant 0 : index
    %c0_271 = arith.constant 0 : index
    %565 = vector.load %arg8[%c0_270, %c0_271] : memref<1x48xf32, #tpu.memory_space<vmem>>, vector<1x48xf32>
    %566 = vector.broadcast %565 : vector<1x48xf32> to vector<2x48xf32>
    %567 = arith.addf %564, %566 : vector<2x48xf32>
    %cst_272 = arith.constant 0.000000e+00 : f32
    %568 = vector.broadcast %cst_272 : f32 to vector<2x48xf32>
    %569 = arith.maximumf %567, %568 : vector<2x48xf32>
    %570 = arith.truncf %569 : vector<2x48xf32> to vector<2x48xbf16>
    %c0_273 = arith.constant 0 : index
    %c0_274 = arith.constant 0 : index
    %571 = vector.load %arg9[%c0_273, %c0_274] : memref<48x128xbf16, #tpu.memory_space<vmem>>, vector<48x128xbf16>
    %cst_275 = arith.constant dense<0.000000e+00> : vector<2x128xf32>
    %572 = tpu.matmul %570, %571, %cst_275 {dimension_numbers = #tpu.dot_dimension_numbers<[1], [0], [0], [1], [0, 0, 1, 1], [], []>} : vector<2x48xbf16>, vector<48x128xbf16>, vector<2x128xf32> -> vector<2x128xf32>
    %c0_276 = arith.constant 0 : index
    %c0_277 = arith.constant 0 : index
    %573 = vector.load %arg10[%c0_276, %c0_277] : memref<1x128xf32, #tpu.memory_space<vmem>>, vector<1x128xf32>
    %574 = vector.broadcast %573 : vector<1x128xf32> to vector<2x128xf32>
    %575 = arith.addf %572, %574 : vector<2x128xf32>
    %c0_278 = arith.constant 0 : index
    %c0_279 = arith.constant 0 : index
    %576 = vector.load %arg11[%c0_278, %c0_279] : memref<2x128xf32, #tpu.memory_space<vmem>>, vector<2x128xf32>
    tpu.vector_store %arg11[%c0_278, %c0_279], %575 {strides = array<i32>} : memref<2x128xf32, #tpu.memory_space<vmem>>, vector<2x128xf32>,
    return
  }
}

</mosaic_0001>

<bundles_post_ra>
// kernel: danq_forward.3
= control target key start
LH: loop header
LB: loop body
LE: loop exit
PB: predicated region body
PF: predicated region fallthrough
CT: control target
= control target key end

     0   :  { %vm95_vm0 = vcmask 254976   ;;  %v1346_v7 = vmov 0.0   ;;  %s1677_s0 = inlined_call_operand.vmem [shape: f32[3,2,32], index: 0, kind: input, shape index: {}]   ;;  %s1678_s1 = inlined_call_operand.vmem [shape: bf16[32,128], index: 1, kind: input, shape index: {}]   ;;  %s1679_s2 = inlined_call_operand.vmem [shape: bf16[32,128], index: 2, kind: input, shape index: {}]   ;;  %s1680_s3 = inlined_call_operand.vmem [shape: f32[1,128], index: 3, kind: input, shape index: {}]   ;;  %s1681_s4 = inlined_call_operand.vmem [shape: bf16[32,128], index: 4, kind: input, shape index: {}]   ;;  %s1682_s5 = inlined_call_operand.vmem [shape: bf16[32,128], index: 5, kind: input, shape index: {}]   ;;  %s1683_s6 = inlined_call_operand.vmem [shape: f32[1,128], index: 6, kind: input, shape index: {}]   ;;  %s1684_s7 = inlined_call_operand.vmem [shape: bf16[3,32,48], index: 7, kind: input, shape index: {}]   ;;  %s1685_s8 = inlined_call_operand.vmem [shape: f32[1,48], index: 8, kind: input, shape index: {}]   ;;  %s1686_s9 = inlined_call_operand.vmem [shape: bf16[48,128], index: 9, kind: input, shape index: {}]   ;;  %s1687_s10 = inlined_call_operand.vmem [shape: f32[1,128], index: 10, kind: input, shape index: {}]   ;;  %s1688_s11 = inlined_call_operand.hbm [shape: f32[2,128], index: 11, kind: output, shape index: {}]  }
   0x1   :  { %v1191_v0 = vld [vmem:[%s1678_s1 + $0x8] sm:$0xff]  ;;  %v1190_v2 = vld [vmem:[%s1678_s1] sm:$0xff]  ;;  %96 = vst.msk [vmem:[#allocation8] sm:$0x3] %vm95_vm0, %v1346_v7 }
   0x2   :  { %v1193_v1 = vld [vmem:[%s1679_s2 + $0x8] sm:$0xff]  ;;  %v40_v3 = vld [vmem:[%s1677_s0] sm:$0x3]  ;;  %v41_v4 = vld [vmem:[%s1677_s0 + $0x2] sm:$0x3]  ;;  %80 = vmatpush.bf16.msra.mxu0 %v1191_v0 }
   0x3   :  { %130 = vmatpush.bf16.msra.mxu1 %v1193_v1  ;;  %v1192_v5 = vld [vmem:[%s1679_s2] sm:$0xff]  ;;  %46 = vst [vmem:[#allocation1] ss:$4 sm:$0xff] %v40_v3 }
   0x4   :  { %v42_v6 = vld [vmem:[%s1677_s0 + $0x4] sm:$0x3]  ;;  %48 = vst [vmem:[#allocation1 + $0x1] ss:$4 sm:$0xff] %v41_v4 }
   0x5   :  { %50 = vst [vmem:[#allocation1 + $0x2] ss:$4 sm:$0xff] %v42_v6 }
   0x6   :  { %81 = vmatpush.bf16.msra.mxu0 %v1190_v2  ;;  %97 = vst.msk [vmem:[#allocation9] sm:$0x3] %vm95_vm0, %v1346_v7 }
   0x7   :  { %131 = vmatpush.bf16.msra.mxu1 %v1192_v5 }
   0x8   :  { %16 = vsyncpa [#allocation11], 0  ;;  %vm70_vm1 = vcmask 261120   ;;  %v98_v10 = vld [vmem:[#allocation8] sm:$0x3]  ;;  %s1347_s0 = smov 16  }
   0x9   :  { %v100_v11 = vpack.c.bf16 %v98_v10, %v98_v10  ;;  %s1348_s1 = smov 64   ;;  %v1228_v16 = vld [vmem:[%s1680_s3] ss:$0 sm:$0xff]  ;;  %s1349_s14 = smov 96   ;;  %vm216_vm2 = vcmask 123904   ;;  %v1195_v56 = vld [vmem:[%s1679_s2 + $0x8] sm:$0xff] }
   0xa   :  { %s1350_s15 = smov 32   ;;  %s1351_s16 = smov 112   ;;  %255 = vmatpush.bf16.msra.mxu2 %v1195_v56  ;;  %v1194_v57 = vld [vmem:[%s1679_s2] sm:$0xff]  ;;  %vm203_vm3 = vcmask 130048   ;;  %vm1036_vm4 = vcmask 392192  }
   0xb   :  { %1087 = vmatmul.msk.bf16.vlgmr.msra.gmra.mxu1 %vm70_vm1, %v100_v11  ;;  %s1352_s17 = smov 80   ;;  %v1229_v2 = vld [vmem:[%s1680_s3] ss:$0 sm:$0xff] }
   0xc   :  { %v51_v8 = vld.sshfl [vmem:[#allocation1] sm:$0xff pattern:$0x73625140] }
   0xd   :  { %v53_v9 = vpack.c.bf16 %v51_v8, %v51_v8  ;;  %v99_v12 = vld [vmem:[#allocation9] sm:$0x3] }
   0xe   :  { %149 = vrot.lane.b32.xlu1 %v99_v12, %s1347_s0  ;;  %256 = vmatpush.bf16.msra.mxu2 %v1194_v57 }
   0xf   :  { %1078 = vmatmul.msk.bf16.vlgmr.msra.gmra.mxu0 %vm70_vm1, %v53_v9 }
  0x16   :  { %175 = vrot.lane.b32.xlu1 %v99_v12, %s1348_s1 }
  0x80   :  { %v150_v41 = vpop.permute.xlu1 %149 }
  0x88   :  { %v133_v17 = vpop.f32.mrf.mxu1  ;;  %v176_v45 = vpop.permute.xlu1 %175 }
  0x89   :  { %v134_v18 = vadd.f32 %v1228_v16, %v133_v17 }
  0x8c   :  { %v83_v13 = vpop.f32.mrf.mxu0 }
  0x8d   :  { %v88_v14 = vrot.slane %v83_v13, 2  ;;  %v89_v15 = vrot.slane %v83_v13, 4  ;;  %92 = vst [vmem:[#allocation2] sm:$0x3] %v83_v13 }
  0x8f   :  { %93 = vst [vmem:[#allocation2 + $0x2] sm:$0x3] %v88_v14 }
  0x90   :  { %94 = vst [vmem:[#allocation2 + $0x4] sm:$0x3] %v89_v15  ;;  %v135_v22 = vpop.f32.mrf.mxu1 }
  0x94   :  { %v137_v19 = vld [vmem:[#allocation2] sm:$0x3]  ;;  %v85_v20 = vpop.f32.mrf.mxu0 }
  0x95   :  { %v138_v21 = vadd.f32 %v137_v19, %v134_v18 }
  0x96   :  { %v263_v5 = vld [vmem:[#allocation2 + $0x2] sm:$0x3] }
  0x97   :  { %1236 = vtanh.f32 %v138_v21  ;;  %v140_v23 = vld [vmem:[#allocation2 + $0x4] sm:$0x3]  ;;  %v142_v27 = vsub.f32 0.0, %v138_v21 }
  0x98   :  { %v141_v24 = vadd.f32 %v140_v23, %v134_v18 }
  0x99   :  { %v143_v28 = vmul.f32 1.442695, %v142_v27 }
  0x9a   :  { %1238 = vtanh.f32 %v141_v24  ;;  %v169_v29 = vsub.f32 0.0, %v141_v24 }
  0x9b   :  { %1240 = vpow2.f32 %v143_v28 }
  0x9c   :  { %v170_v30 = vmul.f32 1.442695, %v169_v29 }
  0x9d   :  { %v1237_v25 = vpop.eup %1236 }
  0x9e   :  { %154 = vrot.lane.b32.xlu0 %v1237_v25, %s1349_s14  ;;  %1242 = vpow2.f32 %v170_v30  ;;  %v1197_v30 = vld [vmem:[%s1679_s2 + $0x8] sm:$0xff] }
  0x9f   :  { %362 = vmatpush.bf16.msra.mxu3 %v1197_v30 }
  0xa0   :  { %v1239_v26 = vpop.eup %1238 }
  0xa1   :  { %v1241_v31 = vpop.eup %1240 }
  0xa2   :  { %v145_v32 = vadd.f32 1.0, %v1241_v31  ;;  %v1196_v31 = vld [vmem:[%s1679_s2] sm:$0xff] }
  0xa3   :  { %363 = vmatpush.bf16.msra.mxu3 %v1196_v31 }
  0xa4   :  { %1244 = vrcp.f32 %v145_v32  ;;  %v1243_v33 = vpop.eup %1242 }
  0xa5   :  { %v172_v34 = vadd.f32 1.0, %v1243_v33 }
  0xa6   :  { %180 = vrot.lane.b32.xlu0 %v1239_v26, %s1349_s14 }
  0xa7   :  { %1246 = vrcp.f32 %v172_v34 }
  0xaa   :  { %v1245_v35 = vpop.eup %1244 }
  0xab   :  { %v152_v42 = vmul.f32 %v1245_v35, %v150_v41  ;;  %v1230_v41 = vld [vmem:[%s1680_s3] ss:$0 sm:$0xff] }
  0xad   :  { %v1247_v38 = vpop.eup %1246 }
  0xae   :  { %v178_v46 = vmul.f32 %v1247_v38, %v176_v45  ;;  %v371_v45 = vld [vmem:[#allocation2] sm:$0x3] }
 0x110   :  { %v155_v36 = vpop.permute.xlu0 %154 }
 0x111   :  { %v157_v37 = vmul.f32 %v1245_v35, %v155_v36 }
 0x113   :  { %159 = vrot.lane.b32.xlu2 %v157_v37, %s1347_s0 }
 0x118   :  { %v181_v39 = vpop.permute.xlu0 %180 }
 0x119   :  { %v183_v40 = vmul.f32 %v1247_v38, %v181_v39 }
 0x11b   :  { %185 = vrot.lane.b32.xlu2 %v183_v40, %s1347_s0 }
 0x16d   :  { %v160_v43 = vpop.permute.xlu2 %159 }
 0x16e   :  { %v162_v44 = vadd.f32 %v160_v43, %v152_v42 }
 0x170   :  { %1248 = vtanh.f32 %v162_v44 }
 0x175   :  { %v186_v47 = vpop.permute.xlu2 %185 }
 0x176   :  { %v1249_v48 = vpop.eup %1248  ;;  %v188_v49 = vadd.f32 %v186_v47, %v178_v46 }
 0x177   :  { %165 = vrot.lane.b32.xlu0 %v1249_v48, %s1350_s15 }
 0x178   :  { %1250 = vtanh.f32 %v188_v49 }
 0x17e   :  { %v1251_v50 = vpop.eup %1250 }
 0x17f   :  { %191 = vrot.lane.b32.xlu1 %v1251_v50, %s1350_s15 }
 0x187   :  { %207 = vrot.lane.b32.xlu1 %v162_v44, %s1351_s16  ;;  %v369_v44 = vld [vmem:[#allocation2 + $0x4] sm:$0x3] }
 0x1e9   :  { %v166_v51 = vpop.permute.xlu0 %165 }
 0x1ea   :  { %v168_v52 = vmul.f32 %v1245_v35, %v166_v51 }
 0x1ec   :  { %196 = vrot.lane.b32.xlu2 %v168_v52, %s1352_s17 }
 0x1f1   :  { %v192_v53 = vpop.permute.xlu1 %191 }
 0x1f2   :  { %v1454_v54 = vmul.f32 %v1247_v38, %v192_v53 }
 0x1f4   :  { %211 = vrot.lane.b32.xlu2 %v188_v49, %s1348_s1  ;;  %200 = vrot.lane.b32.xlu0 %v1454_v54, %s1350_s15 }
 0x1f9   :  { %v208_v58 = vpop.permute.xlu1 %207 }
 0x246   :  { %v197_v55 = vpop.permute.xlu2 %196 }
 0x247   :  { %217 = vst.msk [vmem:[#allocation4] sm:$0x3] %vm216_vm2, %v197_v55 }
 0x24e   :  { %v212_v59 = vpop.permute.xlu2 %211 }
 0x24f   :  { %v214_v60 = vsel %vm203_vm3, %v208_v58, %v212_v59 }
 0x250   :  { %215 = vst.msk [vmem:[#allocation9] sm:$0x3] %vm95_vm0, %v214_v60 }
 0x257   :  { %v224_v61 = vld [vmem:[#allocation9] sm:$0x3] }
 0x258   :  { %292 = vrot.lane.b32.xlu2 %v224_v61, %s1348_s1  ;;  %272 = vrot.lane.b32.xlu1 %v224_v61, %s1347_s0 }
 0x266   :  { %v201_v62 = vpop.permute.xlu0 %200 }
 0x267   :  { %v204_v63 = vsel %vm203_vm3, %v197_v55, %v201_v62 }
 0x268   :  { %205 = vst.msk [vmem:[#allocation8] sm:$0x3] %vm95_vm0, %v204_v63 }
 0x26f   :  { %v223_v0 = vld [vmem:[#allocation8] sm:$0x3] }
 0x270   :  { %v225_v1 = vpack.c.bf16 %v223_v0, %v223_v0 }
 0x272   :  { %1096 = vmatmul.msk.bf16.vlgmr.msra.gmra.mxu2 %vm70_vm1, %v225_v1 }
 0x2b2   :  { %v293_v17 = vpop.permute.xlu2 %292 }
 0x2ca   :  { %v273_v18 = vpop.permute.xlu1 %272 }
 0x2f5   :  { %v258_v3 = vpop.f32.mrf.mxu2 }
 0x2f6   :  { %v259_v4 = vadd.f32 %v1229_v2, %v258_v3 }
 0x2f8   :  { %v264_v6 = vadd.f32 %v263_v5, %v259_v4 }
 0x2fa   :  { %1252 = vtanh.f32 %v264_v6  ;;  %v265_v10 = vsub.f32 0.0, %v264_v6 }
 0x2fc   :  { %v266_v11 = vmul.f32 1.442695, %v265_v10 }
 0x2fd   :  { %v260_v8 = vpop.f32.mrf.mxu2 }
 0x2fe   :  { %1254 = vpow2.f32 %v266_v11 }
 0x300   :  { %v1253_v9 = vpop.eup %1252 }
 0x301   :  { %277 = vrot.lane.b32.xlu0 %v1253_v9, %s1349_s14 }
 0x304   :  { %v1255_v12 = vpop.eup %1254 }
 0x305   :  { %v268_v13 = vadd.f32 1.0, %v1255_v12 }
 0x307   :  { %1256 = vrcp.f32 %v268_v13 }
 0x30d   :  { %v1257_v14 = vpop.eup %1256 }
 0x30e   :  { %v295_v19 = vmul.f32 %v1257_v14, %v293_v17  ;;  %v275_v20 = vmul.f32 %v1257_v14, %v273_v18 }
 0x373   :  { %v278_v15 = vpop.permute.xlu0 %277 }
 0x374   :  { %v280_v16 = vmul.f32 %v1257_v14, %v278_v15 }
 0x376   :  { %282 = vrot.lane.b32.xlu0 %v280_v16, %s1347_s0 }
 0x3e8   :  { %v283_v21 = vpop.permute.xlu0 %282 }
 0x3e9   :  { %v285_v22 = vadd.f32 %v283_v21, %v275_v20  ;;  %v296_v23 = vadd.f32 %v295_v19, %v283_v21 }
 0x3eb   :  { %1258 = vtanh.f32 %v285_v22 }
 0x3ec   :  { %1260 = vtanh.f32 %v296_v23 }
 0x3f1   :  { %v1259_v24 = vpop.eup %1258 }
 0x3f2   :  { %v1261_v25 = vpop.eup %1260  ;;  %288 = vrot.lane.b32.xlu1 %v1259_v24, %s1350_s15  ;;  %v1199_v24 = vld [vmem:[%s1681_s4 + $0x8] sm:$0xff] }
 0x3f3   :  { %299 = vrot.lane.b32.xlu2 %v1261_v25, %s1350_s15  ;;  %509 = vmatpush.bf16.msrb.mxu0 %v1199_v24  ;;  %v1203_v24 = vld [vmem:[%s1682_s5 + $0x8] sm:$0xff] }
 0x3f4   :  { %681 = vmatpush.bf16.msrb.mxu2 %v1203_v24 }
 0x3fb   :  { %314 = vrot.lane.b32.xlu2 %v285_v22, %s1351_s16 }
 0x44d   :  { %v300_v26 = vpop.permute.xlu2 %299 }
 0x44e   :  { %v1481_v27 = vmul.f32 %v1257_v14, %v300_v26 }
 0x450   :  { %308 = vrot.lane.b32.xlu1 %v1481_v27, %s1350_s15 }
 0x455   :  { %v315_v35 = vpop.permute.xlu2 %314 }
 0x464   :  { %v289_v28 = vpop.permute.xlu1 %288 }
 0x465   :  { %v291_v29 = vmul.f32 %v1257_v14, %v289_v28 }
 0x467   :  { %304 = vrot.lane.b32.xlu0 %v291_v29, %s1352_s17 }
 0x46f   :  { %318 = vrot.lane.b32.xlu0 %v296_v23, %s1348_s1 }
 0x4c2   :  { %v309_v32 = vpop.permute.xlu1 %308 }
 0x4d9   :  { %v305_v33 = vpop.permute.xlu0 %304 }
 0x4da   :  { %v311_v34 = vsel %vm203_vm3, %v305_v33, %v309_v32  ;;  %324 = vst.msk [vmem:[#allocation4 + $0x2] sm:$0x3] %vm216_vm2, %v305_v33  ;;  %v1201_v33 = vld [vmem:[%s1682_s5 + $0x8] sm:$0xff] }
 0x4db   :  { %312 = vst.msk [vmem:[#allocation8] sm:$0x3] %vm95_vm0, %v311_v34  ;;  %v1198_v34 = vld [vmem:[%s1681_s4] sm:$0xff]  ;;  %558 = vmatpush.bf16.msrb.mxu1 %v1201_v33 }
 0x4dc   :  { %510 = vmatpush.bf16.msrb.mxu0 %v1198_v34 }
 0x4e1   :  { %v319_v36 = vpop.permute.xlu0 %318 }
 0x4e2   :  { %v321_v37 = vsel %vm203_vm3, %v315_v35, %v319_v36  ;;  %v330_v38 = vld [vmem:[#allocation8] sm:$0x3]  ;;  %v1200_v35 = vld [vmem:[%s1682_s5] sm:$0xff] }
 0x4e3   :  { %322 = vst.msk [vmem:[#allocation9] sm:$0x3] %vm95_vm0, %v321_v37  ;;  %v332_v39 = vpack.c.bf16 %v330_v38, %v330_v38  ;;  %559 = vmatpush.bf16.msrb.mxu1 %v1200_v35  ;;  %v452_v37 = vld [vmem:[#allocation4] sm:$0x3]  ;;  %v1232_v35 = vld [vmem:[%s1683_s6] ss:$0 sm:$0xff] }
 0x4e5   :  { %1105 = vmatmul.msk.bf16.vlgmr.msra.gmra.mxu3 %vm70_vm1, %v332_v39 }
 0x4ea   :  { %v331_v40 = vld [vmem:[#allocation9] sm:$0x3] }
 0x4eb   :  { %406 = vrot.lane.b32.xlu0 %v331_v40, %s1348_s1 }
 0x55d   :  { %v407_v2 = vpop.permute.xlu0 %406 }
 0x568   :  { %v365_v42 = vpop.f32.mrf.mxu3 }
 0x569   :  { %v366_v43 = vadd.f32 %v1230_v41, %v365_v42 }
 0x56b   :  { %v370_v46 = vadd.f32 %v369_v44, %v366_v43  ;;  %v372_v47 = vadd.f32 %v371_v45, %v366_v43 }
 0x56d   :  { %1262 = vtanh.f32 %v370_v46  ;;  %v373_v51 = vsub.f32 0.0, %v370_v46  ;;  %v400_v56 = vsub.f32 0.0, %v372_v47 }
 0x56e   :  { %1264 = vtanh.f32 %v372_v47 }
 0x56f   :  { %v374_v52 = vmul.f32 1.442695, %v373_v51  ;;  %v401_v60 = vmul.f32 1.442695, %v400_v56 }
 0x570   :  { %v367_v48 = vpop.f32.mrf.mxu3 }
 0x571   :  { %1266 = vpow2.f32 %v374_v52 }
 0x573   :  { %v1263_v49 = vpop.eup %1262 }
 0x574   :  { %v1265_v50 = vpop.eup %1264  ;;  %385 = vrot.lane.b32.xlu2 %v1263_v49, %s1349_s14  ;;  %v1231_v49 = vld [vmem:[%s1683_s6] ss:$0 sm:$0xff] }
 0x575   :  { %411 = vrot.lane.b32.xlu1 %v1265_v50, %s1349_s14 }
 0x577   :  { %v1267_v53 = vpop.eup %1266 }
 0x578   :  { %v376_v55 = vadd.f32 1.0, %v1267_v53 }
 0x57a   :  { %1268 = vrcp.f32 %v376_v55 }
 0x57b   :  { %1270 = vpow2.f32 %v401_v60 }
 0x57c   :  { %380 = vrot.lane.b32.xlu2 %v331_v40, %s1347_s0 }
 0x580   :  { %v1269_v57 = vpop.eup %1268 }
 0x581   :  { %v1271_v61 = vpop.eup %1270 }
 0x582   :  { %v403_v62 = vadd.f32 1.0, %v1271_v61 }
 0x584   :  { %1272 = vrcp.f32 %v403_v62 }
 0x58a   :  { %v1273_v63 = vpop.eup %1272 }
 0x5ce   :  { %v386_v58 = vpop.permute.xlu2 %385 }
 0x5cf   :  { %v388_v59 = vmul.f32 %v1269_v57, %v386_v58 }
 0x5d1   :  { %390 = vrot.lane.b32.xlu0 %v388_v59, %s1347_s0 }
 0x5d6   :  { %v381_v3 = vpop.permute.xlu2 %380 }
 0x5d7   :  { %v383_v4 = vmul.f32 %v1269_v57, %v381_v3 }
 0x5d9   :  { %218 = vrot.lane.b32.xlu0 %v1454_v54, %s1347_s0  ;;  %v409_v54 = vmul.f32 %v1273_v63, %v407_v2 }
 0x5e7   :  { %v412_v0 = vpop.permute.xlu1 %411 }
 0x5e8   :  { %v414_v1 = vmul.f32 %v1273_v63, %v412_v0 }
 0x5ea   :  { %416 = vrot.lane.b32.xlu1 %v414_v1, %s1347_s0 }
 0x643   :  { %v391_v5 = vpop.permute.xlu0 %390 }
 0x644   :  { %v393_v6 = vadd.f32 %v391_v5, %v383_v4 }
 0x646   :  { %1274 = vtanh.f32 %v393_v6 }
 0x64b   :  { %v219_v8 = vpop.permute.xlu0 %218 }
 0x64c   :  { %v1275_v9 = vpop.eup %1274  ;;  %222 = vst.msk [vmem:[#allocation5 + $0x4] sm:$0x3] %vm216_vm2, %v219_v8 }
 0x64d   :  { %396 = vrot.lane.b32.xlu2 %v1275_v9, %s1350_s15 }
 0x653   :  { %v457_v15 = vld [vmem:[#allocation5 + $0x4] sm:$0x3] }
 0x65c   :  { %v417_v10 = vpop.permute.xlu1 %416 }
 0x65d   :  { %v419_v11 = vadd.f32 %v417_v10, %v409_v54 }
 0x65f   :  { %1276 = vtanh.f32 %v419_v11 }
 0x665   :  { %v1277_v12 = vpop.eup %1276 }
 0x666   :  { %422 = vrot.lane.b32.xlu1 %v1277_v12, %s1350_s15 }
 0x66e   :  { %325 = vrot.lane.b32.xlu1 %v1481_v27, %s1347_s0  ;;  %v453_v27 = vld [vmem:[#allocation4 + $0x2] sm:$0x3] }
 0x6a7   :  { %v397_v13 = vpop.permute.xlu2 %396 }
 0x6a8   :  { %v399_v14 = vmul.f32 %v1269_v57, %v397_v13 }
 0x6aa   :  { %427 = vrot.lane.b32.xlu0 %v399_v14, %s1352_s17 }
 0x6b2   :  { %465 = vrot.lane.b32.xlu0 %v457_v15, %s1347_s0 }
 0x6ba   :  { %441 = vrot.lane.b32.xlu0 %v419_v11, %s1348_s1 }
 0x6d8   :  { %v423_v16 = vpop.permute.xlu1 %422 }
 0x6d9   :  { %v425_v17 = vmul.f32 %v1273_v63, %v423_v16 }
 0x6db   :  { %448 = vrot.lane.b32.xlu2 %v425_v17, %s1347_s0 }
 0x6e0   :  { %v326_v18 = vpop.permute.xlu1 %325 }
 0x6e1   :  { %329 = vst.msk [vmem:[#allocation5 + $0x2] sm:$0x3] %vm216_vm2, %v326_v18 }
 0x6e8   :  { %v456_v19 = vld [vmem:[#allocation5 + $0x2] sm:$0x3] }
 0x6e9   :  { %463 = vrot.lane.b32.xlu2 %v456_v19, %s1347_s0 }
 0x6f1   :  { %437 = vrot.lane.b32.xlu2 %v393_v6, %s1351_s16 }
 0x71c   :  { %v428_v20 = vpop.permute.xlu0 %427 }
 0x71d   :  { %447 = vst.msk [vmem:[#allocation4 + $0x4] sm:$0x3] %vm216_vm2, %v428_v20 }
 0x724   :  { %v454_v21 = vld [vmem:[#allocation4 + $0x4] sm:$0x3]  ;;  %v466_v22 = vpop.permute.xlu0 %465 }
 0x725   :  { %v472_v23 = vsel %vm203_vm3, %v454_v21, %v466_v22 }
 0x726   :  { %480 = vst [vmem:[#allocation1 + $0x2] ss:$4 sm:$0xff] %v472_v23 }
 0x72c   :  { %v442_v30 = vpop.permute.xlu0 %441 }
 0x735   :  { %v449_v25 = vpop.permute.xlu2 %448 }
 0x736   :  { %451 = vst.msk [vmem:[#allocation5] sm:$0x3] %vm216_vm2, %v449_v25  ;;  %v1202_v25 = vld [vmem:[%s1682_s5] sm:$0xff] }
 0x737   :  { %682 = vmatpush.bf16.msrb.mxu2 %v1202_v25 }
 0x73d   :  { %v455_v26 = vld [vmem:[#allocation5] sm:$0x3] }
 0x73e   :  { %461 = vrot.lane.b32.xlu1 %v455_v26, %s1347_s0 }
 0x743   :  { %v464_v28 = vpop.permute.xlu2 %463 }
 0x744   :  { %v471_v29 = vsel %vm203_vm3, %v453_v27, %v464_v28 }
 0x745   :  { %478 = vst [vmem:[#allocation1 + $0x1] ss:$4 sm:$0xff] %v471_v29 }
 0x746   :  { %431 = vrot.lane.b32.xlu1 %v425_v17, %s1350_s15 }
 0x74b   :  { %v438_v31 = vpop.permute.xlu2 %437 }
 0x74c   :  { %v444_v32 = vsel %vm203_vm3, %v438_v31, %v442_v30 }
 0x74d   :  { %445 = vst.msk [vmem:[#allocation9] sm:$0x3] %vm95_vm0, %v444_v32 }
 0x74e   :  { %525 = vst.msk [vmem:[#allocation9] sm:$0x3] %vm95_vm0, %v1346_v7 }
 0x755   :  { %v527_v36 = vld [vmem:[#allocation9] sm:$0x3] }
 0x756   :  { %577 = vrot.lane.b32.xlu0 %v527_v36, %s1347_s0 }
 0x7b0   :  { %v462_v38 = vpop.permute.xlu1 %461 }
 0x7b1   :  { %v470_v39 = vsel %vm203_vm3, %v452_v37, %v462_v38 }
 0x7b2   :  { %476 = vst [vmem:[#allocation1] ss:$4 sm:$0xff] %v470_v39 }
 0x7b8   :  { %v432_v40 = vpop.permute.xlu1 %431 }
 0x7b9   :  { %v434_v41 = vsel %vm203_vm3, %v428_v20, %v432_v40  ;;  %v481_v42 = vld.sshfl [vmem:[#allocation1] sm:$0xff pattern:$0x73625140] }
 0x7ba   :  { %435 = vst.msk [vmem:[#allocation8] sm:$0x3] %vm95_vm0, %v434_v41  ;;  %v483_v43 = vpack.c.bf16 %v481_v42, %v481_v42 }
 0x7bb   :  { %524 = vst.msk [vmem:[#allocation8] sm:$0x3] %vm95_vm0, %v1346_v7 }
 0x7bc   :  { %1114 = vmatmul.msk.bf16.vlgmr.msrb.gmra.mxu0 %vm70_vm1, %v483_v43 }
 0x7c2   :  { %v526_v44 = vld [vmem:[#allocation8] sm:$0x3] }
 0x7c3   :  { %v528_v45 = vpack.c.bf16 %v526_v44, %v526_v44 }
 0x7c5   :  { %1123 = vmatmul.msk.bf16.vlgmr.msrb.gmra.mxu1 %vm70_vm1, %v528_v45 }
 0x7c8   :  { %v578_v10 = vpop.permute.xlu0 %577 }
 0x839   :  { %v512_v46 = vpop.f32.mrf.mxu0 }
 0x83a   :  { %v517_v47 = vrot.slane %v512_v46, 2  ;;  %v518_v48 = vrot.slane %v512_v46, 4  ;;  %521 = vst [vmem:[#allocation3] sm:$0x3] %v512_v46 }
 0x83c   :  { %522 = vst [vmem:[#allocation3 + $0x2] sm:$0x3] %v517_v47 }
 0x83d   :  { %523 = vst [vmem:[#allocation3 + $0x4] sm:$0x3] %v518_v48 }
 0x841   :  { %v514_v50 = vpop.f32.mrf.mxu0  ;;  %v565_v7 = vld [vmem:[#allocation3] sm:$0x3] }
 0x842   :  { %v561_v51 = vpop.f32.mrf.mxu1 }
 0x843   :  { %v562_v52 = vadd.f32 %v1231_v49, %v561_v51  ;;  %v689_v38 = vld [vmem:[#allocation3 + $0x2] sm:$0x3] }
 0x844   :  { %v568_v53 = vld [vmem:[#allocation3 + $0x4] sm:$0x3] }
 0x845   :  { %v566_v55 = vadd.f32 %v565_v7, %v562_v52  ;;  %v569_v56 = vadd.f32 %v568_v53, %v562_v52 }
 0x847   :  { %1278 = vtanh.f32 %v566_v55  ;;  %v597_v60 = vsub.f32 0.0, %v569_v56  ;;  %v570_v0 = vsub.f32 0.0, %v566_v55 }
 0x848   :  { %1280 = vtanh.f32 %v569_v56 }
 0x849   :  { %v598_v61 = vmul.f32 1.442695, %v597_v60  ;;  %v571_v2 = vmul.f32 1.442695, %v570_v0  ;;  %v1205_v60 = vld [vmem:[%s1682_s5 + $0x8] sm:$0xff] }
 0x84a   :  { %v563_v57 = vpop.f32.mrf.mxu1  ;;  %788 = vmatpush.bf16.msrb.mxu3 %v1205_v60  ;;  %v1211_v60 = vld [vmem:[%s1684_s7 + $0x28] sm:$0xff] }
 0x84b   :  { %1282 = vpow2.f32 %v598_v61  ;;  %993 = vmatpush.bf16.msra.mxu2 %v1211_v60 }
 0x84d   :  { %v1279_v58 = vpop.eup %1278 }
 0x84e   :  { %v1281_v59 = vpop.eup %1280  ;;  %582 = vrot.lane.b32.xlu1 %v1279_v58, %s1349_s14 }
 0x84f   :  { %608 = vrot.lane.b32.xlu2 %v1281_v59, %s1349_s14 }
 0x851   :  { %v1283_v62 = vpop.eup %1282 }
 0x852   :  { %v600_v63 = vadd.f32 1.0, %v1283_v62 }
 0x854   :  { %1284 = vrcp.f32 %v600_v63  ;;  %v1204_v63 = vld [vmem:[%s1682_s5] sm:$0xff]  ;;  %s1061_s5 = sshll.u32 %s1688_s11, 4  ;;  %s1062_s5 = int_to_ptr.hbm [resolvable:$true] %s1061_s5 }
 0x855   :  { %1286 = vpow2.f32 %v571_v2  ;;  %789 = vmatpush.bf16.msrb.mxu3 %v1204_v63  ;;  %v1206_v63 = vld [vmem:[%s1684_s7] sm:$0xff] }
 0x856   :  { %603 = vrot.lane.b32.xlu1 %v527_v36, %s1348_s1 }
 0x85a   :  { %v1285_v1 = vpop.eup %1284 }
 0x85b   :  { %v1287_v5 = vpop.eup %1286 }
 0x85c   :  { %v573_v6 = vadd.f32 1.0, %v1287_v5 }
 0x85e   :  { %1288 = vrcp.f32 %v573_v6 }
 0x864   :  { %v1289_v8 = vpop.eup %1288 }
 0x865   :  { %v580_v12 = vmul.f32 %v1289_v8, %v578_v10 }
 0x8a9   :  { %v609_v3 = vpop.permute.xlu2 %608 }
 0x8aa   :  { %v611_v4 = vmul.f32 %v1285_v1, %v609_v3 }
 0x8ac   :  { %613 = vrot.lane.b32.xlu0 %v611_v4, %s1347_s0 }
 0x8c0   :  { %v583_v9 = vpop.permute.xlu1 %582 }
 0x8c1   :  { %v585_v54 = vmul.f32 %v1289_v8, %v583_v9 }
 0x8c3   :  { %587 = vrot.lane.b32.xlu2 %v585_v54, %s1347_s0  ;;  %v1233_v54 = vld [vmem:[%s1683_s6] ss:$0 sm:$0xff] }
 0x8c8   :  { %v604_v11 = vpop.permute.xlu1 %603 }
 0x8c9   :  { %v606_v13 = vmul.f32 %v1285_v1, %v604_v11 }
 0x91d   :  { %v588_v14 = vpop.permute.xlu2 %587 }
 0x91e   :  { %v590_v15 = vadd.f32 %v588_v14, %v580_v12  ;;  %v614_v16 = vpop.permute.xlu0 %613  ;;  %v795_v12 = vld [vmem:[#allocation3 + $0x4] sm:$0x3] }
 0x91f   :  { %v616_v17 = vadd.f32 %v614_v16, %v606_v13  ;;  %v797_v13 = vld [vmem:[#allocation3] sm:$0x3] }
 0x920   :  { %1290 = vtanh.f32 %v590_v15 }
 0x921   :  { %1292 = vtanh.f32 %v616_v17 }
 0x926   :  { %v1291_v18 = vpop.eup %1290 }
 0x927   :  { %v1293_v19 = vpop.eup %1292  ;;  %593 = vrot.lane.b32.xlu1 %v1291_v18, %s1350_s15 }
 0x928   :  { %619 = vrot.lane.b32.xlu2 %v1293_v19, %s1350_s15 }
 0x930   :  { %634 = vrot.lane.b32.xlu2 %v590_v15, %s1351_s16 }
 0x982   :  { %v620_v20 = vpop.permute.xlu2 %619 }
 0x983   :  { %v1563_v21 = vmul.f32 %v1285_v1, %v620_v20 }
 0x985   :  { %628 = vrot.lane.b32.xlu1 %v1563_v21, %s1350_s15 }
 0x98a   :  { %v635_v29 = vpop.permute.xlu2 %634 }
 0x999   :  { %v594_v22 = vpop.permute.xlu1 %593 }
 0x99a   :  { %v596_v23 = vmul.f32 %v1289_v8, %v594_v22 }
 0x99c   :  { %624 = vrot.lane.b32.xlu0 %v596_v23, %s1352_s17 }
 0x9a4   :  { %638 = vrot.lane.b32.xlu0 %v616_v17, %s1348_s1 }
 0x9f7   :  { %v629_v26 = vpop.permute.xlu1 %628 }
 0xa0e   :  { %v625_v27 = vpop.permute.xlu0 %624 }
 0xa0f   :  { %v631_v28 = vsel %vm203_vm3, %v625_v27, %v629_v26  ;;  %643 = vst.msk [vmem:[#allocation6] sm:$0x3] %vm216_vm2, %v625_v27 }
 0xa10   :  { %632 = vst.msk [vmem:[#allocation8] sm:$0x3] %vm95_vm0, %v631_v28 }
 0xa16   :  { %v639_v30 = vpop.permute.xlu0 %638 }
 0xa17   :  { %v641_v31 = vsel %vm203_vm3, %v635_v29, %v639_v30  ;;  %v649_v32 = vld [vmem:[#allocation8] sm:$0x3] }
 0xa18   :  { %642 = vst.msk [vmem:[#allocation9] sm:$0x3] %vm95_vm0, %v641_v31  ;;  %v651_v33 = vpack.c.bf16 %v649_v32, %v649_v32 }
 0xa1a   :  { %1132 = vmatmul.msk.bf16.vlgmr.msrb.gmra.mxu2 %vm70_vm1, %v651_v33 }
 0xa1f   :  { %v650_v34 = vld [vmem:[#allocation9] sm:$0x3] }
 0xa20   :  { %718 = vrot.lane.b32.xlu0 %v650_v34, %s1348_s1  ;;  %698 = vrot.lane.b32.xlu2 %v650_v34, %s1347_s0 }
 0xa7a   :  { %v699_v49 = vpop.permute.xlu2 %698 }
 0xa92   :  { %v719_v50 = vpop.permute.xlu0 %718 }
 0xa9d   :  { %v684_v36 = vpop.f32.mrf.mxu2 }
 0xa9e   :  { %v685_v37 = vadd.f32 %v1232_v35, %v684_v36 }
 0xaa0   :  { %v690_v39 = vadd.f32 %v689_v38, %v685_v37 }
 0xaa2   :  { %1294 = vtanh.f32 %v690_v39  ;;  %v691_v42 = vsub.f32 0.0, %v690_v39 }
 0xaa4   :  { %v692_v43 = vmul.f32 1.442695, %v691_v42 }
 0xaa5   :  { %v686_v40 = vpop.f32.mrf.mxu2 }
 0xaa6   :  { %1296 = vpow2.f32 %v692_v43 }
 0xaa8   :  { %v1295_v41 = vpop.eup %1294 }
 0xaa9   :  { %703 = vrot.lane.b32.xlu1 %v1295_v41, %s1349_s14 }
 0xaac   :  { %v1297_v44 = vpop.eup %1296 }
 0xaad   :  { %v694_v45 = vadd.f32 1.0, %v1297_v44 }
 0xaaf   :  { %1298 = vrcp.f32 %v694_v45 }
 0xab5   :  { %v1299_v46 = vpop.eup %1298 }
 0xab6   :  { %v721_v51 = vmul.f32 %v1299_v46, %v719_v50  ;;  %v701_v52 = vmul.f32 %v1299_v46, %v699_v49  ;;  %v1209_v50 = vld [vmem:[%s1684_s7 + $0x18] sm:$0xff] }
 0xab7   :  { %931 = vmatpush.bf16.msra.mxu0 %v1209_v50 }
 0xb1b   :  { %v704_v47 = vpop.permute.xlu1 %703 }
 0xb1c   :  { %v706_v48 = vmul.f32 %v1299_v46, %v704_v47 }
 0xb1e   :  { %708 = vrot.lane.b32.xlu1 %v706_v48, %s1347_s0 }
 0xb90   :  { %v709_v7 = vpop.permute.xlu1 %708 }
 0xb91   :  { %v711_v53 = vadd.f32 %v709_v7, %v701_v52  ;;  %v722_v55 = vadd.f32 %v721_v51, %v709_v7  ;;  %v1208_v51 = vld [vmem:[%s1684_s7 + $0x10] sm:$0xff] }
 0xb92   :  { %932 = vmatpush.bf16.msra.mxu0 %v1208_v51 }
 0xb93   :  { %1300 = vtanh.f32 %v711_v53 }
 0xb94   :  { %1302 = vtanh.f32 %v722_v55 }
 0xb99   :  { %v1301_v56 = vpop.eup %1300 }
 0xb9a   :  { %v1303_v57 = vpop.eup %1302  ;;  %714 = vrot.lane.b32.xlu2 %v1301_v56, %s1350_s15 }
 0xb9b   :  { %725 = vrot.lane.b32.xlu0 %v1303_v57, %s1350_s15 }
 0xba3   :  { %740 = vrot.lane.b32.xlu0 %v711_v53, %s1351_s16 }
 0xbf4   :  { %v715_v58 = vpop.permute.xlu2 %714 }
 0xbf5   :  { %v717_v59 = vmul.f32 %v1299_v46, %v715_v58 }
 0xbf7   :  { %730 = vrot.lane.b32.xlu1 %v717_v59, %s1352_s17 }
 0xbff   :  { %744 = vrot.lane.b32.xlu1 %v722_v55, %s1348_s1 }
 0xc0d   :  { %v726_v61 = vpop.permute.xlu0 %725 }
 0xc0e   :  { %v728_v62 = vmul.f32 %v1299_v46, %v726_v61  ;;  %v1207_v61 = vld [vmem:[%s1684_s7 + $0x8] sm:$0xff] }
 0xc0f   :  { %959 = vmatpush.bf16.msra.mxu1 %v1207_v61 }
 0xc10   :  { %734 = vrot.lane.b32.xlu2 %v728_v62, %s1350_s15 }
 0xc13   :  { %960 = vmatpush.bf16.msra.mxu1 %v1206_v63 }
 0xc15   :  { %v741_v3 = vpop.permute.xlu0 %740 }
 0xc69   :  { %v731_v0 = vpop.permute.xlu1 %730 }
 0xc6a   :  { %750 = vst.msk [vmem:[#allocation6 + $0x2] sm:$0x3] %vm216_vm2, %v731_v0  ;;  %v735_v1 = vpop.permute.xlu2 %734 }
 0xc6b   :  { %v737_v2 = vsel %vm203_vm3, %v731_v0, %v735_v1 }
 0xc6c   :  { %738 = vst.msk [vmem:[#allocation8] sm:$0x3] %vm95_vm0, %v737_v2 }
 0xc71   :  { %v745_v4 = vpop.permute.xlu1 %744  ;;  %v879_v56 = vld [vmem:[#allocation6 + $0x2] sm:$0x3] }
 0xc72   :  { %v747_v5 = vsel %vm203_vm3, %v741_v3, %v745_v4 }
 0xc73   :  { %748 = vst.msk [vmem:[#allocation9] sm:$0x3] %vm95_vm0, %v747_v5  ;;  %v756_v6 = vld [vmem:[#allocation8] sm:$0x3] }
 0xc74   :  { %v758_v8 = vpack.c.bf16 %v756_v6, %v756_v6  ;;  %v878_v6 = vld [vmem:[#allocation6] sm:$0x3] }
 0xc76   :  { %1141 = vmatmul.msk.bf16.vlgmr.msrb.gmra.mxu3 %vm70_vm1, %v758_v8 }
 0xc7a   :  { %v757_v9 = vld [vmem:[#allocation9] sm:$0x3] }
 0xc7b   :  { %832 = vrot.lane.b32.xlu1 %v757_v9, %s1348_s1 }
 0xced   :  { %v833_v34 = vpop.permute.xlu1 %832 }
 0xcf9   :  { %v791_v10 = vpop.f32.mrf.mxu3 }
 0xcfa   :  { %v792_v11 = vadd.f32 %v1233_v54, %v791_v10 }
 0xcfc   :  { %v796_v14 = vadd.f32 %v795_v12, %v792_v11  ;;  %v798_v15 = vadd.f32 %v797_v13, %v792_v11 }
 0xcfe   :  { %1304 = vtanh.f32 %v796_v14  ;;  %v826_v19 = vsub.f32 0.0, %v798_v15  ;;  %v799_v24 = vsub.f32 0.0, %v796_v14 }
 0xcff   :  { %1306 = vtanh.f32 %v798_v15  ;;  %v1214_v15 = vld [vmem:[%s1686_s9 + $0x10] sm:$0xff] }
 0xd00   :  { %v827_v20 = vmul.f32 1.442695, %v826_v19  ;;  %v800_v26 = vmul.f32 1.442695, %v799_v24  ;;  %1045 = vmatpush.bf16.msra.mxu3 %v1214_v15  ;;  %v1212_v19 = vld [vmem:[%s1686_s9] sm:$0xff] }
 0xd01   :  { %v793_v16 = vpop.f32.mrf.mxu3 }
 0xd02   :  { %1308 = vpow2.f32 %v827_v20 }
 0xd04   :  { %v1305_v17 = vpop.eup %1304 }
 0xd05   :  { %v1307_v18 = vpop.eup %1306  ;;  %811 = vrot.lane.b32.xlu0 %v1305_v17, %s1349_s14 }
 0xd06   :  { %837 = vrot.lane.b32.xlu2 %v1307_v18, %s1349_s14  ;;  %v1213_v18 = vld [vmem:[%s1686_s9 + $0x8] sm:$0xff]  ;;  %s1353_s9 = smov [#allocation10]  }
 0xd07   :  { %1046 = vmatpush.bf16.msra.mxu3 %v1213_v18  ;;  %s1059_s28 = sshll.u32 %s1353_s9, 4  ;;  %s1060_s28 = int_to_ptr.vmem [resolvable:$true] %s1059_s28 }
 0xd08   :  { %v1309_v22 = vpop.eup %1308 }
 0xd09   :  { %v829_v23 = vadd.f32 1.0, %v1309_v22 }
 0xd0b   :  { %1310 = vrcp.f32 %v829_v23  ;;  %1047 = vmatpush.bf16.msra.mxu3 %v1212_v19  ;;  %v1234_v23 = vld [vmem:[%s1685_s8] ss:$0 sm:$0xff] }
 0xd0c   :  { %1312 = vpow2.f32 %v800_v26 }
 0xd0d   :  { %806 = vrot.lane.b32.xlu0 %v757_v9, %s1347_s0 }
 0xd11   :  { %v1311_v25 = vpop.eup %1310 }
 0xd12   :  { %v1313_v29 = vpop.eup %1312  ;;  %v835_v35 = vmul.f32 %v1311_v25, %v833_v34 }
 0xd13   :  { %v802_v30 = vadd.f32 1.0, %v1313_v29 }
 0xd15   :  { %1314 = vrcp.f32 %v802_v30 }
 0xd1b   :  { %v1315_v31 = vpop.eup %1314 }
 0xd60   :  { %v838_v27 = vpop.permute.xlu2 %837 }
 0xd61   :  { %v840_v28 = vmul.f32 %v1311_v25, %v838_v27 }
 0xd63   :  { %842 = vrot.lane.b32.xlu2 %v840_v28, %s1347_s0 }
 0xd77   :  { %v812_v32 = vpop.permute.xlu0 %811 }
 0xd78   :  { %v814_v33 = vmul.f32 %v1315_v31, %v812_v32 }
 0xd7a   :  { %816 = vrot.lane.b32.xlu1 %v814_v33, %s1347_s0 }
 0xd7f   :  { %v807_v39 = vpop.permute.xlu0 %806 }
 0xd80   :  { %v809_v40 = vmul.f32 %v1315_v31, %v807_v39 }
 0xd82   :  { %644 = vrot.lane.b32.xlu1 %v1563_v21, %s1347_s0 }
 0xdbd   :  { %v843_v36 = vpop.permute.xlu2 %842 }
 0xdbe   :  { %v845_v37 = vadd.f32 %v843_v36, %v835_v35 }
 0xdc0   :  { %1316 = vtanh.f32 %v845_v37 }
 0xdc6   :  { %v1317_v38 = vpop.eup %1316 }
 0xdc7   :  { %848 = vrot.lane.b32.xlu2 %v1317_v38, %s1350_s15 }
 0xdcf   :  { %751 = vrot.lane.b32.xlu2 %v728_v62, %s1347_s0  ;;  %v1210_v62 = vld [vmem:[%s1684_s7 + $0x20] sm:$0xff] }
 0xdd0   :  { %994 = vmatpush.bf16.msra.mxu2 %v1210_v62 }
 0xdec   :  { %v817_v41 = vpop.permute.xlu1 %816 }
 0xded   :  { %v819_v42 = vadd.f32 %v817_v41, %v809_v40 }
 0xdef   :  { %1318 = vtanh.f32 %v819_v42 }
 0xdf4   :  { %v645_v43 = vpop.permute.xlu1 %644 }
 0xdf5   :  { %v1319_v44 = vpop.eup %1318  ;;  %648 = vst.msk [vmem:[#allocation7 + $0x4] sm:$0x3] %vm216_vm2, %v645_v43 }
 0xdf6   :  { %822 = vrot.lane.b32.xlu0 %v1319_v44, %s1350_s15 }
 0xdfc   :  { %v883_v53 = vld [vmem:[#allocation7 + $0x4] sm:$0x3] }
 0xe21   :  { %v849_v21 = vpop.permute.xlu2 %848 }
 0xe22   :  { %v851_v45 = vmul.f32 %v1311_v25, %v849_v21 }
 0xe24   :  { %874 = vrot.lane.b32.xlu0 %v851_v45, %s1347_s0 }
 0xe29   :  { %v752_v46 = vpop.permute.xlu2 %751 }
 0xe2a   :  { %755 = vst.msk [vmem:[#allocation7 + $0x2] sm:$0x3] %vm216_vm2, %v752_v46 }
 0xe31   :  { %v882_v47 = vld [vmem:[#allocation7 + $0x2] sm:$0x3] }
 0xe32   :  { %889 = vrot.lane.b32.xlu0 %v882_v47, %s1347_s0 }
 0xe3a   :  { %867 = vrot.lane.b32.xlu0 %v845_v37, %s1348_s1 }
 0xe68   :  { %v823_v48 = vpop.permute.xlu0 %822 }
 0xe69   :  { %v825_v49 = vmul.f32 %v1315_v31, %v823_v48  ;;  %v1235_v31 = vld [vmem:[%s1687_s10] ss:$0 sm:$0xff] }
 0xe6b   :  { %853 = vrot.lane.b32.xlu1 %v825_v49, %s1352_s17 }
 0xe73   :  { %857 = vrot.lane.b32.xlu1 %v851_v45, %s1350_s15 }
 0xe96   :  { %v875_v52 = vpop.permute.xlu0 %874 }
 0xe97   :  { %877 = vst.msk [vmem:[#allocation7] sm:$0x3] %vm216_vm2, %v875_v52 }
 0xe9e   :  { %v881_v7 = vld [vmem:[#allocation7] sm:$0x3] }
 0xe9f   :  { %v1223_v55 = vpack.i.bf16 %v881_v7, %v883_v53 }
 0xea1   :  { %1224 = vrot.lane.b32.xlu2 %v1223_v55, %s1347_s0 }
 0xea4   :  { %v890_v57 = vpop.permute.xlu0 %889 }
 0xea5   :  { %v897_v58 = vsel %vm203_vm3, %v879_v56, %v890_v57 }
 0xea6   :  { %v904_v59 = vpack.c.bf16 %v897_v58, %v897_v58 }
 0xea8   :  { %1154 = vmatmul.msk.bf16.vlgmr.msra.gmra.mxu0 %vm70_vm1, %v904_v59 }
 0xea9   :  { %863 = vrot.lane.b32.xlu2 %v819_v42, %s1351_s16 }
 0xeac   :  { %v868_v12 = vpop.permute.xlu0 %867 }
 0xedd   :  { %v854_v0 = vpop.permute.xlu1 %853 }
 0xede   :  { %873 = vst.msk [vmem:[#allocation6 + $0x4] sm:$0x3] %vm216_vm2, %v854_v0 }
 0xee5   :  { %v858_v1 = vpop.permute.xlu1 %857  ;;  %v880_v8 = vld [vmem:[#allocation6 + $0x4] sm:$0x3] }
 0xee6   :  { %v860_v2 = vsel %vm203_vm3, %v854_v0, %v858_v1 }
 0xee7   :  { %861 = vst.msk [vmem:[#allocation8] sm:$0x3] %vm95_vm0, %v860_v2 }
 0xefb   :  { %v1225_v3 = vpop.permute.xlu2 %1224 }
 0xefc   :  { %v1227_v4 = vunpack.i.h.bf16 %v1225_v3  ;;  %v1226_v5 = vunpack.i.l.bf16 %v1225_v3 }
 0xefe   :  { %v896_v9 = vsel %vm203_vm3, %v878_v6, %v1227_v4  ;;  %v898_v54 = vsel %vm203_vm3, %v880_v8, %v1226_v5 }
 0xeff   :  { %v899_v10 = vpack.c.bf16 %v896_v9, %v896_v9  ;;  %v966_v11 = vpack.c.bf16 %v898_v54, %v898_v54 }
 0xf01   :  { %1163 = vmatmul.msk.bf16.vlgmr.msra.gmra.mxu1 %vm70_vm1, %v899_v10  ;;  %1176 = vmatmul.msk.bf16.vlgmr.msra.gmra.mxu2 %vm70_vm1, %v966_v11 }
 0xf03   :  { %v864_v13 = vpop.permute.xlu2 %863 }
 0xf04   :  { %v870_v14 = vsel %vm203_vm3, %v864_v13, %v868_v12 }
 0xf05   :  { %871 = vst.msk [vmem:[#allocation9] sm:$0x3] %vm95_vm0, %v870_v14 }
 0xf25   :  { %v934_v16 = vpop.f32.mrf.mxu0 }
 0xf2d   :  { %v936_v17 = vpop.f32.mrf.mxu0 }
 0xf7e   :  { %v962_v20 = vpop.f32.mrf.mxu1 }
 0xf7f   :  { %v963_v22 = vadd.f32 %v962_v20, %v934_v16 }
 0xf84   :  { %v996_v24 = vpop.f32.mrf.mxu2 }
 0xf85   :  { %v1000_v25 = vadd.f32 %v996_v24, %v963_v22 }
 0xf86   :  { %v964_v26 = vpop.f32.mrf.mxu1 }
 0xf87   :  { %v1005_v27 = vadd.f32 %v1234_v23, %v1000_v25 }
 0xf89   :  { %v1006_v28 = vmax.f32 %v1005_v27, 0.0 }
 0xf8b   :  { %v1007_v29 = vpack.c.bf16 %v1006_v28, %v1006_v28 }
 0xf8c   :  { %v998_v30 = vpop.f32.mrf.mxu2 }
 0xf8d   :  { %1189 = vmatmul.msk.bf16.vlgmr.msra.gmra.mxu3 %vm1036_vm4, %v1007_v29 }
0x1010   :  { %v1049_v32 = vpop.f32.mrf.mxu3 }
0x1011   :  { %v1050_v33 = vadd.f32 %v1235_v31, %v1049_v32 }
0x1013   :  { %1053 = vst [vmem:[#allocation10] sm:$0x3] %v1050_v33 }
0x1014   :  { %1064 = dma.vmem_to_hbm [thread:$0]  %s1060_s28, 32, %s1062_s5, [#allocation11]  }
0x1018   :  { %v1051_v34 = vpop.f32.mrf.mxu3 }
0x1019   :  { %1344 = dma.done.wait [#allocation11], 32  }
0x101a   :  { %1345 = vsyncadd [#allocation11], 4294967264 }
0x101b   :  { %1069 = vsyncpa [#allocation11], 1 }

// kernel: danq_forward.2
= control target key start
LH: loop header
LB: loop body
LE: loop exit
PB: predicated region body
PF: predicated region fallthrough
CT: control target
= control target key end

     0   :  { %s3894_s18 = smov 4   ;;  %s3895_s12 = smov 8   ;;  %vm1887_vm0 = vcmask 31744   ;;  %vm1927_vm1 = vcmask 64512   ;;  %vm1967_vm2 = vcmask 97280   ;;  %vm2007_vm3 = vcmask 130048   ;;  %s9235_s0 = inlined_call_operand.vmem [shape: f32[64,2,4], index: 0, kind: input, shape index: {}]   ;;  %s9236_s1 = inlined_call_operand.vmem [shape: bf16[104,32], index: 1, kind: input, shape index: {}]   ;;  %s9237_s2 = inlined_call_operand.vmem [shape: f32[1,32], index: 2, kind: input, shape index: {}]   ;;  %s9238_s3 = inlined_call_operand.vmem [shape: f32[3,2,32], index: 3, kind: output, shape index: {}]  }
   0x1   :  { %v3933_v0 = vld [vmem:[%s9235_s0 + $0xa] sm:$0x3]  ;;  %v3938_v1 = vld [vmem:[%s9235_s0 + $0x6] sm:$0x3]  ;;  %v16_v2 = vld [vmem:[%s9235_s0 + $0x2] sm:$0x3] }
   0x2   :  { %126 = vrot.lane.b32.xlu2 %v3933_v0, %s3894_s18  ;;  %122 = vrot.lane.b32.xlu1 %v3938_v1, %s3894_s18  ;;  %v3951_v3 = vld [vmem:[%s9235_s0 + $0xc] sm:$0x3]  ;;  %v3956_v4 = vld [vmem:[%s9235_s0 + $0x8] sm:$0x3]  ;;  %s3896_s15 = smov 12   ;;  %s3897_s19 = smov 16  }
   0x3   :  { %118 = vrot.lane.b32.xlu0 %v16_v2, %s3894_s18  ;;  %v3961_v5 = vld [vmem:[%s9235_s0 + $0x4] sm:$0x3]  ;;  %v3972_v6 = vld [vmem:[%s9235_s0 + $0x12] sm:$0x3]  ;;  %v3977_v7 = vld [vmem:[%s9235_s0 + $0x10] sm:$0x3] }
   0x4   :  { %v3982_v8 = vld [vmem:[%s9235_s0 + $0xe] sm:$0x3]  ;;  %v3993_v9 = vld [vmem:[%s9235_s0 + $0x18] sm:$0x3]  ;;  %v3998_v10 = vld [vmem:[%s9235_s0 + $0x16] sm:$0x3] }
   0x5   :  { %v4003_v11 = vld [vmem:[%s9235_s0 + $0x14] sm:$0x3]  ;;  %v4014_v12 = vld [vmem:[%s9235_s0 + $0x1e] sm:$0x3]  ;;  %v4019_v13 = vld [vmem:[%s9235_s0 + $0x1c] sm:$0x3] }
   0x6   :  { %v4024_v14 = vld [vmem:[%s9235_s0 + $0x1a] sm:$0x3]  ;;  %v4035_v15 = vld [vmem:[%s9235_s0 + $0x24] sm:$0x3]  ;;  %v4040_v16 = vld [vmem:[%s9235_s0 + $0x22] sm:$0x3] }
   0x7   :  { %v4045_v17 = vld [vmem:[%s9235_s0 + $0x20] sm:$0x3]  ;;  %v4056_v18 = vld [vmem:[%s9235_s0 + $0x2a] sm:$0x3]  ;;  %v4061_v19 = vld [vmem:[%s9235_s0 + $0x28] sm:$0x3] }
   0x8   :  { %v4066_v20 = vld [vmem:[%s9235_s0 + $0x26] sm:$0x3]  ;;  %v4077_v21 = vld [vmem:[%s9235_s0 + $0x30] sm:$0x3]  ;;  %v4082_v22 = vld [vmem:[%s9235_s0 + $0x2e] sm:$0x3] }
   0x9   :  { %v4087_v23 = vld [vmem:[%s9235_s0 + $0x2c] sm:$0x3]  ;;  %v4098_v24 = vld [vmem:[%s9235_s0 + $0x36] sm:$0x3]  ;;  %v4103_v25 = vld [vmem:[%s9235_s0 + $0x34] sm:$0x3] }
   0xa   :  { %128 = vrot.lane.b32.xlu2 %v3951_v3, %s3894_s18  ;;  %124 = vrot.lane.b32.xlu1 %v3956_v4, %s3894_s18  ;;  %v4108_v26 = vld [vmem:[%s9235_s0 + $0x32] sm:$0x3]  ;;  %v4119_v27 = vld [vmem:[%s9235_s0 + $0x3c] sm:$0x3]  ;;  %s3898_s22 = smov 20   ;;  %s3899_s25 = smov 24  }
   0xb   :  { %120 = vrot.lane.b32.xlu0 %v3961_v5, %s3894_s18  ;;  %v4124_v28 = vld [vmem:[%s9235_s0 + $0x3a] sm:$0x3]  ;;  %v4129_v29 = vld [vmem:[%s9235_s0 + $0x38] sm:$0x3]  ;;  %v4140_v30 = vld [vmem:[%s9235_s0 + $0x42] sm:$0x3] }
   0xc   :  { %v4145_v31 = vld [vmem:[%s9235_s0 + $0x40] sm:$0x3]  ;;  %v4150_v32 = vld [vmem:[%s9235_s0 + $0x3e] sm:$0x3]  ;;  %v4161_v33 = vld [vmem:[%s9235_s0 + $0x48] sm:$0x3] }
   0xd   :  { %v4166_v34 = vld [vmem:[%s9235_s0 + $0x46] sm:$0x3]  ;;  %v4171_v35 = vld [vmem:[%s9235_s0 + $0x44] sm:$0x3]  ;;  %v4184_v37 = vld [vmem:[%s9235_s0 + $0x4e] sm:$0x3] }
   0xe   :  { %v4189_v38 = vld [vmem:[%s9235_s0 + $0x4c] sm:$0x3]  ;;  %v4194_v39 = vld [vmem:[%s9235_s0 + $0x4a] sm:$0x3]  ;;  %s3900_s28 = smov 28   ;;  %s3901_s6 = smov 32  }
   0xf   :  { %s3902_s16 = smov 36   ;;  %s3903_s24 = smov 40   ;;  %vm2047_vm4 = vcmask 162816   ;;  %vm2087_vm5 = vcmask 195584   ;;  %vm2127_vm6 = vcmask 228352   ;;  %vm2167_vm7 = vcmask 261120  }
  0x10   :  { %s3904_s4 = smov 44   ;;  %s3905_s10 = smov 48   ;;  %vm2207_vm8 = vcmask 293888   ;;  %vm2247_vm9 = vcmask 326656   ;;  %vm3447_vm10 = vcmask 1043456   ;;  %vm2287_vm11 = vcmask 359424  }
  0x11   :  { %s3906_s20 = smov 52   ;;  %s3907_s27 = smov 56   ;;  %vm2327_vm12 = vcmask 392192   ;;  %vm2367_vm13 = vcmask 424960   ;;  %vm2407_vm14 = vcmask 457728   ;;  %vm2447_vm15 = vcmask 490496  }
  0x12   :  { %134 = vrot.lane.b32.xlu2 %v3972_v6, %s3894_s18  ;;  %132 = vrot.lane.b32.xlu1 %v3977_v7, %s3894_s18  ;;  %s3908_s9 = smov 60  }
  0x13   :  { %130 = vrot.lane.b32.xlu0 %v3982_v8, %s3894_s18 }
  0x1a   :  { %140 = vrot.lane.b32.xlu2 %v3993_v9, %s3894_s18  ;;  %138 = vrot.lane.b32.xlu1 %v3998_v10, %s3894_s18 }
  0x1b   :  { %136 = vrot.lane.b32.xlu0 %v4003_v11, %s3894_s18 }
  0x22   :  { %146 = vrot.lane.b32.xlu2 %v4014_v12, %s3894_s18  ;;  %144 = vrot.lane.b32.xlu1 %v4019_v13, %s3894_s18 }
  0x23   :  { %142 = vrot.lane.b32.xlu0 %v4024_v14, %s3894_s18 }
  0x2a   :  { %152 = vrot.lane.b32.xlu2 %v4035_v15, %s3894_s18  ;;  %150 = vrot.lane.b32.xlu1 %v4040_v16, %s3894_s18 }
  0x2b   :  { %148 = vrot.lane.b32.xlu0 %v4045_v17, %s3894_s18 }
  0x32   :  { %158 = vrot.lane.b32.xlu2 %v4056_v18, %s3894_s18  ;;  %156 = vrot.lane.b32.xlu1 %v4061_v19, %s3894_s18 }
  0x33   :  { %154 = vrot.lane.b32.xlu0 %v4066_v20, %s3894_s18 }
  0x3a   :  { %164 = vrot.lane.b32.xlu2 %v4077_v21, %s3894_s18  ;;  %162 = vrot.lane.b32.xlu1 %v4082_v22, %s3894_s18 }
  0x3b   :  { %160 = vrot.lane.b32.xlu0 %v4087_v23, %s3894_s18 }
  0x42   :  { %170 = vrot.lane.b32.xlu2 %v4098_v24, %s3894_s18  ;;  %168 = vrot.lane.b32.xlu1 %v4103_v25, %s3894_s18 }
  0x43   :  { %166 = vrot.lane.b32.xlu0 %v4108_v26, %s3894_s18 }
  0x4a   :  { %176 = vrot.lane.b32.xlu2 %v4119_v27, %s3894_s18  ;;  %174 = vrot.lane.b32.xlu1 %v4124_v28, %s3894_s18 }
  0x4b   :  { %172 = vrot.lane.b32.xlu0 %v4129_v29, %s3894_s18 }
  0x52   :  { %182 = vrot.lane.b32.xlu2 %v4140_v30, %s3894_s18  ;;  %180 = vrot.lane.b32.xlu1 %v4145_v31, %s3894_s18 }
  0x53   :  { %178 = vrot.lane.b32.xlu0 %v4150_v32, %s3894_s18 }
  0x5a   :  { %188 = vrot.lane.b32.xlu2 %v4161_v33, %s3894_s18  ;;  %186 = vrot.lane.b32.xlu1 %v4166_v34, %s3894_s18 }
  0x5b   :  { %184 = vrot.lane.b32.xlu0 %v4171_v35, %s3894_s18 }
  0x5c   :  { %v4179_v36 = vpop.permute.xlu2 %126 }
  0x5d   :  { %9260 = vst [vmem:[#allocation2_spill] sm:$0xff] %v4179_v36 }
  0x62   :  { %194 = vrot.lane.b32.xlu2 %v4184_v37, %s3894_s18  ;;  %192 = vrot.lane.b32.xlu1 %v4189_v38, %s3894_s18 }
  0x63   :  { %190 = vrot.lane.b32.xlu0 %v4194_v39, %s3894_s18 }
  0x64   :  { %v4202_v40 = vpop.permute.xlu2 %128 }
  0x65   :  { %9261 = vst [vmem:[#allocation3_spill] sm:$0xff] %v4202_v40 }
  0x6a   :  { %240 = vrot.lane.b32.xlu2 %v3956_v4, %s3895_s12  ;;  %238 = vrot.lane.b32.xlu1 %v3938_v1, %s3895_s12 }
  0x6b   :  { %236 = vrot.lane.b32.xlu0 %v3961_v5, %s3895_s12 }
  0x6c   :  { %v4210_v41 = vpop.permute.xlu2 %134 }
  0x6d   :  { %9262 = vst [vmem:[#allocation4_spill] sm:$0xff] %v4210_v41 }
  0x72   :  { %246 = vrot.lane.b32.xlu2 %v3982_v8, %s3895_s12  ;;  %244 = vrot.lane.b32.xlu1 %v3951_v3, %s3895_s12 }
  0x73   :  { %242 = vrot.lane.b32.xlu0 %v3933_v0, %s3895_s12 }
  0x74   :  { %v4218_v42 = vpop.permute.xlu2 %140  ;;  %v4220_v43 = vpop.permute.xlu1 %122 }
  0x75   :  { %9263 = vst [vmem:[#allocation5_spill] sm:$0xff] %v4218_v42  ;;  %v4222_v44 = vpop.permute.xlu0 %118 }
  0x76   :  { %9264 = vst [vmem:[#allocation6_spill] sm:$0xff] %v4220_v43 }
  0x77   :  { %9265 = vst [vmem:[#allocation7_spill] sm:$0xff] %v4222_v44 }
  0x7a   :  { %252 = vrot.lane.b32.xlu2 %v4003_v11, %s3895_s12  ;;  %250 = vrot.lane.b32.xlu1 %v3972_v6, %s3895_s12 }
  0x7b   :  { %248 = vrot.lane.b32.xlu0 %v3977_v7, %s3895_s12 }
  0x7c   :  { %v4230_v45 = vpop.permute.xlu2 %146  ;;  %v4232_v46 = vpop.permute.xlu1 %124 }
  0x7d   :  { %9266 = vst [vmem:[#allocation8_spill] sm:$0xff] %v4230_v45  ;;  %v4234_v47 = vpop.permute.xlu0 %120  ;;  %v4347_v45 = vld [vmem:[%s9235_s0 + $0x50] sm:$0x3] }
  0x7e   :  { %9267 = vst [vmem:[#allocation9_spill] sm:$0xff] %v4232_v46 }
  0x7f   :  { %9268 = vst [vmem:[#allocation10_spill] sm:$0xff] %v4234_v47 }
  0x82   :  { %258 = vrot.lane.b32.xlu2 %v4024_v14, %s3895_s12  ;;  %256 = vrot.lane.b32.xlu1 %v3993_v9, %s3895_s12 }
  0x83   :  { %254 = vrot.lane.b32.xlu0 %v3998_v10, %s3895_s12 }
  0x84   :  { %v4242_v48 = vpop.permute.xlu2 %152  ;;  %v4244_v49 = vpop.permute.xlu1 %132 }
  0x85   :  { %9269 = vst [vmem:[#allocation11_spill] sm:$0xff] %v4242_v48  ;;  %v4246_v50 = vpop.permute.xlu0 %130 }
  0x86   :  { %9270 = vst [vmem:[#allocation12_spill] sm:$0xff] %v4244_v49 }
  0x87   :  { %9271 = vst [vmem:[#allocation13_spill] sm:$0xff] %v4246_v50 }
  0x8a   :  { %264 = vrot.lane.b32.xlu2 %v4045_v17, %s3895_s12  ;;  %262 = vrot.lane.b32.xlu1 %v4014_v12, %s3895_s12 }
  0x8b   :  { %260 = vrot.lane.b32.xlu0 %v4019_v13, %s3895_s12 }
  0x8c   :  { %v4254_v51 = vpop.permute.xlu2 %158  ;;  %v4256_v52 = vpop.permute.xlu1 %138 }
  0x8d   :  { %9272 = vst [vmem:[#allocation14_spill] sm:$0xff] %v4254_v51  ;;  %v4258_v53 = vpop.permute.xlu0 %136 }
  0x8e   :  { %9273 = vst [vmem:[#allocation15_spill] sm:$0xff] %v4256_v52 }
  0x8f   :  { %9274 = vst [vmem:[#allocation16_spill] sm:$0xff] %v4258_v53 }
  0x92   :  { %270 = vrot.lane.b32.xlu2 %v4066_v20, %s3895_s12  ;;  %268 = vrot.lane.b32.xlu1 %v4035_v15, %s3895_s12 }
  0x93   :  { %266 = vrot.lane.b32.xlu0 %v4040_v16, %s3895_s12 }
  0x94   :  { %v4266_v54 = vpop.permute.xlu2 %164  ;;  %v4268_v55 = vpop.permute.xlu1 %144 }
  0x95   :  { %9275 = vst [vmem:[#allocation17_spill] sm:$0xff] %v4266_v54  ;;  %v4270_v56 = vpop.permute.xlu0 %142 }
  0x96   :  { %9276 = vst [vmem:[#allocation18_spill] sm:$0xff] %v4268_v55 }
  0x97   :  { %9277 = vst [vmem:[#allocation19_spill] sm:$0xff] %v4270_v56 }
  0x9a   :  { %276 = vrot.lane.b32.xlu2 %v4087_v23, %s3895_s12  ;;  %274 = vrot.lane.b32.xlu1 %v4056_v18, %s3895_s12 }
  0x9b   :  { %272 = vrot.lane.b32.xlu0 %v4061_v19, %s3895_s12 }
  0x9c   :  { %v4278_v57 = vpop.permute.xlu2 %170  ;;  %v4280_v58 = vpop.permute.xlu1 %150 }
  0x9d   :  { %9278 = vst [vmem:[#allocation20_spill] sm:$0xff] %v4278_v57  ;;  %v4282_v59 = vpop.permute.xlu0 %148 }
  0x9e   :  { %9279 = vst [vmem:[#allocation21_spill] sm:$0xff] %v4280_v58 }
  0x9f   :  { %9280 = vst [vmem:[#allocation22_spill] sm:$0xff] %v4282_v59 }
  0xa2   :  { %282 = vrot.lane.b32.xlu2 %v4108_v26, %s3895_s12  ;;  %280 = vrot.lane.b32.xlu1 %v4077_v21, %s3895_s12 }
  0xa3   :  { %278 = vrot.lane.b32.xlu0 %v4082_v22, %s3895_s12 }
  0xa4   :  { %v4290_v60 = vpop.permute.xlu2 %176  ;;  %v4292_v61 = vpop.permute.xlu1 %156 }
  0xa5   :  { %9281 = vst [vmem:[#allocation23_spill] sm:$0xff] %v4290_v60  ;;  %v4294_v62 = vpop.permute.xlu0 %154 }
  0xa6   :  { %9282 = vst [vmem:[#allocation24_spill] sm:$0xff] %v4292_v61 }
  0xa7   :  { %9283 = vst [vmem:[#allocation25_spill] sm:$0xff] %v4294_v62 }
  0xaa   :  { %288 = vrot.lane.b32.xlu2 %v4129_v29, %s3895_s12  ;;  %286 = vrot.lane.b32.xlu1 %v4098_v24, %s3895_s12 }
  0xab   :  { %284 = vrot.lane.b32.xlu0 %v4103_v25, %s3895_s12 }
  0xac   :  { %v4302_v63 = vpop.permute.xlu2 %182  ;;  %v4304_v2 = vpop.permute.xlu1 %162 }
  0xad   :  { %9284 = vst [vmem:[#allocation26_spill] sm:$0xff] %v4302_v63  ;;  %v4306_v5 = vpop.permute.xlu0 %160 }
  0xae   :  { %9285 = vst [vmem:[#allocation27_spill] sm:$0xff] %v4304_v2 }
  0xaf   :  { %9286 = vst [vmem:[#allocation28_spill] sm:$0xff] %v4306_v5 }
  0xb2   :  { %294 = vrot.lane.b32.xlu2 %v4150_v32, %s3895_s12  ;;  %292 = vrot.lane.b32.xlu1 %v4119_v27, %s3895_s12 }
  0xb3   :  { %290 = vrot.lane.b32.xlu0 %v4124_v28, %s3895_s12 }
  0xb4   :  { %v4314_v59 = vpop.permute.xlu2 %188  ;;  %v4316_v56 = vpop.permute.xlu1 %168 }
  0xb5   :  { %9287 = vst [vmem:[#allocation29_spill] sm:$0xff] %v4314_v59  ;;  %v4318_v55 = vpop.permute.xlu0 %166 }
  0xb6   :  { %9288 = vst [vmem:[#allocation30_spill] sm:$0xff] %v4316_v56 }
  0xb7   :  { %9289 = vst [vmem:[#allocation31_spill] sm:$0xff] %v4318_v55 }
  0xba   :  { %300 = vrot.lane.b32.xlu2 %v4171_v35, %s3895_s12  ;;  %298 = vrot.lane.b32.xlu1 %v4140_v30, %s3895_s12 }
  0xbb   :  { %296 = vrot.lane.b32.xlu0 %v4145_v31, %s3895_s12 }
  0xbc   :  { %v4326_v53 = vpop.permute.xlu2 %194  ;;  %v4328_v52 = vpop.permute.xlu1 %174 }
  0xbd   :  { %9290 = vst [vmem:[#allocation32_spill] sm:$0xff] %v4326_v53  ;;  %v4330_v50 = vpop.permute.xlu0 %172 }
  0xbe   :  { %9291 = vst [vmem:[#allocation33_spill] sm:$0xff] %v4328_v52 }
  0xbf   :  { %9292 = vst [vmem:[#allocation34_spill] sm:$0xff] %v4330_v50 }
  0xc2   :  { %306 = vrot.lane.b32.xlu2 %v4194_v39, %s3895_s12  ;;  %304 = vrot.lane.b32.xlu1 %v4161_v33, %s3895_s12 }
  0xc3   :  { %302 = vrot.lane.b32.xlu0 %v4166_v34, %s3895_s12 }
  0xc4   :  { %v4338_v49 = vpop.permute.xlu2 %240  ;;  %v4340_v47 = vpop.permute.xlu1 %180 }
  0xc5   :  { %9293 = vst [vmem:[#allocation35_spill] sm:$0xff] %v4338_v49  ;;  %v4342_v46 = vpop.permute.xlu0 %178 }
  0xc6   :  { %9294 = vst [vmem:[#allocation36_spill] sm:$0xff] %v4340_v47 }
  0xc7   :  { %9295 = vst [vmem:[#allocation37_spill] sm:$0xff] %v4342_v46 }
  0xca   :  { %312 = vrot.lane.b32.xlu2 %v4347_v45, %s3895_s12  ;;  %310 = vrot.lane.b32.xlu1 %v4184_v37, %s3895_s12 }
  0xcb   :  { %308 = vrot.lane.b32.xlu0 %v4189_v38, %s3895_s12 }
  0xcc   :  { %v4355_v44 = vpop.permute.xlu2 %246  ;;  %v4357_v49 = vpop.permute.xlu1 %186 }
  0xcd   :  { %9296 = vst [vmem:[#allocation38_spill] sm:$0xff] %v4355_v44  ;;  %v4359_v43 = vpop.permute.xlu0 %184 }
  0xce   :  { %9297 = vst [vmem:[#allocation39_spill] sm:$0xff] %v4357_v49 }
  0xcf   :  { %9298 = vst [vmem:[#allocation40_spill] sm:$0xff] %v4359_v43 }
  0xd2   :  { %358 = vrot.lane.b32.xlu2 %v3933_v0, %s3896_s15  ;;  %356 = vrot.lane.b32.xlu1 %v3956_v4, %s3896_s15 }
  0xd3   :  { %354 = vrot.lane.b32.xlu0 %v3938_v1, %s3896_s15 }
  0xd4   :  { %v4367_v42 = vpop.permute.xlu2 %252  ;;  %v4369_v41 = vpop.permute.xlu1 %192 }
  0xd5   :  { %9299 = vst [vmem:[#allocation41_spill] sm:$0xff] %v4367_v42  ;;  %v4371_v40 = vpop.permute.xlu0 %190 }
  0xd6   :  { %9300 = vst [vmem:[#allocation42_spill] sm:$0xff] %v4369_v41 }
  0xd7   :  { %9301 = vst [vmem:[#allocation43_spill] sm:$0xff] %v4371_v40 }
  0xda   :  { %364 = vrot.lane.b32.xlu2 %v3977_v7, %s3896_s15  ;;  %362 = vrot.lane.b32.xlu1 %v3982_v8, %s3896_s15 }
  0xdb   :  { %360 = vrot.lane.b32.xlu0 %v3951_v3, %s3896_s15 }
  0xdc   :  { %v4379_v44 = vpop.permute.xlu2 %258  ;;  %v4381_v36 = vpop.permute.xlu1 %238 }
  0xdd   :  { %9302 = vst [vmem:[#allocation44_spill] sm:$0xff] %v4379_v44  ;;  %v4383_v1 = vpop.permute.xlu0 %236 }
  0xde   :  { %9303 = vst [vmem:[#allocation45_spill] sm:$0xff] %v4381_v36 }
  0xdf   :  { %9304 = vst [vmem:[#allocation46_spill] sm:$0xff] %v4383_v1 }
  0xe2   :  { %370 = vrot.lane.b32.xlu2 %v3998_v10, %s3896_s15  ;;  %368 = vrot.lane.b32.xlu1 %v4003_v11, %s3896_s15 }
  0xe3   :  { %366 = vrot.lane.b32.xlu0 %v3972_v6, %s3896_s15 }
  0xe4   :  { %v4391_v42 = vpop.permute.xlu2 %264  ;;  %v4393_v41 = vpop.permute.xlu1 %244 }
  0xe5   :  { %9305 = vst [vmem:[#allocation47_spill] sm:$0xff] %v4391_v42  ;;  %v4395_v53 = vpop.permute.xlu0 %242 }
  0xe6   :  { %9306 = vst [vmem:[#allocation48_spill] sm:$0xff] %v4393_v41 }
  0xe7   :  { %9307 = vst [vmem:[#allocation49_spill] sm:$0xff] %v4395_v53 }
  0xea   :  { %376 = vrot.lane.b32.xlu2 %v4019_v13, %s3896_s15  ;;  %374 = vrot.lane.b32.xlu1 %v4024_v14, %s3896_s15 }
  0xeb   :  { %372 = vrot.lane.b32.xlu0 %v3993_v9, %s3896_s15 }
  0xec   :  { %v4403_v1 = vpop.permute.xlu2 %270  ;;  %v4405_v36 = vpop.permute.xlu1 %250 }
  0xed   :  { %9308 = vst [vmem:[#allocation50_spill] sm:$0xff] %v4403_v1  ;;  %v4407_v44 = vpop.permute.xlu0 %248 }
  0xee   :  { %9309 = vst [vmem:[#allocation51_spill] sm:$0xff] %v4405_v36 }
  0xef   :  { %9310 = vst [vmem:[#allocation52_spill] sm:$0xff] %v4407_v44 }
  0xf2   :  { %382 = vrot.lane.b32.xlu2 %v4040_v16, %s3896_s15  ;;  %380 = vrot.lane.b32.xlu1 %v4045_v17, %s3896_s15 }
  0xf3   :  { %378 = vrot.lane.b32.xlu0 %v4014_v12, %s3896_s15 }
  0xf4   :  { %v4415_v53 = vpop.permute.xlu2 %276  ;;  %v4417_v41 = vpop.permute.xlu1 %256 }
  0xf5   :  { %9311 = vst [vmem:[#allocation53_spill] sm:$0xff] %v4415_v53  ;;  %v4419_v42 = vpop.permute.xlu0 %254  ;;  %v5445_v53 = vld [vmem:[%s9235_s0 + $0x4c] sm:$0x3] }
  0xf6   :  { %9312 = vst [vmem:[#allocation54_spill] sm:$0xff] %v4417_v41 }
  0xf7   :  { %9313 = vst [vmem:[#allocation55_spill] sm:$0xff] %v4419_v42 }
  0xfa   :  { %388 = vrot.lane.b32.xlu2 %v4061_v19, %s3896_s15  ;;  %386 = vrot.lane.b32.xlu1 %v4066_v20, %s3896_s15 }
  0xfb   :  { %384 = vrot.lane.b32.xlu0 %v4035_v15, %s3896_s15 }
  0xfc   :  { %v4427_v44 = vpop.permute.xlu2 %282  ;;  %v4429_v36 = vpop.permute.xlu1 %262 }
  0xfd   :  { %9314 = vst [vmem:[#allocation56_spill] sm:$0xff] %v4427_v44  ;;  %v4431_v40 = vpop.permute.xlu0 %260 }
  0xfe   :  { %9315 = vst [vmem:[#allocation57_spill] sm:$0xff] %v4429_v36 }
  0xff   :  { %9316 = vst [vmem:[#allocation58_spill] sm:$0xff] %v4431_v40 }
 0x102   :  { %394 = vrot.lane.b32.xlu2 %v4082_v22, %s3896_s15  ;;  %392 = vrot.lane.b32.xlu1 %v4087_v23, %s3896_s15 }
 0x103   :  { %390 = vrot.lane.b32.xlu0 %v4056_v18, %s3896_s15 }
 0x104   :  { %v4439_v42 = vpop.permute.xlu2 %288  ;;  %v4441_v41 = vpop.permute.xlu1 %268 }
 0x105   :  { %9317 = vst [vmem:[#allocation59_spill] sm:$0xff] %v4439_v42  ;;  %v4443_v49 = vpop.permute.xlu0 %266 }
 0x106   :  { %9318 = vst [vmem:[#allocation60_spill] sm:$0xff] %v4441_v41 }
 0x107   :  { %9319 = vst [vmem:[#allocation61_spill] sm:$0xff] %v4443_v49 }
 0x10a   :  { %400 = vrot.lane.b32.xlu2 %v4103_v25, %s3896_s15  ;;  %398 = vrot.lane.b32.xlu1 %v4108_v26, %s3896_s15 }
 0x10b   :  { %396 = vrot.lane.b32.xlu0 %v4077_v21, %s3896_s15 }
 0x10c   :  { %v4451_v40 = vpop.permute.xlu2 %294  ;;  %v4453_v36 = vpop.permute.xlu1 %274 }
 0x10d   :  { %9320 = vst [vmem:[#allocation62_spill] sm:$0xff] %v4451_v40  ;;  %v4455_v59 = vpop.permute.xlu0 %272 }
 0x10e   :  { %9321 = vst [vmem:[#allocation63_spill] sm:$0xff] %v4453_v36 }
 0x10f   :  { %9322 = vst [vmem:[#allocation64_spill] sm:$0xff] %v4455_v59  ;;  %v7059_v59 = vld [vmem:[%s9235_s0 + $0x76] sm:$0x3] }
 0x110   :  { %9854 = vst [vmem:[#allocation596_spill] sm:$0xff] %v7059_v59 }
 0x112   :  { %406 = vrot.lane.b32.xlu2 %v4124_v28, %s3896_s15  ;;  %404 = vrot.lane.b32.xlu1 %v4129_v29, %s3896_s15 }
 0x113   :  { %402 = vrot.lane.b32.xlu0 %v4098_v24, %s3896_s15 }
 0x114   :  { %v4463_v49 = vpop.permute.xlu2 %300  ;;  %v4465_v43 = vpop.permute.xlu1 %280 }
 0x115   :  { %9323 = vst [vmem:[#allocation65_spill] sm:$0xff] %v4463_v49  ;;  %v4467_v47 = vpop.permute.xlu0 %278 }
 0x116   :  { %9324 = vst [vmem:[#allocation66_spill] sm:$0xff] %v4465_v43 }
 0x117   :  { %9325 = vst [vmem:[#allocation67_spill] sm:$0xff] %v4467_v47  ;;  %v5438_v47 = vld [vmem:[%s9235_s0 + $0x4e] sm:$0x3] }
 0x11a   :  { %412 = vrot.lane.b32.xlu2 %v4145_v31, %s3896_s15  ;;  %410 = vrot.lane.b32.xlu1 %v4150_v32, %s3896_s15 }
 0x11b   :  { %408 = vrot.lane.b32.xlu0 %v4119_v27, %s3896_s15 }
 0x11c   :  { %v4475_v63 = vpop.permute.xlu2 %306  ;;  %v4477_v40 = vpop.permute.xlu1 %286 }
 0x11d   :  { %9326 = vst [vmem:[#allocation68_spill] sm:$0xff] %v4475_v63  ;;  %v4479_v46 = vpop.permute.xlu0 %284 }
 0x11e   :  { %9327 = vst [vmem:[#allocation69_spill] sm:$0xff] %v4477_v40 }
 0x11f   :  { %9328 = vst [vmem:[#allocation70_spill] sm:$0xff] %v4479_v46 }
 0x122   :  { %418 = vrot.lane.b32.xlu2 %v4166_v34, %s3896_s15  ;;  %416 = vrot.lane.b32.xlu1 %v4171_v35, %s3896_s15 }
 0x123   :  { %414 = vrot.lane.b32.xlu0 %v4140_v30, %s3896_s15 }
 0x124   :  { %v4487_v49 = vpop.permute.xlu2 %312  ;;  %v4489_v52 = vpop.permute.xlu1 %292 }
 0x125   :  { %9329 = vst [vmem:[#allocation71_spill] sm:$0xff] %v4487_v49  ;;  %v4491_v60 = vpop.permute.xlu0 %290  ;;  %v4508_v49 = vld [vmem:[%s9235_s0 + $0x52] sm:$0x3] }
 0x126   :  { %9330 = vst [vmem:[#allocation72_spill] sm:$0xff] %v4489_v52 }
 0x127   :  { %9331 = vst [vmem:[#allocation73_spill] sm:$0xff] %v4491_v60 }
 0x12a   :  { %424 = vrot.lane.b32.xlu2 %v4189_v38, %s3896_s15  ;;  %422 = vrot.lane.b32.xlu1 %v4194_v39, %s3896_s15 }
 0x12b   :  { %420 = vrot.lane.b32.xlu0 %v4161_v33, %s3896_s15 }
 0x12c   :  { %v4499_v63 = vpop.permute.xlu2 %358  ;;  %v4501_v40 = vpop.permute.xlu1 %298 }
 0x12d   :  { %9332 = vst [vmem:[#allocation74_spill] sm:$0xff] %v4499_v63  ;;  %v4503_v42 = vpop.permute.xlu0 %296 }
 0x12e   :  { %9333 = vst [vmem:[#allocation75_spill] sm:$0xff] %v4501_v40 }
 0x12f   :  { %9334 = vst [vmem:[#allocation76_spill] sm:$0xff] %v4503_v42 }
 0x132   :  { %430 = vrot.lane.b32.xlu2 %v4508_v49, %s3896_s15  ;;  %428 = vrot.lane.b32.xlu1 %v4347_v45, %s3896_s15 }
 0x133   :  { %426 = vrot.lane.b32.xlu0 %v4184_v37, %s3896_s15 }
 0x134   :  { %v4516_v52 = vpop.permute.xlu2 %364  ;;  %v4518_v63 = vpop.permute.xlu1 %304 }
 0x135   :  { %9335 = vst [vmem:[#allocation77_spill] sm:$0xff] %v4516_v52  ;;  %v4520_v40 = vpop.permute.xlu0 %302 }
 0x136   :  { %9336 = vst [vmem:[#allocation78_spill] sm:$0xff] %v4518_v63 }
 0x137   :  { %9337 = vst [vmem:[#allocation79_spill] sm:$0xff] %v4520_v40 }
 0x13a   :  { %476 = vrot.lane.b32.xlu2 %v3951_v3, %s3897_s19  ;;  %474 = vrot.lane.b32.xlu1 %v3933_v0, %s3897_s19 }
 0x13b   :  { %472 = vrot.lane.b32.xlu0 %v3956_v4, %s3897_s19 }
 0x13c   :  { %v4528_v42 = vpop.permute.xlu2 %370  ;;  %v4530_v60 = vpop.permute.xlu1 %310 }
 0x13d   :  { %9338 = vst [vmem:[#allocation80_spill] sm:$0xff] %v4528_v42  ;;  %v4532_v50 = vpop.permute.xlu0 %308 }
 0x13e   :  { %9339 = vst [vmem:[#allocation81_spill] sm:$0xff] %v4530_v60 }
 0x13f   :  { %9340 = vst [vmem:[#allocation82_spill] sm:$0xff] %v4532_v50 }
 0x142   :  { %482 = vrot.lane.b32.xlu2 %v3972_v6, %s3897_s19  ;;  %480 = vrot.lane.b32.xlu1 %v3977_v7, %s3897_s19 }
 0x143   :  { %478 = vrot.lane.b32.xlu0 %v3982_v8, %s3897_s19 }
 0x144   :  { %v4540_v52 = vpop.permute.xlu2 %376  ;;  %v4542_v63 = vpop.permute.xlu1 %356 }
 0x145   :  { %9341 = vst [vmem:[#allocation83_spill] sm:$0xff] %v4540_v52  ;;  %v4544_v4 = vpop.permute.xlu0 %354 }
 0x146   :  { %9342 = vst [vmem:[#allocation84_spill] sm:$0xff] %v4542_v63 }
 0x147   :  { %9343 = vst [vmem:[#allocation85_spill] sm:$0xff] %v4544_v4 }
 0x14a   :  { %488 = vrot.lane.b32.xlu2 %v3993_v9, %s3897_s19  ;;  %486 = vrot.lane.b32.xlu1 %v3998_v10, %s3897_s19 }
 0x14b   :  { %484 = vrot.lane.b32.xlu0 %v4003_v11, %s3897_s19 }
 0x14c   :  { %v4552_v42 = vpop.permute.xlu2 %382  ;;  %v4554_v60 = vpop.permute.xlu1 %362 }
 0x14d   :  { %9344 = vst [vmem:[#allocation86_spill] sm:$0xff] %v4552_v42  ;;  %v4556_v50 = vpop.permute.xlu0 %360 }
 0x14e   :  { %9345 = vst [vmem:[#allocation87_spill] sm:$0xff] %v4554_v60 }
 0x14f   :  { %9346 = vst [vmem:[#allocation88_spill] sm:$0xff] %v4556_v50 }
 0x152   :  { %494 = vrot.lane.b32.xlu2 %v4014_v12, %s3897_s19  ;;  %492 = vrot.lane.b32.xlu1 %v4019_v13, %s3897_s19 }
 0x153   :  { %490 = vrot.lane.b32.xlu0 %v4024_v14, %s3897_s19 }
 0x154   :  { %v4564_v4 = vpop.permute.xlu2 %388  ;;  %v4566_v63 = vpop.permute.xlu1 %368 }
 0x155   :  { %9347 = vst [vmem:[#allocation89_spill] sm:$0xff] %v4564_v4  ;;  %v4568_v52 = vpop.permute.xlu0 %366 }
 0x156   :  { %9348 = vst [vmem:[#allocation90_spill] sm:$0xff] %v4566_v63 }
 0x157   :  { %9349 = vst [vmem:[#allocation91_spill] sm:$0xff] %v4568_v52 }
 0x15a   :  { %500 = vrot.lane.b32.xlu2 %v4035_v15, %s3897_s19  ;;  %498 = vrot.lane.b32.xlu1 %v4040_v16, %s3897_s19 }
 0x15b   :  { %496 = vrot.lane.b32.xlu0 %v4045_v17, %s3897_s19 }
 0x15c   :  { %v4576_v50 = vpop.permute.xlu2 %394  ;;  %v4578_v60 = vpop.permute.xlu1 %374 }
 0x15d   :  { %9350 = vst [vmem:[#allocation92_spill] sm:$0xff] %v4576_v50  ;;  %v4580_v42 = vpop.permute.xlu0 %372 }
 0x15e   :  { %9351 = vst [vmem:[#allocation93_spill] sm:$0xff] %v4578_v60 }
 0x15f   :  { %9352 = vst [vmem:[#allocation94_spill] sm:$0xff] %v4580_v42 }
 0x162   :  { %506 = vrot.lane.b32.xlu2 %v4056_v18, %s3897_s19  ;;  %504 = vrot.lane.b32.xlu1 %v4061_v19, %s3897_s19 }
 0x163   :  { %502 = vrot.lane.b32.xlu0 %v4066_v20, %s3897_s19 }
 0x164   :  { %v4588_v52 = vpop.permute.xlu2 %400  ;;  %v4590_v63 = vpop.permute.xlu1 %380 }
 0x165   :  { %9353 = vst [vmem:[#allocation95_spill] sm:$0xff] %v4588_v52  ;;  %v4592_v40 = vpop.permute.xlu0 %378 }
 0x166   :  { %9354 = vst [vmem:[#allocation96_spill] sm:$0xff] %v4590_v63 }
 0x167   :  { %9355 = vst [vmem:[#allocation97_spill] sm:$0xff] %v4592_v40 }
 0x16a   :  { %512 = vrot.lane.b32.xlu2 %v4077_v21, %s3897_s19  ;;  %510 = vrot.lane.b32.xlu1 %v4082_v22, %s3897_s19 }
 0x16b   :  { %508 = vrot.lane.b32.xlu0 %v4087_v23, %s3897_s19 }
 0x16c   :  { %v4600_v42 = vpop.permute.xlu2 %406  ;;  %v4602_v60 = vpop.permute.xlu1 %386 }
 0x16d   :  { %9356 = vst [vmem:[#allocation98_spill] sm:$0xff] %v4600_v42  ;;  %v4604_v56 = vpop.permute.xlu0 %384 }
 0x16e   :  { %9357 = vst [vmem:[#allocation99_spill] sm:$0xff] %v4602_v60 }
 0x16f   :  { %9358 = vst [vmem:[#allocation100_spill] sm:$0xff] %v4604_v56 }
 0x172   :  { %518 = vrot.lane.b32.xlu2 %v4098_v24, %s3897_s19  ;;  %516 = vrot.lane.b32.xlu1 %v4103_v25, %s3897_s19 }
 0x173   :  { %514 = vrot.lane.b32.xlu0 %v4108_v26, %s3897_s19 }
 0x174   :  { %v4612_v40 = vpop.permute.xlu2 %412  ;;  %v4614_v63 = vpop.permute.xlu1 %392 }
 0x175   :  { %9359 = vst [vmem:[#allocation101_spill] sm:$0xff] %v4612_v40  ;;  %v4616_v57 = vpop.permute.xlu0 %390 }
 0x176   :  { %9360 = vst [vmem:[#allocation102_spill] sm:$0xff] %v4614_v63 }
 0x177   :  { %9361 = vst [vmem:[#allocation103_spill] sm:$0xff] %v4616_v57 }
 0x17a   :  { %524 = vrot.lane.b32.xlu2 %v4119_v27, %s3897_s19  ;;  %522 = vrot.lane.b32.xlu1 %v4124_v28, %s3897_s19 }
 0x17b   :  { %520 = vrot.lane.b32.xlu0 %v4129_v29, %s3897_s19 }
 0x17c   :  { %v4624_v56 = vpop.permute.xlu2 %418  ;;  %v4626_v42 = vpop.permute.xlu1 %398 }
 0x17d   :  { %9362 = vst [vmem:[#allocation104_spill] sm:$0xff] %v4624_v56  ;;  %v4628_v52 = vpop.permute.xlu0 %396 }
 0x17e   :  { %9363 = vst [vmem:[#allocation105_spill] sm:$0xff] %v4626_v42 }
 0x17f   :  { %9364 = vst [vmem:[#allocation106_spill] sm:$0xff] %v4628_v52 }
 0x182   :  { %530 = vrot.lane.b32.xlu2 %v4140_v30, %s3897_s19  ;;  %528 = vrot.lane.b32.xlu1 %v4145_v31, %s3897_s19 }
 0x183   :  { %526 = vrot.lane.b32.xlu0 %v4150_v32, %s3897_s19 }
 0x184   :  { %v4636_v40 = vpop.permute.xlu2 %424  ;;  %v4638_v43 = vpop.permute.xlu1 %404 }
 0x185   :  { %9365 = vst [vmem:[#allocation107_spill] sm:$0xff] %v4636_v40  ;;  %v4640_v46 = vpop.permute.xlu0 %402 }
 0x186   :  { %9366 = vst [vmem:[#allocation108_spill] sm:$0xff] %v4638_v43 }
 0x187   :  { %9367 = vst [vmem:[#allocation109_spill] sm:$0xff] %v4640_v46 }
 0x18a   :  { %536 = vrot.lane.b32.xlu2 %v4161_v33, %s3897_s19  ;;  %534 = vrot.lane.b32.xlu1 %v4166_v34, %s3897_s19 }
 0x18b   :  { %532 = vrot.lane.b32.xlu0 %v4171_v35, %s3897_s19 }
 0x18c   :  { %v4648_v56 = vpop.permute.xlu2 %430  ;;  %v4650_v42 = vpop.permute.xlu1 %410 }
 0x18d   :  { %9368 = vst [vmem:[#allocation110_spill] sm:$0xff] %v4648_v56  ;;  %v4652_v44 = vpop.permute.xlu0 %408  ;;  %v4669_v56 = vld [vmem:[%s9235_s0 + $0x54] sm:$0x3] }
 0x18e   :  { %9369 = vst [vmem:[#allocation111_spill] sm:$0xff] %v4650_v42 }
 0x18f   :  { %9370 = vst [vmem:[#allocation112_spill] sm:$0xff] %v4652_v44 }
 0x192   :  { %542 = vrot.lane.b32.xlu2 %v4184_v37, %s3897_s19  ;;  %540 = vrot.lane.b32.xlu1 %v4189_v38, %s3897_s19 }
 0x193   :  { %538 = vrot.lane.b32.xlu0 %v4194_v39, %s3897_s19 }
 0x194   :  { %v4660_v40 = vpop.permute.xlu2 %476  ;;  %v4662_v43 = vpop.permute.xlu1 %416 }
 0x195   :  { %9371 = vst [vmem:[#allocation113_spill] sm:$0xff] %v4660_v40  ;;  %v4664_v46 = vpop.permute.xlu0 %414 }
 0x196   :  { %9372 = vst [vmem:[#allocation114_spill] sm:$0xff] %v4662_v43 }
 0x197   :  { %9373 = vst [vmem:[#allocation115_spill] sm:$0xff] %v4664_v46 }
 0x19a   :  { %548 = vrot.lane.b32.xlu2 %v4669_v56, %s3897_s19  ;;  %546 = vrot.lane.b32.xlu1 %v4508_v49, %s3897_s19 }
 0x19b   :  { %544 = vrot.lane.b32.xlu0 %v4347_v45, %s3897_s19 }
 0x19c   :  { %v4677_v42 = vpop.permute.xlu2 %482  ;;  %v4679_v40 = vpop.permute.xlu1 %422 }
 0x19d   :  { %9374 = vst [vmem:[#allocation116_spill] sm:$0xff] %v4677_v42  ;;  %v4681_v43 = vpop.permute.xlu0 %420 }
 0x19e   :  { %9375 = vst [vmem:[#allocation117_spill] sm:$0xff] %v4679_v40 }
 0x19f   :  { %9376 = vst [vmem:[#allocation118_spill] sm:$0xff] %v4681_v43 }
 0x1a2   :  { %594 = vrot.lane.b32.xlu2 %v3982_v8, %s3898_s22  ;;  %592 = vrot.lane.b32.xlu1 %v3951_v3, %s3898_s22 }
 0x1a3   :  { %590 = vrot.lane.b32.xlu0 %v3933_v0, %s3898_s22 }
 0x1a4   :  { %v4689_v46 = vpop.permute.xlu2 %488  ;;  %v4691_v44 = vpop.permute.xlu1 %428 }
 0x1a5   :  { %9377 = vst [vmem:[#allocation119_spill] sm:$0xff] %v4689_v46  ;;  %v4693_v55 = vpop.permute.xlu0 %426 }
 0x1a6   :  { %9378 = vst [vmem:[#allocation120_spill] sm:$0xff] %v4691_v44 }
 0x1a7   :  { %9379 = vst [vmem:[#allocation121_spill] sm:$0xff] %v4693_v55 }
 0x1aa   :  { %600 = vrot.lane.b32.xlu2 %v4003_v11, %s3898_s22  ;;  %598 = vrot.lane.b32.xlu1 %v3972_v6, %s3898_s22 }
 0x1ab   :  { %596 = vrot.lane.b32.xlu0 %v3977_v7, %s3898_s22 }
 0x1ac   :  { %v4701_v42 = vpop.permute.xlu2 %494  ;;  %v4703_v40 = vpop.permute.xlu1 %474 }
 0x1ad   :  { %9380 = vst [vmem:[#allocation122_spill] sm:$0xff] %v4701_v42  ;;  %v4705_v0 = vpop.permute.xlu0 %472 }
 0x1ae   :  { %9381 = vst [vmem:[#allocation123_spill] sm:$0xff] %v4703_v40 }
 0x1af   :  { %9382 = vst [vmem:[#allocation124_spill] sm:$0xff] %v4705_v0 }
 0x1b2   :  { %606 = vrot.lane.b32.xlu2 %v4024_v14, %s3898_s22  ;;  %604 = vrot.lane.b32.xlu1 %v3993_v9, %s3898_s22 }
 0x1b3   :  { %602 = vrot.lane.b32.xlu0 %v3998_v10, %s3898_s22 }
 0x1b4   :  { %v4713_v46 = vpop.permute.xlu2 %500  ;;  %v4715_v44 = vpop.permute.xlu1 %480 }
 0x1b5   :  { %9383 = vst [vmem:[#allocation125_spill] sm:$0xff] %v4713_v46  ;;  %v4717_v55 = vpop.permute.xlu0 %478 }
 0x1b6   :  { %9384 = vst [vmem:[#allocation126_spill] sm:$0xff] %v4715_v44 }
 0x1b7   :  { %9385 = vst [vmem:[#allocation127_spill] sm:$0xff] %v4717_v55 }
 0x1ba   :  { %612 = vrot.lane.b32.xlu2 %v4045_v17, %s3898_s22  ;;  %610 = vrot.lane.b32.xlu1 %v4014_v12, %s3898_s22 }
 0x1bb   :  { %608 = vrot.lane.b32.xlu0 %v4019_v13, %s3898_s22 }
 0x1bc   :  { %v4725_v0 = vpop.permute.xlu2 %506  ;;  %v4727_v40 = vpop.permute.xlu1 %486 }
 0x1bd   :  { %9386 = vst [vmem:[#allocation128_spill] sm:$0xff] %v4725_v0  ;;  %v4729_v42 = vpop.permute.xlu0 %484 }
 0x1be   :  { %9387 = vst [vmem:[#allocation129_spill] sm:$0xff] %v4727_v40 }
 0x1bf   :  { %9388 = vst [vmem:[#allocation130_spill] sm:$0xff] %v4729_v42 }
 0x1c2   :  { %618 = vrot.lane.b32.xlu2 %v4066_v20, %s3898_s22  ;;  %616 = vrot.lane.b32.xlu1 %v4035_v15, %s3898_s22 }
 0x1c3   :  { %614 = vrot.lane.b32.xlu0 %v4040_v16, %s3898_s22 }
 0x1c4   :  { %v4737_v55 = vpop.permute.xlu2 %512  ;;  %v4739_v44 = vpop.permute.xlu1 %492 }
 0x1c5   :  { %9389 = vst [vmem:[#allocation131_spill] sm:$0xff] %v4737_v55  ;;  %v4741_v46 = vpop.permute.xlu0 %490 }
 0x1c6   :  { %9390 = vst [vmem:[#allocation132_spill] sm:$0xff] %v4739_v44 }
 0x1c7   :  { %9391 = vst [vmem:[#allocation133_spill] sm:$0xff] %v4741_v46 }
 0x1ca   :  { %624 = vrot.lane.b32.xlu2 %v4087_v23, %s3898_s22  ;;  %622 = vrot.lane.b32.xlu1 %v4056_v18, %s3898_s22 }
 0x1cb   :  { %620 = vrot.lane.b32.xlu0 %v4061_v19, %s3898_s22 }
 0x1cc   :  { %v4749_v42 = vpop.permute.xlu2 %518  ;;  %v4751_v40 = vpop.permute.xlu1 %498 }
 0x1cd   :  { %9392 = vst [vmem:[#allocation134_spill] sm:$0xff] %v4749_v42  ;;  %v4753_v43 = vpop.permute.xlu0 %496 }
 0x1ce   :  { %9393 = vst [vmem:[#allocation135_spill] sm:$0xff] %v4751_v40 }
 0x1cf   :  { %9394 = vst [vmem:[#allocation136_spill] sm:$0xff] %v4753_v43 }
 0x1d2   :  { %630 = vrot.lane.b32.xlu2 %v4108_v26, %s3898_s22  ;;  %628 = vrot.lane.b32.xlu1 %v4077_v21, %s3898_s22 }
 0x1d3   :  { %626 = vrot.lane.b32.xlu0 %v4082_v22, %s3898_s22 }
 0x1d4   :  { %v4761_v46 = vpop.permute.xlu2 %524  ;;  %v4763_v44 = vpop.permute.xlu1 %504 }
 0x1d5   :  { %9395 = vst [vmem:[#allocation137_spill] sm:$0xff] %v4761_v46  ;;  %v4765_v2 = vpop.permute.xlu0 %502 }
 0x1d6   :  { %9396 = vst [vmem:[#allocation138_spill] sm:$0xff] %v4763_v44 }
 0x1d7   :  { %9397 = vst [vmem:[#allocation139_spill] sm:$0xff] %v4765_v2 }
 0x1da   :  { %636 = vrot.lane.b32.xlu2 %v4129_v29, %s3898_s22  ;;  %634 = vrot.lane.b32.xlu1 %v4098_v24, %s3898_s22 }
 0x1db   :  { %632 = vrot.lane.b32.xlu0 %v4103_v25, %s3898_s22 }
 0x1dc   :  { %v4773_v43 = vpop.permute.xlu2 %530  ;;  %v4775_v40 = vpop.permute.xlu1 %510 }
 0x1dd   :  { %9398 = vst [vmem:[#allocation140_spill] sm:$0xff] %v4773_v43  ;;  %v4777_v42 = vpop.permute.xlu0 %508 }
 0x1de   :  { %9399 = vst [vmem:[#allocation141_spill] sm:$0xff] %v4775_v40 }
 0x1df   :  { %9400 = vst [vmem:[#allocation142_spill] sm:$0xff] %v4777_v42 }
 0x1e2   :  { %642 = vrot.lane.b32.xlu2 %v4150_v32, %s3898_s22  ;;  %640 = vrot.lane.b32.xlu1 %v4119_v27, %s3898_s22 }
 0x1e3   :  { %638 = vrot.lane.b32.xlu0 %v4124_v28, %s3898_s22 }
 0x1e4   :  { %v4785_v2 = vpop.permute.xlu2 %536  ;;  %v4787_v46 = vpop.permute.xlu1 %516 }
 0x1e5   :  { %9401 = vst [vmem:[#allocation143_spill] sm:$0xff] %v4785_v2  ;;  %v4789_v55 = vpop.permute.xlu0 %514 }
 0x1e6   :  { %9402 = vst [vmem:[#allocation144_spill] sm:$0xff] %v4787_v46 }
 0x1e7   :  { %9403 = vst [vmem:[#allocation145_spill] sm:$0xff] %v4789_v55 }
 0x1ea   :  { %648 = vrot.lane.b32.xlu2 %v4171_v35, %s3898_s22  ;;  %646 = vrot.lane.b32.xlu1 %v4140_v30, %s3898_s22 }
 0x1eb   :  { %644 = vrot.lane.b32.xlu0 %v4145_v31, %s3898_s22 }
 0x1ec   :  { %v4797_v43 = vpop.permute.xlu2 %542  ;;  %v4799_v40 = vpop.permute.xlu1 %522 }
 0x1ed   :  { %9404 = vst [vmem:[#allocation146_spill] sm:$0xff] %v4797_v43  ;;  %v4801_v63 = vpop.permute.xlu0 %520 }
 0x1ee   :  { %9405 = vst [vmem:[#allocation147_spill] sm:$0xff] %v4799_v40 }
 0x1ef   :  { %9406 = vst [vmem:[#allocation148_spill] sm:$0xff] %v4801_v63 }
 0x1f2   :  { %654 = vrot.lane.b32.xlu2 %v4194_v39, %s3898_s22  ;;  %652 = vrot.lane.b32.xlu1 %v4161_v33, %s3898_s22 }
 0x1f3   :  { %650 = vrot.lane.b32.xlu0 %v4166_v34, %s3898_s22 }
 0x1f4   :  { %v4809_v2 = vpop.permute.xlu2 %548  ;;  %v4811_v46 = vpop.permute.xlu1 %528 }
 0x1f5   :  { %9407 = vst [vmem:[#allocation149_spill] sm:$0xff] %v4809_v2  ;;  %v4813_v55 = vpop.permute.xlu0 %526  ;;  %v4830_v2 = vld [vmem:[%s9235_s0 + $0x56] sm:$0x3] }
 0x1f6   :  { %9408 = vst [vmem:[#allocation150_spill] sm:$0xff] %v4811_v46 }
 0x1f7   :  { %9409 = vst [vmem:[#allocation151_spill] sm:$0xff] %v4813_v55 }
 0x1fa   :  { %660 = vrot.lane.b32.xlu2 %v4347_v45, %s3898_s22  ;;  %658 = vrot.lane.b32.xlu1 %v4184_v37, %s3898_s22 }
 0x1fb   :  { %656 = vrot.lane.b32.xlu0 %v4189_v38, %s3898_s22 }
 0x1fc   :  { %v4821_v43 = vpop.permute.xlu2 %594  ;;  %v4823_v40 = vpop.permute.xlu1 %534 }
 0x1fd   :  { %9410 = vst [vmem:[#allocation152_spill] sm:$0xff] %v4821_v43  ;;  %v4825_v63 = vpop.permute.xlu0 %532 }
 0x1fe   :  { %9411 = vst [vmem:[#allocation153_spill] sm:$0xff] %v4823_v40 }
 0x1ff   :  { %9412 = vst [vmem:[#allocation154_spill] sm:$0xff] %v4825_v63 }
 0x202   :  { %666 = vrot.lane.b32.xlu2 %v4830_v2, %s3898_s22  ;;  %664 = vrot.lane.b32.xlu1 %v4669_v56, %s3898_s22 }
 0x203   :  { %662 = vrot.lane.b32.xlu0 %v4508_v49, %s3898_s22 }
 0x204   :  { %v4838_v46 = vpop.permute.xlu2 %600  ;;  %v4840_v43 = vpop.permute.xlu1 %540 }
 0x205   :  { %9413 = vst [vmem:[#allocation155_spill] sm:$0xff] %v4838_v46  ;;  %v4842_v40 = vpop.permute.xlu0 %538 }
 0x206   :  { %9414 = vst [vmem:[#allocation156_spill] sm:$0xff] %v4840_v43 }
 0x207   :  { %9415 = vst [vmem:[#allocation157_spill] sm:$0xff] %v4842_v40 }
 0x20a   :  { %712 = vrot.lane.b32.xlu2 %v3977_v7, %s3899_s25  ;;  %710 = vrot.lane.b32.xlu1 %v3982_v8, %s3899_s25 }
 0x20b   :  { %708 = vrot.lane.b32.xlu0 %v3951_v3, %s3899_s25 }
 0x20c   :  { %v4850_v63 = vpop.permute.xlu2 %606  ;;  %v4852_v55 = vpop.permute.xlu1 %546 }
 0x20d   :  { %9416 = vst [vmem:[#allocation158_spill] sm:$0xff] %v4850_v63  ;;  %v4854_v54 = vpop.permute.xlu0 %544 }
 0x20e   :  { %9417 = vst [vmem:[#allocation159_spill] sm:$0xff] %v4852_v55 }
 0x20f   :  { %9418 = vst [vmem:[#allocation160_spill] sm:$0xff] %v4854_v54 }
 0x212   :  { %718 = vrot.lane.b32.xlu2 %v3998_v10, %s3899_s25  ;;  %716 = vrot.lane.b32.xlu1 %v4003_v11, %s3899_s25 }
 0x213   :  { %714 = vrot.lane.b32.xlu0 %v3972_v6, %s3899_s25 }
 0x214   :  { %v4862_v46 = vpop.permute.xlu2 %612  ;;  %v4864_v43 = vpop.permute.xlu1 %592 }
 0x215   :  { %9419 = vst [vmem:[#allocation161_spill] sm:$0xff] %v4862_v46  ;;  %v4866_v3 = vpop.permute.xlu0 %590 }
 0x216   :  { %9420 = vst [vmem:[#allocation162_spill] sm:$0xff] %v4864_v43 }
 0x217   :  { %9421 = vst [vmem:[#allocation163_spill] sm:$0xff] %v4866_v3 }
 0x21a   :  { %724 = vrot.lane.b32.xlu2 %v4019_v13, %s3899_s25  ;;  %722 = vrot.lane.b32.xlu1 %v4024_v14, %s3899_s25 }
 0x21b   :  { %720 = vrot.lane.b32.xlu0 %v3993_v9, %s3899_s25 }
 0x21c   :  { %v4874_v63 = vpop.permute.xlu2 %618  ;;  %v4876_v55 = vpop.permute.xlu1 %598 }
 0x21d   :  { %9422 = vst [vmem:[#allocation164_spill] sm:$0xff] %v4874_v63  ;;  %v4878_v54 = vpop.permute.xlu0 %596 }
 0x21e   :  { %9423 = vst [vmem:[#allocation165_spill] sm:$0xff] %v4876_v55 }
 0x21f   :  { %9424 = vst [vmem:[#allocation166_spill] sm:$0xff] %v4878_v54 }
 0x222   :  { %730 = vrot.lane.b32.xlu2 %v4040_v16, %s3899_s25  ;;  %728 = vrot.lane.b32.xlu1 %v4045_v17, %s3899_s25 }
 0x223   :  { %726 = vrot.lane.b32.xlu0 %v4014_v12, %s3899_s25 }
 0x224   :  { %v4886_v3 = vpop.permute.xlu2 %624  ;;  %v4888_v43 = vpop.permute.xlu1 %604 }
 0x225   :  { %9425 = vst [vmem:[#allocation167_spill] sm:$0xff] %v4886_v3  ;;  %v4890_v46 = vpop.permute.xlu0 %602 }
 0x226   :  { %9426 = vst [vmem:[#allocation168_spill] sm:$0xff] %v4888_v43 }
 0x227   :  { %9427 = vst [vmem:[#allocation169_spill] sm:$0xff] %v4890_v46 }
 0x22a   :  { %736 = vrot.lane.b32.xlu2 %v4061_v19, %s3899_s25  ;;  %734 = vrot.lane.b32.xlu1 %v4066_v20, %s3899_s25 }
 0x22b   :  { %732 = vrot.lane.b32.xlu0 %v4035_v15, %s3899_s25 }
 0x22c   :  { %v4898_v54 = vpop.permute.xlu2 %630  ;;  %v4900_v55 = vpop.permute.xlu1 %610 }
 0x22d   :  { %9428 = vst [vmem:[#allocation170_spill] sm:$0xff] %v4898_v54  ;;  %v4902_v63 = vpop.permute.xlu0 %608 }
 0x22e   :  { %9429 = vst [vmem:[#allocation171_spill] sm:$0xff] %v4900_v55 }
 0x22f   :  { %9430 = vst [vmem:[#allocation172_spill] sm:$0xff] %v4902_v63 }
 0x232   :  { %742 = vrot.lane.b32.xlu2 %v4082_v22, %s3899_s25  ;;  %740 = vrot.lane.b32.xlu1 %v4087_v23, %s3899_s25 }
 0x233   :  { %738 = vrot.lane.b32.xlu0 %v4056_v18, %s3899_s25 }
 0x234   :  { %v4910_v46 = vpop.permute.xlu2 %636  ;;  %v4912_v43 = vpop.permute.xlu1 %616 }
 0x235   :  { %9431 = vst [vmem:[#allocation173_spill] sm:$0xff] %v4910_v46  ;;  %v4914_v40 = vpop.permute.xlu0 %614 }
 0x236   :  { %9432 = vst [vmem:[#allocation174_spill] sm:$0xff] %v4912_v43 }
 0x237   :  { %9433 = vst [vmem:[#allocation175_spill] sm:$0xff] %v4914_v40 }
 0x23a   :  { %748 = vrot.lane.b32.xlu2 %v4103_v25, %s3899_s25  ;;  %746 = vrot.lane.b32.xlu1 %v4108_v26, %s3899_s25 }
 0x23b   :  { %744 = vrot.lane.b32.xlu0 %v4077_v21, %s3899_s25 }
 0x23c   :  { %v4922_v63 = vpop.permute.xlu2 %642  ;;  %v4924_v55 = vpop.permute.xlu1 %622 }
 0x23d   :  { %9434 = vst [vmem:[#allocation176_spill] sm:$0xff] %v4922_v63  ;;  %v4926_v54 = vpop.permute.xlu0 %620 }
 0x23e   :  { %9435 = vst [vmem:[#allocation177_spill] sm:$0xff] %v4924_v55 }
 0x23f   :  { %9436 = vst [vmem:[#allocation178_spill] sm:$0xff] %v4926_v54 }
 0x242   :  { %754 = vrot.lane.b32.xlu2 %v4124_v28, %s3899_s25  ;;  %752 = vrot.lane.b32.xlu1 %v4129_v29, %s3899_s25 }
 0x243   :  { %750 = vrot.lane.b32.xlu0 %v4098_v24, %s3899_s25 }
 0x244   :  { %v4934_v40 = vpop.permute.xlu2 %648  ;;  %v4936_v43 = vpop.permute.xlu1 %628 }
 0x245   :  { %9437 = vst [vmem:[#allocation179_spill] sm:$0xff] %v4934_v40  ;;  %v4938_v46 = vpop.permute.xlu0 %626 }
 0x246   :  { %9438 = vst [vmem:[#allocation180_spill] sm:$0xff] %v4936_v43 }
 0x247   :  { %9439 = vst [vmem:[#allocation181_spill] sm:$0xff] %v4938_v46 }
 0x24a   :  { %760 = vrot.lane.b32.xlu2 %v4145_v31, %s3899_s25  ;;  %758 = vrot.lane.b32.xlu1 %v4150_v32, %s3899_s25 }
 0x24b   :  { %756 = vrot.lane.b32.xlu0 %v4119_v27, %s3899_s25 }
 0x24c   :  { %v4946_v54 = vpop.permute.xlu2 %654  ;;  %v4948_v63 = vpop.permute.xlu1 %634 }
 0x24d   :  { %9440 = vst [vmem:[#allocation182_spill] sm:$0xff] %v4946_v54  ;;  %v4950_v52 = vpop.permute.xlu0 %632 }
 0x24e   :  { %9441 = vst [vmem:[#allocation183_spill] sm:$0xff] %v4948_v63 }
 0x24f   :  { %9442 = vst [vmem:[#allocation184_spill] sm:$0xff] %v4950_v52 }
 0x252   :  { %766 = vrot.lane.b32.xlu2 %v4166_v34, %s3899_s25  ;;  %764 = vrot.lane.b32.xlu1 %v4171_v35, %s3899_s25 }
 0x253   :  { %762 = vrot.lane.b32.xlu0 %v4140_v30, %s3899_s25 }
 0x254   :  { %v4958_v40 = vpop.permute.xlu2 %660  ;;  %v4960_v43 = vpop.permute.xlu1 %640 }
 0x255   :  { %9443 = vst [vmem:[#allocation185_spill] sm:$0xff] %v4958_v40  ;;  %v4962_v50 = vpop.permute.xlu0 %638 }
 0x256   :  { %9444 = vst [vmem:[#allocation186_spill] sm:$0xff] %v4960_v43 }
 0x257   :  { %9445 = vst [vmem:[#allocation187_spill] sm:$0xff] %v4962_v50 }
 0x25a   :  { %772 = vrot.lane.b32.xlu2 %v4189_v38, %s3899_s25  ;;  %770 = vrot.lane.b32.xlu1 %v4194_v39, %s3899_s25 }
 0x25b   :  { %768 = vrot.lane.b32.xlu0 %v4161_v33, %s3899_s25 }
 0x25c   :  { %v4970_v54 = vpop.permute.xlu2 %666  ;;  %v4972_v63 = vpop.permute.xlu1 %646 }
 0x25d   :  { %9446 = vst [vmem:[#allocation188_spill] sm:$0xff] %v4970_v54  ;;  %v4974_v52 = vpop.permute.xlu0 %644  ;;  %v4991_v54 = vld [vmem:[%s9235_s0 + $0x58] sm:$0x3] }
 0x25e   :  { %9447 = vst [vmem:[#allocation189_spill] sm:$0xff] %v4972_v63 }
 0x25f   :  { %9448 = vst [vmem:[#allocation190_spill] sm:$0xff] %v4974_v52 }
 0x262   :  { %778 = vrot.lane.b32.xlu2 %v4508_v49, %s3899_s25  ;;  %776 = vrot.lane.b32.xlu1 %v4347_v45, %s3899_s25 }
 0x263   :  { %774 = vrot.lane.b32.xlu0 %v4184_v37, %s3899_s25 }
 0x264   :  { %v4982_v40 = vpop.permute.xlu2 %712  ;;  %v4984_v43 = vpop.permute.xlu1 %652 }
 0x265   :  { %9449 = vst [vmem:[#allocation191_spill] sm:$0xff] %v4982_v40  ;;  %v4986_v50 = vpop.permute.xlu0 %650 }
 0x266   :  { %9450 = vst [vmem:[#allocation192_spill] sm:$0xff] %v4984_v43 }
 0x267   :  { %9451 = vst [vmem:[#allocation193_spill] sm:$0xff] %v4986_v50 }
 0x26a   :  { %784 = vrot.lane.b32.xlu2 %v4991_v54, %s3899_s25  ;;  %782 = vrot.lane.b32.xlu1 %v4830_v2, %s3899_s25 }
 0x26b   :  { %780 = vrot.lane.b32.xlu0 %v4669_v56, %s3899_s25 }
 0x26c   :  { %v4999_v63 = vpop.permute.xlu2 %718  ;;  %v5001_v40 = vpop.permute.xlu1 %658 }
 0x26d   :  { %9452 = vst [vmem:[#allocation194_spill] sm:$0xff] %v4999_v63  ;;  %v5003_v43 = vpop.permute.xlu0 %656  ;;  %v5227_v63 = vld [vmem:[%s9235_s0 + $0x1e] sm:$0x3] }
 0x26e   :  { %9453 = vst [vmem:[#allocation195_spill] sm:$0xff] %v5001_v40 }
 0x26f   :  { %9454 = vst [vmem:[#allocation196_spill] sm:$0xff] %v5003_v43  ;;  %v5328_v43 = vld [vmem:[%s9235_s0 + $0x38] sm:$0x3] }
 0x272   :  { %830 = vrot.lane.b32.xlu2 %v3972_v6, %s3900_s28  ;;  %828 = vrot.lane.b32.xlu1 %v3977_v7, %s3900_s28 }
 0x273   :  { %826 = vrot.lane.b32.xlu0 %v3982_v8, %s3900_s28 }
 0x274   :  { %v5011_v50 = vpop.permute.xlu2 %724  ;;  %v5013_v52 = vpop.permute.xlu1 %664 }
 0x275   :  { %9455 = vst [vmem:[#allocation197_spill] sm:$0xff] %v5011_v50  ;;  %v5015_v36 = vpop.permute.xlu0 %662  ;;  %v5200_v50 = vld [vmem:[%s9235_s0 + $0x18] sm:$0x3] }
 0x276   :  { %9456 = vst [vmem:[#allocation198_spill] sm:$0xff] %v5013_v52 }
 0x277   :  { %9457 = vst [vmem:[#allocation199_spill] sm:$0xff] %v5015_v36  ;;  %v5301_v36 = vld [vmem:[%s9235_s0 + $0x32] sm:$0x3] }
 0x27a   :  { %836 = vrot.lane.b32.xlu2 %v3993_v9, %s3900_s28  ;;  %834 = vrot.lane.b32.xlu1 %v3998_v10, %s3900_s28 }
 0x27b   :  { %832 = vrot.lane.b32.xlu0 %v4003_v11, %s3900_s28 }
 0x27c   :  { %v5023_v6 = vpop.permute.xlu2 %730  ;;  %v5025_v7 = vpop.permute.xlu1 %710 }
 0x27d   :  { %9458 = vst [vmem:[#allocation200_spill] sm:$0xff] %v5023_v6  ;;  %v5027_v8 = vpop.permute.xlu0 %708 }
 0x27e   :  { %9459 = vst [vmem:[#allocation201_spill] sm:$0xff] %v5025_v7 }
 0x27f   :  { %9460 = vst [vmem:[#allocation202_spill] sm:$0xff] %v5027_v8 }
 0x282   :  { %842 = vrot.lane.b32.xlu2 %v4014_v12, %s3900_s28  ;;  %840 = vrot.lane.b32.xlu1 %v4019_v13, %s3900_s28 }
 0x283   :  { %838 = vrot.lane.b32.xlu0 %v4024_v14, %s3900_s28 }
 0x284   :  { %v5035_v9 = vpop.permute.xlu2 %736  ;;  %v5037_v10 = vpop.permute.xlu1 %716 }
 0x285   :  { %9461 = vst [vmem:[#allocation203_spill] sm:$0xff] %v5035_v9  ;;  %v5039_v11 = vpop.permute.xlu0 %714 }
 0x286   :  { %9462 = vst [vmem:[#allocation204_spill] sm:$0xff] %v5037_v10  ;;  %v5193_v10 = vld [vmem:[%s9235_s0 + $0x1a] sm:$0x3] }
 0x287   :  { %9463 = vst [vmem:[#allocation205_spill] sm:$0xff] %v5039_v11 }
 0x28a   :  { %848 = vrot.lane.b32.xlu2 %v4035_v15, %s3900_s28  ;;  %846 = vrot.lane.b32.xlu1 %v4040_v16, %s3900_s28 }
 0x28b   :  { %844 = vrot.lane.b32.xlu0 %v4045_v17, %s3900_s28 }
 0x28c   :  { %v5047_v12 = vpop.permute.xlu2 %742  ;;  %v5049_v13 = vpop.permute.xlu1 %722 }
 0x28d   :  { %9464 = vst [vmem:[#allocation206_spill] sm:$0xff] %v5047_v12  ;;  %v5051_v14 = vpop.permute.xlu0 %720 }
 0x28e   :  { %9465 = vst [vmem:[#allocation207_spill] sm:$0xff] %v5049_v13  ;;  %v3793_v13 = vld [vmem:[%s9235_s0 + $0x10] sm:$0x3] }
 0x28f   :  { %9466 = vst [vmem:[#allocation208_spill] sm:$0xff] %v5051_v14  ;;  %v5176_v14 = vld [vmem:[%s9235_s0 + $0x12] sm:$0x3] }
 0x292   :  { %854 = vrot.lane.b32.xlu2 %v4056_v18, %s3900_s28  ;;  %852 = vrot.lane.b32.xlu1 %v4061_v19, %s3900_s28 }
 0x293   :  { %850 = vrot.lane.b32.xlu0 %v4066_v20, %s3900_s28 }
 0x294   :  { %v5059_v15 = vpop.permute.xlu2 %748  ;;  %v5061_v16 = vpop.permute.xlu1 %728 }
 0x295   :  { %9467 = vst [vmem:[#allocation209_spill] sm:$0xff] %v5059_v15  ;;  %v5063_v17 = vpop.permute.xlu0 %726 }
 0x296   :  { %9468 = vst [vmem:[#allocation210_spill] sm:$0xff] %v5061_v16  ;;  %v5169_v16 = vld [vmem:[%s9235_s0 + $0x14] sm:$0x3] }
 0x297   :  { %9469 = vst [vmem:[#allocation211_spill] sm:$0xff] %v5063_v17 }
 0x29a   :  { %860 = vrot.lane.b32.xlu2 %v4077_v21, %s3900_s28  ;;  %858 = vrot.lane.b32.xlu1 %v4082_v22, %s3900_s28 }
 0x29b   :  { %856 = vrot.lane.b32.xlu0 %v4087_v23, %s3900_s28 }
 0x29c   :  { %v5071_v18 = vpop.permute.xlu2 %754  ;;  %v5073_v19 = vpop.permute.xlu1 %734 }
 0x29d   :  { %9470 = vst [vmem:[#allocation212_spill] sm:$0xff] %v5071_v18  ;;  %v5075_v20 = vpop.permute.xlu0 %732 }
 0x29e   :  { %9471 = vst [vmem:[#allocation213_spill] sm:$0xff] %v5073_v19 }
 0x29f   :  { %9472 = vst [vmem:[#allocation214_spill] sm:$0xff] %v5075_v20 }
 0x2a2   :  { %866 = vrot.lane.b32.xlu2 %v4098_v24, %s3900_s28  ;;  %864 = vrot.lane.b32.xlu1 %v4103_v25, %s3900_s28 }
 0x2a3   :  { %862 = vrot.lane.b32.xlu0 %v4108_v26, %s3900_s28 }
 0x2a4   :  { %v5083_v21 = vpop.permute.xlu2 %760  ;;  %v5085_v22 = vpop.permute.xlu1 %740 }
 0x2a5   :  { %9473 = vst [vmem:[#allocation215_spill] sm:$0xff] %v5083_v21  ;;  %v5087_v23 = vpop.permute.xlu0 %738 }
 0x2a6   :  { %9474 = vst [vmem:[#allocation216_spill] sm:$0xff] %v5085_v22 }
 0x2a7   :  { %9475 = vst [vmem:[#allocation217_spill] sm:$0xff] %v5087_v23  ;;  %v5152_v23 = vld [vmem:[%s9235_s0 + $0x5a] sm:$0x3] }
 0x2aa   :  { %872 = vrot.lane.b32.xlu2 %v4119_v27, %s3900_s28  ;;  %870 = vrot.lane.b32.xlu1 %v4124_v28, %s3900_s28 }
 0x2ab   :  { %868 = vrot.lane.b32.xlu0 %v4129_v29, %s3900_s28 }
 0x2ac   :  { %v5095_v24 = vpop.permute.xlu2 %766  ;;  %v5097_v25 = vpop.permute.xlu1 %746 }
 0x2ad   :  { %9476 = vst [vmem:[#allocation218_spill] sm:$0xff] %v5095_v24  ;;  %v5099_v26 = vpop.permute.xlu0 %744 }
 0x2ae   :  { %9477 = vst [vmem:[#allocation219_spill] sm:$0xff] %v5097_v25  ;;  %v5409_v25 = vld [vmem:[%s9235_s0 + $0x4a] sm:$0x3] }
 0x2af   :  { %9478 = vst [vmem:[#allocation220_spill] sm:$0xff] %v5099_v26 }
 0x2b2   :  { %878 = vrot.lane.b32.xlu2 %v4140_v30, %s3900_s28  ;;  %876 = vrot.lane.b32.xlu1 %v4145_v31, %s3900_s28 }
 0x2b3   :  { %874 = vrot.lane.b32.xlu0 %v4150_v32, %s3900_s28 }
 0x2b4   :  { %v5107_v27 = vpop.permute.xlu2 %772  ;;  %v5109_v28 = vpop.permute.xlu1 %752 }
 0x2b5   :  { %9479 = vst [vmem:[#allocation221_spill] sm:$0xff] %v5107_v27  ;;  %v5111_v29 = vpop.permute.xlu0 %750 }
 0x2b6   :  { %9480 = vst [vmem:[#allocation222_spill] sm:$0xff] %v5109_v28  ;;  %v5382_v28 = vld [vmem:[%s9235_s0 + $0x44] sm:$0x3] }
 0x2b7   :  { %9481 = vst [vmem:[#allocation223_spill] sm:$0xff] %v5111_v29  ;;  %v5416_v29 = vld [vmem:[%s9235_s0 + $0x48] sm:$0x3] }
 0x2ba   :  { %884 = vrot.lane.b32.xlu2 %v4161_v33, %s3900_s28  ;;  %882 = vrot.lane.b32.xlu1 %v4166_v34, %s3900_s28 }
 0x2bb   :  { %880 = vrot.lane.b32.xlu0 %v4171_v35, %s3900_s28 }
 0x2bc   :  { %v5119_v30 = vpop.permute.xlu2 %778  ;;  %v5121_v31 = vpop.permute.xlu1 %758 }
 0x2bd   :  { %9482 = vst [vmem:[#allocation224_spill] sm:$0xff] %v5119_v30  ;;  %v5123_v32 = vpop.permute.xlu0 %756 }
 0x2be   :  { %9483 = vst [vmem:[#allocation225_spill] sm:$0xff] %v5121_v31  ;;  %v5355_v31 = vld [vmem:[%s9235_s0 + $0x3e] sm:$0x3] }
 0x2bf   :  { %9484 = vst [vmem:[#allocation226_spill] sm:$0xff] %v5123_v32  ;;  %v5389_v32 = vld [vmem:[%s9235_s0 + $0x42] sm:$0x3] }
 0x2c2   :  { %890 = vrot.lane.b32.xlu2 %v4184_v37, %s3900_s28  ;;  %888 = vrot.lane.b32.xlu1 %v4189_v38, %s3900_s28 }
 0x2c3   :  { %886 = vrot.lane.b32.xlu0 %v4194_v39, %s3900_s28 }
 0x2c4   :  { %v5131_v33 = vpop.permute.xlu2 %784  ;;  %v5133_v34 = vpop.permute.xlu1 %764 }
 0x2c5   :  { %9485 = vst [vmem:[#allocation227_spill] sm:$0xff] %v5131_v33  ;;  %v5135_v35 = vpop.permute.xlu0 %762  ;;  %v5254_v33 = vld [vmem:[%s9235_s0 + $0x24] sm:$0x3] }
 0x2c6   :  { %9486 = vst [vmem:[#allocation228_spill] sm:$0xff] %v5133_v34  ;;  %v5335_v34 = vld [vmem:[%s9235_s0 + $0x36] sm:$0x3] }
 0x2c7   :  { %9487 = vst [vmem:[#allocation229_spill] sm:$0xff] %v5135_v35  ;;  %v5362_v35 = vld [vmem:[%s9235_s0 + $0x3c] sm:$0x3] }
 0x2ca   :  { %896 = vrot.lane.b32.xlu2 %v4669_v56, %s3900_s28  ;;  %894 = vrot.lane.b32.xlu1 %v4508_v49, %s3900_s28 }
 0x2cb   :  { %892 = vrot.lane.b32.xlu0 %v4347_v45, %s3900_s28 }
 0x2cc   :  { %v5143_v37 = vpop.permute.xlu2 %830  ;;  %v5145_v38 = vpop.permute.xlu1 %770 }
 0x2cd   :  { %9488 = vst [vmem:[#allocation230_spill] sm:$0xff] %v5143_v37  ;;  %v5147_v39 = vpop.permute.xlu0 %768 }
 0x2ce   :  { %9489 = vst [vmem:[#allocation231_spill] sm:$0xff] %v5145_v38  ;;  %v5308_v38 = vld [vmem:[%s9235_s0 + $0x30] sm:$0x3] }
 0x2cf   :  { %9490 = vst [vmem:[#allocation232_spill] sm:$0xff] %v5147_v39 }
 0x2d2   :  { %902 = vrot.lane.b32.xlu2 %v5152_v23, %s3900_s28  ;;  %900 = vrot.lane.b32.xlu1 %v4991_v54, %s3900_s28 }
 0x2d3   :  { %898 = vrot.lane.b32.xlu0 %v4830_v2, %s3900_s28 }
 0x2d4   :  { %v5160_v20 = vpop.permute.xlu2 %836  ;;  %v5162_v19 = vpop.permute.xlu1 %776 }
 0x2d5   :  { %9491 = vst [vmem:[#allocation233_spill] sm:$0xff] %v5160_v20  ;;  %v5164_v17 = vpop.permute.xlu0 %774  ;;  %v5220_v20 = vld [vmem:[%s9235_s0 + $0x20] sm:$0x3] }
 0x2d6   :  { %9492 = vst [vmem:[#allocation234_spill] sm:$0xff] %v5162_v19  ;;  %v5274_v19 = vld [vmem:[%s9235_s0 + $0x2c] sm:$0x3] }
 0x2d7   :  { %9493 = vst [vmem:[#allocation235_spill] sm:$0xff] %v5164_v17 }
 0x2da   :  { %948 = vrot.lane.b32.xlu2 %v5169_v16, %s3901_s6  ;;  %946 = vrot.lane.b32.xlu1 %v5176_v14, %s3901_s6 }
 0x2db   :  { %944 = vrot.lane.b32.xlu0 %v3793_v13, %s3901_s6  ;;  %v5207_v13 = vld [vmem:[%s9235_s0 + $0x16] sm:$0x3] }
 0x2dc   :  { %v5184_v9 = vpop.permute.xlu2 %842  ;;  %v5186_v6 = vpop.permute.xlu1 %782 }
 0x2dd   :  { %9494 = vst [vmem:[#allocation236_spill] sm:$0xff] %v5184_v9  ;;  %v5188_v11 = vpop.permute.xlu0 %780 }
 0x2de   :  { %9495 = vst [vmem:[#allocation237_spill] sm:$0xff] %v5186_v6  ;;  %v5247_v6 = vld [vmem:[%s9235_s0 + $0x26] sm:$0x3] }
 0x2df   :  { %9496 = vst [vmem:[#allocation238_spill] sm:$0xff] %v5188_v11  ;;  %v5281_v11 = vld [vmem:[%s9235_s0 + $0x2a] sm:$0x3] }
 0x2e2   :  { %954 = vrot.lane.b32.xlu2 %v5193_v10, %s3901_s6  ;;  %952 = vrot.lane.b32.xlu1 %v5200_v50, %s3901_s6 }
 0x2e3   :  { %950 = vrot.lane.b32.xlu0 %v5207_v13, %s3901_s6 }
 0x2e4   :  { %v5211_v9 = vpop.permute.xlu2 %848  ;;  %v5213_v8 = vpop.permute.xlu1 %828 }
 0x2e5   :  { %9497 = vst [vmem:[#allocation239_spill] sm:$0xff] %v5211_v9  ;;  %v5215_v7 = vpop.permute.xlu0 %826  ;;  %v5234_v9 = vld [vmem:[%s9235_s0 + $0x1c] sm:$0x3] }
 0x2e6   :  { %9498 = vst [vmem:[#allocation240_spill] sm:$0xff] %v5213_v8 }
 0x2e7   :  { %9499 = vst [vmem:[#allocation241_spill] sm:$0xff] %v5215_v7 }
 0x2ea   :  { %960 = vrot.lane.b32.xlu2 %v5220_v20, %s3901_s6  ;;  %958 = vrot.lane.b32.xlu1 %v5227_v63, %s3901_s6 }
 0x2eb   :  { %956 = vrot.lane.b32.xlu0 %v5234_v9, %s3901_s6 }
 0x2ec   :  { %v5238_v7 = vpop.permute.xlu2 %854  ;;  %v5240_v8 = vpop.permute.xlu1 %834 }
 0x2ed   :  { %9500 = vst [vmem:[#allocation242_spill] sm:$0xff] %v5238_v7  ;;  %v5242_v37 = vpop.permute.xlu0 %832  ;;  %v5261_v7 = vld [vmem:[%s9235_s0 + $0x22] sm:$0x3] }
 0x2ee   :  { %9501 = vst [vmem:[#allocation243_spill] sm:$0xff] %v5240_v8 }
 0x2ef   :  { %9502 = vst [vmem:[#allocation244_spill] sm:$0xff] %v5242_v37 }
 0x2f2   :  { %966 = vrot.lane.b32.xlu2 %v5247_v6, %s3901_s6  ;;  %964 = vrot.lane.b32.xlu1 %v5254_v33, %s3901_s6 }
 0x2f3   :  { %962 = vrot.lane.b32.xlu0 %v5261_v7, %s3901_s6 }
 0x2f4   :  { %v5265_v37 = vpop.permute.xlu2 %860  ;;  %v5267_v8 = vpop.permute.xlu1 %840 }
 0x2f5   :  { %9503 = vst [vmem:[#allocation245_spill] sm:$0xff] %v5265_v37  ;;  %v5269_v52 = vpop.permute.xlu0 %838  ;;  %v7002_v37 = vld [vmem:[%s9235_s0 + $0x74] sm:$0x3] }
 0x2f6   :  { %9504 = vst [vmem:[#allocation246_spill] sm:$0xff] %v5267_v8 }
 0x2f7   :  { %9505 = vst [vmem:[#allocation247_spill] sm:$0xff] %v5269_v52  ;;  %v5288_v52 = vld [vmem:[%s9235_s0 + $0x28] sm:$0x3] }
 0x2fa   :  { %972 = vrot.lane.b32.xlu2 %v5274_v19, %s3901_s6  ;;  %970 = vrot.lane.b32.xlu1 %v5281_v11, %s3901_s6 }
 0x2fb   :  { %968 = vrot.lane.b32.xlu0 %v5288_v52, %s3901_s6 }
 0x2fc   :  { %v5292_v8 = vpop.permute.xlu2 %866  ;;  %v5294_v30 = vpop.permute.xlu1 %846 }
 0x2fd   :  { %9506 = vst [vmem:[#allocation248_spill] sm:$0xff] %v5292_v8  ;;  %v5296_v40 = vpop.permute.xlu0 %844 }
 0x2fe   :  { %9507 = vst [vmem:[#allocation249_spill] sm:$0xff] %v5294_v30 }
 0x2ff   :  { %9508 = vst [vmem:[#allocation250_spill] sm:$0xff] %v5296_v40  ;;  %v5315_v40 = vld [vmem:[%s9235_s0 + $0x2e] sm:$0x3] }
 0x302   :  { %978 = vrot.lane.b32.xlu2 %v5301_v36, %s3901_s6  ;;  %976 = vrot.lane.b32.xlu1 %v5308_v38, %s3901_s6 }
 0x303   :  { %974 = vrot.lane.b32.xlu0 %v5315_v40, %s3901_s6 }
 0x304   :  { %v5319_v30 = vpop.permute.xlu2 %872  ;;  %v5321_v17 = vpop.permute.xlu1 %852 }
 0x305   :  { %9509 = vst [vmem:[#allocation251_spill] sm:$0xff] %v5319_v30  ;;  %v5323_v27 = vpop.permute.xlu0 %850 }
 0x306   :  { %9510 = vst [vmem:[#allocation252_spill] sm:$0xff] %v5321_v17 }
 0x307   :  { %9511 = vst [vmem:[#allocation253_spill] sm:$0xff] %v5323_v27  ;;  %v5342_v27 = vld [vmem:[%s9235_s0 + $0x34] sm:$0x3] }
 0x30a   :  { %984 = vrot.lane.b32.xlu2 %v5328_v43, %s3901_s6  ;;  %982 = vrot.lane.b32.xlu1 %v5335_v34, %s3901_s6 }
 0x30b   :  { %980 = vrot.lane.b32.xlu0 %v5342_v27, %s3901_s6 }
 0x30c   :  { %v5346_v17 = vpop.permute.xlu2 %878  ;;  %v5348_v39 = vpop.permute.xlu1 %858 }
 0x30d   :  { %9512 = vst [vmem:[#allocation254_spill] sm:$0xff] %v5346_v17  ;;  %v5350_v24 = vpop.permute.xlu0 %856 }
 0x30e   :  { %9513 = vst [vmem:[#allocation255_spill] sm:$0xff] %v5348_v39 }
 0x30f   :  { %9514 = vst [vmem:[#allocation256_spill] sm:$0xff] %v5350_v24  ;;  %v5369_v24 = vld [vmem:[%s9235_s0 + $0x3a] sm:$0x3] }
 0x312   :  { %990 = vrot.lane.b32.xlu2 %v5355_v31, %s3901_s6  ;;  %988 = vrot.lane.b32.xlu1 %v5362_v35, %s3901_s6 }
 0x313   :  { %986 = vrot.lane.b32.xlu0 %v5369_v24, %s3901_s6 }
 0x314   :  { %v5373_v17 = vpop.permute.xlu2 %884  ;;  %v5375_v21 = vpop.permute.xlu1 %864 }
 0x315   :  { %9515 = vst [vmem:[#allocation257_spill] sm:$0xff] %v5373_v17  ;;  %v5377_v30 = vpop.permute.xlu0 %862  ;;  %v5396_v17 = vld [vmem:[%s9235_s0 + $0x40] sm:$0x3] }
 0x316   :  { %9516 = vst [vmem:[#allocation258_spill] sm:$0xff] %v5375_v21 }
 0x317   :  { %9517 = vst [vmem:[#allocation259_spill] sm:$0xff] %v5377_v30 }
 0x31a   :  { %996 = vrot.lane.b32.xlu2 %v5382_v28, %s3901_s6  ;;  %994 = vrot.lane.b32.xlu1 %v5389_v32, %s3901_s6 }
 0x31b   :  { %992 = vrot.lane.b32.xlu0 %v5396_v17, %s3901_s6 }
 0x31c   :  { %v5400_v18 = vpop.permute.xlu2 %890  ;;  %v5402_v21 = vpop.permute.xlu1 %870 }
 0x31d   :  { %9518 = vst [vmem:[#allocation260_spill] sm:$0xff] %v5400_v18  ;;  %v5404_v8 = vpop.permute.xlu0 %868  ;;  %v5423_v18 = vld [vmem:[%s9235_s0 + $0x46] sm:$0x3] }
 0x31e   :  { %9519 = vst [vmem:[#allocation261_spill] sm:$0xff] %v5402_v21 }
 0x31f   :  { %9520 = vst [vmem:[#allocation262_spill] sm:$0xff] %v5404_v8 }
 0x322   :  { %1002 = vrot.lane.b32.xlu2 %v5409_v25, %s3901_s6  ;;  %1000 = vrot.lane.b32.xlu1 %v5416_v29, %s3901_s6 }
 0x323   :  { %998 = vrot.lane.b32.xlu0 %v5423_v18, %s3901_s6 }
 0x324   :  { %v5427_v21 = vpop.permute.xlu2 %896  ;;  %v5429_v8 = vpop.permute.xlu1 %876 }
 0x325   :  { %9521 = vst [vmem:[#allocation263_spill] sm:$0xff] %v5427_v21  ;;  %v5431_v15 = vpop.permute.xlu0 %874 }
 0x326   :  { %9522 = vst [vmem:[#allocation264_spill] sm:$0xff] %v5429_v8 }
 0x327   :  { %9523 = vst [vmem:[#allocation265_spill] sm:$0xff] %v5431_v15 }
 0x32a   :  { %1008 = vrot.lane.b32.xlu2 %v4347_v45, %s3901_s6  ;;  %1006 = vrot.lane.b32.xlu1 %v5438_v47, %s3901_s6 }
 0x32b   :  { %1004 = vrot.lane.b32.xlu0 %v5445_v53, %s3901_s6 }
 0x32c   :  { %v5449_v21 = vpop.permute.xlu2 %902  ;;  %v5451_v8 = vpop.permute.xlu1 %882 }
 0x32d   :  { %9524 = vst [vmem:[#allocation266_spill] sm:$0xff] %v5449_v21  ;;  %v5453_v45 = vpop.permute.xlu0 %880  ;;  %v5470_v21 = vld [vmem:[%s9235_s0 + $0x5c] sm:$0x3] }
 0x32e   :  { %9525 = vst [vmem:[#allocation267_spill] sm:$0xff] %v5451_v8 }
 0x32f   :  { %9526 = vst [vmem:[#allocation268_spill] sm:$0xff] %v5453_v45 }
 0x332   :  { %1014 = vrot.lane.b32.xlu2 %v4830_v2, %s3901_s6  ;;  %1012 = vrot.lane.b32.xlu1 %v4669_v56, %s3901_s6 }
 0x333   :  { %1010 = vrot.lane.b32.xlu0 %v4508_v49, %s3901_s6 }
 0x334   :  { %v5461_v15 = vpop.permute.xlu2 %948  ;;  %v5463_v5 = vpop.permute.xlu1 %888 }
 0x335   :  { %9527 = vst [vmem:[#allocation269_spill] sm:$0xff] %v5461_v15  ;;  %v5465_v39 = vpop.permute.xlu0 %886 }
 0x336   :  { %9528 = vst [vmem:[#allocation270_spill] sm:$0xff] %v5463_v5 }
 0x337   :  { %9529 = vst [vmem:[#allocation271_spill] sm:$0xff] %v5465_v39 }
 0x33a   :  { %1020 = vrot.lane.b32.xlu2 %v5470_v21, %s3901_s6  ;;  %1018 = vrot.lane.b32.xlu1 %v5152_v23, %s3901_s6 }
 0x33b   :  { %1016 = vrot.lane.b32.xlu0 %v4991_v54, %s3901_s6 }
 0x33c   :  { %v5478_v8 = vpop.permute.xlu2 %954  ;;  %v5480_v15 = vpop.permute.xlu1 %894 }
 0x33d   :  { %9530 = vst [vmem:[#allocation272_spill] sm:$0xff] %v5478_v8  ;;  %v5482_v5 = vpop.permute.xlu0 %892 }
 0x33e   :  { %9531 = vst [vmem:[#allocation273_spill] sm:$0xff] %v5480_v15 }
 0x33f   :  { %9532 = vst [vmem:[#allocation274_spill] sm:$0xff] %v5482_v5 }
 0x342   :  { %1066 = vrot.lane.b32.xlu2 %v5207_v13, %s3902_s16  ;;  %1064 = vrot.lane.b32.xlu1 %v5169_v16, %s3902_s16 }
 0x343   :  { %1062 = vrot.lane.b32.xlu0 %v5176_v14, %s3902_s16 }
 0x344   :  { %v5490_v39 = vpop.permute.xlu2 %960  ;;  %v5492_v45 = vpop.permute.xlu1 %900 }
 0x345   :  { %9533 = vst [vmem:[#allocation275_spill] sm:$0xff] %v5490_v39  ;;  %v5494_v61 = vpop.permute.xlu0 %898 }
 0x346   :  { %9534 = vst [vmem:[#allocation276_spill] sm:$0xff] %v5492_v45 }
 0x347   :  { %9535 = vst [vmem:[#allocation277_spill] sm:$0xff] %v5494_v61 }
 0x34a   :  { %1072 = vrot.lane.b32.xlu2 %v5234_v9, %s3902_s16  ;;  %1070 = vrot.lane.b32.xlu1 %v5193_v10, %s3902_s16 }
 0x34b   :  { %1068 = vrot.lane.b32.xlu0 %v5200_v50, %s3902_s16 }
 0x34c   :  { %v5502_v8 = vpop.permute.xlu2 %966  ;;  %v5504_v15 = vpop.permute.xlu1 %946 }
 0x34d   :  { %9536 = vst [vmem:[#allocation278_spill] sm:$0xff] %v5502_v8  ;;  %v5506_v14 = vpop.permute.xlu0 %944 }
 0x34e   :  { %9537 = vst [vmem:[#allocation279_spill] sm:$0xff] %v5504_v15 }
 0x34f   :  { %9538 = vst [vmem:[#allocation280_spill] sm:$0xff] %v5506_v14 }
 0x352   :  { %1078 = vrot.lane.b32.xlu2 %v5261_v7, %s3902_s16  ;;  %1076 = vrot.lane.b32.xlu1 %v5220_v20, %s3902_s16 }
 0x353   :  { %1074 = vrot.lane.b32.xlu0 %v5227_v63, %s3902_s16 }
 0x354   :  { %v5514_v39 = vpop.permute.xlu2 %972  ;;  %v5516_v45 = vpop.permute.xlu1 %952 }
 0x355   :  { %9539 = vst [vmem:[#allocation281_spill] sm:$0xff] %v5514_v39  ;;  %v5518_v61 = vpop.permute.xlu0 %950 }
 0x356   :  { %9540 = vst [vmem:[#allocation282_spill] sm:$0xff] %v5516_v45 }
 0x357   :  { %9541 = vst [vmem:[#allocation283_spill] sm:$0xff] %v5518_v61 }
 0x35a   :  { %1084 = vrot.lane.b32.xlu2 %v5288_v52, %s3902_s16  ;;  %1082 = vrot.lane.b32.xlu1 %v5247_v6, %s3902_s16 }
 0x35b   :  { %1080 = vrot.lane.b32.xlu0 %v5254_v33, %s3902_s16 }
 0x35c   :  { %v5526_v8 = vpop.permute.xlu2 %978  ;;  %v5528_v14 = vpop.permute.xlu1 %958 }
 0x35d   :  { %9542 = vst [vmem:[#allocation284_spill] sm:$0xff] %v5526_v8  ;;  %v5530_v15 = vpop.permute.xlu0 %956 }
 0x35e   :  { %9543 = vst [vmem:[#allocation285_spill] sm:$0xff] %v5528_v14 }
 0x35f   :  { %9544 = vst [vmem:[#allocation286_spill] sm:$0xff] %v5530_v15 }
 0x362   :  { %1090 = vrot.lane.b32.xlu2 %v5315_v40, %s3902_s16  ;;  %1088 = vrot.lane.b32.xlu1 %v5274_v19, %s3902_s16 }
 0x363   :  { %1086 = vrot.lane.b32.xlu0 %v5281_v11, %s3902_s16 }
 0x364   :  { %v5538_v39 = vpop.permute.xlu2 %984  ;;  %v5540_v61 = vpop.permute.xlu1 %964 }
 0x365   :  { %9545 = vst [vmem:[#allocation287_spill] sm:$0xff] %v5538_v39  ;;  %v5542_v45 = vpop.permute.xlu0 %962 }
 0x366   :  { %9546 = vst [vmem:[#allocation288_spill] sm:$0xff] %v5540_v61 }
 0x367   :  { %9547 = vst [vmem:[#allocation289_spill] sm:$0xff] %v5542_v45 }
 0x36a   :  { %1096 = vrot.lane.b32.xlu2 %v5342_v27, %s3902_s16  ;;  %1094 = vrot.lane.b32.xlu1 %v5301_v36, %s3902_s16 }
 0x36b   :  { %1092 = vrot.lane.b32.xlu0 %v5308_v38, %s3902_s16 }
 0x36c   :  { %v5550_v15 = vpop.permute.xlu2 %990  ;;  %v5552_v14 = vpop.permute.xlu1 %970 }
 0x36d   :  { %9548 = vst [vmem:[#allocation290_spill] sm:$0xff] %v5550_v15  ;;  %v5554_v5 = vpop.permute.xlu0 %968 }
 0x36e   :  { %9549 = vst [vmem:[#allocation291_spill] sm:$0xff] %v5552_v14 }
 0x36f   :  { %9550 = vst [vmem:[#allocation292_spill] sm:$0xff] %v5554_v5 }
 0x372   :  { %1102 = vrot.lane.b32.xlu2 %v5369_v24, %s3902_s16  ;;  %1100 = vrot.lane.b32.xlu1 %v5328_v43, %s3902_s16 }
 0x373   :  { %1098 = vrot.lane.b32.xlu0 %v5335_v34, %s3902_s16 }
 0x374   :  { %v5562_v45 = vpop.permute.xlu2 %996  ;;  %v5564_v61 = vpop.permute.xlu1 %976 }
 0x375   :  { %9551 = vst [vmem:[#allocation293_spill] sm:$0xff] %v5562_v45  ;;  %v5566_v39 = vpop.permute.xlu0 %974 }
 0x376   :  { %9552 = vst [vmem:[#allocation294_spill] sm:$0xff] %v5564_v61 }
 0x377   :  { %9553 = vst [vmem:[#allocation295_spill] sm:$0xff] %v5566_v39 }
 0x37a   :  { %1108 = vrot.lane.b32.xlu2 %v5396_v17, %s3902_s16  ;;  %1106 = vrot.lane.b32.xlu1 %v5355_v31, %s3902_s16 }
 0x37b   :  { %1104 = vrot.lane.b32.xlu0 %v5362_v35, %s3902_s16 }
 0x37c   :  { %v5574_v5 = vpop.permute.xlu2 %1002  ;;  %v5576_v14 = vpop.permute.xlu1 %982 }
 0x37d   :  { %9554 = vst [vmem:[#allocation296_spill] sm:$0xff] %v5574_v5  ;;  %v5578_v15 = vpop.permute.xlu0 %980 }
 0x37e   :  { %9555 = vst [vmem:[#allocation297_spill] sm:$0xff] %v5576_v14 }
 0x37f   :  { %9556 = vst [vmem:[#allocation298_spill] sm:$0xff] %v5578_v15 }
 0x382   :  { %1114 = vrot.lane.b32.xlu2 %v5423_v18, %s3902_s16  ;;  %1112 = vrot.lane.b32.xlu1 %v5382_v28, %s3902_s16 }
 0x383   :  { %1110 = vrot.lane.b32.xlu0 %v5389_v32, %s3902_s16 }
 0x384   :  { %v5586_v39 = vpop.permute.xlu2 %1008  ;;  %v5588_v45 = vpop.permute.xlu1 %988 }
 0x385   :  { %9557 = vst [vmem:[#allocation299_spill] sm:$0xff] %v5586_v39  ;;  %v5590_v61 = vpop.permute.xlu0 %986  ;;  %v5609_v39 = vld [vmem:[%s9235_s0 + $0x50] sm:$0x3] }
 0x386   :  { %9558 = vst [vmem:[#allocation300_spill] sm:$0xff] %v5588_v45 }
 0x387   :  { %9559 = vst [vmem:[#allocation301_spill] sm:$0xff] %v5590_v61 }
 0x38a   :  { %1120 = vrot.lane.b32.xlu2 %v5445_v53, %s3902_s16  ;;  %1118 = vrot.lane.b32.xlu1 %v5409_v25, %s3902_s16 }
 0x38b   :  { %1116 = vrot.lane.b32.xlu0 %v5416_v29, %s3902_s16 }
 0x38c   :  { %v5598_v5 = vpop.permute.xlu2 %1014  ;;  %v5600_v14 = vpop.permute.xlu1 %994 }
 0x38d   :  { %9560 = vst [vmem:[#allocation302_spill] sm:$0xff] %v5598_v5  ;;  %v5602_v15 = vpop.permute.xlu0 %992 }
 0x38e   :  { %9561 = vst [vmem:[#allocation303_spill] sm:$0xff] %v5600_v14 }
 0x38f   :  { %9562 = vst [vmem:[#allocation304_spill] sm:$0xff] %v5602_v15 }
 0x392   :  { %1126 = vrot.lane.b32.xlu2 %v4508_v49, %s3902_s16  ;;  %1124 = vrot.lane.b32.xlu1 %v5609_v39, %s3902_s16 }
 0x393   :  { %1122 = vrot.lane.b32.xlu0 %v5438_v47, %s3902_s16 }
 0x394   :  { %v5615_v45 = vpop.permute.xlu2 %1020  ;;  %v5617_v5 = vpop.permute.xlu1 %1000 }
 0x395   :  { %9563 = vst [vmem:[#allocation305_spill] sm:$0xff] %v5615_v45  ;;  %v5619_v14 = vpop.permute.xlu0 %998  ;;  %v5636_v45 = vld [vmem:[%s9235_s0 + $0x5e] sm:$0x3] }
 0x396   :  { %9564 = vst [vmem:[#allocation306_spill] sm:$0xff] %v5617_v5 }
 0x397   :  { %9565 = vst [vmem:[#allocation307_spill] sm:$0xff] %v5619_v14 }
 0x39a   :  { %1132 = vrot.lane.b32.xlu2 %v4991_v54, %s3902_s16  ;;  %1130 = vrot.lane.b32.xlu1 %v4830_v2, %s3902_s16 }
 0x39b   :  { %1128 = vrot.lane.b32.xlu0 %v4669_v56, %s3902_s16 }
 0x39c   :  { %v5627_v49 = vpop.permute.xlu2 %1066  ;;  %v5629_v15 = vpop.permute.xlu1 %1006 }
 0x39d   :  { %9566 = vst [vmem:[#allocation308_spill] sm:$0xff] %v5627_v49  ;;  %v5631_v61 = vpop.permute.xlu0 %1004 }
 0x39e   :  { %9567 = vst [vmem:[#allocation309_spill] sm:$0xff] %v5629_v15 }
 0x39f   :  { %9568 = vst [vmem:[#allocation310_spill] sm:$0xff] %v5631_v61 }
 0x3a2   :  { %1138 = vrot.lane.b32.xlu2 %v5636_v45, %s3902_s16  ;;  %1136 = vrot.lane.b32.xlu1 %v5470_v21, %s3902_s16 }
 0x3a3   :  { %1134 = vrot.lane.b32.xlu0 %v5152_v23, %s3902_s16 }
 0x3a4   :  { %v5644_v5 = vpop.permute.xlu2 %1072  ;;  %v5646_v49 = vpop.permute.xlu1 %1012 }
 0x3a5   :  { %9569 = vst [vmem:[#allocation311_spill] sm:$0xff] %v5644_v5  ;;  %v5648_v15 = vpop.permute.xlu0 %1010 }
 0x3a6   :  { %9570 = vst [vmem:[#allocation312_spill] sm:$0xff] %v5646_v49 }
 0x3a7   :  { %9571 = vst [vmem:[#allocation313_spill] sm:$0xff] %v5648_v15 }
 0x3aa   :  { %1184 = vrot.lane.b32.xlu2 %v5200_v50, %s3903_s24  ;;  %1182 = vrot.lane.b32.xlu1 %v5207_v13, %s3903_s24 }
 0x3ab   :  { %1180 = vrot.lane.b32.xlu0 %v5169_v16, %s3903_s24 }
 0x3ac   :  { %v5656_v61 = vpop.permute.xlu2 %1078  ;;  %v5658_v14 = vpop.permute.xlu1 %1018 }
 0x3ad   :  { %9572 = vst [vmem:[#allocation314_spill] sm:$0xff] %v5656_v61  ;;  %v5660_v8 = vpop.permute.xlu0 %1016 }
 0x3ae   :  { %9573 = vst [vmem:[#allocation315_spill] sm:$0xff] %v5658_v14 }
 0x3af   :  { %9574 = vst [vmem:[#allocation316_spill] sm:$0xff] %v5660_v8 }
 0x3b2   :  { %1190 = vrot.lane.b32.xlu2 %v5227_v63, %s3903_s24  ;;  %1188 = vrot.lane.b32.xlu1 %v5234_v9, %s3903_s24 }
 0x3b3   :  { %1186 = vrot.lane.b32.xlu0 %v5193_v10, %s3903_s24 }
 0x3b4   :  { %v5668_v5 = vpop.permute.xlu2 %1084  ;;  %v5670_v49 = vpop.permute.xlu1 %1064 }
 0x3b5   :  { %9575 = vst [vmem:[#allocation317_spill] sm:$0xff] %v5668_v5  ;;  %v5672_v16 = vpop.permute.xlu0 %1062 }
 0x3b6   :  { %9576 = vst [vmem:[#allocation318_spill] sm:$0xff] %v5670_v49 }
 0x3b7   :  { %9577 = vst [vmem:[#allocation319_spill] sm:$0xff] %v5672_v16 }
 0x3ba   :  { %1196 = vrot.lane.b32.xlu2 %v5254_v33, %s3903_s24  ;;  %1194 = vrot.lane.b32.xlu1 %v5261_v7, %s3903_s24 }
 0x3bb   :  { %1192 = vrot.lane.b32.xlu0 %v5220_v20, %s3903_s24 }
 0x3bc   :  { %v5680_v61 = vpop.permute.xlu2 %1090  ;;  %v5682_v14 = vpop.permute.xlu1 %1070 }
 0x3bd   :  { %9578 = vst [vmem:[#allocation320_spill] sm:$0xff] %v5680_v61  ;;  %v5684_v8 = vpop.permute.xlu0 %1068 }
 0x3be   :  { %9579 = vst [vmem:[#allocation321_spill] sm:$0xff] %v5682_v14 }
 0x3bf   :  { %9580 = vst [vmem:[#allocation322_spill] sm:$0xff] %v5684_v8 }
 0x3c2   :  { %1202 = vrot.lane.b32.xlu2 %v5281_v11, %s3903_s24  ;;  %1200 = vrot.lane.b32.xlu1 %v5288_v52, %s3903_s24 }
 0x3c3   :  { %1198 = vrot.lane.b32.xlu0 %v5247_v6, %s3903_s24 }
 0x3c4   :  { %v5692_v5 = vpop.permute.xlu2 %1096  ;;  %v5694_v16 = vpop.permute.xlu1 %1076 }
 0x3c5   :  { %9581 = vst [vmem:[#allocation323_spill] sm:$0xff] %v5692_v5  ;;  %v5696_v49 = vpop.permute.xlu0 %1074 }
 0x3c6   :  { %9582 = vst [vmem:[#allocation324_spill] sm:$0xff] %v5694_v16 }
 0x3c7   :  { %9583 = vst [vmem:[#allocation325_spill] sm:$0xff] %v5696_v49 }
 0x3ca   :  { %1208 = vrot.lane.b32.xlu2 %v5308_v38, %s3903_s24  ;;  %1206 = vrot.lane.b32.xlu1 %v5315_v40, %s3903_s24 }
 0x3cb   :  { %1204 = vrot.lane.b32.xlu0 %v5274_v19, %s3903_s24 }
 0x3cc   :  { %v5704_v61 = vpop.permute.xlu2 %1102  ;;  %v5706_v8 = vpop.permute.xlu1 %1082 }
 0x3cd   :  { %9584 = vst [vmem:[#allocation326_spill] sm:$0xff] %v5704_v61  ;;  %v5708_v14 = vpop.permute.xlu0 %1080 }
 0x3ce   :  { %9585 = vst [vmem:[#allocation327_spill] sm:$0xff] %v5706_v8 }
 0x3cf   :  { %9586 = vst [vmem:[#allocation328_spill] sm:$0xff] %v5708_v14 }
 0x3d2   :  { %1214 = vrot.lane.b32.xlu2 %v5335_v34, %s3903_s24  ;;  %1212 = vrot.lane.b32.xlu1 %v5342_v27, %s3903_s24 }
 0x3d3   :  { %1210 = vrot.lane.b32.xlu0 %v5301_v36, %s3903_s24 }
 0x3d4   :  { %v5716_v49 = vpop.permute.xlu2 %1108  ;;  %v5718_v16 = vpop.permute.xlu1 %1088 }
 0x3d5   :  { %9587 = vst [vmem:[#allocation329_spill] sm:$0xff] %v5716_v49  ;;  %v5720_v15 = vpop.permute.xlu0 %1086 }
 0x3d6   :  { %9588 = vst [vmem:[#allocation330_spill] sm:$0xff] %v5718_v16 }
 0x3d7   :  { %9589 = vst [vmem:[#allocation331_spill] sm:$0xff] %v5720_v15 }
 0x3da   :  { %1220 = vrot.lane.b32.xlu2 %v5362_v35, %s3903_s24  ;;  %1218 = vrot.lane.b32.xlu1 %v5369_v24, %s3903_s24 }
 0x3db   :  { %1216 = vrot.lane.b32.xlu0 %v5328_v43, %s3903_s24 }
 0x3dc   :  { %v5728_v14 = vpop.permute.xlu2 %1114  ;;  %v5730_v8 = vpop.permute.xlu1 %1094 }
 0x3dd   :  { %9590 = vst [vmem:[#allocation332_spill] sm:$0xff] %v5728_v14  ;;  %v5732_v61 = vpop.permute.xlu0 %1092 }
 0x3de   :  { %9591 = vst [vmem:[#allocation333_spill] sm:$0xff] %v5730_v8 }
 0x3df   :  { %9592 = vst [vmem:[#allocation334_spill] sm:$0xff] %v5732_v61 }
 0x3e2   :  { %1226 = vrot.lane.b32.xlu2 %v5389_v32, %s3903_s24  ;;  %1224 = vrot.lane.b32.xlu1 %v5396_v17, %s3903_s24 }
 0x3e3   :  { %1222 = vrot.lane.b32.xlu0 %v5355_v31, %s3903_s24 }
 0x3e4   :  { %v5740_v15 = vpop.permute.xlu2 %1120  ;;  %v5742_v16 = vpop.permute.xlu1 %1100 }
 0x3e5   :  { %9593 = vst [vmem:[#allocation335_spill] sm:$0xff] %v5740_v15  ;;  %v5744_v49 = vpop.permute.xlu0 %1098 }
 0x3e6   :  { %9594 = vst [vmem:[#allocation336_spill] sm:$0xff] %v5742_v16 }
 0x3e7   :  { %9595 = vst [vmem:[#allocation337_spill] sm:$0xff] %v5744_v49 }
 0x3ea   :  { %1232 = vrot.lane.b32.xlu2 %v5416_v29, %s3903_s24  ;;  %1230 = vrot.lane.b32.xlu1 %v5423_v18, %s3903_s24 }
 0x3eb   :  { %1228 = vrot.lane.b32.xlu0 %v5382_v28, %s3903_s24 }
 0x3ec   :  { %v5752_v61 = vpop.permute.xlu2 %1126  ;;  %v5754_v14 = vpop.permute.xlu1 %1106 }
 0x3ed   :  { %9596 = vst [vmem:[#allocation338_spill] sm:$0xff] %v5752_v61  ;;  %v5756_v8 = vpop.permute.xlu0 %1104  ;;  %v5775_v61 = vld [vmem:[%s9235_s0 + $0x52] sm:$0x3] }
 0x3ee   :  { %9597 = vst [vmem:[#allocation339_spill] sm:$0xff] %v5754_v14 }
 0x3ef   :  { %9598 = vst [vmem:[#allocation340_spill] sm:$0xff] %v5756_v8 }
 0x3f2   :  { %1238 = vrot.lane.b32.xlu2 %v5438_v47, %s3903_s24  ;;  %1236 = vrot.lane.b32.xlu1 %v5445_v53, %s3903_s24 }
 0x3f3   :  { %1234 = vrot.lane.b32.xlu0 %v5409_v25, %s3903_s24 }
 0x3f4   :  { %v5764_v15 = vpop.permute.xlu2 %1132  ;;  %v5766_v16 = vpop.permute.xlu1 %1112 }
 0x3f5   :  { %9599 = vst [vmem:[#allocation341_spill] sm:$0xff] %v5764_v15  ;;  %v5768_v49 = vpop.permute.xlu0 %1110 }
 0x3f6   :  { %9600 = vst [vmem:[#allocation342_spill] sm:$0xff] %v5766_v16 }
 0x3f7   :  { %9601 = vst [vmem:[#allocation343_spill] sm:$0xff] %v5768_v49 }
 0x3fa   :  { %1244 = vrot.lane.b32.xlu2 %v4669_v56, %s3903_s24  ;;  %1242 = vrot.lane.b32.xlu1 %v5775_v61, %s3903_s24 }
 0x3fb   :  { %1240 = vrot.lane.b32.xlu0 %v5609_v39, %s3903_s24 }
 0x3fc   :  { %v5781_v14 = vpop.permute.xlu2 %1138  ;;  %v5783_v15 = vpop.permute.xlu1 %1118 }
 0x3fd   :  { %9602 = vst [vmem:[#allocation344_spill] sm:$0xff] %v5781_v14  ;;  %v5785_v16 = vpop.permute.xlu0 %1116  ;;  %v5802_v14 = vld [vmem:[%s9235_s0 + $0x60] sm:$0x3] }
 0x3fe   :  { %9603 = vst [vmem:[#allocation345_spill] sm:$0xff] %v5783_v15 }
 0x3ff   :  { %9604 = vst [vmem:[#allocation346_spill] sm:$0xff] %v5785_v16 }
 0x402   :  { %1250 = vrot.lane.b32.xlu2 %v5152_v23, %s3903_s24  ;;  %1248 = vrot.lane.b32.xlu1 %v4991_v54, %s3903_s24 }
 0x403   :  { %1246 = vrot.lane.b32.xlu0 %v4830_v2, %s3903_s24 }
 0x404   :  { %v5793_v56 = vpop.permute.xlu2 %1184  ;;  %v5795_v49 = vpop.permute.xlu1 %1124 }
 0x405   :  { %9605 = vst [vmem:[#allocation347_spill] sm:$0xff] %v5793_v56  ;;  %v5797_v8 = vpop.permute.xlu0 %1122 }
 0x406   :  { %9606 = vst [vmem:[#allocation348_spill] sm:$0xff] %v5795_v49 }
 0x407   :  { %9607 = vst [vmem:[#allocation349_spill] sm:$0xff] %v5797_v8 }
 0x40a   :  { %1256 = vrot.lane.b32.xlu2 %v5802_v14, %s3903_s24  ;;  %1254 = vrot.lane.b32.xlu1 %v5636_v45, %s3903_s24 }
 0x40b   :  { %1252 = vrot.lane.b32.xlu0 %v5470_v21, %s3903_s24 }
 0x40c   :  { %v5810_v15 = vpop.permute.xlu2 %1190  ;;  %v5812_v56 = vpop.permute.xlu1 %1130 }
 0x40d   :  { %9608 = vst [vmem:[#allocation350_spill] sm:$0xff] %v5810_v15  ;;  %v5814_v49 = vpop.permute.xlu0 %1128 }
 0x40e   :  { %9609 = vst [vmem:[#allocation351_spill] sm:$0xff] %v5812_v56 }
 0x40f   :  { %9610 = vst [vmem:[#allocation352_spill] sm:$0xff] %v5814_v49 }
 0x412   :  { %1302 = vrot.lane.b32.xlu2 %v5193_v10, %s3904_s4  ;;  %1300 = vrot.lane.b32.xlu1 %v5200_v50, %s3904_s4 }
 0x413   :  { %1298 = vrot.lane.b32.xlu0 %v5207_v13, %s3904_s4 }
 0x414   :  { %v5822_v8 = vpop.permute.xlu2 %1196  ;;  %v5824_v16 = vpop.permute.xlu1 %1136 }
 0x415   :  { %9611 = vst [vmem:[#allocation353_spill] sm:$0xff] %v5822_v8  ;;  %v5826_v5 = vpop.permute.xlu0 %1134 }
 0x416   :  { %9612 = vst [vmem:[#allocation354_spill] sm:$0xff] %v5824_v16 }
 0x417   :  { %9613 = vst [vmem:[#allocation355_spill] sm:$0xff] %v5826_v5 }
 0x41a   :  { %1308 = vrot.lane.b32.xlu2 %v5220_v20, %s3904_s4  ;;  %1306 = vrot.lane.b32.xlu1 %v5227_v63, %s3904_s4 }
 0x41b   :  { %1304 = vrot.lane.b32.xlu0 %v5234_v9, %s3904_s4 }
 0x41c   :  { %v5834_v15 = vpop.permute.xlu2 %1202  ;;  %v5836_v56 = vpop.permute.xlu1 %1182 }
 0x41d   :  { %9614 = vst [vmem:[#allocation356_spill] sm:$0xff] %v5834_v15  ;;  %v5838_v13 = vpop.permute.xlu0 %1180 }
 0x41e   :  { %9615 = vst [vmem:[#allocation357_spill] sm:$0xff] %v5836_v56 }
 0x41f   :  { %9616 = vst [vmem:[#allocation358_spill] sm:$0xff] %v5838_v13 }
 0x422   :  { %1314 = vrot.lane.b32.xlu2 %v5247_v6, %s3904_s4  ;;  %1312 = vrot.lane.b32.xlu1 %v5254_v33, %s3904_s4 }
 0x423   :  { %1310 = vrot.lane.b32.xlu0 %v5261_v7, %s3904_s4 }
 0x424   :  { %v5846_v8 = vpop.permute.xlu2 %1208  ;;  %v5848_v16 = vpop.permute.xlu1 %1188 }
 0x425   :  { %9617 = vst [vmem:[#allocation359_spill] sm:$0xff] %v5846_v8  ;;  %v5850_v5 = vpop.permute.xlu0 %1186 }
 0x426   :  { %9618 = vst [vmem:[#allocation360_spill] sm:$0xff] %v5848_v16 }
 0x427   :  { %9619 = vst [vmem:[#allocation361_spill] sm:$0xff] %v5850_v5 }
 0x42a   :  { %1320 = vrot.lane.b32.xlu2 %v5274_v19, %s3904_s4  ;;  %1318 = vrot.lane.b32.xlu1 %v5281_v11, %s3904_s4 }
 0x42b   :  { %1316 = vrot.lane.b32.xlu0 %v5288_v52, %s3904_s4 }
 0x42c   :  { %v5858_v15 = vpop.permute.xlu2 %1214  ;;  %v5860_v13 = vpop.permute.xlu1 %1194 }
 0x42d   :  { %9620 = vst [vmem:[#allocation362_spill] sm:$0xff] %v5858_v15  ;;  %v5862_v56 = vpop.permute.xlu0 %1192 }
 0x42e   :  { %9621 = vst [vmem:[#allocation363_spill] sm:$0xff] %v5860_v13 }
 0x42f   :  { %9622 = vst [vmem:[#allocation364_spill] sm:$0xff] %v5862_v56 }
 0x432   :  { %1326 = vrot.lane.b32.xlu2 %v5301_v36, %s3904_s4  ;;  %1324 = vrot.lane.b32.xlu1 %v5308_v38, %s3904_s4 }
 0x433   :  { %1322 = vrot.lane.b32.xlu0 %v5315_v40, %s3904_s4 }
 0x434   :  { %v5870_v8 = vpop.permute.xlu2 %1220  ;;  %v5872_v5 = vpop.permute.xlu1 %1200 }
 0x435   :  { %9623 = vst [vmem:[#allocation365_spill] sm:$0xff] %v5870_v8  ;;  %v5874_v16 = vpop.permute.xlu0 %1198 }
 0x436   :  { %9624 = vst [vmem:[#allocation366_spill] sm:$0xff] %v5872_v5 }
 0x437   :  { %9625 = vst [vmem:[#allocation367_spill] sm:$0xff] %v5874_v16 }
 0x43a   :  { %1332 = vrot.lane.b32.xlu2 %v5328_v43, %s3904_s4  ;;  %1330 = vrot.lane.b32.xlu1 %v5335_v34, %s3904_s4 }
 0x43b   :  { %1328 = vrot.lane.b32.xlu0 %v5342_v27, %s3904_s4 }
 0x43c   :  { %v5882_v15 = vpop.permute.xlu2 %1226  ;;  %v5884_v56 = vpop.permute.xlu1 %1206 }
 0x43d   :  { %9626 = vst [vmem:[#allocation368_spill] sm:$0xff] %v5882_v15  ;;  %v5886_v13 = vpop.permute.xlu0 %1204 }
 0x43e   :  { %9627 = vst [vmem:[#allocation369_spill] sm:$0xff] %v5884_v56 }
 0x43f   :  { %9628 = vst [vmem:[#allocation370_spill] sm:$0xff] %v5886_v13 }
 0x442   :  { %1338 = vrot.lane.b32.xlu2 %v5355_v31, %s3904_s4  ;;  %1336 = vrot.lane.b32.xlu1 %v5362_v35, %s3904_s4 }
 0x443   :  { %1334 = vrot.lane.b32.xlu0 %v5369_v24, %s3904_s4 }
 0x444   :  { %v5894_v8 = vpop.permute.xlu2 %1232  ;;  %v5896_v16 = vpop.permute.xlu1 %1212 }
 0x445   :  { %9629 = vst [vmem:[#allocation371_spill] sm:$0xff] %v5894_v8  ;;  %v5898_v5 = vpop.permute.xlu0 %1210 }
 0x446   :  { %9630 = vst [vmem:[#allocation372_spill] sm:$0xff] %v5896_v16 }
 0x447   :  { %9631 = vst [vmem:[#allocation373_spill] sm:$0xff] %v5898_v5 }
 0x44a   :  { %1344 = vrot.lane.b32.xlu2 %v5382_v28, %s3904_s4  ;;  %1342 = vrot.lane.b32.xlu1 %v5389_v32, %s3904_s4 }
 0x44b   :  { %1340 = vrot.lane.b32.xlu0 %v5396_v17, %s3904_s4 }
 0x44c   :  { %v5906_v15 = vpop.permute.xlu2 %1238  ;;  %v5908_v13 = vpop.permute.xlu1 %1218 }
 0x44d   :  { %9632 = vst [vmem:[#allocation374_spill] sm:$0xff] %v5906_v15  ;;  %v5910_v56 = vpop.permute.xlu0 %1216 }
 0x44e   :  { %9633 = vst [vmem:[#allocation375_spill] sm:$0xff] %v5908_v13 }
 0x44f   :  { %9634 = vst [vmem:[#allocation376_spill] sm:$0xff] %v5910_v56 }
 0x452   :  { %1350 = vrot.lane.b32.xlu2 %v5409_v25, %s3904_s4  ;;  %1348 = vrot.lane.b32.xlu1 %v5416_v29, %s3904_s4 }
 0x453   :  { %1346 = vrot.lane.b32.xlu0 %v5423_v18, %s3904_s4 }
 0x454   :  { %v5918_v8 = vpop.permute.xlu2 %1244  ;;  %v5920_v5 = vpop.permute.xlu1 %1224 }
 0x455   :  { %9635 = vst [vmem:[#allocation377_spill] sm:$0xff] %v5918_v8  ;;  %v5922_v16 = vpop.permute.xlu0 %1222  ;;  %v5941_v8 = vld [vmem:[%s9235_s0 + $0x54] sm:$0x3] }
 0x456   :  { %9636 = vst [vmem:[#allocation378_spill] sm:$0xff] %v5920_v5 }
 0x457   :  { %9637 = vst [vmem:[#allocation379_spill] sm:$0xff] %v5922_v16 }
 0x45a   :  { %1356 = vrot.lane.b32.xlu2 %v5609_v39, %s3904_s4  ;;  %1354 = vrot.lane.b32.xlu1 %v5438_v47, %s3904_s4 }
 0x45b   :  { %1352 = vrot.lane.b32.xlu0 %v5445_v53, %s3904_s4 }
 0x45c   :  { %v5930_v15 = vpop.permute.xlu2 %1250  ;;  %v5932_v56 = vpop.permute.xlu1 %1230 }
 0x45d   :  { %9638 = vst [vmem:[#allocation380_spill] sm:$0xff] %v5930_v15  ;;  %v5934_v13 = vpop.permute.xlu0 %1228 }
 0x45e   :  { %9639 = vst [vmem:[#allocation381_spill] sm:$0xff] %v5932_v56 }
 0x45f   :  { %9640 = vst [vmem:[#allocation382_spill] sm:$0xff] %v5934_v13 }
 0x462   :  { %1362 = vrot.lane.b32.xlu2 %v4830_v2, %s3904_s4  ;;  %1360 = vrot.lane.b32.xlu1 %v5941_v8, %s3904_s4 }
 0x463   :  { %1358 = vrot.lane.b32.xlu0 %v5775_v61, %s3904_s4 }
 0x464   :  { %v5947_v16 = vpop.permute.xlu2 %1256  ;;  %v5949_v15 = vpop.permute.xlu1 %1236 }
 0x465   :  { %9641 = vst [vmem:[#allocation383_spill] sm:$0xff] %v5947_v16  ;;  %v5951_v56 = vpop.permute.xlu0 %1234  ;;  %v5968_v16 = vld [vmem:[%s9235_s0 + $0x62] sm:$0x3] }
 0x466   :  { %9642 = vst [vmem:[#allocation384_spill] sm:$0xff] %v5949_v15 }
 0x467   :  { %9643 = vst [vmem:[#allocation385_spill] sm:$0xff] %v5951_v56 }
 0x46a   :  { %1368 = vrot.lane.b32.xlu2 %v5470_v21, %s3904_s4  ;;  %1366 = vrot.lane.b32.xlu1 %v5152_v23, %s3904_s4 }
 0x46b   :  { %1364 = vrot.lane.b32.xlu0 %v4991_v54, %s3904_s4 }
 0x46c   :  { %v5959_v2 = vpop.permute.xlu2 %1302  ;;  %v5961_v13 = vpop.permute.xlu1 %1242 }
 0x46d   :  { %9644 = vst [vmem:[#allocation386_spill] sm:$0xff] %v5959_v2  ;;  %v5963_v5 = vpop.permute.xlu0 %1240 }
 0x46e   :  { %9645 = vst [vmem:[#allocation387_spill] sm:$0xff] %v5961_v13 }
 0x46f   :  { %9646 = vst [vmem:[#allocation388_spill] sm:$0xff] %v5963_v5 }
 0x472   :  { %1374 = vrot.lane.b32.xlu2 %v5968_v16, %s3904_s4  ;;  %1372 = vrot.lane.b32.xlu1 %v5802_v14, %s3904_s4 }
 0x473   :  { %1370 = vrot.lane.b32.xlu0 %v5636_v45, %s3904_s4 }
 0x474   :  { %v5976_v56 = vpop.permute.xlu2 %1308  ;;  %v5978_v15 = vpop.permute.xlu1 %1248 }
 0x475   :  { %9647 = vst [vmem:[#allocation389_spill] sm:$0xff] %v5976_v56  ;;  %v5980_v13 = vpop.permute.xlu0 %1246 }
 0x476   :  { %9648 = vst [vmem:[#allocation390_spill] sm:$0xff] %v5978_v15 }
 0x477   :  { %9649 = vst [vmem:[#allocation391_spill] sm:$0xff] %v5980_v13 }
 0x47a   :  { %1420 = vrot.lane.b32.xlu2 %v5234_v9, %s3905_s10  ;;  %1418 = vrot.lane.b32.xlu1 %v5193_v10, %s3905_s10 }
 0x47b   :  { %1416 = vrot.lane.b32.xlu0 %v5200_v50, %s3905_s10 }
 0x47c   :  { %v5988_v5 = vpop.permute.xlu2 %1314  ;;  %v5990_v2 = vpop.permute.xlu1 %1254 }
 0x47d   :  { %9650 = vst [vmem:[#allocation392_spill] sm:$0xff] %v5988_v5  ;;  %v5992_v49 = vpop.permute.xlu0 %1252 }
 0x47e   :  { %9651 = vst [vmem:[#allocation393_spill] sm:$0xff] %v5990_v2 }
 0x47f   :  { %9652 = vst [vmem:[#allocation394_spill] sm:$0xff] %v5992_v49 }
 0x482   :  { %1426 = vrot.lane.b32.xlu2 %v5261_v7, %s3905_s10  ;;  %1424 = vrot.lane.b32.xlu1 %v5220_v20, %s3905_s10 }
 0x483   :  { %1422 = vrot.lane.b32.xlu0 %v5227_v63, %s3905_s10 }
 0x484   :  { %v6000_v13 = vpop.permute.xlu2 %1320  ;;  %v6002_v15 = vpop.permute.xlu1 %1300 }
 0x485   :  { %9653 = vst [vmem:[#allocation395_spill] sm:$0xff] %v6000_v13  ;;  %v6004_v50 = vpop.permute.xlu0 %1298 }
 0x486   :  { %9654 = vst [vmem:[#allocation396_spill] sm:$0xff] %v6002_v15 }
 0x487   :  { %9655 = vst [vmem:[#allocation397_spill] sm:$0xff] %v6004_v50 }
 0x48a   :  { %1432 = vrot.lane.b32.xlu2 %v5288_v52, %s3905_s10  ;;  %1430 = vrot.lane.b32.xlu1 %v5247_v6, %s3905_s10 }
 0x48b   :  { %1428 = vrot.lane.b32.xlu0 %v5254_v33, %s3905_s10 }
 0x48c   :  { %v6012_v49 = vpop.permute.xlu2 %1326  ;;  %v6014_v2 = vpop.permute.xlu1 %1306 }
 0x48d   :  { %9656 = vst [vmem:[#allocation398_spill] sm:$0xff] %v6012_v49  ;;  %v6016_v5 = vpop.permute.xlu0 %1304 }
 0x48e   :  { %9657 = vst [vmem:[#allocation399_spill] sm:$0xff] %v6014_v2 }
 0x48f   :  { %9658 = vst [vmem:[#allocation400_spill] sm:$0xff] %v6016_v5 }
 0x492   :  { %1438 = vrot.lane.b32.xlu2 %v5315_v40, %s3905_s10  ;;  %1436 = vrot.lane.b32.xlu1 %v5274_v19, %s3905_s10 }
 0x493   :  { %1434 = vrot.lane.b32.xlu0 %v5281_v11, %s3905_s10 }
 0x494   :  { %v6024_v13 = vpop.permute.xlu2 %1332  ;;  %v6026_v50 = vpop.permute.xlu1 %1312 }
 0x495   :  { %9659 = vst [vmem:[#allocation401_spill] sm:$0xff] %v6024_v13  ;;  %v6028_v15 = vpop.permute.xlu0 %1310 }
 0x496   :  { %9660 = vst [vmem:[#allocation402_spill] sm:$0xff] %v6026_v50 }
 0x497   :  { %9661 = vst [vmem:[#allocation403_spill] sm:$0xff] %v6028_v15 }
 0x49a   :  { %1444 = vrot.lane.b32.xlu2 %v5342_v27, %s3905_s10  ;;  %1442 = vrot.lane.b32.xlu1 %v5301_v36, %s3905_s10 }
 0x49b   :  { %1440 = vrot.lane.b32.xlu0 %v5308_v38, %s3905_s10 }
 0x49c   :  { %v6036_v49 = vpop.permute.xlu2 %1338  ;;  %v6038_v5 = vpop.permute.xlu1 %1318 }
 0x49d   :  { %9662 = vst [vmem:[#allocation404_spill] sm:$0xff] %v6036_v49  ;;  %v6040_v2 = vpop.permute.xlu0 %1316 }
 0x49e   :  { %9663 = vst [vmem:[#allocation405_spill] sm:$0xff] %v6038_v5 }
 0x49f   :  { %9664 = vst [vmem:[#allocation406_spill] sm:$0xff] %v6040_v2 }
 0x4a2   :  { %1450 = vrot.lane.b32.xlu2 %v5369_v24, %s3905_s10  ;;  %1448 = vrot.lane.b32.xlu1 %v5328_v43, %s3905_s10 }
 0x4a3   :  { %1446 = vrot.lane.b32.xlu0 %v5335_v34, %s3905_s10 }
 0x4a4   :  { %v6048_v13 = vpop.permute.xlu2 %1344  ;;  %v6050_v15 = vpop.permute.xlu1 %1324 }
 0x4a5   :  { %9665 = vst [vmem:[#allocation407_spill] sm:$0xff] %v6048_v13  ;;  %v6052_v50 = vpop.permute.xlu0 %1322 }
 0x4a6   :  { %9666 = vst [vmem:[#allocation408_spill] sm:$0xff] %v6050_v15 }
 0x4a7   :  { %9667 = vst [vmem:[#allocation409_spill] sm:$0xff] %v6052_v50 }
 0x4aa   :  { %1456 = vrot.lane.b32.xlu2 %v5396_v17, %s3905_s10  ;;  %1454 = vrot.lane.b32.xlu1 %v5355_v31, %s3905_s10 }
 0x4ab   :  { %1452 = vrot.lane.b32.xlu0 %v5362_v35, %s3905_s10 }
 0x4ac   :  { %v6060_v49 = vpop.permute.xlu2 %1350  ;;  %v6062_v2 = vpop.permute.xlu1 %1330 }
 0x4ad   :  { %9668 = vst [vmem:[#allocation410_spill] sm:$0xff] %v6060_v49  ;;  %v6064_v5 = vpop.permute.xlu0 %1328 }
 0x4ae   :  { %9669 = vst [vmem:[#allocation411_spill] sm:$0xff] %v6062_v2 }
 0x4af   :  { %9670 = vst [vmem:[#allocation412_spill] sm:$0xff] %v6064_v5 }
 0x4b2   :  { %1462 = vrot.lane.b32.xlu2 %v5423_v18, %s3905_s10  ;;  %1460 = vrot.lane.b32.xlu1 %v5382_v28, %s3905_s10 }
 0x4b3   :  { %1458 = vrot.lane.b32.xlu0 %v5389_v32, %s3905_s10 }
 0x4b4   :  { %v6072_v13 = vpop.permute.xlu2 %1356  ;;  %v6074_v50 = vpop.permute.xlu1 %1336 }
 0x4b5   :  { %9671 = vst [vmem:[#allocation413_spill] sm:$0xff] %v6072_v13  ;;  %v6076_v15 = vpop.permute.xlu0 %1334 }
 0x4b6   :  { %9672 = vst [vmem:[#allocation414_spill] sm:$0xff] %v6074_v50 }
 0x4b7   :  { %9673 = vst [vmem:[#allocation415_spill] sm:$0xff] %v6076_v15 }
 0x4ba   :  { %1468 = vrot.lane.b32.xlu2 %v5445_v53, %s3905_s10  ;;  %1466 = vrot.lane.b32.xlu1 %v5409_v25, %s3905_s10 }
 0x4bb   :  { %1464 = vrot.lane.b32.xlu0 %v5416_v29, %s3905_s10 }
 0x4bc   :  { %v6084_v49 = vpop.permute.xlu2 %1362  ;;  %v6086_v5 = vpop.permute.xlu1 %1342 }
 0x4bd   :  { %9674 = vst [vmem:[#allocation416_spill] sm:$0xff] %v6084_v49  ;;  %v6088_v2 = vpop.permute.xlu0 %1340  ;;  %v6107_v49 = vld [vmem:[%s9235_s0 + $0x56] sm:$0x3] }
 0x4be   :  { %9675 = vst [vmem:[#allocation417_spill] sm:$0xff] %v6086_v5 }
 0x4bf   :  { %9676 = vst [vmem:[#allocation418_spill] sm:$0xff] %v6088_v2 }
 0x4c2   :  { %1474 = vrot.lane.b32.xlu2 %v5775_v61, %s3905_s10  ;;  %1472 = vrot.lane.b32.xlu1 %v5609_v39, %s3905_s10 }
 0x4c3   :  { %1470 = vrot.lane.b32.xlu0 %v5438_v47, %s3905_s10 }
 0x4c4   :  { %v6096_v13 = vpop.permute.xlu2 %1368  ;;  %v6098_v15 = vpop.permute.xlu1 %1348 }
 0x4c5   :  { %9677 = vst [vmem:[#allocation419_spill] sm:$0xff] %v6096_v13  ;;  %v6100_v50 = vpop.permute.xlu0 %1346 }
 0x4c6   :  { %9678 = vst [vmem:[#allocation420_spill] sm:$0xff] %v6098_v15 }
 0x4c7   :  { %9679 = vst [vmem:[#allocation421_spill] sm:$0xff] %v6100_v50 }
 0x4ca   :  { %1480 = vrot.lane.b32.xlu2 %v4991_v54, %s3905_s10  ;;  %1478 = vrot.lane.b32.xlu1 %v6107_v49, %s3905_s10 }
 0x4cb   :  { %1476 = vrot.lane.b32.xlu0 %v5941_v8, %s3905_s10 }
 0x4cc   :  { %v6113_v2 = vpop.permute.xlu2 %1374  ;;  %v6115_v13 = vpop.permute.xlu1 %1354 }
 0x4cd   :  { %9680 = vst [vmem:[#allocation422_spill] sm:$0xff] %v6113_v2  ;;  %v6117_v15 = vpop.permute.xlu0 %1352  ;;  %v6134_v2 = vld [vmem:[%s9235_s0 + $0x64] sm:$0x3] }
 0x4ce   :  { %9681 = vst [vmem:[#allocation423_spill] sm:$0xff] %v6115_v13 }
 0x4cf   :  { %9682 = vst [vmem:[#allocation424_spill] sm:$0xff] %v6117_v15 }
 0x4d2   :  { %1486 = vrot.lane.b32.xlu2 %v5636_v45, %s3905_s10  ;;  %1484 = vrot.lane.b32.xlu1 %v5470_v21, %s3905_s10 }
 0x4d3   :  { %1482 = vrot.lane.b32.xlu0 %v5152_v23, %s3905_s10 }
 0x4d4   :  { %v6125_v54 = vpop.permute.xlu2 %1420  ;;  %v6127_v50 = vpop.permute.xlu1 %1360 }
 0x4d5   :  { %9683 = vst [vmem:[#allocation425_spill] sm:$0xff] %v6125_v54  ;;  %v6129_v5 = vpop.permute.xlu0 %1358 }
 0x4d6   :  { %9684 = vst [vmem:[#allocation426_spill] sm:$0xff] %v6127_v50 }
 0x4d7   :  { %9685 = vst [vmem:[#allocation427_spill] sm:$0xff] %v6129_v5 }
 0x4da   :  { %1492 = vrot.lane.b32.xlu2 %v6134_v2, %s3905_s10  ;;  %1490 = vrot.lane.b32.xlu1 %v5968_v16, %s3905_s10 }
 0x4db   :  { %1488 = vrot.lane.b32.xlu0 %v5802_v14, %s3905_s10 }
 0x4dc   :  { %v6142_v15 = vpop.permute.xlu2 %1426  ;;  %v6144_v13 = vpop.permute.xlu1 %1366 }
 0x4dd   :  { %9686 = vst [vmem:[#allocation428_spill] sm:$0xff] %v6142_v15  ;;  %v6146_v50 = vpop.permute.xlu0 %1364 }
 0x4de   :  { %9687 = vst [vmem:[#allocation429_spill] sm:$0xff] %v6144_v13 }
 0x4df   :  { %9688 = vst [vmem:[#allocation430_spill] sm:$0xff] %v6146_v50 }
 0x4e2   :  { %1538 = vrot.lane.b32.xlu2 %v5227_v63, %s3906_s20  ;;  %1536 = vrot.lane.b32.xlu1 %v5234_v9, %s3906_s20 }
 0x4e3   :  { %1534 = vrot.lane.b32.xlu0 %v5193_v10, %s3906_s20 }
 0x4e4   :  { %v6154_v5 = vpop.permute.xlu2 %1432  ;;  %v6156_v56 = vpop.permute.xlu1 %1372 }
 0x4e5   :  { %9689 = vst [vmem:[#allocation431_spill] sm:$0xff] %v6154_v5  ;;  %v6158_v54 = vpop.permute.xlu0 %1370 }
 0x4e6   :  { %9690 = vst [vmem:[#allocation432_spill] sm:$0xff] %v6156_v56 }
 0x4e7   :  { %9691 = vst [vmem:[#allocation433_spill] sm:$0xff] %v6158_v54 }
 0x4ea   :  { %1544 = vrot.lane.b32.xlu2 %v5254_v33, %s3906_s20  ;;  %1542 = vrot.lane.b32.xlu1 %v5261_v7, %s3906_s20 }
 0x4eb   :  { %1540 = vrot.lane.b32.xlu0 %v5220_v20, %s3906_s20 }
 0x4ec   :  { %v6166_v50 = vpop.permute.xlu2 %1438  ;;  %v6168_v13 = vpop.permute.xlu1 %1418 }
 0x4ed   :  { %9692 = vst [vmem:[#allocation434_spill] sm:$0xff] %v6166_v50  ;;  %v6170_v10 = vpop.permute.xlu0 %1416 }
 0x4ee   :  { %9693 = vst [vmem:[#allocation435_spill] sm:$0xff] %v6168_v13 }
 0x4ef   :  { %9694 = vst [vmem:[#allocation436_spill] sm:$0xff] %v6170_v10 }
 0x4f2   :  { %1550 = vrot.lane.b32.xlu2 %v5281_v11, %s3906_s20  ;;  %1548 = vrot.lane.b32.xlu1 %v5288_v52, %s3906_s20 }
 0x4f3   :  { %1546 = vrot.lane.b32.xlu0 %v5247_v6, %s3906_s20 }
 0x4f4   :  { %v6178_v54 = vpop.permute.xlu2 %1444  ;;  %v6180_v56 = vpop.permute.xlu1 %1424 }
 0x4f5   :  { %9695 = vst [vmem:[#allocation437_spill] sm:$0xff] %v6178_v54  ;;  %v6182_v5 = vpop.permute.xlu0 %1422 }
 0x4f6   :  { %9696 = vst [vmem:[#allocation438_spill] sm:$0xff] %v6180_v56 }
 0x4f7   :  { %9697 = vst [vmem:[#allocation439_spill] sm:$0xff] %v6182_v5 }
 0x4fa   :  { %1556 = vrot.lane.b32.xlu2 %v5308_v38, %s3906_s20  ;;  %1554 = vrot.lane.b32.xlu1 %v5315_v40, %s3906_s20 }
 0x4fb   :  { %1552 = vrot.lane.b32.xlu0 %v5274_v19, %s3906_s20 }
 0x4fc   :  { %v6190_v50 = vpop.permute.xlu2 %1450  ;;  %v6192_v10 = vpop.permute.xlu1 %1430 }
 0x4fd   :  { %9698 = vst [vmem:[#allocation440_spill] sm:$0xff] %v6190_v50  ;;  %v6194_v13 = vpop.permute.xlu0 %1428 }
 0x4fe   :  { %9699 = vst [vmem:[#allocation441_spill] sm:$0xff] %v6192_v10 }
 0x4ff   :  { %9700 = vst [vmem:[#allocation442_spill] sm:$0xff] %v6194_v13 }
 0x502   :  { %1562 = vrot.lane.b32.xlu2 %v5335_v34, %s3906_s20  ;;  %1560 = vrot.lane.b32.xlu1 %v5342_v27, %s3906_s20 }
 0x503   :  { %1558 = vrot.lane.b32.xlu0 %v5301_v36, %s3906_s20 }
 0x504   :  { %v6202_v54 = vpop.permute.xlu2 %1456  ;;  %v6204_v5 = vpop.permute.xlu1 %1436 }
 0x505   :  { %9701 = vst [vmem:[#allocation443_spill] sm:$0xff] %v6202_v54  ;;  %v6206_v56 = vpop.permute.xlu0 %1434 }
 0x506   :  { %9702 = vst [vmem:[#allocation444_spill] sm:$0xff] %v6204_v5 }
 0x507   :  { %9703 = vst [vmem:[#allocation445_spill] sm:$0xff] %v6206_v56 }
 0x50a   :  { %1568 = vrot.lane.b32.xlu2 %v5362_v35, %s3906_s20  ;;  %1566 = vrot.lane.b32.xlu1 %v5369_v24, %s3906_s20 }
 0x50b   :  { %1564 = vrot.lane.b32.xlu0 %v5328_v43, %s3906_s20 }
 0x50c   :  { %v6214_v50 = vpop.permute.xlu2 %1462  ;;  %v6216_v13 = vpop.permute.xlu1 %1442 }
 0x50d   :  { %9704 = vst [vmem:[#allocation446_spill] sm:$0xff] %v6214_v50  ;;  %v6218_v10 = vpop.permute.xlu0 %1440 }
 0x50e   :  { %9705 = vst [vmem:[#allocation447_spill] sm:$0xff] %v6216_v13 }
 0x50f   :  { %9706 = vst [vmem:[#allocation448_spill] sm:$0xff] %v6218_v10 }
 0x512   :  { %1574 = vrot.lane.b32.xlu2 %v5389_v32, %s3906_s20  ;;  %1572 = vrot.lane.b32.xlu1 %v5396_v17, %s3906_s20 }
 0x513   :  { %1570 = vrot.lane.b32.xlu0 %v5355_v31, %s3906_s20 }
 0x514   :  { %v6226_v54 = vpop.permute.xlu2 %1468  ;;  %v6228_v56 = vpop.permute.xlu1 %1448 }
 0x515   :  { %9707 = vst [vmem:[#allocation449_spill] sm:$0xff] %v6226_v54  ;;  %v6230_v5 = vpop.permute.xlu0 %1446 }
 0x516   :  { %9708 = vst [vmem:[#allocation450_spill] sm:$0xff] %v6228_v56 }
 0x517   :  { %9709 = vst [vmem:[#allocation451_spill] sm:$0xff] %v6230_v5 }
 0x51a   :  { %1580 = vrot.lane.b32.xlu2 %v5416_v29, %s3906_s20  ;;  %1578 = vrot.lane.b32.xlu1 %v5423_v18, %s3906_s20 }
 0x51b   :  { %1576 = vrot.lane.b32.xlu0 %v5382_v28, %s3906_s20 }
 0x51c   :  { %v6238_v50 = vpop.permute.xlu2 %1474  ;;  %v6240_v10 = vpop.permute.xlu1 %1454 }
 0x51d   :  { %9710 = vst [vmem:[#allocation452_spill] sm:$0xff] %v6238_v50  ;;  %v6242_v13 = vpop.permute.xlu0 %1452 }
 0x51e   :  { %9711 = vst [vmem:[#allocation453_spill] sm:$0xff] %v6240_v10 }
 0x51f   :  { %9712 = vst [vmem:[#allocation454_spill] sm:$0xff] %v6242_v13 }
 0x522   :  { %1586 = vrot.lane.b32.xlu2 %v5438_v47, %s3906_s20  ;;  %1584 = vrot.lane.b32.xlu1 %v5445_v53, %s3906_s20 }
 0x523   :  { %1582 = vrot.lane.b32.xlu0 %v5409_v25, %s3906_s20 }
 0x524   :  { %v6250_v54 = vpop.permute.xlu2 %1480  ;;  %v6252_v5 = vpop.permute.xlu1 %1460 }
 0x525   :  { %9713 = vst [vmem:[#allocation455_spill] sm:$0xff] %v6250_v54  ;;  %v6254_v56 = vpop.permute.xlu0 %1458  ;;  %v6273_v54 = vld [vmem:[%s9235_s0 + $0x58] sm:$0x3] }
 0x526   :  { %9714 = vst [vmem:[#allocation456_spill] sm:$0xff] %v6252_v5 }
 0x527   :  { %9715 = vst [vmem:[#allocation457_spill] sm:$0xff] %v6254_v56 }
 0x52a   :  { %1592 = vrot.lane.b32.xlu2 %v5941_v8, %s3906_s20  ;;  %1590 = vrot.lane.b32.xlu1 %v5775_v61, %s3906_s20 }
 0x52b   :  { %1588 = vrot.lane.b32.xlu0 %v5609_v39, %s3906_s20 }
 0x52c   :  { %v6262_v50 = vpop.permute.xlu2 %1486  ;;  %v6264_v13 = vpop.permute.xlu1 %1466 }
 0x52d   :  { %9716 = vst [vmem:[#allocation458_spill] sm:$0xff] %v6262_v50  ;;  %v6266_v10 = vpop.permute.xlu0 %1464 }
 0x52e   :  { %9717 = vst [vmem:[#allocation459_spill] sm:$0xff] %v6264_v13 }
 0x52f   :  { %9718 = vst [vmem:[#allocation460_spill] sm:$0xff] %v6266_v10 }
 0x532   :  { %1598 = vrot.lane.b32.xlu2 %v5152_v23, %s3906_s20  ;;  %1596 = vrot.lane.b32.xlu1 %v6273_v54, %s3906_s20 }
 0x533   :  { %1594 = vrot.lane.b32.xlu0 %v6107_v49, %s3906_s20 }
 0x534   :  { %v6279_v56 = vpop.permute.xlu2 %1492  ;;  %v6281_v50 = vpop.permute.xlu1 %1472 }
 0x535   :  { %9719 = vst [vmem:[#allocation461_spill] sm:$0xff] %v6279_v56  ;;  %v6283_v13 = vpop.permute.xlu0 %1470  ;;  %v6300_v56 = vld [vmem:[%s9235_s0 + $0x66] sm:$0x3] }
 0x536   :  { %9720 = vst [vmem:[#allocation462_spill] sm:$0xff] %v6281_v50 }
 0x537   :  { %9721 = vst [vmem:[#allocation463_spill] sm:$0xff] %v6283_v13 }
 0x53a   :  { %1604 = vrot.lane.b32.xlu2 %v5802_v14, %s3906_s20  ;;  %1602 = vrot.lane.b32.xlu1 %v5636_v45, %s3906_s20 }
 0x53b   :  { %1600 = vrot.lane.b32.xlu0 %v5470_v21, %s3906_s20 }
 0x53c   :  { %v6291_v23 = vpop.permute.xlu2 %1538  ;;  %v6293_v10 = vpop.permute.xlu1 %1478 }
 0x53d   :  { %9722 = vst [vmem:[#allocation464_spill] sm:$0xff] %v6291_v23  ;;  %v6295_v5 = vpop.permute.xlu0 %1476 }
 0x53e   :  { %9723 = vst [vmem:[#allocation465_spill] sm:$0xff] %v6293_v10 }
 0x53f   :  { %9724 = vst [vmem:[#allocation466_spill] sm:$0xff] %v6295_v5 }
 0x542   :  { %1610 = vrot.lane.b32.xlu2 %v6300_v56, %s3906_s20  ;;  %1608 = vrot.lane.b32.xlu1 %v6134_v2, %s3906_s20 }
 0x543   :  { %1606 = vrot.lane.b32.xlu0 %v5968_v16, %s3906_s20 }
 0x544   :  { %v6308_v13 = vpop.permute.xlu2 %1544  ;;  %v6310_v50 = vpop.permute.xlu1 %1484 }
 0x545   :  { %9725 = vst [vmem:[#allocation467_spill] sm:$0xff] %v6308_v13  ;;  %v6312_v10 = vpop.permute.xlu0 %1482 }
 0x546   :  { %9726 = vst [vmem:[#allocation468_spill] sm:$0xff] %v6310_v50 }
 0x547   :  { %9727 = vst [vmem:[#allocation469_spill] sm:$0xff] %v6312_v10 }
 0x54a   :  { %1656 = vrot.lane.b32.xlu2 %v5220_v20, %s3907_s27  ;;  %1654 = vrot.lane.b32.xlu1 %v5227_v63, %s3907_s27 }
 0x54b   :  { %1652 = vrot.lane.b32.xlu0 %v5234_v9, %s3907_s27 }
 0x54c   :  { %v6320_v5 = vpop.permute.xlu2 %1550  ;;  %v6322_v15 = vpop.permute.xlu1 %1490 }
 0x54d   :  { %9728 = vst [vmem:[#allocation470_spill] sm:$0xff] %v6320_v5  ;;  %v6324_v23 = vpop.permute.xlu0 %1488 }
 0x54e   :  { %9729 = vst [vmem:[#allocation471_spill] sm:$0xff] %v6322_v15  ;;  %v6439_v15 = vld [vmem:[%s9235_s0 + $0x5a] sm:$0x3] }
 0x54f   :  { %9730 = vst [vmem:[#allocation472_spill] sm:$0xff] %v6324_v23 }
 0x552   :  { %1662 = vrot.lane.b32.xlu2 %v5247_v6, %s3907_s27  ;;  %1660 = vrot.lane.b32.xlu1 %v5254_v33, %s3907_s27 }
 0x553   :  { %1658 = vrot.lane.b32.xlu0 %v5261_v7, %s3907_s27 }
 0x554   :  { %v6332_v20 = vpop.permute.xlu2 %1556  ;;  %v6334_v63 = vpop.permute.xlu1 %1536 }
 0x555   :  { %9731 = vst [vmem:[#allocation473_spill] sm:$0xff] %v6332_v20  ;;  %v6336_v9 = vpop.permute.xlu0 %1534 }
 0x556   :  { %9732 = vst [vmem:[#allocation474_spill] sm:$0xff] %v6334_v63 }
 0x557   :  { %9733 = vst [vmem:[#allocation475_spill] sm:$0xff] %v6336_v9 }
 0x55a   :  { %1668 = vrot.lane.b32.xlu2 %v5274_v19, %s3907_s27  ;;  %1666 = vrot.lane.b32.xlu1 %v5281_v11, %s3907_s27 }
 0x55b   :  { %1664 = vrot.lane.b32.xlu0 %v5288_v52, %s3907_s27 }
 0x55c   :  { %v6344_v6 = vpop.permute.xlu2 %1562  ;;  %v6346_v33 = vpop.permute.xlu1 %1542 }
 0x55d   :  { %9734 = vst [vmem:[#allocation476_spill] sm:$0xff] %v6344_v6  ;;  %v6348_v7 = vpop.permute.xlu0 %1540 }
 0x55e   :  { %9735 = vst [vmem:[#allocation477_spill] sm:$0xff] %v6346_v33 }
 0x55f   :  { %9736 = vst [vmem:[#allocation478_spill] sm:$0xff] %v6348_v7 }
 0x562   :  { %1674 = vrot.lane.b32.xlu2 %v5301_v36, %s3907_s27  ;;  %1672 = vrot.lane.b32.xlu1 %v5308_v38, %s3907_s27 }
 0x563   :  { %1670 = vrot.lane.b32.xlu0 %v5315_v40, %s3907_s27 }
 0x564   :  { %v6356_v19 = vpop.permute.xlu2 %1568  ;;  %v6358_v11 = vpop.permute.xlu1 %1548 }
 0x565   :  { %9737 = vst [vmem:[#allocation479_spill] sm:$0xff] %v6356_v19  ;;  %v6360_v52 = vpop.permute.xlu0 %1546  ;;  %v3840_v19 = vld [vmem:[%s9235_s0 + $0x30] sm:$0x3] }
 0x566   :  { %9738 = vst [vmem:[#allocation480_spill] sm:$0xff] %v6358_v11 }
 0x567   :  { %9739 = vst [vmem:[#allocation481_spill] sm:$0xff] %v6360_v52 }
 0x56a   :  { %1680 = vrot.lane.b32.xlu2 %v5328_v43, %s3907_s27  ;;  %1678 = vrot.lane.b32.xlu1 %v5335_v34, %s3907_s27 }
 0x56b   :  { %1676 = vrot.lane.b32.xlu0 %v5342_v27, %s3907_s27 }
 0x56c   :  { %v6368_v36 = vpop.permute.xlu2 %1574  ;;  %v6370_v38 = vpop.permute.xlu1 %1554 }
 0x56d   :  { %9740 = vst [vmem:[#allocation482_spill] sm:$0xff] %v6368_v36  ;;  %v6372_v40 = vpop.permute.xlu0 %1552 }
 0x56e   :  { %9741 = vst [vmem:[#allocation483_spill] sm:$0xff] %v6370_v38 }
 0x56f   :  { %9742 = vst [vmem:[#allocation484_spill] sm:$0xff] %v6372_v40 }
 0x572   :  { %1686 = vrot.lane.b32.xlu2 %v5355_v31, %s3907_s27  ;;  %1684 = vrot.lane.b32.xlu1 %v5362_v35, %s3907_s27 }
 0x573   :  { %1682 = vrot.lane.b32.xlu0 %v5369_v24, %s3907_s27 }
 0x574   :  { %v6380_v43 = vpop.permute.xlu2 %1580  ;;  %v6382_v34 = vpop.permute.xlu1 %1560 }
 0x575   :  { %9743 = vst [vmem:[#allocation485_spill] sm:$0xff] %v6380_v43  ;;  %v6384_v27 = vpop.permute.xlu0 %1558  ;;  %v3836_v43 = vld [vmem:[%s9235_s0 + $0x2c] sm:$0x3] }
 0x576   :  { %9744 = vst [vmem:[#allocation486_spill] sm:$0xff] %v6382_v34 }
 0x577   :  { %9745 = vst [vmem:[#allocation487_spill] sm:$0xff] %v6384_v27 }
 0x57a   :  { %1692 = vrot.lane.b32.xlu2 %v5382_v28, %s3907_s27  ;;  %1690 = vrot.lane.b32.xlu1 %v5389_v32, %s3907_s27 }
 0x57b   :  { %1688 = vrot.lane.b32.xlu0 %v5396_v17, %s3907_s27 }
 0x57c   :  { %v6392_v31 = vpop.permute.xlu2 %1586  ;;  %v6394_v35 = vpop.permute.xlu1 %1566 }
 0x57d   :  { %9746 = vst [vmem:[#allocation488_spill] sm:$0xff] %v6392_v31  ;;  %v6396_v24 = vpop.permute.xlu0 %1564 }
 0x57e   :  { %9747 = vst [vmem:[#allocation489_spill] sm:$0xff] %v6394_v35 }
 0x57f   :  { %9748 = vst [vmem:[#allocation490_spill] sm:$0xff] %v6396_v24 }
 0x582   :  { %1698 = vrot.lane.b32.xlu2 %v5409_v25, %s3907_s27  ;;  %1696 = vrot.lane.b32.xlu1 %v5416_v29, %s3907_s27 }
 0x583   :  { %1694 = vrot.lane.b32.xlu0 %v5423_v18, %s3907_s27 }
 0x584   :  { %v6404_v28 = vpop.permute.xlu2 %1592  ;;  %v6406_v32 = vpop.permute.xlu1 %1572 }
 0x585   :  { %9749 = vst [vmem:[#allocation491_spill] sm:$0xff] %v6404_v28  ;;  %v6408_v17 = vpop.permute.xlu0 %1570  ;;  %v6490_v28 = vld [vmem:[%s9235_s0 + $0x20] sm:$0x3] }
 0x586   :  { %9750 = vst [vmem:[#allocation492_spill] sm:$0xff] %v6406_v32  ;;  %v6542_v32 = vld [vmem:[%s9235_s0 + $0x2a] sm:$0x3] }
 0x587   :  { %9751 = vst [vmem:[#allocation493_spill] sm:$0xff] %v6408_v17  ;;  %v3835_v17 = vld [vmem:[%s9235_s0 + $0x2e] sm:$0x3] }
 0x588   :  { %9768 = vst [vmem:[#allocation510_spill] sm:$0xff] %v6490_v28 }
 0x589   :  { %9778 = vst [vmem:[#allocation520_spill] sm:$0xff] %v6542_v32 }
 0x58a   :  { %1704 = vrot.lane.b32.xlu2 %v5609_v39, %s3907_s27  ;;  %1702 = vrot.lane.b32.xlu1 %v5438_v47, %s3907_s27 }
 0x58b   :  { %1700 = vrot.lane.b32.xlu0 %v5445_v53, %s3907_s27 }
 0x58c   :  { %v6416_v25 = vpop.permute.xlu2 %1598  ;;  %v6418_v29 = vpop.permute.xlu1 %1578 }
 0x58d   :  { %9752 = vst [vmem:[#allocation494_spill] sm:$0xff] %v6416_v25  ;;  %v6420_v18 = vpop.permute.xlu0 %1576 }
 0x58e   :  { %9753 = vst [vmem:[#allocation495_spill] sm:$0xff] %v6418_v29  ;;  %v6514_v29 = vld [vmem:[%s9235_s0 + $0x26] sm:$0x3] }
 0x58f   :  { %9754 = vst [vmem:[#allocation496_spill] sm:$0xff] %v6420_v18  ;;  %v6507_v18 = vld [vmem:[%s9235_s0 + $0x28] sm:$0x3] }
 0x590   :  { %9772 = vst [vmem:[#allocation514_spill] sm:$0xff] %v6507_v18 }
 0x591   :  { %9773 = vst [vmem:[#allocation515_spill] sm:$0xff] %v6514_v29 }
 0x592   :  { %1710 = vrot.lane.b32.xlu2 %v6107_v49, %s3907_s27  ;;  %1708 = vrot.lane.b32.xlu1 %v5941_v8, %s3907_s27 }
 0x593   :  { %1706 = vrot.lane.b32.xlu0 %v5775_v61, %s3907_s27 }
 0x594   :  { %v6428_v23 = vpop.permute.xlu2 %1604  ;;  %v6430_v47 = vpop.permute.xlu1 %1584 }
 0x595   :  { %9755 = vst [vmem:[#allocation497_spill] sm:$0xff] %v6428_v23  ;;  %v6432_v53 = vpop.permute.xlu0 %1582 }
 0x596   :  { %9756 = vst [vmem:[#allocation498_spill] sm:$0xff] %v6430_v47 }
 0x597   :  { %9757 = vst [vmem:[#allocation499_spill] sm:$0xff] %v6432_v53 }
 0x59a   :  { %1716 = vrot.lane.b32.xlu2 %v5470_v21, %s3907_s27  ;;  %1714 = vrot.lane.b32.xlu1 %v6439_v15, %s3907_s27 }
 0x59b   :  { %1712 = vrot.lane.b32.xlu0 %v6273_v54, %s3907_s27 }
 0x59c   :  { %v6445_v10 = vpop.permute.xlu2 %1610  ;;  %v6447_v50 = vpop.permute.xlu1 %1590 }
 0x59d   :  { %9758 = vst [vmem:[#allocation500_spill] sm:$0xff] %v6445_v10  ;;  %v6449_v23 = vpop.permute.xlu0 %1588  ;;  %v6466_v10 = vld [vmem:[%s9235_s0 + $0x68] sm:$0x3] }
 0x59e   :  { %9759 = vst [vmem:[#allocation501_spill] sm:$0xff] %v6447_v50 }
 0x59f   :  { %9760 = vst [vmem:[#allocation502_spill] sm:$0xff] %v6449_v23 }
 0x5a2   :  { %1722 = vrot.lane.b32.xlu2 %v5968_v16, %s3907_s27  ;;  %1720 = vrot.lane.b32.xlu1 %v5802_v14, %s3907_s27 }
 0x5a3   :  { %1718 = vrot.lane.b32.xlu0 %v5636_v45, %s3907_s27 }
 0x5a4   :  { %v6457_v21 = vpop.permute.xlu2 %1656  ;;  %v6459_v25 = vpop.permute.xlu1 %1596 }
 0x5a5   :  { %9761 = vst [vmem:[#allocation503_spill] sm:$0xff] %v6457_v21  ;;  %v6461_v53 = vpop.permute.xlu0 %1594 }
 0x5a6   :  { %9762 = vst [vmem:[#allocation504_spill] sm:$0xff] %v6459_v25 }
 0x5a7   :  { %9763 = vst [vmem:[#allocation505_spill] sm:$0xff] %v6461_v53  ;;  %v6483_v53 = vld [vmem:[%s9235_s0 + $0x22] sm:$0x3] }
 0x5a8   :  { %9767 = vst [vmem:[#allocation509_spill] sm:$0xff] %v6483_v53 }
 0x5aa   :  { %1728 = vrot.lane.b32.xlu2 %v6466_v10, %s3907_s27  ;;  %1726 = vrot.lane.b32.xlu1 %v6300_v56, %s3907_s27 }
 0x5ab   :  { %1724 = vrot.lane.b32.xlu0 %v6134_v2, %s3907_s27 }
 0x5ac   :  { %v6474_v23 = vpop.permute.xlu2 %1662  ;;  %v6476_v50 = vpop.permute.xlu1 %1602 }
 0x5ad   :  { %9764 = vst [vmem:[#allocation506_spill] sm:$0xff] %v6474_v23  ;;  %v6478_v25 = vpop.permute.xlu0 %1600 }
 0x5ae   :  { %9765 = vst [vmem:[#allocation507_spill] sm:$0xff] %v6476_v50 }
 0x5af   :  { %9766 = vst [vmem:[#allocation508_spill] sm:$0xff] %v6478_v25  ;;  %v3831_v25 = vld [vmem:[%s9235_s0 + $0x1e] sm:$0x3] }
 0x5b2   :  { %1774 = vrot.lane.b32.xlu2 %v6483_v53, %s3908_s9  ;;  %1772 = vrot.lane.b32.xlu1 %v6490_v28, %s3908_s9 }
 0x5b3   :  { %1770 = vrot.lane.b32.xlu0 %v3831_v25, %s3908_s9  ;;  %v6521_v25 = vld [vmem:[%s9235_s0 + $0x24] sm:$0x3] }
 0x5b4   :  { %v6498_v50 = vpop.permute.xlu2 %1668  ;;  %v6500_v47 = vpop.permute.xlu1 %1608  ;;  %9774 = vst [vmem:[#allocation516_spill] sm:$0xff] %v6521_v25 }
 0x5b5   :  { %9769 = vst [vmem:[#allocation511_spill] sm:$0xff] %v6498_v50  ;;  %v6502_v31 = vpop.permute.xlu0 %1606 }
 0x5b6   :  { %9770 = vst [vmem:[#allocation512_spill] sm:$0xff] %v6500_v47 }
 0x5b7   :  { %9771 = vst [vmem:[#allocation513_spill] sm:$0xff] %v6502_v31 }
 0x5ba   :  { %1780 = vrot.lane.b32.xlu2 %v6507_v18, %s3908_s9  ;;  %1778 = vrot.lane.b32.xlu1 %v6514_v29, %s3908_s9 }
 0x5bb   :  { %1776 = vrot.lane.b32.xlu0 %v6521_v25, %s3908_s9 }
 0x5bc   :  { %v6525_v31 = vpop.permute.xlu2 %1674  ;;  %v6527_v47 = vpop.permute.xlu1 %1654 }
 0x5bd   :  { %9775 = vst [vmem:[#allocation517_spill] sm:$0xff] %v6525_v31  ;;  %v6529_v36 = vpop.permute.xlu0 %1652 }
 0x5be   :  { %9776 = vst [vmem:[#allocation518_spill] sm:$0xff] %v6527_v47 }
 0x5bf   :  { %9777 = vst [vmem:[#allocation519_spill] sm:$0xff] %v6529_v36 }
 0x5c2   :  { %1786 = vrot.lane.b32.xlu2 %v3835_v17, %s3908_s9  ;;  %1784 = vrot.lane.b32.xlu1 %v3836_v43, %s3908_s9  ;;  %v3838_v17 = vld [vmem:[%s9235_s0 + $0x34] sm:$0x3]  ;;  %v3839_v43 = vld [vmem:[%s9235_s0 + $0x32] sm:$0x3] }
 0x5c3   :  { %1782 = vrot.lane.b32.xlu0 %v6542_v32, %s3908_s9 }
 0x5c4   :  { %v6546_v24 = vpop.permute.xlu2 %1680  ;;  %v6548_v35 = vpop.permute.xlu1 %1660 }
 0x5c5   :  { %9779 = vst [vmem:[#allocation521_spill] sm:$0xff] %v6546_v24  ;;  %v6550_v27 = vpop.permute.xlu0 %1658 }
 0x5c6   :  { %9780 = vst [vmem:[#allocation522_spill] sm:$0xff] %v6548_v35 }
 0x5c7   :  { %9781 = vst [vmem:[#allocation523_spill] sm:$0xff] %v6550_v27 }
 0x5ca   :  { %1792 = vrot.lane.b32.xlu2 %v3838_v17, %s3908_s9  ;;  %1790 = vrot.lane.b32.xlu1 %v3839_v43, %s3908_s9  ;;  %v3841_v17 = vld [vmem:[%s9235_s0 + $0x3a] sm:$0x3]  ;;  %v3842_v43 = vld [vmem:[%s9235_s0 + $0x38] sm:$0x3] }
 0x5cb   :  { %1788 = vrot.lane.b32.xlu0 %v3840_v19, %s3908_s9  ;;  %v3843_v19 = vld [vmem:[%s9235_s0 + $0x36] sm:$0x3] }
 0x5cc   :  { %v6564_v34 = vpop.permute.xlu2 %1686  ;;  %v6566_v24 = vpop.permute.xlu1 %1666 }
 0x5cd   :  { %9782 = vst [vmem:[#allocation524_spill] sm:$0xff] %v6564_v34  ;;  %v6568_v6 = vpop.permute.xlu0 %1664 }
 0x5ce   :  { %9783 = vst [vmem:[#allocation525_spill] sm:$0xff] %v6566_v24 }
 0x5cf   :  { %9784 = vst [vmem:[#allocation526_spill] sm:$0xff] %v6568_v6 }
 0x5d2   :  { %1798 = vrot.lane.b32.xlu2 %v3841_v17, %s3908_s9  ;;  %1796 = vrot.lane.b32.xlu1 %v3842_v43, %s3908_s9  ;;  %v3844_v17 = vld [vmem:[%s9235_s0 + $0x40] sm:$0x3]  ;;  %v3845_v43 = vld [vmem:[%s9235_s0 + $0x3e] sm:$0x3] }
 0x5d3   :  { %1794 = vrot.lane.b32.xlu0 %v3843_v19, %s3908_s9  ;;  %v3846_v19 = vld [vmem:[%s9235_s0 + $0x3c] sm:$0x3] }
 0x5d4   :  { %v6582_v34 = vpop.permute.xlu2 %1692  ;;  %v6584_v40 = vpop.permute.xlu1 %1672 }
 0x5d5   :  { %9785 = vst [vmem:[#allocation527_spill] sm:$0xff] %v6582_v34  ;;  %v6586_v38 = vpop.permute.xlu0 %1670 }
 0x5d6   :  { %9786 = vst [vmem:[#allocation528_spill] sm:$0xff] %v6584_v40 }
 0x5d7   :  { %9787 = vst [vmem:[#allocation529_spill] sm:$0xff] %v6586_v38 }
 0x5da   :  { %1804 = vrot.lane.b32.xlu2 %v3844_v17, %s3908_s9  ;;  %1802 = vrot.lane.b32.xlu1 %v3845_v43, %s3908_s9  ;;  %v3847_v17 = vld [vmem:[%s9235_s0 + $0x46] sm:$0x3]  ;;  %v3848_v43 = vld [vmem:[%s9235_s0 + $0x44] sm:$0x3] }
 0x5db   :  { %1800 = vrot.lane.b32.xlu0 %v3846_v19, %s3908_s9  ;;  %v3849_v19 = vld [vmem:[%s9235_s0 + $0x42] sm:$0x3] }
 0x5dc   :  { %v6600_v34 = vpop.permute.xlu2 %1698  ;;  %v6602_v38 = vpop.permute.xlu1 %1678 }
 0x5dd   :  { %9788 = vst [vmem:[#allocation530_spill] sm:$0xff] %v6600_v34  ;;  %v6604_v40 = vpop.permute.xlu0 %1676 }
 0x5de   :  { %9789 = vst [vmem:[#allocation531_spill] sm:$0xff] %v6602_v38 }
 0x5df   :  { %9790 = vst [vmem:[#allocation532_spill] sm:$0xff] %v6604_v40 }
 0x5e2   :  { %1810 = vrot.lane.b32.xlu2 %v3847_v17, %s3908_s9  ;;  %1808 = vrot.lane.b32.xlu1 %v3848_v43, %s3908_s9  ;;  %v3850_v17 = vld [vmem:[%s9235_s0 + $0x4c] sm:$0x3]  ;;  %v3851_v43 = vld [vmem:[%s9235_s0 + $0x4a] sm:$0x3] }
 0x5e3   :  { %1806 = vrot.lane.b32.xlu0 %v3849_v19, %s3908_s9  ;;  %v3852_v19 = vld [vmem:[%s9235_s0 + $0x48] sm:$0x3] }
 0x5e4   :  { %v6618_v34 = vpop.permute.xlu2 %1704  ;;  %v6620_v40 = vpop.permute.xlu1 %1684 }
 0x5e5   :  { %9791 = vst [vmem:[#allocation533_spill] sm:$0xff] %v6618_v34  ;;  %v6622_v38 = vpop.permute.xlu0 %1682 }
 0x5e6   :  { %9792 = vst [vmem:[#allocation534_spill] sm:$0xff] %v6620_v40 }
 0x5e7   :  { %9793 = vst [vmem:[#allocation535_spill] sm:$0xff] %v6622_v38 }
 0x5ea   :  { %1816 = vrot.lane.b32.xlu2 %v3850_v17, %s3908_s9  ;;  %1814 = vrot.lane.b32.xlu1 %v3851_v43, %s3908_s9  ;;  %v6649_v17 = vld [vmem:[%s9235_s0 + $0x4e] sm:$0x3] }
 0x5eb   :  { %1812 = vrot.lane.b32.xlu0 %v3852_v19, %s3908_s9 }
 0x5ec   :  { %v6636_v34 = vpop.permute.xlu2 %1710  ;;  %v6638_v38 = vpop.permute.xlu1 %1690 }
 0x5ed   :  { %9794 = vst [vmem:[#allocation536_spill] sm:$0xff] %v6636_v34  ;;  %v6640_v40 = vpop.permute.xlu0 %1688 }
 0x5ee   :  { %9795 = vst [vmem:[#allocation537_spill] sm:$0xff] %v6638_v38 }
 0x5ef   :  { %9796 = vst [vmem:[#allocation538_spill] sm:$0xff] %v6640_v40 }
 0x5f2   :  { %1822 = vrot.lane.b32.xlu2 %v5775_v61, %s3908_s9  ;;  %1820 = vrot.lane.b32.xlu1 %v5609_v39, %s3908_s9 }
 0x5f3   :  { %1818 = vrot.lane.b32.xlu0 %v6649_v17, %s3908_s9 }
 0x5f4   :  { %v6653_v43 = vpop.permute.xlu2 %1716  ;;  %v6655_v19 = vpop.permute.xlu1 %1696 }
 0x5f5   :  { %9797 = vst [vmem:[#allocation539_spill] sm:$0xff] %v6653_v43  ;;  %v6657_v34 = vpop.permute.xlu0 %1694  ;;  %v6676_v43 = vld [vmem:[%s9235_s0 + $0x5c] sm:$0x3] }
 0x5f6   :  { %9798 = vst [vmem:[#allocation540_spill] sm:$0xff] %v6655_v19 }
 0x5f7   :  { %9799 = vst [vmem:[#allocation541_spill] sm:$0xff] %v6657_v34 }
 0x5fa   :  { %1828 = vrot.lane.b32.xlu2 %v6273_v54, %s3908_s9  ;;  %1826 = vrot.lane.b32.xlu1 %v6107_v49, %s3908_s9 }
 0x5fb   :  { %1824 = vrot.lane.b32.xlu0 %v5941_v8, %s3908_s9 }
 0x5fc   :  { %v6665_v40 = vpop.permute.xlu2 %1722  ;;  %v6667_v38 = vpop.permute.xlu1 %1702 }
 0x5fd   :  { %9800 = vst [vmem:[#allocation542_spill] sm:$0xff] %v6665_v40  ;;  %v6669_v50 = vpop.permute.xlu0 %1700 }
 0x5fe   :  { %9801 = vst [vmem:[#allocation543_spill] sm:$0xff] %v6667_v38 }
 0x5ff   :  { %9802 = vst [vmem:[#allocation544_spill] sm:$0xff] %v6669_v50 }
 0x602   :  { %1834 = vrot.lane.b32.xlu2 %v5636_v45, %s3908_s9  ;;  %1832 = vrot.lane.b32.xlu1 %v6676_v43, %s3908_s9 }
 0x603   :  { %1830 = vrot.lane.b32.xlu0 %v6439_v15, %s3908_s9 }
 0x604   :  { %v6682_v34 = vpop.permute.xlu2 %1728  ;;  %v6684_v40 = vpop.permute.xlu1 %1708 }
 0x605   :  { %9803 = vst [vmem:[#allocation545_spill] sm:$0xff] %v6682_v34  ;;  %v6686_v38 = vpop.permute.xlu0 %1706  ;;  %v6703_v34 = vld [vmem:[%s9235_s0 + $0x6a] sm:$0x3] }
 0x606   :  { %9804 = vst [vmem:[#allocation546_spill] sm:$0xff] %v6684_v40 }
 0x607   :  { %9805 = vst [vmem:[#allocation547_spill] sm:$0xff] %v6686_v38 }
 0x60a   :  { %1840 = vrot.lane.b32.xlu2 %v6134_v2, %s3908_s9  ;;  %1838 = vrot.lane.b32.xlu1 %v5968_v16, %s3908_s9 }
 0x60b   :  { %1836 = vrot.lane.b32.xlu0 %v5802_v14, %s3908_s9 }
 0x60c   :  { %v6694_v50 = vpop.permute.xlu2 %1774  ;;  %v6696_v19 = vpop.permute.xlu1 %1714 }
 0x60d   :  { %9806 = vst [vmem:[#allocation548_spill] sm:$0xff] %v6694_v50  ;;  %v6698_v6 = vpop.permute.xlu0 %1712 }
 0x60e   :  { %9807 = vst [vmem:[#allocation549_spill] sm:$0xff] %v6696_v19 }
 0x60f   :  { %9808 = vst [vmem:[#allocation550_spill] sm:$0xff] %v6698_v6 }
 0x612   :  { %1846 = vrot.lane.b32.xlu2 %v6703_v34, %s3908_s9  ;;  %1844 = vrot.lane.b32.xlu1 %v6466_v10, %s3908_s9 }
 0x613   :  { %1842 = vrot.lane.b32.xlu0 %v6300_v56, %s3908_s9 }
 0x614   :  { %v6711_v38 = vpop.permute.xlu2 %1780  ;;  %v6713_v40 = vpop.permute.xlu1 %1720 }
 0x615   :  { %9809 = vst [vmem:[#allocation551_spill] sm:$0xff] %v6711_v38  ;;  %v6715_v19 = vpop.permute.xlu0 %1718 }
 0x616   :  { %9810 = vst [vmem:[#allocation552_spill] sm:$0xff] %v6713_v40 }
 0x617   :  { %9811 = vst [vmem:[#allocation553_spill] sm:$0xff] %v6715_v19 }
 0x61a   :  { %2493 = vrot.lane.b32.xlu2 %v5941_v8, %s3894_s18  ;;  %2491 = vrot.lane.b32.xlu1 %v5775_v61, %s3894_s18 }
 0x61b   :  { %2489 = vrot.lane.b32.xlu0 %v5609_v39, %s3894_s18 }
 0x61c   :  { %v6723_v6 = vpop.permute.xlu2 %1786  ;;  %v6725_v31 = vpop.permute.xlu1 %1726 }
 0x61d   :  { %9812 = vst [vmem:[#allocation554_spill] sm:$0xff] %v6723_v6  ;;  %v6727_v5 = vpop.permute.xlu0 %1724 }
 0x61e   :  { %9813 = vst [vmem:[#allocation555_spill] sm:$0xff] %v6725_v31 }
 0x61f   :  { %9814 = vst [vmem:[#allocation556_spill] sm:$0xff] %v6727_v5 }
 0x622   :  { %2499 = vrot.lane.b32.xlu2 %v6439_v15, %s3894_s18  ;;  %2497 = vrot.lane.b32.xlu1 %v6273_v54, %s3894_s18 }
 0x623   :  { %2495 = vrot.lane.b32.xlu0 %v6107_v49, %s3894_s18 }
 0x624   :  { %v6735_v19 = vpop.permute.xlu2 %1792  ;;  %v6737_v40 = vpop.permute.xlu1 %1772 }
 0x625   :  { %9815 = vst [vmem:[#allocation557_spill] sm:$0xff] %v6735_v19  ;;  %v6739_v39 = vpop.permute.xlu0 %1770 }
 0x626   :  { %9816 = vst [vmem:[#allocation558_spill] sm:$0xff] %v6737_v40  ;;  %v6949_v40 = vld [vmem:[%s9235_s0 + $0x60] sm:$0x3] }
 0x627   :  { %9817 = vst [vmem:[#allocation559_spill] sm:$0xff] %v6739_v39 }
 0x62a   :  { %2505 = vrot.lane.b32.xlu2 %v5802_v14, %s3894_s18  ;;  %2503 = vrot.lane.b32.xlu1 %v5636_v45, %s3894_s18 }
 0x62b   :  { %2501 = vrot.lane.b32.xlu0 %v6676_v43, %s3894_s18 }
 0x62c   :  { %v6747_v5 = vpop.permute.xlu2 %1798  ;;  %v6749_v31 = vpop.permute.xlu1 %1778 }
 0x62d   :  { %9818 = vst [vmem:[#allocation560_spill] sm:$0xff] %v6747_v5  ;;  %v6751_v6 = vpop.permute.xlu0 %1776  ;;  %v6768_v5 = vld [vmem:[%s9235_s0 + $0x6c] sm:$0x3] }
 0x62e   :  { %9819 = vst [vmem:[#allocation561_spill] sm:$0xff] %v6749_v31 }
 0x62f   :  { %9820 = vst [vmem:[#allocation562_spill] sm:$0xff] %v6751_v6 }
 0x632   :  { %2511 = vrot.lane.b32.xlu2 %v6300_v56, %s3894_s18  ;;  %2509 = vrot.lane.b32.xlu1 %v6134_v2, %s3894_s18 }
 0x633   :  { %2507 = vrot.lane.b32.xlu0 %v5968_v16, %s3894_s18 }
 0x634   :  { %v6759_v19 = vpop.permute.xlu2 %1804  ;;  %v6761_v45 = vpop.permute.xlu1 %1784 }
 0x635   :  { %9821 = vst [vmem:[#allocation563_spill] sm:$0xff] %v6759_v19  ;;  %v6763_v24 = vpop.permute.xlu0 %1782 }
 0x636   :  { %9822 = vst [vmem:[#allocation564_spill] sm:$0xff] %v6761_v45 }
 0x637   :  { %9823 = vst [vmem:[#allocation565_spill] sm:$0xff] %v6763_v24  ;;  %v6785_v24 = vld [vmem:[%s9235_s0 + $0x6e] sm:$0x3] }
 0x63a   :  { %2517 = vrot.lane.b32.xlu2 %v6768_v5, %s3894_s18  ;;  %2515 = vrot.lane.b32.xlu1 %v6703_v34, %s3894_s18 }
 0x63b   :  { %2513 = vrot.lane.b32.xlu0 %v6466_v10, %s3894_s18 }
 0x63c   :  { %v6776_v52 = vpop.permute.xlu2 %1810  ;;  %v6778_v19 = vpop.permute.xlu1 %1790 }
 0x63d   :  { %9824 = vst [vmem:[#allocation566_spill] sm:$0xff] %v6776_v52  ;;  %v6780_v45 = vpop.permute.xlu0 %1788 }
 0x63e   :  { %9825 = vst [vmem:[#allocation567_spill] sm:$0xff] %v6778_v19 }
 0x63f   :  { %9826 = vst [vmem:[#allocation568_spill] sm:$0xff] %v6780_v45 }
 0x642   :  { %2540 = vrot.lane.b32.xlu2 %v5941_v8, %s3895_s12  ;;  %2538 = vrot.lane.b32.xlu1 %v5775_v61, %s3895_s12 }
 0x643   :  { %2519 = vrot.lane.b32.xlu0 %v6785_v24, %s3894_s18 }
 0x644   :  { %v6793_v20 = vpop.permute.xlu2 %1816  ;;  %v6795_v52 = vpop.permute.xlu1 %1796 }
 0x645   :  { %9827 = vst [vmem:[#allocation569_spill] sm:$0xff] %v6793_v20  ;;  %v6797_v19 = vpop.permute.xlu0 %1794  ;;  %v6816_v20 = vld [vmem:[%s9235_s0 + $0x5e] sm:$0x3] }
 0x646   :  { %9828 = vst [vmem:[#allocation570_spill] sm:$0xff] %v6795_v52 }
 0x647   :  { %9829 = vst [vmem:[#allocation571_spill] sm:$0xff] %v6797_v19 }
 0x64a   :  { %2546 = vrot.lane.b32.xlu2 %v6439_v15, %s3895_s12  ;;  %2544 = vrot.lane.b32.xlu1 %v6273_v54, %s3895_s12 }
 0x64b   :  { %2542 = vrot.lane.b32.xlu0 %v6107_v49, %s3895_s12 }
 0x64c   :  { %v6805_v45 = vpop.permute.xlu2 %1822  ;;  %v6807_v61 = vpop.permute.xlu1 %1802 }
 0x64d   :  { %9830 = vst [vmem:[#allocation572_spill] sm:$0xff] %v6805_v45  ;;  %v6809_v11 = vpop.permute.xlu0 %1800 }
 0x64e   :  { %9831 = vst [vmem:[#allocation573_spill] sm:$0xff] %v6807_v61 }
 0x64f   :  { %9832 = vst [vmem:[#allocation574_spill] sm:$0xff] %v6809_v11 }
 0x652   :  { %2552 = vrot.lane.b32.xlu2 %v5802_v14, %s3895_s12  ;;  %2550 = vrot.lane.b32.xlu1 %v6816_v20, %s3895_s12 }
 0x653   :  { %2548 = vrot.lane.b32.xlu0 %v6676_v43, %s3895_s12 }
 0x654   :  { %v6822_v19 = vpop.permute.xlu2 %1828  ;;  %v6824_v45 = vpop.permute.xlu1 %1808 }
 0x655   :  { %9833 = vst [vmem:[#allocation575_spill] sm:$0xff] %v6822_v19  ;;  %v6826_v61 = vpop.permute.xlu0 %1806 }
 0x656   :  { %9834 = vst [vmem:[#allocation576_spill] sm:$0xff] %v6824_v45 }
 0x657   :  { %9835 = vst [vmem:[#allocation577_spill] sm:$0xff] %v6826_v61 }
 0x65a   :  { %2558 = vrot.lane.b32.xlu2 %v6300_v56, %s3895_s12  ;;  %2556 = vrot.lane.b32.xlu1 %v6134_v2, %s3895_s12 }
 0x65b   :  { %2554 = vrot.lane.b32.xlu0 %v5968_v16, %s3895_s12 }
 0x65c   :  { %v6834_v11 = vpop.permute.xlu2 %1834  ;;  %v6836_v52 = vpop.permute.xlu1 %1814 }
 0x65d   :  { %9836 = vst [vmem:[#allocation578_spill] sm:$0xff] %v6834_v11  ;;  %v6838_v6 = vpop.permute.xlu0 %1812  ;;  %v6855_v11 = vld [vmem:[%s9235_s0 + $0x70] sm:$0x3] }
 0x65e   :  { %9837 = vst [vmem:[#allocation579_spill] sm:$0xff] %v6836_v52 }
 0x65f   :  { %9838 = vst [vmem:[#allocation580_spill] sm:$0xff] %v6838_v6 }
 0x662   :  { %2564 = vrot.lane.b32.xlu2 %v6768_v5, %s3895_s12  ;;  %2562 = vrot.lane.b32.xlu1 %v6703_v34, %s3895_s12 }
 0x663   :  { %2560 = vrot.lane.b32.xlu0 %v6466_v10, %s3895_s12 }
 0x664   :  { %v6846_v19 = vpop.permute.xlu2 %1840  ;;  %v6848_v61 = vpop.permute.xlu1 %1820 }
 0x665   :  { %9839 = vst [vmem:[#allocation581_spill] sm:$0xff] %v6846_v19  ;;  %v6850_v45 = vpop.permute.xlu0 %1818 }
 0x666   :  { %9840 = vst [vmem:[#allocation582_spill] sm:$0xff] %v6848_v61 }
 0x667   :  { %9841 = vst [vmem:[#allocation583_spill] sm:$0xff] %v6850_v45 }
 0x66a   :  { %2587 = vrot.lane.b32.xlu2 %v5941_v8, %s3896_s15  ;;  %2568 = vrot.lane.b32.xlu1 %v6855_v11, %s3895_s12 }
 0x66b   :  { %2566 = vrot.lane.b32.xlu0 %v6785_v24, %s3895_s12 }
 0x66c   :  { %v6863_v6 = vpop.permute.xlu2 %1846  ;;  %v6865_v19 = vpop.permute.xlu1 %1826 }
 0x66d   :  { %9842 = vst [vmem:[#allocation584_spill] sm:$0xff] %v6863_v6  ;;  %v6867_v61 = vpop.permute.xlu0 %1824 }
 0x66e   :  { %9843 = vst [vmem:[#allocation585_spill] sm:$0xff] %v6865_v19 }
 0x66f   :  { %9844 = vst [vmem:[#allocation586_spill] sm:$0xff] %v6867_v61 }
 0x672   :  { %2593 = vrot.lane.b32.xlu2 %v6439_v15, %s3896_s15  ;;  %2591 = vrot.lane.b32.xlu1 %v6273_v54, %s3896_s15 }
 0x673   :  { %2589 = vrot.lane.b32.xlu0 %v6107_v49, %s3896_s15 }
 0x674   :  { %v6875_v8 = vpop.permute.xlu2 %2493  ;;  %v6877_v45 = vpop.permute.xlu1 %1832 }
 0x675   :  { %9845 = vst [vmem:[#allocation587_spill] sm:$0xff] %v6877_v45  ;;  %v6879_v52 = vpop.permute.xlu0 %1830 }
 0x676   :  { %9846 = vst [vmem:[#allocation588_spill] sm:$0xff] %v6879_v52 }
 0x67a   :  { %2599 = vrot.lane.b32.xlu2 %v5802_v14, %s3896_s15  ;;  %2597 = vrot.lane.b32.xlu1 %v6816_v20, %s3896_s15 }
 0x67b   :  { %2595 = vrot.lane.b32.xlu0 %v6676_v43, %s3896_s15 }
 0x67c   :  { %v6887_v6 = vpop.permute.xlu2 %2499  ;;  %v6889_v61 = vpop.permute.xlu1 %1838 }
 0x67d   :  { %9847 = vst [vmem:[#allocation589_spill] sm:$0xff] %v6889_v61  ;;  %v6891_v19 = vpop.permute.xlu0 %1836  ;;  %v2934_v48 = vsel %vm1887_vm0, %v6273_v54, %v6887_v6 }
 0x67e   :  { %9848 = vst [vmem:[#allocation590_spill] sm:$0xff] %v6891_v19 }
 0x682   :  { %2605 = vrot.lane.b32.xlu2 %v6300_v56, %s3896_s15  ;;  %2603 = vrot.lane.b32.xlu1 %v6134_v2, %s3896_s15 }
 0x683   :  { %2601 = vrot.lane.b32.xlu0 %v5968_v16, %s3896_s15 }
 0x684   :  { %v6899_v14 = vpop.permute.xlu2 %2505  ;;  %v6901_v52 = vpop.permute.xlu1 %1844 }
 0x685   :  { %9849 = vst [vmem:[#allocation591_spill] sm:$0xff] %v6901_v52  ;;  %v6903_v45 = vpop.permute.xlu0 %1842  ;;  %v6920_v52 = vld [vmem:[%s9235_s0 + $0x72] sm:$0x3]  ;;  %v2937_v6 = vsel %vm1887_vm0, %v6816_v20, %v6899_v14 }
 0x686   :  { %9850 = vst [vmem:[#allocation592_spill] sm:$0xff] %v6903_v45 }
 0x68a   :  { %2611 = vrot.lane.b32.xlu2 %v6768_v5, %s3896_s15  ;;  %2609 = vrot.lane.b32.xlu1 %v6703_v34, %s3896_s15 }
 0x68b   :  { %2607 = vrot.lane.b32.xlu0 %v6466_v10, %s3896_s15 }
 0x68c   :  { %v6911_v19 = vpop.permute.xlu2 %2511  ;;  %v6913_v61 = vpop.permute.xlu1 %2491 }
 0x68d   :  { %v6915_v31 = vpop.permute.xlu0 %2489 }
 0x692   :  { %2617 = vrot.lane.b32.xlu2 %v6920_v52, %s3896_s15  ;;  %2615 = vrot.lane.b32.xlu1 %v6855_v11, %s3896_s15 }
 0x693   :  { %2613 = vrot.lane.b32.xlu0 %v6785_v24, %s3896_s15 }
 0x694   :  { %v6928_v45 = vpop.permute.xlu2 %2517  ;;  %v6930_v27 = vpop.permute.xlu1 %2497 }
 0x695   :  { %v6932_v35 = vpop.permute.xlu0 %2495 }
 0x69a   :  { %2640 = vrot.lane.b32.xlu2 %v6439_v15, %s3897_s19  ;;  %2638 = vrot.lane.b32.xlu1 %v6273_v54, %s3897_s19 }
 0x69b   :  { %2636 = vrot.lane.b32.xlu0 %v6107_v49, %s3897_s19 }
 0x69c   :  { %v6940_v7 = vpop.permute.xlu2 %2540  ;;  %v6942_v33 = vpop.permute.xlu1 %2503 }
 0x69d   :  { %v6944_v39 = vpop.permute.xlu0 %2501 }
 0x6a2   :  { %2646 = vrot.lane.b32.xlu2 %v6949_v40, %s3897_s19  ;;  %2644 = vrot.lane.b32.xlu1 %v6816_v20, %s3897_s19 }
 0x6a3   :  { %2642 = vrot.lane.b32.xlu0 %v6676_v43, %s3897_s19 }
 0x6a4   :  { %v6957_v36 = vpop.permute.xlu2 %2546  ;;  %v6959_v47 = vpop.permute.xlu1 %2509 }
 0x6a5   :  { %v6961_v9 = vpop.permute.xlu0 %2507 }
 0x6aa   :  { %2652 = vrot.lane.b32.xlu2 %v6300_v56, %s3897_s19  ;;  %2650 = vrot.lane.b32.xlu1 %v6134_v2, %s3897_s19 }
 0x6ab   :  { %2648 = vrot.lane.b32.xlu0 %v5968_v16, %s3897_s19 }
 0x6ac   :  { %v6969_v63 = vpop.permute.xlu2 %2552  ;;  %v6971_v38 = vpop.permute.xlu1 %2515 }
 0x6ad   :  { %v6973_v23 = vpop.permute.xlu0 %2513 }
 0x6b2   :  { %2658 = vrot.lane.b32.xlu2 %v6768_v5, %s3897_s19  ;;  %2656 = vrot.lane.b32.xlu1 %v6703_v34, %s3897_s19 }
 0x6b3   :  { %2654 = vrot.lane.b32.xlu0 %v6466_v10, %s3897_s19 }
 0x6b4   :  { %v6981_v13 = vpop.permute.xlu2 %2558  ;;  %v6983_v50 = vpop.permute.xlu1 %2538 }
 0x6b5   :  { %v6985_v21 = vpop.permute.xlu0 %2519 }
 0x6ba   :  { %2664 = vrot.lane.b32.xlu2 %v6920_v52, %s3897_s19  ;;  %2662 = vrot.lane.b32.xlu1 %v6855_v11, %s3897_s19 }
 0x6bb   :  { %2660 = vrot.lane.b32.xlu0 %v6785_v24, %s3897_s19 }
 0x6bc   :  { %v6993_v32 = vpop.permute.xlu2 %2564  ;;  %v6995_v29 = vpop.permute.xlu1 %2544 }
 0x6bd   :  { %v6997_v30 = vpop.permute.xlu0 %2542 }
 0x6be   :  { %9851 = vst [vmem:[#allocation593_spill] sm:$0xff] %v6997_v30 }
 0x6c2   :  { %2687 = vrot.lane.b32.xlu2 %v6439_v15, %s3898_s22  ;;  %2685 = vrot.lane.b32.xlu1 %v6273_v54, %s3898_s22 }
 0x6c3   :  { %2666 = vrot.lane.b32.xlu0 %v7002_v37, %s3897_s19 }
 0x6c4   :  { %v7010_v22 = vpop.permute.xlu2 %2587  ;;  %v7012_v26 = vpop.permute.xlu1 %2550 }
 0x6c5   :  { %v2549_v12 = vpop.permute.xlu0 %2548 }
 0x6ca   :  { %2693 = vrot.lane.b32.xlu2 %v6949_v40, %s3898_s22  ;;  %2691 = vrot.lane.b32.xlu1 %v6816_v20, %s3898_s22 }
 0x6cb   :  { %2689 = vrot.lane.b32.xlu0 %v6676_v43, %s3898_s22 }
 0x6cc   :  { %v7020_v55 = vpop.permute.xlu2 %2593  ;;  %v7022_v46 = vpop.permute.xlu1 %2556 }
 0x6cd   :  { %9852 = vst [vmem:[#allocation594_spill] sm:$0xff] %v7020_v55  ;;  %v2555_v3 = vpop.permute.xlu0 %2554 }
 0x6d2   :  { %2699 = vrot.lane.b32.xlu2 %v6300_v56, %s3898_s22  ;;  %2697 = vrot.lane.b32.xlu1 %v6134_v2, %s3898_s22 }
 0x6d3   :  { %2695 = vrot.lane.b32.xlu0 %v5968_v16, %s3898_s22 }
 0x6d4   :  { %v7030_v44 = vpop.permute.xlu2 %2599  ;;  %v7032_v42 = vpop.permute.xlu1 %2562 }
 0x6d5   :  { %v2561_v0 = vpop.permute.xlu0 %2560 }
 0x6da   :  { %2705 = vrot.lane.b32.xlu2 %v6768_v5, %s3898_s22  ;;  %2703 = vrot.lane.b32.xlu1 %v6703_v34, %s3898_s22 }
 0x6db   :  { %2701 = vrot.lane.b32.xlu0 %v6466_v10, %s3898_s22 }
 0x6dc   :  { %v7040_v60 = vpop.permute.xlu2 %2605  ;;  %v7042_v18 = vpop.permute.xlu1 %2568 }
 0x6dd   :  { %v2567_v51 = vpop.permute.xlu0 %2566 }
 0x6e2   :  { %2711 = vrot.lane.b32.xlu2 %v6920_v52, %s3898_s22  ;;  %2709 = vrot.lane.b32.xlu1 %v6855_v11, %s3898_s22 }
 0x6e3   :  { %2707 = vrot.lane.b32.xlu0 %v6785_v24, %s3898_s22 }
 0x6e4   :  { %v7050_v57 = vpop.permute.xlu2 %2611  ;;  %v7052_v4 = vpop.permute.xlu1 %2591 }
 0x6e5   :  { %9853 = vst [vmem:[#allocation595_spill] sm:$0xff] %v7052_v4  ;;  %v7054_v41 = vpop.permute.xlu0 %2589 }
 0x6ea   :  { %2734 = vrot.lane.b32.xlu2 %v6439_v15, %s3899_s25  ;;  %2715 = vrot.lane.b32.xlu1 %v7059_v59, %s3898_s22  ;;  %v2950_v59 = vsel %vm1927_vm1, %v2934_v48, %v2549_v12  ;;  %v2953_v48 = vsel %vm1927_vm1, %v2937_v6, %v2555_v3 }
 0x6eb   :  { %2713 = vrot.lane.b32.xlu0 %v7002_v37, %s3898_s22 }
 0x6ec   :  { %v7067_v1 = vpop.permute.xlu2 %2617  ;;  %v2598_v28 = vpop.permute.xlu1 %2597 }
 0x6ed   :  { %v2596_v58 = vpop.permute.xlu0 %2595 }
 0x6f2   :  { %2740 = vrot.lane.b32.xlu2 %v6949_v40, %s3899_s25  ;;  %2738 = vrot.lane.b32.xlu1 %v6816_v20, %s3899_s25 }
 0x6f3   :  { %2736 = vrot.lane.b32.xlu0 %v6676_v43, %s3899_s25 }
 0x6f4   :  { %v7075_v25 = vpop.permute.xlu2 %2640  ;;  %v2604_v62 = vpop.permute.xlu1 %2603 }
 0x6f5   :  { %9855 = vst [vmem:[#allocation597_spill] sm:$0xff] %v7075_v25  ;;  %v2602_v53 = vpop.permute.xlu0 %2601  ;;  %v2966_v25 = vsel %vm1967_vm2, %v2950_v59, %v2598_v28  ;;  %v2969_v59 = vsel %vm1967_vm2, %v2953_v48, %v2604_v62 }
 0x6fa   :  { %2746 = vrot.lane.b32.xlu2 %v6300_v56, %s3899_s25  ;;  %2744 = vrot.lane.b32.xlu1 %v6134_v2, %s3899_s25 }
 0x6fb   :  { %2742 = vrot.lane.b32.xlu0 %v5968_v16, %s3899_s25 }
 0x6fc   :  { %v2647_v4 = vpop.permute.xlu2 %2646  ;;  %v2610_v55 = vpop.permute.xlu1 %2609 }
 0x6fd   :  { %v7089_v30 = vsel %vm2007_vm3, %v2966_v25, %v2647_v4  ;;  %v7091_v54 = vpop.permute.xlu0 %2607  ;;  %v2940_v25 = vsel %vm1887_vm0, %v6134_v2, %v6911_v19  ;;  %v2943_v19 = vsel %vm1887_vm0, %v6703_v34, %v6928_v45 }
 0x6fe   :  { %v2956_v3 = vsel %vm1927_vm1, %v2940_v25, %v2561_v0  ;;  %v2933_v0 = vsel %vm1887_vm0, %v6107_v49, %v6930_v27 }
 0x6ff   :  { %v2972_v62 = vsel %vm1967_vm2, %v2956_v3, %v2610_v55  ;;  %v2949_v55 = vsel %vm1927_vm1, %v2933_v0, %v6957_v36 }
 0x700   :  { %v2965_v45 = vsel %vm1967_vm2, %v2949_v55, %v2596_v58 }
 0x702   :  { %2752 = vrot.lane.b32.xlu2 %v6768_v5, %s3899_s25  ;;  %2750 = vrot.lane.b32.xlu1 %v6703_v34, %s3899_s25 }
 0x703   :  { %2748 = vrot.lane.b32.xlu0 %v6466_v10, %s3899_s25 }
 0x704   :  { %v2653_v4 = vpop.permute.xlu2 %2652  ;;  %v2616_v12 = vpop.permute.xlu1 %2615 }
 0x705   :  { %v7105_v16 = vsel %vm2007_vm3, %v2969_v59, %v2653_v4  ;;  %v7107_v28 = vpop.permute.xlu0 %2613  ;;  %v2959_v4 = vsel %vm1927_vm1, %v2943_v19, %v2567_v51  ;;  %v3857_v51 = vld [vmem:[%s9235_s0 + $0x50] sm:$0x3]  ;;  %v2935_v19 = vsel %vm1887_vm0, %v6439_v15, %v6944_v39 }
 0x706   :  { %v2975_v25 = vsel %vm1967_vm2, %v2959_v4, %v2616_v12  ;;  %v2930_v36 = vsel %vm1887_vm0, %v3857_v51, %v6913_v61  ;;  %v2936_v12 = vsel %vm1887_vm0, %v6676_v43, %v6942_v33  ;;  %v2951_v33 = vsel %vm1927_vm1, %v2935_v19, %v7012_v26  ;;  %v7187_v26 = vld [vmem:[%s9235_s0 + $0x62] sm:$0x3] }
 0x707   :  { %v2946_v58 = vsel %vm1927_vm1, %v2930_v36, %v6940_v7  ;;  %v2952_v61 = vsel %vm1927_vm1, %v2936_v12, %v6969_v63  ;;  %v2967_v15 = vsel %vm1967_vm2, %v2951_v33, %v7030_v44  ;;  %v2938_v44 = vsel %vm1887_vm0, %v6949_v40, %v6961_v9 }
 0x708   :  { %v2962_v7 = vsel %vm1967_vm2, %v2946_v58, %v7054_v41 }
 0x70a   :  { %2758 = vrot.lane.b32.xlu2 %v6920_v52, %s3899_s25  ;;  %2756 = vrot.lane.b32.xlu1 %v6855_v11, %s3899_s25 }
 0x70b   :  { %2754 = vrot.lane.b32.xlu0 %v6785_v24, %s3899_s25 }
 0x70c   :  { %v2659_v14 = vpop.permute.xlu2 %2658  ;;  %v2639_v6 = vpop.permute.xlu1 %2638 }
 0x70d   :  { %v7121_v48 = vsel %vm2007_vm3, %v2972_v62, %v2659_v14  ;;  %v7123_v59 = vpop.permute.xlu0 %2636 }
 0x712   :  { %2832 = vrot.lane.b32.xlu2 %v6816_v20, %s3901_s6  ;;  %2783 = vrot.lane.b32.xlu1 %v6676_v43, %s3900_s28  ;;  %v2968_v43 = vsel %vm1967_vm2, %v2952_v61, %v2602_v53  ;;  %v2939_v53 = vsel %vm1887_vm0, %v7187_v26, %v6959_v47 }
 0x713   :  { %2760 = vrot.lane.b32.xlu0 %v7002_v37, %s3899_s25 }
 0x714   :  { %v2665_v3 = vpop.permute.xlu2 %2664  ;;  %v2645_v49 = vpop.permute.xlu1 %2644 }
 0x715   :  { %v7143_v27 = vsel %vm2007_vm3, %v2975_v25, %v2665_v3  ;;  %v2981_v62 = vsel %vm2007_vm3, %v2965_v45, %v2645_v49  ;;  %v7146_v14 = vpop.permute.xlu0 %2642  ;;  %v2954_v45 = vsel %vm1927_vm1, %v2938_v44, %v7022_v46  ;;  %v2942_v46 = vsel %vm1887_vm0, %v6466_v10, %v6971_v38  ;;  %v9858_v44 = vld [vmem:[#allocation595_spill] sm:$0xff] }
 0x71a   :  { %2787 = vrot.lane.b32.xlu2 %v6949_v40, %s3900_s28  ;;  %2785 = vrot.lane.b32.xlu1 %v6816_v20, %s3900_s28  ;;  %v2978_v20 = vsel %vm2007_vm3, %v2962_v7, %v2639_v6  ;;  %v2955_v6 = vsel %vm1927_vm1, %v2939_v53, %v6981_v13  ;;  %v2944_v7 = vsel %vm1887_vm0, %v6768_v5, %v6985_v21 }
 0x71b   :  { %2881 = vrot.lane.b32.xlu0 %v6949_v40, %s3902_s16  ;;  %v2971_v47 = vsel %vm1967_vm2, %v2955_v6, %v7091_v54  ;;  %v2958_v54 = vsel %vm1927_vm1, %v2942_v46, %v6993_v32 }
 0x71c   :  { %v2688_v0 = vpop.permute.xlu2 %2687  ;;  %v2651_v55 = vpop.permute.xlu1 %2650  ;;  %v2974_v38 = vsel %vm1967_vm2, %v2958_v54, %v7107_v28 }
 0x71d   :  { %v7178_v63 = vsel %vm2047_vm4, %v2978_v20, %v2688_v0  ;;  %v2984_v41 = vsel %vm2007_vm3, %v2968_v43, %v2651_v55  ;;  %v2649_v39 = vpop.permute.xlu0 %2648 }
 0x71e   :  { %v7182_v4 = vsel %vm2007_vm3, %v2967_v15, %v2649_v39 }
 0x722   :  { %2793 = vrot.lane.b32.xlu2 %v6300_v56, %s3900_s28  ;;  %2791 = vrot.lane.b32.xlu1 %v6134_v2, %s3900_s28  ;;  %v2970_v2 = vsel %vm1967_vm2, %v2954_v45, %v7040_v60  ;;  %v2941_v60 = vsel %vm1887_vm0, %v6300_v56, %v6973_v23 }
 0x723   :  { %2789 = vrot.lane.b32.xlu0 %v7187_v26, %s3900_s28 }
 0x724   :  { %v2694_v25 = vpop.permute.xlu2 %2693  ;;  %v2657_v3 = vpop.permute.xlu1 %2656 }
 0x725   :  { %v7210_v49 = vsel %vm2047_vm4, %v2981_v62, %v2694_v25  ;;  %v2987_v9 = vsel %vm2007_vm3, %v2971_v47, %v2657_v3  ;;  %v2655_v13 = vpop.permute.xlu0 %2654  ;;  %v2957_v62 = vsel %vm1927_vm1, %v2941_v60, %v7032_v42  ;;  %v2929_v42 = vsel %vm1887_vm0, %v6649_v17, %v6915_v31  ;;  %v9859_v47 = vld [vmem:[#allocation597_spill] sm:$0xff] }
 0x726   :  { %v7214_v51 = vsel %vm2007_vm3, %v2970_v2, %v2655_v13  ;;  %v2973_v12 = vsel %vm1967_vm2, %v2957_v62, %v7050_v57  ;;  %v2945_v28 = vsel %vm1927_vm1, %v2929_v42, %v6983_v50  ;;  %v3859_v57 = vld [vmem:[%s9235_s0 + $0x64] sm:$0x3]  ;;  %v2960_v50 = vsel %vm1927_vm1, %v2944_v7, %v7042_v18  ;;  %v75_v42 = vld [vmem:[%s9235_s0 + $0x78] sm:$0x3] }
 0x727   :  { %v2961_v33 = vsel %vm1967_vm2, %v2945_v28, %v7010_v22  ;;  %v2976_v20 = vsel %vm1967_vm2, %v2960_v50, %v7067_v1 }
 0x728   :  { %v2977_v31 = vsel %vm2007_vm3, %v2961_v33, %v7123_v59  ;;  %v3861_v59 = vld [vmem:[%s9235_s0 + $0x52] sm:$0x3] }
 0x729   :  { %v2931_v1 = vsel %vm1887_vm0, %v3861_v59, %v6875_v8 }
 0x72a   :  { %2799 = vrot.lane.b32.xlu2 %v6768_v5, %s3900_s28  ;;  %2797 = vrot.lane.b32.xlu1 %v6703_v34, %s3900_s28 }
 0x72b   :  { %2795 = vrot.lane.b32.xlu0 %v6466_v10, %s3900_s28 }
 0x72c   :  { %v2700_v36 = vpop.permute.xlu2 %2699  ;;  %v2663_v58 = vpop.permute.xlu1 %2662 }
 0x72d   :  { %v7237_v19 = vsel %vm2047_vm4, %v2984_v41, %v2700_v36  ;;  %v2990_v23 = vsel %vm2007_vm3, %v2974_v38, %v2663_v58  ;;  %v2661_v32 = vpop.permute.xlu0 %2660  ;;  %v9856_v41 = vld [vmem:[#allocation593_spill] sm:$0xff] }
 0x72e   :  { %v7241_v61 = vsel %vm2007_vm3, %v2973_v12, %v2661_v32  ;;  %v2947_v39 = vsel %vm1927_vm1, %v2931_v1, %v9856_v41 }
 0x72f   :  { %v2963_v8 = vsel %vm1967_vm2, %v2947_v39, %v9858_v44  ;;  %v77_v44 = vld [vmem:[%s9235_s0 + $0x7c] sm:$0x3] }
 0x730   :  { %v2979_v25 = vsel %vm2007_vm3, %v2963_v8, %v9859_v47 }
 0x732   :  { %2838 = vrot.lane.b32.xlu2 %v3859_v57, %s3901_s6  ;;  %2836 = vrot.lane.b32.xlu1 %v7187_v26, %s3901_s6 }
 0x733   :  { %2834 = vrot.lane.b32.xlu0 %v6949_v40, %s3901_s6  ;;  %v3860_v40 = vld [vmem:[%s9235_s0 + $0x54] sm:$0x3] }
 0x734   :  { %v2706_v17 = vpop.permute.xlu2 %2705  ;;  %v2686_v43 = vpop.permute.xlu1 %2685  ;;  %v2932_v18 = vsel %vm1887_vm0, %v3860_v40, %v6932_v35  ;;  %v9857_v35 = vld [vmem:[#allocation594_spill] sm:$0xff] }
 0x735   :  { %v7268_v0 = vsel %vm2047_vm4, %v2987_v9, %v2706_v17  ;;  %v2993_v21 = vsel %vm2047_vm4, %v2977_v31, %v2686_v43  ;;  %v2667_v22 = vpop.permute.xlu0 %2666  ;;  %v2948_v15 = vsel %vm1927_vm1, %v2932_v18, %v6995_v29 }
 0x736   :  { %v2992_v55 = vsel %vm2007_vm3, %v2976_v20, %v2667_v22  ;;  %v2964_v53 = vsel %vm1967_vm2, %v2948_v15, %v9857_v35 }
 0x737   :  { %v2980_v29 = vsel %vm2007_vm3, %v2964_v53, %v7146_v14 }
 0x73a   :  { %2844 = vrot.lane.b32.xlu2 %v6703_v34, %s3901_s6  ;;  %2842 = vrot.lane.b32.xlu1 %v6466_v10, %s3901_s6 }
 0x73b   :  { %2840 = vrot.lane.b32.xlu0 %v6300_v56, %s3901_s6 }
 0x73c   :  { %v2712_v6 = vpop.permute.xlu2 %2711  ;;  %v2692_v45 = vpop.permute.xlu1 %2691 }
 0x73d   :  { %v7301_v3 = vsel %vm2047_vm4, %v2990_v23, %v2712_v6  ;;  %v2996_v2 = vsel %vm2047_vm4, %v2980_v29, %v2692_v45  ;;  %v2690_v9 = vpop.permute.xlu0 %2689 }
 0x73e   :  { %v2995_v13 = vsel %vm2047_vm4, %v2979_v25, %v2690_v9 }
 0x742   :  { %2883 = vrot.lane.b32.xlu2 %v7187_v26, %s3902_s16  ;;  %2848 = vrot.lane.b32.xlu1 %v6785_v24, %s3901_s6 }
 0x743   :  { %2846 = vrot.lane.b32.xlu0 %v6768_v5, %s3901_s6 }
 0x744   :  { %v2735_v14 = vpop.permute.xlu2 %2734  ;;  %v2698_v46 = vpop.permute.xlu1 %2697 }
 0x745   :  { %v7312_v60 = vsel %vm2087_vm5, %v2993_v21, %v2735_v14  ;;  %v2999_v54 = vsel %vm2047_vm4, %v7182_v4, %v2698_v46  ;;  %v2696_v62 = vpop.permute.xlu0 %2695  ;;  %v78_v14 = vld [vmem:[%s9235_s0 + $0x7e] sm:$0x3]  ;;  %v9861_v46 = vld [vmem:[#allocation11_spill] sm:$0xff] }
 0x746   :  { %v2998_v38 = vsel %vm2047_vm4, %v7089_v30, %v2696_v62  ;;  %v9863_v62 = vld [vmem:[#allocation25_spill] sm:$0xff] }
 0x74a   :  { %2889 = vrot.lane.b32.xlu2 %v6466_v10, %s3902_s16  ;;  %2887 = vrot.lane.b32.xlu1 %v6300_v56, %s3902_s16 }
 0x74b   :  { %2885 = vrot.lane.b32.xlu0 %v3859_v57, %s3902_s16 }
 0x74c   :  { %v2741_v26 = vpop.permute.xlu2 %2740  ;;  %v2704_v36 = vpop.permute.xlu1 %2703 }
 0x74d   :  { %v7324_v58 = vsel %vm2087_vm5, %v2996_v2, %v2741_v26  ;;  %v3002_v4 = vsel %vm2047_vm4, %v7214_v51, %v2704_v36  ;;  %v2702_v12 = vpop.permute.xlu0 %2701  ;;  %v9865_v26 = vld [vmem:[#allocation21_spill] sm:$0xff]  ;;  %v9866_v36 = vld [vmem:[#allocation510_spill] sm:$0xff] }
 0x74e   :  { %v3001_v30 = vsel %vm2047_vm4, %v7105_v16, %v2702_v12  ;;  %v9867_v12 = vld [vmem:[#allocation50_spill] sm:$0xff] }
 0x752   :  { %2895 = vrot.lane.b32.xlu2 %v6785_v24, %s3902_s16  ;;  %2893 = vrot.lane.b32.xlu1 %v6768_v5, %s3902_s16  ;;  %v9860_v5 = vld [vmem:[#allocation596_spill] sm:$0xff] }
 0x753   :  { %2891 = vrot.lane.b32.xlu0 %v6703_v34, %s3902_s16 }
 0x754   :  { %v2747_v56 = vpop.permute.xlu2 %2746  ;;  %v2710_v10 = vpop.permute.xlu1 %2709 }
 0x755   :  { %v7337_v23 = vsel %vm2087_vm5, %v2999_v54, %v2747_v56  ;;  %v3005_v51 = vsel %vm2047_vm4, %v7241_v61, %v2710_v10  ;;  %v2708_v32 = vpop.permute.xlu0 %2707  ;;  %v9868_v56 = vld [vmem:[#allocation64_spill] sm:$0xff] }
 0x756   :  { %v3004_v16 = vsel %vm2047_vm4, %v7121_v48, %v2708_v32 }
 0x75a   :  { %2764 = vrot.lane.b32.xlu2 %v75_v42, %s3899_s25  ;;  %2762 = vrot.lane.b32.xlu1 %v9860_v5, %s3899_s25 }
 0x75b   :  { %2897 = vrot.lane.b32.xlu0 %v6855_v11, %s3902_s16 }
 0x75c   :  { %v2753_v34 = vpop.permute.xlu2 %2752  ;;  %v2716_v28 = vpop.permute.xlu1 %2715 }
 0x75d   :  { %v7352_v61 = vsel %vm2087_vm5, %v3002_v4, %v2753_v34  ;;  %v7355_v57 = vsel %vm2047_vm4, %v2992_v55, %v2716_v28  ;;  %v2714_v48 = vpop.permute.xlu0 %2713  ;;  %v1904_v4 = vsel %vm1887_vm0, %v9866_v36, %v9865_v26  ;;  %v9872_v28 = vld [vmem:[#allocation14_spill] sm:$0xff]  ;;  %v9888_v36 = vld [vmem:[#allocation255_spill] sm:$0xff] }
 0x75e   :  { %v7359_v7 = vsel %vm2047_vm4, %v7143_v27, %v2714_v48  ;;  %v9873_v48 = vld [vmem:[#allocation514_spill] sm:$0xff] }
 0x762   :  { %2805 = vrot.lane.b32.xlu2 %v6920_v52, %s3900_s28  ;;  %2803 = vrot.lane.b32.xlu1 %v6855_v11, %s3900_s28 }
 0x763   :  { %2801 = vrot.lane.b32.xlu0 %v6785_v24, %s3900_s28 }
 0x764   :  { %v2759_v33 = vpop.permute.xlu2 %2758  ;;  %v2739_v50 = vpop.permute.xlu1 %2738 }
 0x765   :  { %v7368_v31 = vsel %vm2087_vm5, %v3005_v51, %v2759_v33  ;;  %v3011_v17 = vsel %vm2087_vm5, %v2995_v13, %v2739_v50  ;;  %v2737_v43 = vpop.permute.xlu0 %2736  ;;  %v9869_v51 = vld [vmem:[#allocation60_spill] sm:$0xff]  ;;  %v1908_v33 = vsel %vm1887_vm0, %v9873_v48, %v9872_v28  ;;  %v9874_v50 = vld [vmem:[#allocation99_spill] sm:$0xff]  ;;  %v9896_v48 = vld [vmem:[#allocation53_spill] sm:$0xff] }
 0x766   :  { %v3010_v27 = vsel %vm2087_vm5, %v7178_v63, %v2737_v43  ;;  %v76_v63 = vld [vmem:[%s9235_s0 + $0x7a] sm:$0x3]  ;;  %v1944_v32 = vsel %vm1927_vm1, %v1904_v4, %v9869_v51 }
 0x767   :  { %v9875_v43 = vld [vmem:[#allocation128_spill] sm:$0xff] }
 0x768   :  { %v9892_v51 = vld [vmem:[#allocation520_spill] sm:$0xff] }
 0x76a   :  { %2811 = vrot.lane.b32.xlu2 %v75_v42, %s3900_s28  ;;  %2809 = vrot.lane.b32.xlu1 %v9860_v5, %s3900_s28 }
 0x76b   :  { %2807 = vrot.lane.b32.xlu0 %v7002_v37, %s3900_s28 }
 0x76c   :  { %v2833_v24 = vpop.permute.xlu2 %2832  ;;  %v2745_v20 = vpop.permute.xlu1 %2744 }
 0x76d   :  { %v3014_v21 = vsel %vm2087_vm5, %v2998_v38, %v2745_v20  ;;  %v2743_v22 = vpop.permute.xlu0 %2742 }
 0x76e   :  { %v7381_v55 = vsel %vm2087_vm5, %v7210_v49, %v2743_v22 }
 0x772   :  { %2852 = vrot.lane.b32.xlu2 %v6920_v52, %s3901_s6  ;;  %2850 = vrot.lane.b32.xlu1 %v6855_v11, %s3901_s6 }
 0x773   :  { %2813 = vrot.lane.b32.xlu0 %v76_v63, %s3900_s28 }
 0x774   :  { %v2788_v40 = vpop.permute.xlu2 %2787  ;;  %v2751_v18 = vpop.permute.xlu1 %2750 }
 0x775   :  { %v7392_v59 = vsel %vm2127_vm6, %v3011_v17, %v2788_v40  ;;  %v3017_v49 = vsel %vm2087_vm5, %v3001_v30, %v2751_v18  ;;  %v2749_v1 = vpop.permute.xlu0 %2748  ;;  %v1984_v17 = vsel %vm1967_vm2, %v1944_v32, %v9874_v50  ;;  %v9877_v40 = vld [vmem:[#allocation138_spill] sm:$0xff]  ;;  %v1948_v50 = vsel %vm1927_vm1, %v1908_v33, %v9896_v48  ;;  %v9915_v48 = vld [vmem:[#allocation27_spill] sm:$0xff] }
 0x776   :  { %v7397_v15 = vsel %vm2087_vm5, %v7237_v19, %v2749_v1  ;;  %v2024_v18 = vsel %vm2007_vm3, %v1984_v17, %v9877_v40  ;;  %v9879_v1 = vld [vmem:[#allocation181_spill] sm:$0xff]  ;;  %v9897_v17 = vld [vmem:[#allocation67_spill] sm:$0xff]  ;;  %v9900_v40 = vld [vmem:[#allocation92_spill] sm:$0xff] }
 0x777   :  { %v1988_v33 = vsel %vm1967_vm2, %v1948_v50, %v9900_v40  ;;  %v9919_v40 = vld [vmem:[#allocation31_spill] sm:$0xff] }
 0x77a   :  { %2858 = vrot.lane.b32.xlu2 %v75_v42, %s3901_s6  ;;  %2856 = vrot.lane.b32.xlu1 %v9860_v5, %s3901_s6 }
 0x77b   :  { %2854 = vrot.lane.b32.xlu0 %v7002_v37, %s3901_s6 }
 0x77c   :  { %v2794_v11 = vpop.permute.xlu2 %2793  ;;  %v2757_v41 = vpop.permute.xlu1 %2756 }
 0x77d   :  { %v7405_v39 = vsel %vm2127_vm6, %v3014_v21, %v2794_v11  ;;  %v7408_v35 = vsel %vm2087_vm5, %v3004_v16, %v2757_v41  ;;  %v2755_v53 = vpop.permute.xlu0 %2754  ;;  %v9870_v16 = vld [vmem:[#allocation89_spill] sm:$0xff] }
 0x77e   :  { %v7412_v19 = vsel %vm2087_vm5, %v7268_v0, %v2755_v53 }
 0x782   :  { %2899 = vrot.lane.b32.xlu2 %v6920_v52, %s3902_s16  ;;  %2862 = vrot.lane.b32.xlu1 %v77_v44, %s3901_s6 }
 0x783   :  { %2860 = vrot.lane.b32.xlu0 %v76_v63, %s3901_s6 }
 0x784   :  { %v2800_v8 = vpop.permute.xlu2 %2799  ;;  %v2784_v29 = vpop.permute.xlu1 %2783 }
 0x785   :  { %v7422_v6 = vsel %vm2127_vm6, %v3017_v49, %v2800_v8  ;;  %v3025_v0 = vsel %vm2127_vm6, %v7312_v60, %v2784_v29  ;;  %v2761_v45 = vpop.permute.xlu0 %2760  ;;  %v9862_v60 = vld [vmem:[#allocation509_spill] sm:$0xff]  ;;  %v9878_v49 = vld [vmem:[#allocation167_spill] sm:$0xff]  ;;  %v9881_v29 = vld [vmem:[#allocation206_spill] sm:$0xff] }
 0x786   :  { %v7428_v47 = vsel %vm2087_vm5, %v7301_v3, %v2761_v45  ;;  %v3041_v52 = vsel %vm2167_vm7, %v3025_v0, %v2833_v24  ;;  %v1905_v54 = vsel %vm1887_vm0, %v9862_v60, %v9861_v46  ;;  %v9876_v24 = vld [vmem:[#allocation142_spill] sm:$0xff]  ;;  %v9882_v45 = vld [vmem:[#allocation220_spill] sm:$0xff]  ;;  %v9884_v46 = vld [vmem:[#allocation245_spill] sm:$0xff] }
 0x787   :  { %v1945_v30 = vsel %vm1927_vm1, %v1905_v54, %v9867_v12  ;;  %v9885_v60 = vld [vmem:[#allocation259_spill] sm:$0xff] }
 0x78a   :  { %2905 = vrot.lane.b32.xlu2 %v75_v42, %s3902_s16  ;;  %2903 = vrot.lane.b32.xlu1 %v9860_v5, %s3902_s16  ;;  %v1985_v42 = vsel %vm1967_vm2, %v1945_v30, %v9870_v16  ;;  %v9871_v5 = vld [vmem:[#allocation103_spill] sm:$0xff]  ;;  %v9890_v30 = vld [vmem:[#allocation298_spill] sm:$0xff] }
 0x78b   :  { %2901 = vrot.lane.b32.xlu0 %v7002_v37, %s3902_s16  ;;  %v9864_v37 = vld [vmem:[#allocation516_spill] sm:$0xff]  ;;  %v9893_v16 = vld [vmem:[#allocation294_spill] sm:$0xff] }
 0x78c   :  { %v2839_v25 = vpop.permute.xlu2 %2838  ;;  %v2786_v2 = vpop.permute.xlu1 %2785  ;;  %v1906_v38 = vsel %vm1887_vm0, %v9864_v37, %v9863_v62  ;;  %v9886_v37 = vld [vmem:[#allocation24_spill] sm:$0xff] }
 0x78d   :  { %v7437_v9 = vsel %vm2127_vm6, %v3010_v27, %v2786_v2  ;;  %v2882_v13 = vpop.permute.xlu0 %2881  ;;  %v1946_v10 = vsel %vm1927_vm1, %v1906_v38, %v9868_v56  ;;  %v2025_v27 = vsel %vm2007_vm3, %v1985_v42, %v9875_v43  ;;  %v9887_v38 = vld [vmem:[#allocation515_spill] sm:$0xff] }
 0x78e   :  { %v7440_v3 = vsel %vm2207_vm8, %v3041_v52, %v2882_v13  ;;  %v1986_v34 = vsel %vm1967_vm2, %v1946_v10, %v9871_v5  ;;  %v9883_v13 = vld [vmem:[#allocation216_spill] sm:$0xff]  ;;  %v1907_v26 = vsel %vm1887_vm0, %v9887_v38, %v9886_v37  ;;  %v9894_v42 = vld [vmem:[#allocation323_spill] sm:$0xff] }
 0x78f   :  { %v2026_v20 = vsel %vm2007_vm3, %v1986_v34, %v9876_v24  ;;  %v9891_v10 = vld [vmem:[#allocation28_spill] sm:$0xff]  ;;  %v9895_v34 = vld [vmem:[#allocation337_spill] sm:$0xff] }
 0x790   :  { %v2066_v11 = vsel %vm2047_vm4, %v2026_v20, %v9879_v1  ;;  %v1909_v32 = vsel %vm1887_vm0, %v9892_v51, %v9891_v10  ;;  %v9899_v20 = vld [vmem:[#allocation63_spill] sm:$0xff]  ;;  %v9902_v1 = vld [vmem:[#allocation17_spill] sm:$0xff] }
 0x791   :  { %v2106_v52 = vsel %vm2087_vm5, %v2066_v11, %v9882_v45  ;;  %v1949_v43 = vsel %vm1927_vm1, %v1909_v32, %v9897_v17  ;;  %v9912_v10 = vld [vmem:[#allocation219_spill] sm:$0xff]  ;;  %v9913_v32 = vld [vmem:[#allocation248_spill] sm:$0xff] }
 0x792   :  { %2911 = vrot.lane.b32.xlu2 %v78_v14, %s3902_s16  ;;  %2909 = vrot.lane.b32.xlu1 %v77_v44, %s3902_s16  ;;  %v9880_v44 = vld [vmem:[#allocation177_spill] sm:$0xff]  ;;  %v2146_v54 = vsel %vm2127_vm6, %v2106_v52, %v9885_v60  ;;  %v9908_v60 = vld [vmem:[#allocation184_spill] sm:$0xff] }
 0x793   :  { %2907 = vrot.lane.b32.xlu0 %v76_v63, %s3902_s16  ;;  %v2065_v63 = vsel %vm2047_vm4, %v2025_v27, %v9878_v49  ;;  %v2064_v8 = vsel %vm2047_vm4, %v2024_v18, %v9880_v44  ;;  %v2186_v56 = vsel %vm2167_vm7, %v2146_v54, %v9890_v30  ;;  %v9898_v27 = vld [vmem:[#allocation333_spill] sm:$0xff]  ;;  %s3909_s16 = smov 64   ;;  %v9901_v18 = vld [vmem:[#allocation106_spill] sm:$0xff] }
 0x794   :  { %v2845_v21 = vpop.permute.xlu2 %2844  ;;  %v2792_v22 = vpop.permute.xlu1 %2791  ;;  %v2105_v0 = vsel %vm2087_vm5, %v2065_v63, %v9881_v29  ;;  %v2104_v14 = vsel %vm2087_vm5, %v2064_v8, %v9883_v13  ;;  %v7523_v28 = vsel %vm2207_vm8, %v2186_v56, %v9895_v34  ;;  %v1989_v49 = vsel %vm1967_vm2, %v1949_v43, %v9901_v18  ;;  %v3862_v63 = vld [vmem:[%s9235_s0 + $0x2e] sm:$0x3]  ;;  %v9904_v8 = vld [vmem:[#allocation131_spill] sm:$0xff]  ;;  %v9906_v13 = vld [vmem:[#allocation141_spill] sm:$0xff] }
 0x795   :  { %v7484_v41 = vsel %vm2127_vm6, %v7381_v55, %v2792_v22  ;;  %v2790_v53 = vpop.permute.xlu0 %2789  ;;  %v2145_v55 = vsel %vm2127_vm6, %v2105_v0, %v9884_v46  ;;  %v2144_v4 = vsel %vm2127_vm6, %v2104_v14, %v9888_v36  ;;  %v1947_v22 = vsel %vm1927_vm1, %v1907_v26, %v9899_v20  ;;  %v9905_v0 = vld [vmem:[#allocation145_spill] sm:$0xff]  ;;  %v9907_v46 = vld [vmem:[#allocation170_spill] sm:$0xff]  ;;  %v9909_v26 = vld [vmem:[#allocation180_spill] sm:$0xff] }
 0x796   :  { %v3028_v2 = vsel %vm2127_vm6, %v7324_v58, %v2790_v53  ;;  %v9889_v58 = vld [vmem:[#allocation284_spill] sm:$0xff]  ;;  %v1911_v11 = vsel %vm1887_vm0, %v3862_v63, %v9902_v1  ;;  %v9903_v53 = vld [vmem:[#allocation102_spill] sm:$0xff]  ;;  %v2028_v29 = vsel %vm2007_vm3, %v1988_v33, %v9904_v8  ;;  %v2029_v45 = vsel %vm2007_vm3, %v1989_v49, %v9905_v0  ;;  %v9917_v43 = vld [vmem:[#allocation287_spill] sm:$0xff] }
 0x797   :  { %v7501_v62 = vsel %vm2167_vm7, %v3028_v2, %v2839_v25  ;;  %v2185_v12 = vsel %vm2167_vm7, %v2145_v55, %v9889_v58  ;;  %v2184_v25 = vsel %vm2167_vm7, %v2144_v4, %v9893_v16  ;;  %v1987_v44 = vsel %vm1967_vm2, %v1947_v22, %v9903_v53  ;;  %v9910_v4 = vld [vmem:[#allocation209_spill] sm:$0xff]  ;;  %v9914_v16 = vld [vmem:[#allocation262_spill] sm:$0xff]  ;;  %v9922_v53 = vld [vmem:[#allocation340_spill] sm:$0xff] }
 0x798   :  { %v7519_v5 = vsel %vm2207_vm8, %v2185_v12, %v9894_v42  ;;  %v7531_v24 = vsel %vm2207_vm8, %v2184_v25, %v9898_v27  ;;  %v2027_v14 = vsel %vm2007_vm3, %v1987_v44, %v9906_v13  ;;  %v2068_v55 = vsel %vm2047_vm4, %v2028_v29, %v9907_v46  ;;  %v9911_v12 = vld [vmem:[#allocation223_spill] sm:$0xff]  ;;  %v3863_v34 = vld [vmem:[%s9235_s0 + $0x2c] sm:$0x3]  ;;  %v9918_v20 = vld [vmem:[#allocation301_spill] sm:$0xff] }
 0x799   :  { %v2069_v54 = vsel %vm2047_vm4, %v2029_v45, %v9908_v60  ;;  %v2067_v36 = vsel %vm2047_vm4, %v2027_v14, %v9909_v26  ;;  %v2108_v58 = vsel %vm2087_vm5, %v2068_v55, %v9910_v4  ;;  %v1910_v50 = vsel %vm1887_vm0, %v3863_v34, %v9915_v48  ;;  %v9920_v18 = vld [vmem:[#allocation297_spill] sm:$0xff]  ;;  %v9921_v63 = vld [vmem:[#allocation326_spill] sm:$0xff]  ;;  %v9923_v8 = vld [vmem:[#allocation56_spill] sm:$0xff] }
 0x79a   :  { %3114 = vrot.lane.b32.xlu1 %v7519_v5, %s3909_s16  ;;  %3116 = vrot.lane.b32.xlu2 %v7523_v28, %s3909_s16  ;;  %v2109_v30 = vsel %vm2087_vm5, %v2069_v54, %v9911_v12  ;;  %v2107_v51 = vsel %vm2087_vm5, %v2067_v36, %v9912_v10  ;;  %v1951_v29 = vsel %vm1927_vm1, %v1911_v11, %v9923_v8  ;;  %v9924_v0 = vld [vmem:[#allocation70_spill] sm:$0xff]  ;;  %v9927_v55 = vld [vmem:[#allocation95_spill] sm:$0xff]  ;;  %v9928_v11 = vld [vmem:[#allocation109_spill] sm:$0xff] }
 0x79b   :  { %3112 = vrot.lane.b32.xlu0 %v7531_v24, %s3909_s16  ;;  %v2149_v25 = vsel %vm2127_vm6, %v2109_v30, %v9914_v16  ;;  %v9926_v14 = vld [vmem:[#allocation66_spill] sm:$0xff]  ;;  %v1991_v60 = vsel %vm1967_vm2, %v1951_v29, %v9927_v55  ;;  %v9932_v10 = vld [vmem:[#allocation144_spill] sm:$0xff]  ;;  %v9934_v16 = vld [vmem:[#allocation187_spill] sm:$0xff] }
 0x79c   :  { %v7556_v52 = vpop.permute.xlu2 %2883  ;;  %v2798_v2 = vpop.permute.xlu1 %2797  ;;  %v2189_v22 = vsel %vm2167_vm7, %v2149_v25, %v9918_v20  ;;  %v1950_v46 = vsel %vm1927_vm1, %v1910_v50, %v9926_v14  ;;  %v9930_v36 = vld [vmem:[#allocation134_spill] sm:$0xff]  ;;  %v9935_v48 = vld [vmem:[#allocation183_spill] sm:$0xff]  ;;  %v9945_v55 = vld [vmem:[#allocation304_spill] sm:$0xff] }
 0x79d   :  { %v7566_v37 = vsel %vm2127_vm6, %v7397_v15, %v2798_v2  ;;  %v2796_v38 = vpop.permute.xlu0 %2795  ;;  %v2148_v15 = vsel %vm2127_vm6, %v2108_v58, %v9913_v32  ;;  %v7609_v44 = vsel %vm2207_vm8, %v2189_v22, %v9922_v53  ;;  %v9925_v2 = vld [vmem:[#allocation336_spill] sm:$0xff]  ;;  %v2031_v4 = vsel %vm2007_vm3, %v1991_v60, %v9930_v36  ;;  %v9933_v32 = vld [vmem:[#allocation173_spill] sm:$0xff]  ;;  %v3865_v20 = vld [vmem:[%s9235_s0 + $0x34] sm:$0x3] }
 0x79e   :  { %v3031_v56 = vsel %vm2127_vm6, %v7337_v23, %v2796_v38  ;;  %v9916_v23 = vld [vmem:[#allocation258_spill] sm:$0xff]  ;;  %v2188_v27 = vsel %vm2167_vm7, %v2148_v15, %v9917_v43  ;;  %v9929_v38 = vld [vmem:[#allocation105_spill] sm:$0xff]  ;;  %v9931_v58 = vld [vmem:[#allocation148_spill] sm:$0xff]  ;;  %v2071_v15 = vsel %vm2047_vm4, %v2031_v4, %v9933_v32 }
 0x79f   :  { %v7583_v42 = vsel %vm2167_vm7, %v3031_v56, %v2845_v21  ;;  %v2147_v17 = vsel %vm2127_vm6, %v2107_v51, %v9916_v23  ;;  %v3864_v21 = vld [vmem:[%s9235_s0 + $0x30] sm:$0x3]  ;;  %v7605_v1 = vsel %vm2207_vm8, %v2188_v27, %v9921_v63  ;;  %v1990_v26 = vsel %vm1967_vm2, %v1950_v46, %v9929_v38  ;;  %v9936_v23 = vld [vmem:[#allocation212_spill] sm:$0xff]  ;;  %v9937_v43 = vld [vmem:[#allocation226_spill] sm:$0xff] }
 0x7a0   :  { %v1912_v33 = vsel %vm1887_vm0, %v3864_v21, %v9919_v40  ;;  %v2187_v49 = vsel %vm2167_vm7, %v2147_v17, %v9920_v18  ;;  %v2030_v51 = vsel %vm2007_vm3, %v1990_v26, %v9932_v10  ;;  %v2111_v17 = vsel %vm2087_vm5, %v2071_v15, %v9936_v23  ;;  %v9938_v22 = vld [vmem:[#allocation20_spill] sm:$0xff]  ;;  %v9939_v40 = vld [vmem:[#allocation222_spill] sm:$0xff]  ;;  %v9940_v18 = vld [vmem:[#allocation251_spill] sm:$0xff] }
 0x7a1   :  { %v1952_v45 = vsel %vm1927_vm1, %v1912_v33, %v9924_v0  ;;  %v7617_v13 = vsel %vm2207_vm8, %v2187_v49, %v9925_v2  ;;  %v2070_v50 = vsel %vm2047_vm4, %v2030_v51, %v9935_v48  ;;  %v1914_v21 = vsel %vm1887_vm0, %v3865_v20, %v9938_v22  ;;  %v9941_v63 = vld [vmem:[#allocation265_spill] sm:$0xff]  ;;  %v3866_v8 = vld [vmem:[%s9235_s0 + $0x32] sm:$0x3]  ;;  %v9942_v29 = vld [vmem:[#allocation30_spill] sm:$0xff] }
 0x7a2   :  { %3120 = vrot.lane.b32.xlu1 %v7605_v1, %s3909_s16  ;;  %3122 = vrot.lane.b32.xlu2 %v7609_v44, %s3909_s16  ;;  %v1992_v54 = vsel %vm1967_vm2, %v1952_v45, %v9928_v11  ;;  %v2110_v33 = vsel %vm2087_vm5, %v2070_v50, %v9939_v40  ;;  %v2151_v49 = vsel %vm2127_vm6, %v2111_v17, %v9940_v18  ;;  %v9943_v45 = vld [vmem:[#allocation261_spill] sm:$0xff]  ;;  %v9944_v14 = vld [vmem:[#allocation290_spill] sm:$0xff]  ;;  %v3867_v11 = vld [vmem:[%s9235_s0 + $0x36] sm:$0x3] }
 0x7a3   :  { %3118 = vrot.lane.b32.xlu0 %v7617_v13, %s3909_s16  ;;  %v2032_v12 = vsel %vm2007_vm3, %v1992_v54, %v9931_v58  ;;  %v1913_v0 = vsel %vm1887_vm0, %v3866_v8, %v9942_v29  ;;  %v2150_v2 = vsel %vm2127_vm6, %v2110_v33, %v9943_v45  ;;  %v2191_v46 = vsel %vm2167_vm7, %v2151_v49, %v9944_v14  ;;  %v9946_v54 = vld [vmem:[#allocation34_spill] sm:$0xff]  ;;  %v9947_v26 = vld [vmem:[#allocation300_spill] sm:$0xff]  ;;  %v9948_v4 = vld [vmem:[#allocation329_spill] sm:$0xff] }
 0x7a4   :  { %v7637_v30 = vpop.permute.xlu2 %2889  ;;  %v7639_v56 = vpop.permute.xlu1 %2836  ;;  %v2072_v25 = vsel %vm2047_vm4, %v2032_v12, %v9934_v16  ;;  %v1915_v38 = vsel %vm1887_vm0, %v3867_v11, %v9946_v54  ;;  %v2190_v36 = vsel %vm2167_vm7, %v2150_v2, %v9947_v26  ;;  %v7686_v58 = vsel %vm2207_vm8, %v2191_v46, %v9948_v4  ;;  %v9949_v12 = vld [vmem:[#allocation343_spill] sm:$0xff]  ;;  %v9952_v15 = vld [vmem:[#allocation73_spill] sm:$0xff]  ;;  %v9955_v17 = vld [vmem:[#allocation98_spill] sm:$0xff] }
 0x7a5   :  { %v7647_v34 = vpop.permute.xlu0 %2834  ;;  %v2112_v27 = vsel %vm2087_vm5, %v2072_v25, %v9937_v43  ;;  %v9951_v51 = vld [vmem:[#allocation59_spill] sm:$0xff]  ;;  %v1955_v16 = vsel %vm1927_vm1, %v1915_v38, %v9952_v15  ;;  %v9954_v50 = vld [vmem:[#allocation69_spill] sm:$0xff]  ;;  %v9957_v22 = vld [vmem:[#allocation108_spill] sm:$0xff] }
 0x7a6   :  { %v2152_v53 = vsel %vm2127_vm6, %v2112_v27, %v9941_v63  ;;  %v1954_v32 = vsel %vm1927_vm1, %v1914_v21, %v9951_v51  ;;  %v9953_v25 = vld [vmem:[#allocation339_spill] sm:$0xff]  ;;  %v1953_v23 = vsel %vm1927_vm1, %v1913_v0, %v9954_v50  ;;  %v9956_v27 = vld [vmem:[#allocation112_spill] sm:$0xff]  ;;  %v9958_v40 = vld [vmem:[#allocation137_spill] sm:$0xff] }
 0x7a7   :  { %v2192_v60 = vsel %vm2167_vm7, %v2152_v53, %v9945_v55  ;;  %v7698_v48 = vsel %vm2207_vm8, %v2190_v36, %v9953_v25  ;;  %v1994_v43 = vsel %vm1967_vm2, %v1954_v32, %v9955_v17  ;;  %v1995_v20 = vsel %vm1967_vm2, %v1955_v16, %v9956_v27  ;;  %v9959_v18 = vld [vmem:[#allocation151_spill] sm:$0xff]  ;;  %v9961_v0 = vld [vmem:[#allocation176_spill] sm:$0xff]  ;;  %v9962_v2 = vld [vmem:[#allocation190_spill] sm:$0xff] }
 0x7a8   :  { %v7690_v10 = vsel %vm2207_vm8, %v2192_v60, %v9949_v12  ;;  %v1993_v21 = vsel %vm1967_vm2, %v1953_v23, %v9957_v22  ;;  %v2034_v33 = vsel %vm2007_vm3, %v1994_v43, %v9958_v40  ;;  %v2035_v49 = vsel %vm2007_vm3, %v1995_v20, %v9959_v18  ;;  %v9960_v8 = vld [vmem:[#allocation147_spill] sm:$0xff]  ;;  %v9963_v55 = vld [vmem:[#allocation186_spill] sm:$0xff]  ;;  %v9965_v38 = vld [vmem:[#allocation229_spill] sm:$0xff] }
 0x7a9   :  { %9950 = vst [vmem:[#allocation593_spill] sm:$0xff] %v7690_v10  ;;  %v2033_v29 = vsel %vm2007_vm3, %v1993_v21, %v9960_v8  ;;  %v2074_v45 = vsel %vm2047_vm4, %v2034_v33, %v9961_v0  ;;  %v2075_v14 = vsel %vm2047_vm4, %v2035_v49, %v9962_v2  ;;  %v9964_v11 = vld [vmem:[#allocation215_spill] sm:$0xff]  ;;  %v3868_v36 = vld [vmem:[%s9235_s0 + $0x3a] sm:$0x3]  ;;  %v9967_v51 = vld [vmem:[#allocation225_spill] sm:$0xff] }
 0x7aa   :  { %3126 = vrot.lane.b32.xlu1 %v7686_v58, %s3909_s16  ;;  %3128 = vrot.lane.b32.xlu2 %v7690_v10, %s3909_s16  ;;  %v2073_v60 = vsel %vm2047_vm4, %v2033_v29, %v9963_v55  ;;  %v2114_v54 = vsel %vm2087_vm5, %v2074_v45, %v9964_v11  ;;  %v2115_v26 = vsel %vm2087_vm5, %v2075_v14, %v9965_v38  ;;  %v9966_v4 = vld [vmem:[#allocation23_spill] sm:$0xff]  ;;  %v9968_v15 = vld [vmem:[#allocation254_spill] sm:$0xff]  ;;  %v9969_v25 = vld [vmem:[#allocation268_spill] sm:$0xff] }
 0x7ab   :  { %3124 = vrot.lane.b32.xlu0 %v7698_v48, %s3909_s16  ;;  %v1917_v12 = vsel %vm1887_vm0, %v3868_v36, %v9966_v4  ;;  %v2113_v32 = vsel %vm2087_vm5, %v2073_v60, %v9967_v51  ;;  %v2154_v16 = vsel %vm2127_vm6, %v2114_v54, %v9968_v15  ;;  %v2155_v50 = vsel %vm2127_vm6, %v2115_v26, %v9969_v25  ;;  %v3869_v23 = vld [vmem:[%s9235_s0 + $0x38] sm:$0x3]  ;;  %v9970_v17 = vld [vmem:[#allocation33_spill] sm:$0xff]  ;;  %v9973_v40 = vld [vmem:[#allocation307_spill] sm:$0xff] }
 0x7ac   :  { %v7718_v63 = vpop.permute.xlu2 %2895  ;;  %v7720_v53 = vpop.permute.xlu1 %2842  ;;  %v1916_v43 = vsel %vm1887_vm0, %v3869_v23, %v9970_v17  ;;  %v9971_v27 = vld [vmem:[#allocation264_spill] sm:$0xff]  ;;  %v9972_v22 = vld [vmem:[#allocation293_spill] sm:$0xff]  ;;  %v2195_v33 = vsel %vm2167_vm7, %v2155_v50, %v9973_v40  ;;  %v9975_v29 = vld [vmem:[#allocation303_spill] sm:$0xff] }
 0x7ad   :  { %v7728_v46 = vpop.permute.xlu0 %2840  ;;  %v2153_v20 = vsel %vm2127_vm6, %v2113_v32, %v9971_v27  ;;  %v2194_v21 = vsel %vm2167_vm7, %v2154_v16, %v9972_v22  ;;  %v3870_v18 = vld [vmem:[%s9235_s0 + $0x3c] sm:$0x3]  ;;  %v9974_v49 = vld [vmem:[#allocation37_spill] sm:$0xff]  ;;  %v9977_v14 = vld [vmem:[#allocation346_spill] sm:$0xff] }
 0x7ae   :  { %v1918_v8 = vsel %vm1887_vm0, %v3870_v18, %v9974_v49  ;;  %v2193_v0 = vsel %vm2167_vm7, %v2153_v20, %v9975_v29  ;;  %v9976_v45 = vld [vmem:[#allocation332_spill] sm:$0xff]  ;;  %v7771_v55 = vsel %vm2207_vm8, %v2195_v33, %v9977_v14  ;;  %v9979_v60 = vld [vmem:[#allocation62_spill] sm:$0xff]  ;;  %v9983_v32 = vld [vmem:[#allocation101_spill] sm:$0xff] }
 0x7af   :  { %v7767_v2 = vsel %vm2207_vm8, %v2194_v21, %v9976_v45  ;;  %9978 = vst [vmem:[#allocation594_spill] sm:$0xff] %v7771_v55  ;;  %v1957_v11 = vsel %vm1927_vm1, %v1917_v12, %v9979_v60  ;;  %v9980_v54 = vld [vmem:[#allocation76_spill] sm:$0xff]  ;;  %v9981_v26 = vld [vmem:[#allocation342_spill] sm:$0xff]  ;;  %v9984_v12 = vld [vmem:[#allocation115_spill] sm:$0xff] }
 0x7b0   :  { %v1958_v38 = vsel %vm1927_vm1, %v1918_v8, %v9980_v54  ;;  %v7779_v36 = vsel %vm2207_vm8, %v2193_v0, %v9981_v26  ;;  %v9982_v4 = vld [vmem:[#allocation72_spill] sm:$0xff]  ;;  %v1997_v15 = vsel %vm1967_vm2, %v1957_v11, %v9983_v32  ;;  %v9985_v25 = vld [vmem:[#allocation111_spill] sm:$0xff]  ;;  %v9987_v27 = vld [vmem:[#allocation154_spill] sm:$0xff] }
 0x7b1   :  { %v1956_v51 = vsel %vm1927_vm1, %v1916_v43, %v9982_v4  ;;  %v1998_v16 = vsel %vm1967_vm2, %v1958_v38, %v9984_v12  ;;  %v9986_v23 = vld [vmem:[#allocation140_spill] sm:$0xff]  ;;  %v9988_v21 = vld [vmem:[#allocation150_spill] sm:$0xff]  ;;  %v9989_v33 = vld [vmem:[#allocation179_spill] sm:$0xff] }
 0x7b2   :  { %3132 = vrot.lane.b32.xlu1 %v7767_v2, %s3909_s16  ;;  %3134 = vrot.lane.b32.xlu2 %v7771_v55, %s3909_s16  ;;  %v1996_v50 = vsel %vm1967_vm2, %v1956_v51, %v9985_v25  ;;  %v2037_v17 = vsel %vm2007_vm3, %v1997_v15, %v9986_v23  ;;  %v2038_v20 = vsel %vm2007_vm3, %v1998_v16, %v9987_v27  ;;  %v9990_v49 = vld [vmem:[#allocation193_spill] sm:$0xff]  ;;  %v9992_v60 = vld [vmem:[#allocation218_spill] sm:$0xff]  ;;  %v9993_v54 = vld [vmem:[#allocation232_spill] sm:$0xff] }
 0x7b3   :  { %3130 = vrot.lane.b32.xlu0 %v7779_v36, %s3909_s16  ;;  %v2036_v40 = vsel %vm2007_vm3, %v1996_v50, %v9988_v21  ;;  %v2077_v18 = vsel %vm2047_vm4, %v2037_v17, %v9989_v33  ;;  %v2078_v8 = vsel %vm2047_vm4, %v2038_v20, %v9990_v49  ;;  %v9991_v45 = vld [vmem:[#allocation189_spill] sm:$0xff]  ;;  %v9994_v4 = vld [vmem:[#allocation26_spill] sm:$0xff]  ;;  %v9997_v16 = vld [vmem:[#allocation271_spill] sm:$0xff] }
 0x7b4   :  { %v2765_v22 = vpop.permute.xlu2 %2764  ;;  %v7799_v43 = vpop.permute.xlu1 %2848  ;;  %v2076_v14 = vsel %vm2047_vm4, %v2036_v40, %v9991_v45  ;;  %v2117_v11 = vsel %vm2087_vm5, %v2077_v18, %v9992_v60  ;;  %v2118_v38 = vsel %vm2087_vm5, %v2078_v8, %v9993_v54  ;;  %v3871_v26 = vld [vmem:[%s9235_s0 + $0x40] sm:$0x3]  ;;  %v3872_v50 = vld [vmem:[%s9235_s0 + $0x3e] sm:$0x3]  ;;  %v9999_v27 = vld [vmem:[#allocation267_spill] sm:$0xff] }
 0x7b5   :  { %v7809_v29 = vsel %vm2087_vm5, %v7355_v57, %v2765_v22  ;;  %v7811_v0 = vpop.permute.xlu0 %2846  ;;  %v1920_v51 = vsel %vm1887_vm0, %v3871_v26, %v9994_v4  ;;  %v9995_v57 = vld [vmem:[#allocation228_spill] sm:$0xff]  ;;  %v9996_v15 = vld [vmem:[#allocation257_spill] sm:$0xff]  ;;  %v2158_v25 = vsel %vm2127_vm6, %v2118_v38, %v9997_v16  ;;  %v10001_v40 = vld [vmem:[#allocation310_spill] sm:$0xff] }
 0x7b6   :  { %v2116_v32 = vsel %vm2087_vm5, %v2076_v14, %v9995_v57  ;;  %v2157_v12 = vsel %vm2127_vm6, %v2117_v11, %v9996_v15  ;;  %v9998_v23 = vld [vmem:[#allocation36_spill] sm:$0xff]  ;;  %v2198_v33 = vsel %vm2167_vm7, %v2158_v25, %v10001_v40  ;;  %v3873_v18 = vld [vmem:[%s9235_s0 + $0x42] sm:$0x3]  ;;  %v10003_v45 = vld [vmem:[#allocation306_spill] sm:$0xff] }
 0x7b7   :  { %v1919_v17 = vsel %vm1887_vm0, %v3872_v50, %v9998_v23  ;;  %v2156_v20 = vsel %vm2127_vm6, %v2116_v32, %v9999_v27  ;;  %v10000_v22 = vld [vmem:[#allocation296_spill] sm:$0xff]  ;;  %v10004_v60 = vld [vmem:[#allocation335_spill] sm:$0xff]  ;;  %v10006_v54 = vld [vmem:[#allocation349_spill] sm:$0xff] }
 0x7b8   :  { %v2197_v21 = vsel %vm2167_vm7, %v2157_v12, %v10000_v22  ;;  %v10002_v49 = vld [vmem:[#allocation40_spill] sm:$0xff]  ;;  %v2196_v14 = vsel %vm2167_vm7, %v2156_v20, %v10003_v45  ;;  %v7854_v38 = vsel %vm2207_vm8, %v2198_v33, %v10006_v54  ;;  %v10008_v26 = vld [vmem:[#allocation65_spill] sm:$0xff]  ;;  %v10009_v57 = vld [vmem:[#allocation79_spill] sm:$0xff] }
 0x7b9   :  { %v1921_v8 = vsel %vm1887_vm0, %v3873_v18, %v10002_v49  ;;  %v7850_v11 = vsel %vm2207_vm8, %v2197_v21, %v10004_v60  ;;  %10007 = vst [vmem:[#allocation597_spill] sm:$0xff] %v7854_v38  ;;  %v1960_v4 = vsel %vm1927_vm1, %v1920_v51, %v10008_v26  ;;  %v10010_v15 = vld [vmem:[#allocation345_spill] sm:$0xff]  ;;  %v10012_v16 = vld [vmem:[#allocation75_spill] sm:$0xff]  ;;  %v10013_v50 = vld [vmem:[#allocation104_spill] sm:$0xff] }
 0x7ba   :  { %10005 = vst [vmem:[#allocation595_spill] sm:$0xff] %v7850_v11  ;;  %v1961_v32 = vsel %vm1927_vm1, %v1921_v8, %v10009_v57  ;;  %v7862_v12 = vsel %vm2207_vm8, %v2196_v14, %v10010_v15  ;;  %3138 = vrot.lane.b32.xlu1 %v7850_v11, %s3909_s16  ;;  %3140 = vrot.lane.b32.xlu2 %v7854_v38, %s3909_s16  ;;  %v10014_v51 = vld [vmem:[#allocation118_spill] sm:$0xff]  ;;  %v10016_v21 = vld [vmem:[#allocation143_spill] sm:$0xff]  ;;  %v10017_v33 = vld [vmem:[#allocation157_spill] sm:$0xff] }
 0x7bb   :  { %10011 = vst [vmem:[#allocation596_spill] sm:$0xff] %v7862_v12  ;;  %v1959_v25 = vsel %vm1927_vm1, %v1919_v17, %v10012_v16  ;;  %v2000_v23 = vsel %vm1967_vm2, %v1960_v4, %v10013_v50  ;;  %v2001_v27 = vsel %vm1967_vm2, %v1961_v32, %v10014_v51  ;;  %3136 = vrot.lane.b32.xlu0 %v7862_v12, %s3909_s16  ;;  %v10015_v20 = vld [vmem:[#allocation114_spill] sm:$0xff]  ;;  %v10018_v8 = vld [vmem:[#allocation153_spill] sm:$0xff]  ;;  %v10020_v54 = vld [vmem:[#allocation196_spill] sm:$0xff] }
 0x7bc   :  { %v1999_v22 = vsel %vm1967_vm2, %v1959_v25, %v10015_v20  ;;  %v2040_v40 = vsel %vm2007_vm3, %v2000_v23, %v10016_v21  ;;  %v2041_v18 = vsel %vm2007_vm3, %v2001_v27, %v10017_v33  ;;  %v7882_v49 = vpop.permute.xlu2 %2805  ;;  %v7884_v17 = vpop.permute.xlu1 %2887  ;;  %v10019_v14 = vld [vmem:[#allocation182_spill] sm:$0xff]  ;;  %v10021_v57 = vld [vmem:[#allocation192_spill] sm:$0xff]  ;;  %v10022_v15 = vld [vmem:[#allocation221_spill] sm:$0xff] }
 0x7bd   :  { %v2039_v45 = vsel %vm2007_vm3, %v1999_v22, %v10018_v8  ;;  %v2080_v60 = vsel %vm2047_vm4, %v2040_v40, %v10019_v14  ;;  %v2081_v26 = vsel %vm2047_vm4, %v2041_v18, %v10020_v54  ;;  %v7892_v4 = vpop.permute.xlu0 %2885  ;;  %v10023_v25 = vld [vmem:[#allocation235_spill] sm:$0xff]  ;;  %v3874_v23 = vld [vmem:[%s9235_s0 + $0x46] sm:$0x3]  ;;  %v10026_v21 = vld [vmem:[#allocation260_spill] sm:$0xff] }
 0x7be   :  { %v2079_v32 = vsel %vm2047_vm4, %v2039_v45, %v10021_v57  ;;  %v2120_v16 = vsel %vm2087_vm5, %v2080_v60, %v10022_v15  ;;  %v2121_v50 = vsel %vm2087_vm5, %v2081_v26, %v10023_v25  ;;  %v10024_v51 = vld [vmem:[#allocation29_spill] sm:$0xff]  ;;  %v10025_v20 = vld [vmem:[#allocation231_spill] sm:$0xff]  ;;  %v10027_v33 = vld [vmem:[#allocation274_spill] sm:$0xff] }
 0x7bf   :  { %v1923_v27 = vsel %vm1887_vm0, %v3874_v23, %v10024_v51  ;;  %v2119_v22 = vsel %vm2087_vm5, %v2079_v32, %v10025_v20  ;;  %v2160_v40 = vsel %vm2127_vm6, %v2120_v16, %v10026_v21  ;;  %v2161_v18 = vsel %vm2127_vm6, %v2121_v50, %v10027_v33  ;;  %v3875_v8 = vld [vmem:[%s9235_s0 + $0x44] sm:$0x3]  ;;  %v10028_v45 = vld [vmem:[#allocation39_spill] sm:$0xff]  ;;  %v10029_v60 = vld [vmem:[#allocation270_spill] sm:$0xff] }
 0x7c0   :  { %v1922_v14 = vsel %vm1887_vm0, %v3875_v8, %v10028_v45  ;;  %v2159_v54 = vsel %vm2127_vm6, %v2119_v22, %v10029_v60  ;;  %v10030_v26 = vld [vmem:[#allocation299_spill] sm:$0xff]  ;;  %v10031_v32 = vld [vmem:[#allocation313_spill] sm:$0xff]  ;;  %v3876_v16 = vld [vmem:[%s9235_s0 + $0x48] sm:$0x3] }
 0x7c1   :  { %v2200_v57 = vsel %vm2167_vm7, %v2160_v40, %v10030_v26  ;;  %v2201_v15 = vsel %vm2167_vm7, %v2161_v18, %v10031_v32  ;;  %v10032_v25 = vld [vmem:[#allocation43_spill] sm:$0xff]  ;;  %v10033_v23 = vld [vmem:[#allocation309_spill] sm:$0xff]  ;;  %v10034_v20 = vld [vmem:[#allocation338_spill] sm:$0xff] }
 0x7c2   :  { %v1924_v50 = vsel %vm1887_vm0, %v3876_v16, %v10032_v25  ;;  %v2199_v51 = vsel %vm2167_vm7, %v2159_v54, %v10033_v23  ;;  %v7931_v21 = vsel %vm2207_vm8, %v2200_v57, %v10034_v20  ;;  %v10036_v22 = vld [vmem:[#allocation352_spill] sm:$0xff]  ;;  %v10039_v8 = vld [vmem:[#allocation82_spill] sm:$0xff]  ;;  %v10043_v32 = vld [vmem:[#allocation107_spill] sm:$0xff] }
 0x7c3   :  { %10035 = vst [vmem:[#allocation11_spill] sm:$0xff] %v7931_v21  ;;  %v7935_v40 = vsel %vm2207_vm8, %v2201_v15, %v10036_v22  ;;  %v10038_v33 = vld [vmem:[#allocation68_spill] sm:$0xff]  ;;  %v1964_v45 = vsel %vm1927_vm1, %v1924_v50, %v10039_v8  ;;  %3144 = vrot.lane.b32.xlu1 %v7931_v21, %s3909_s16  ;;  %v10042_v54 = vld [vmem:[#allocation78_spill] sm:$0xff]  ;;  %v10045_v25 = vld [vmem:[#allocation117_spill] sm:$0xff] }
 0x7c4   :  { %10037 = vst [vmem:[#allocation509_spill] sm:$0xff] %v7935_v40  ;;  %v1963_v18 = vsel %vm1927_vm1, %v1923_v27, %v10038_v33  ;;  %v10040_v60 = vld [vmem:[#allocation348_spill] sm:$0xff]  ;;  %3146 = vrot.lane.b32.xlu2 %v7935_v40, %s3909_s16  ;;  %v1962_v57 = vsel %vm1927_vm1, %v1922_v14, %v10042_v54  ;;  %v10044_v27 = vld [vmem:[#allocation121_spill] sm:$0xff]  ;;  %v10046_v23 = vld [vmem:[#allocation146_spill] sm:$0xff]  ;;  %v7963_v33 = vpop.permute.xlu2 %2811  ;;  %v7965_v14 = vpop.permute.xlu1 %2893 }
 0x7c5   :  { %v7943_v26 = vsel %vm2207_vm8, %v2199_v51, %v10040_v60  ;;  %v2003_v15 = vsel %vm1967_vm2, %v1963_v18, %v10043_v32  ;;  %v2004_v16 = vsel %vm1967_vm2, %v1964_v45, %v10044_v27  ;;  %v2002_v50 = vsel %vm1967_vm2, %v1962_v57, %v10045_v25  ;;  %v10047_v20 = vld [vmem:[#allocation160_spill] sm:$0xff]  ;;  %v10049_v45 = vld [vmem:[#allocation185_spill] sm:$0xff]  ;;  %v10050_v54 = vld [vmem:[#allocation199_spill] sm:$0xff]  ;;  %v7973_v57 = vpop.permute.xlu0 %2891 }
 0x7c6   :  { %10041 = vst [vmem:[#allocation25_spill] sm:$0xff] %v7943_v26  ;;  %3142 = vrot.lane.b32.xlu0 %v7943_v26, %s3909_s16  ;;  %v2043_v51 = vsel %vm2007_vm3, %v2003_v15, %v10046_v23  ;;  %v2044_v22 = vsel %vm2007_vm3, %v2004_v16, %v10047_v20  ;;  %v10048_v18 = vld [vmem:[#allocation156_spill] sm:$0xff]  ;;  %v10051_v27 = vld [vmem:[#allocation195_spill] sm:$0xff]  ;;  %v10053_v23 = vld [vmem:[#allocation238_spill] sm:$0xff] }
 0x7c7   :  { %v2042_v8 = vsel %vm2007_vm3, %v2002_v50, %v10048_v18  ;;  %v2083_v60 = vsel %vm2047_vm4, %v2043_v51, %v10049_v45  ;;  %v2084_v32 = vsel %vm2047_vm4, %v2044_v22, %v10050_v54  ;;  %v10052_v25 = vld [vmem:[#allocation224_spill] sm:$0xff]  ;;  %v10054_v40 = vld [vmem:[#allocation234_spill] sm:$0xff]  ;;  %v10055_v18 = vld [vmem:[#allocation263_spill] sm:$0xff] }
 0x7c8   :  { %v2082_v15 = vsel %vm2047_vm4, %v2042_v8, %v10051_v27  ;;  %v2123_v16 = vsel %vm2087_vm5, %v2083_v60, %v10052_v25  ;;  %v2124_v20 = vsel %vm2087_vm5, %v2084_v32, %v10053_v23  ;;  %v10056_v45 = vld [vmem:[#allocation277_spill] sm:$0xff]  ;;  %v10058_v38 = vld [vmem:[#allocation302_spill] sm:$0xff]  ;;  %v10059_v27 = vld [vmem:[#allocation316_spill] sm:$0xff] }
 0x7c9   :  { %v2122_v50 = vsel %vm2087_vm5, %v2082_v15, %v10054_v40  ;;  %v2163_v51 = vsel %vm2127_vm6, %v2123_v16, %v10055_v18  ;;  %v2164_v22 = vsel %vm2127_vm6, %v2124_v20, %v10056_v45  ;;  %v10057_v54 = vld [vmem:[#allocation273_spill] sm:$0xff]  ;;  %v3877_v32 = vld [vmem:[%s9235_s0 + $0x4c] sm:$0x3]  ;;  %v10060_v40 = vld [vmem:[#allocation32_spill] sm:$0xff] }
 0x7ca   :  { %v2162_v21 = vsel %vm2127_vm6, %v2122_v50, %v10057_v54  ;;  %v2203_v8 = vsel %vm2167_vm7, %v2163_v51, %v10058_v38  ;;  %v2204_v60 = vsel %vm2167_vm7, %v2164_v22, %v10059_v27  ;;  %v1926_v15 = vsel %vm1887_vm0, %v3877_v32, %v10060_v40  ;;  %v10061_v25 = vld [vmem:[#allocation312_spill] sm:$0xff]  ;;  %v10062_v23 = vld [vmem:[#allocation341_spill] sm:$0xff]  ;;  %v10064_v50 = vld [vmem:[#allocation355_spill] sm:$0xff] }
 0x7cb   :  { %v2202_v16 = vsel %vm2167_vm7, %v2162_v21, %v10061_v25  ;;  %v8002_v20 = vsel %vm2207_vm8, %v2203_v8, %v10062_v23  ;;  %v8006_v38 = vsel %vm2207_vm8, %v2204_v60, %v10064_v50  ;;  %v3878_v18 = vld [vmem:[%s9235_s0 + $0x4a] sm:$0x3]  ;;  %v10067_v22 = vld [vmem:[#allocation71_spill] sm:$0xff]  ;;  %v10070_v8 = vld [vmem:[#allocation81_spill] sm:$0xff] }
 0x7cc   :  { %10063 = vst [vmem:[#allocation516_spill] sm:$0xff] %v8002_v20  ;;  %v10066_v51 = vld [vmem:[#allocation42_spill] sm:$0xff]  ;;  %v1966_v54 = vsel %vm1927_vm1, %v1926_v15, %v10067_v22  ;;  %v10068_v27 = vld [vmem:[#allocation351_spill] sm:$0xff]  ;;  %3150 = vrot.lane.b32.xlu1 %v8002_v20, %s3909_s16  ;;  %3152 = vrot.lane.b32.xlu2 %v8006_v38, %s3909_s16  ;;  %v10072_v15 = vld [vmem:[#allocation120_spill] sm:$0xff]  ;;  %v8033_v50 = vpop.permute.xlu2 %2852 }
 0x7cd   :  { %10065 = vst [vmem:[#allocation21_spill] sm:$0xff] %v8006_v38  ;;  %v1925_v45 = vsel %vm1887_vm0, %v3878_v18, %v10066_v51  ;;  %v8017_v21 = vsel %vm2207_vm8, %v2202_v16, %v10068_v27  ;;  %v10071_v32 = vld [vmem:[#allocation110_spill] sm:$0xff]  ;;  %v10073_v16 = vld [vmem:[#allocation149_spill] sm:$0xff]  ;;  %v8035_v18 = vpop.permute.xlu1 %2762  ;;  %v10074_v51 = vld [vmem:[#allocation159_spill] sm:$0xff] }
 0x7ce   :  { %10069 = vst [vmem:[#allocation510_spill] sm:$0xff] %v8017_v21  ;;  %v1965_v60 = vsel %vm1927_vm1, %v1925_v45, %v10070_v8  ;;  %v2006_v40 = vsel %vm1967_vm2, %v1966_v54, %v10071_v32  ;;  %3148 = vrot.lane.b32.xlu0 %v8017_v21, %s3909_s16  ;;  %v10075_v45 = vld [vmem:[#allocation188_spill] sm:$0xff]  ;;  %v8041_v54 = vpop.permute.xlu0 %2897  ;;  %v10076_v8 = vld [vmem:[#allocation198_spill] sm:$0xff]  ;;  %v10077_v38 = vld [vmem:[#allocation227_spill] sm:$0xff] }
 0x7cf   :  { %v2005_v25 = vsel %vm1967_vm2, %v1965_v60, %v10072_v15  ;;  %v2046_v23 = vsel %vm2007_vm3, %v2006_v40, %v10073_v16  ;;  %v10078_v15 = vld [vmem:[#allocation237_spill] sm:$0xff]  ;;  %v10079_v16 = vld [vmem:[#allocation266_spill] sm:$0xff]  ;;  %v10080_v20 = vld [vmem:[#allocation276_spill] sm:$0xff] }
 0x7d0   :  { %v2045_v22 = vsel %vm2007_vm3, %v2005_v25, %v10074_v51  ;;  %v2086_v27 = vsel %vm2047_vm4, %v2046_v23, %v10075_v45  ;;  %v10081_v51 = vld [vmem:[#allocation305_spill] sm:$0xff]  ;;  %v10082_v45 = vld [vmem:[#allocation315_spill] sm:$0xff]  ;;  %v10083_v55 = vld [vmem:[#allocation344_spill] sm:$0xff] }
 0x7d1   :  { %v2085_v32 = vsel %vm2047_vm4, %v2045_v22, %v10076_v8  ;;  %v2126_v60 = vsel %vm2087_vm5, %v2086_v27, %v10077_v38  ;;  %v10085_v38 = vld [vmem:[#allocation354_spill] sm:$0xff]  ;;  %v10107_v10 = vld [vmem:[#allocation45_spill] sm:$0xff] }
 0x7d2   :  { %v2125_v40 = vsel %vm2087_vm5, %v2085_v32, %v10078_v15  ;;  %v2166_v21 = vsel %vm2127_vm6, %v2126_v60, %v10079_v16  ;;  %v3063_v16 = vsel %vm2207_vm8, %v7583_v42, %v7965_v14  ;;  %v3883_v14 = vld [vmem:[%s9235_s0 + $0x4] sm:$0x3] }
 0x7d3   :  { %v2165_v25 = vsel %vm2127_vm6, %v2125_v40, %v10080_v20  ;;  %v2206_v23 = vsel %vm2167_vm7, %v2166_v21, %v10081_v51  ;;  %v3880_v40 = vld [vmem:[%s9235_s0 + $0xa] sm:$0x3] }
 0x7d4   :  { %v2205_v26 = vsel %vm2167_vm7, %v2165_v25, %v10082_v45  ;;  %v8059_v22 = vsel %vm2207_vm8, %v2206_v23, %v10083_v55  ;;  %3158 = vrot.lane.b32.xlu2 %v7440_v3, %s3909_s16  ;;  %v8071_v20 = vpop.permute.xlu2 %2858  ;;  %v3042_v55 = vsel %vm2167_vm7, %v7437_v9, %v7647_v34  ;;  %v3060_v3 = vsel %vm2207_vm8, %v7501_v62, %v7884_v17  ;;  %v3879_v17 = vld [vmem:[%s9235_s0 + $0x8] sm:$0x3]  ;;  %v10089_v25 = vld [vmem:[#allocation4_spill] sm:$0xff]  ;;  %v3882_v23 = vld [vmem:[%s9235_s0 + $0x16] sm:$0x3] }
 0x7d5   :  { %10084 = vst [vmem:[#allocation50_spill] sm:$0xff] %v8059_v22  ;;  %v8063_v27 = vsel %vm2207_vm8, %v2205_v26, %v10085_v38  ;;  %3156 = vrot.lane.b32.xlu1 %v8059_v22, %s3909_s16  ;;  %v8073_v21 = vpop.permute.xlu1 %2803  ;;  %v3043_v26 = vsel %vm2167_vm7, %v7392_v59, %v7639_v56  ;;  %v3058_v60 = vsel %vm2207_vm8, %v3042_v55, %v7556_v52  ;;  %v15_v56 = vld [vmem:[%s9235_s0] sm:$0x3] }
 0x7d6   :  { %10086 = vst [vmem:[#allocation64_spill] sm:$0xff] %v8063_v27  ;;  %3154 = vrot.lane.b32.xlu0 %v8063_v27, %s3909_s16  ;;  %v2802_v8 = vpop.permute.xlu0 %2801  ;;  %v3059_v32 = vsel %vm2207_vm8, %v3043_v26, %v7892_v4  ;;  %v3045_v62 = vsel %vm2167_vm7, %v7484_v41, %v7728_v46  ;;  %v3046_v52 = vsel %vm2167_vm7, %v7405_v39, %v7720_v53  ;;  %v10087_v4 = vld [vmem:[#allocation2_spill] sm:$0xff]  ;;  %v10088_v41 = vld [vmem:[#allocation3_spill] sm:$0xff]  ;;  %v10090_v45 = vld [vmem:[#allocation5_spill] sm:$0xff] }
 0x7d7   :  { %v1892_v15 = vsel %vm1887_vm0, %v3879_v17, %v10087_v4  ;;  %v1893_v46 = vsel %vm1887_vm0, %v3880_v40, %v10088_v41  ;;  %v3062_v39 = vsel %vm2207_vm8, %v3046_v52, %v7973_v57  ;;  %v3881_v53 = vld [vmem:[%s9235_s0 + $0x10] sm:$0x3]  ;;  %v1899_v38 = vsel %vm1887_vm0, %v3882_v23, %v10090_v45  ;;  %v10091_v57 = vld [vmem:[#allocation6_spill] sm:$0xff]  ;;  %v3889_v45 = vld [vmem:[%s9235_s0 + $0x14] sm:$0x3] }
 0x7d8   :  { %v1896_v51 = vsel %vm1887_vm0, %v3881_v53, %v10089_v25  ;;  %v3061_v42 = vsel %vm2207_vm8, %v3045_v62, %v7637_v30  ;;  %v1890_v55 = vsel %vm1887_vm0, %v3883_v14, %v10091_v57  ;;  %v10092_v26 = vld [vmem:[#allocation7_spill] sm:$0xff]  ;;  %v3885_v30 = vld [vmem:[%s9235_s0 + $0x6] sm:$0x3]  ;;  %v10095_v4 = vld [vmem:[#allocation10_spill] sm:$0xff] }
 0x7d9   :  { %v10094_v62 = vld [vmem:[#allocation9_spill] sm:$0xff]  ;;  %v3887_v41 = vld [vmem:[%s9235_s0 + $0xe] sm:$0x3]  ;;  %v3888_v53 = vld [vmem:[%s9235_s0 + $0xc] sm:$0x3] }
 0x7da   :  { %v1891_v17 = vsel %vm1887_vm0, %v3885_v30, %v10094_v62  ;;  %v10097_v25 = vld [vmem:[#allocation13_spill] sm:$0xff]  ;;  %v3891_v62 = vld [vmem:[%s9235_s0 + $0x1a] sm:$0x3]  ;;  %v10104_v27 = vld [vmem:[#allocation38_spill] sm:$0xff] }
 0x7db   :  { %v1894_v23 = vsel %vm1887_vm0, %v3888_v53, %v10097_v25  ;;  %v3034_v25 = vsel %vm2127_vm6, %v7352_v61, %v2802_v8  ;;  %v1933_v22 = vsel %vm1927_vm1, %v1893_v46, %v10104_v27  ;;  %v10106_v8 = vld [vmem:[#allocation44_spill] sm:$0xff]  ;;  %v10109_v46 = vld [vmem:[#allocation47_spill] sm:$0xff] }
 0x7dc   :  { %3164 = vrot.lane.b32.xlu2 %v3060_v3, %s3909_s16  ;;  %v8091_v9 = vpop.permute.xlu2 %2899  ;;  %v1888_v3 = vsel %vm1887_vm0, %v15_v56, %v10092_v26  ;;  %v3886_v56 = vld [vmem:[%s9235_s0 + $0x2] sm:$0x3]  ;;  %v8208_v12 = vsel %vm1927_vm1, %v1899_v38, %v10106_v8 }
 0x7dd   :  { %3162 = vrot.lane.b32.xlu1 %v3059_v32, %s3909_s16  ;;  %v8093_v34 = vpop.permute.xlu1 %2809  ;;  %v3884_v32 = vld [vmem:[%s9235_s0 + $0x1c] sm:$0x3]  ;;  %v1889_v40 = vsel %vm1887_vm0, %v3886_v56, %v10095_v4  ;;  %v10100_v56 = vld [vmem:[#allocation18_spill] sm:$0xff] }
 0x7de   :  { %3160 = vrot.lane.b32.xlu0 %v3058_v60, %s3909_s16  ;;  %v8095_v59 = vpop.permute.xlu0 %2807  ;;  %v10093_v60 = vld [vmem:[#allocation8_spill] sm:$0xff]  ;;  %v1901_v4 = vsel %vm1887_vm0, %v3891_v62, %v10100_v56  ;;  %v10103_v62 = vld [vmem:[#allocation35_spill] sm:$0xff]  ;;  %v8212_v11 = vsel %vm1927_vm1, %v1889_v40, %v10107_v10  ;;  %v3049_v10 = vsel %vm2167_vm7, %v7422_v6, %v7799_v43 }
 0x7df   :  { %v1902_v52 = vsel %vm1887_vm0, %v3884_v32, %v10093_v60  ;;  %v3890_v32 = vld [vmem:[%s9235_s0 + $0x12] sm:$0x3]  ;;  %v10099_v60 = vld [vmem:[#allocation16_spill] sm:$0xff]  ;;  %v1930_v56 = vsel %vm1927_vm1, %v1890_v55, %v10103_v62  ;;  %v3048_v55 = vsel %vm2167_vm7, %v7566_v37, %v7811_v0  ;;  %v10111_v37 = vld [vmem:[#allocation113_spill] sm:$0xff] }
 0x7e0   :  { %v1897_v30 = vsel %vm1887_vm0, %v3890_v32, %v10099_v60  ;;  %v10102_v32 = vld [vmem:[#allocation22_spill] sm:$0xff]  ;;  %v3391_v40 = vld [vmem:[%s9236_s1 + $0x30] sm:$0xf]  ;;  %v3064_v43 = vsel %vm2207_vm8, %v3048_v55, %v7718_v63 }
 0x7e1   :  { %v10118_v55 = vld [vmem:[#allocation230_spill] sm:$0xff] }
 0x7e4   :  { %3170 = vrot.lane.b32.xlu2 %v3063_v16, %s3909_s16  ;;  %v10096_v16 = vld [vmem:[#allocation12_spill] sm:$0xff]  ;;  %v8173_v57 = vpop.permute.xlu2 %2905 }
 0x7e5   :  { %3168 = vrot.lane.b32.xlu1 %v3062_v39, %s3909_s16  ;;  %v1895_v39 = vsel %vm1887_vm0, %v3887_v41, %v10096_v16  ;;  %v2851_v26 = vpop.permute.xlu1 %2850  ;;  %v3892_v41 = vld [vmem:[%s9235_s0 + $0x18] sm:$0x3]  ;;  %v10101_v16 = vld [vmem:[#allocation19_spill] sm:$0xff] }
 0x7e6   :  { %3166 = vrot.lane.b32.xlu0 %v3061_v42, %s3909_s16  ;;  %v10098_v42 = vld [vmem:[#allocation15_spill] sm:$0xff]  ;;  %v1900_v53 = vsel %vm1887_vm0, %v3892_v41, %v10101_v16  ;;  %v3050_v41 = vsel %vm2167_vm7, %v3034_v25, %v2851_v26  ;;  %v10105_v16 = vld [vmem:[#allocation41_spill] sm:$0xff]  ;;  %v8223_v26 = vsel %vm1927_vm1, %v1902_v52, %v10109_v46  ;;  %v3417_v25 = vunpack.c.l.b16 %v3391_v40  ;;  %v10117_v46 = vld [vmem:[#allocation52_spill] sm:$0xff] }
 0x7e7   :  { %v1898_v14 = vsel %vm1887_vm0, %v3889_v45, %v10098_v42  ;;  %v8192_v45 = vpop.permute.xlu0 %2813  ;;  %v3893_v42 = vld [vmem:[%s9235_s0 + $0x1e] sm:$0x3]  ;;  %v1936_v61 = vsel %vm1927_vm1, %v1896_v51, %v10105_v16  ;;  %v10110_v51 = vld [vmem:[#allocation74_spill] sm:$0xff]  ;;  %v3066_v52 = vsel %vm2207_vm8, %v3050_v41, %v8091_v9  ;;  %v10114_v16 = vld [vmem:[#allocation49_spill] sm:$0xff]  ;;  %v8262_v63 = vsel %vm1927_vm1, %v1894_v23, %v10117_v46 }
 0x7e8   :  { %v1903_v60 = vsel %vm1887_vm0, %v3893_v42, %v10102_v32  ;;  %v10108_v42 = vld [vmem:[#allocation46_spill] sm:$0xff]  ;;  %v1970_v38 = vsel %vm1967_vm2, %v1930_v56, %v10110_v51  ;;  %v10112_v32 = vld [vmem:[#allocation48_spill] sm:$0xff]  ;;  %v10115_v9 = vld [vmem:[#allocation51_spill] sm:$0xff]  ;;  %v3037_v40 = vsel %vm2127_vm6, %v7368_v31, %v8095_v59  ;;  %vm3229_vm0 = vcmask 523264  }
 0x7e9   :  { %v8219_v27 = vsel %vm1927_vm1, %v1888_v3, %v10108_v42  ;;  %v2010_v0 = vsel %vm2007_vm3, %v1970_v38, %v10111_v37  ;;  %v3065_v3 = vsel %vm2207_vm8, %v3049_v10, %v8041_v54  ;;  %v8241_v62 = vsel %vm1927_vm1, %v1892_v15, %v10112_v32  ;;  %v10113_v56 = vld [vmem:[#allocation152_spill] sm:$0xff]  ;;  %v10116_v15 = vld [vmem:[#allocation191_spill] sm:$0xff] }
 0x7ea   :  { %v2050_v6 = vsel %vm2047_vm4, %v2010_v0, %v10113_v56  ;;  %v8251_v54 = vsel %vm1927_vm1, %v1891_v17, %v10114_v16  ;;  %v8255_v41 = vsel %vm1927_vm1, %v1895_v39, %v10115_v9  ;;  %v3424_v42 = vpack.c.b16 %v3417_v25, %v3417_v25  ;;  %v10119_v39 = vld [vmem:[#allocation269_spill] sm:$0xff]  ;;  %v10120_v0 = vld [vmem:[#allocation54_spill] sm:$0xff]  ;;  %v10122_v56 = vld [vmem:[#allocation55_spill] sm:$0xff] }
 0x7eb   :  { %v2090_v8 = vsel %vm2087_vm5, %v2050_v6, %v10116_v15  ;;  %v1937_v6 = vsel %vm1927_vm1, %v1897_v30, %v10122_v56  ;;  %v10124_v59 = vld [vmem:[#allocation347_spill] sm:$0xff]  ;;  %v10125_v9 = vld [vmem:[#allocation58_spill] sm:$0xff] }
 0x7ec   :  { %3176 = vrot.lane.b32.xlu2 %v3066_v52, %s3909_s16  ;;  %v2130_v51 = vsel %vm2127_vm6, %v2090_v8, %v10118_v55  ;;  %v8266_v17 = vpop.permute.xlu2 %2911  ;;  %v3449_v23 = vsel %vm3447_vm10, %v3424_v42, 0  ;;  %v10121_v52 = vld [vmem:[#allocation308_spill] sm:$0xff]  ;;  %v1940_v15 = vsel %vm1927_vm1, %v1900_v53, %v10125_v9  ;;  %v10126_v8 = vld [vmem:[#allocation77_spill] sm:$0xff]  ;;  %v10127_v30 = vld [vmem:[#allocation386_spill] sm:$0xff] }
 0x7ed   :  { %3174 = vrot.lane.b32.xlu1 %v3065_v3, %s3909_s16  ;;  %v2857_v38 = vpop.permute.xlu1 %2856  ;;  %v2170_v10 = vsel %vm2167_vm7, %v2130_v51, %v10119_v39  ;;  %v1938_v3 = vsel %vm1927_vm1, %v1898_v14, %v10120_v0  ;;  %3452 = vmatpush.bf16.msra.mxu0 %v3449_v23  ;;  %v3752_v14 = vld [vmem:[%s9236_s1 + $0x28] sm:$0xff]  ;;  %v1973_v42 = vsel %vm1967_vm2, %v1933_v22, %v10126_v8  ;;  %v10129_v51 = vld [vmem:[#allocation425_spill] sm:$0xff] }
 0x7ee   :  { %3172 = vrot.lane.b32.xlu0 %v3064_v43, %s3909_s16  ;;  %v2210_v25 = vsel %vm2207_vm8, %v2170_v10, %v10121_v52  ;;  %v3053_v32 = vsel %vm2167_vm7, %v3037_v40, %v2857_v38  ;;  %3753 = vmatpush.bf16.msra.mxu1 %v3449_v23  ;;  %v10123_v43 = vld [vmem:[#allocation57_spill] sm:$0xff]  ;;  %v10131_v40 = vld [vmem:[#allocation155_spill] sm:$0xff]  ;;  %v10133_v52 = vld [vmem:[#allocation80_spill] sm:$0xff] }
 0x7ef   :  { %v8273_v37 = vpop.permute.xlu0 %2854  ;;  %v1941_v31 = vsel %vm1927_vm1, %v1901_v4, %v10123_v43  ;;  %v2250_v16 = vsel %vm2247_vm9, %v2210_v25, %v10124_v59  ;;  %3754 = vmatpush.bf16.msra.mxu2 %v3449_v23  ;;  %3755 = vmatpush.bf16.msra.mxu3 %v3449_v23  ;;  %v10128_v4 = vld [vmem:[#allocation116_spill] sm:$0xff]  ;;  %v3069_v39 = vsel %vm2207_vm8, %v3053_v32, %v8173_v57  ;;  %v10130_v10 = vld [vmem:[#allocation61_spill] sm:$0xff]  ;;  %v10134_v56 = vld [vmem:[#allocation194_spill] sm:$0xff] }
 0x7f0   :  { %v2290_v46 = vsel %vm2287_vm11, %v2250_v16, %v10127_v30  ;;  %v2013_v55 = vsel %vm2007_vm3, %v1973_v42, %v10128_v4  ;;  %v1943_v53 = vsel %vm1927_vm1, %v1903_v60, %v10130_v10  ;;  %v10132_v23 = vld [vmem:[#allocation464_spill] sm:$0xff]  ;;  %v1976_v25 = vsel %vm1967_vm2, %v1936_v61, %v10133_v52  ;;  %v10135_v57 = vld [vmem:[#allocation503_spill] sm:$0xff]  ;;  %v10138_v8 = vld [vmem:[#allocation233_spill] sm:$0xff] }
 0x7f1   :  { %v2330_v38 = vsel %vm2327_vm12, %v2290_v46, %v10129_v51  ;;  %v2053_v22 = vsel %vm2047_vm4, %v2013_v55, %v10131_v40  ;;  %3453 = vmatpush.bf16.msra.mxu0 %v3752_v14  ;;  %v10136_v60 = vld [vmem:[#allocation83_spill] sm:$0xff]  ;;  %v10137_v16 = vld [vmem:[#allocation84_spill] sm:$0xff]  ;;  %v10140_v55 = vld [vmem:[#allocation85_spill] sm:$0xff]  ;;  %vm3431_vm1 = vcmask 850944  }
 0x7f2   :  { %v2370_v0 = vsel %vm2367_vm13, %v2330_v38, %v10132_v23  ;;  %v2093_v43 = vsel %vm2087_vm5, %v2053_v22, %v10134_v56  ;;  %3756 = vmatpush.bf16.msra.mxu1 %v3752_v14  ;;  %v1979_v59 = vsel %vm1967_vm2, %v8208_v12, %v10136_v60  ;;  %v1969_v9 = vsel %vm1967_vm2, %v8212_v11, %v10137_v16  ;;  %v10139_v61 = vld [vmem:[#allocation548_spill] sm:$0xff]  ;;  %v3751_v40 = vld [vmem:[%s9236_s1 + $0x20] sm:$0xff] }
 0x7f3   :  { %v2410_v32 = vsel %vm2407_vm14, %v2370_v0, %v10135_v57  ;;  %3757 = vmatpush.bf16.msra.mxu2 %v3752_v14  ;;  %v2133_v42 = vsel %vm2127_vm6, %v2093_v43, %v10138_v8  ;;  %3758 = vmatpush.bf16.msra.mxu3 %v3752_v14  ;;  %v1968_v51 = vsel %vm1967_vm2, %v8219_v27, %v10140_v55  ;;  %v10141_v38 = vld [vmem:[#allocation272_spill] sm:$0xff]  ;;  %v10142_v14 = vld [vmem:[#allocation86_spill] sm:$0xff]  ;;  %v10143_v27 = vld [vmem:[#allocation87_spill] sm:$0xff] }
 0x7f4   :  { %3182 = vrot.lane.b32.xlu2 %v3069_v39, %s3909_s16  ;;  %v2450_v30 = vsel %vm2447_vm15, %v2410_v32, %v10139_v61  ;;  %v3117_v4 = vpop.permute.xlu2 %3116  ;;  %v2173_v12 = vsel %vm2167_vm7, %v2133_v42, %v10141_v38  ;;  %v3040_v11 = vsel %vm2127_vm6, %v7809_v29, %v8192_v45  ;;  %v1982_v22 = vsel %vm1967_vm2, %v8223_v26, %v10142_v14  ;;  %v10144_v0 = vld [vmem:[#allocation311_spill] sm:$0xff]  ;;  %v10145_v45 = vld [vmem:[#allocation88_spill] sm:$0xff]  ;;  %v10146_v43 = vld [vmem:[#allocation90_spill] sm:$0xff] }
 0x7f5   :  { %v2863_v46 = vpop.permute.xlu1 %2862  ;;  %v3232_v39 = vsel %vm3229_vm0, %v2450_v30, %v3117_v4  ;;  %v1972_v23 = vsel %vm1967_vm2, %v8241_v62, %v10143_v27  ;;  %v2213_v52 = vsel %vm2207_vm8, %v2173_v12, %v10144_v0  ;;  %v1971_v56 = vsel %vm1967_vm2, %v8251_v54, %v10145_v45  ;;  %v10147_v32 = vld [vmem:[#allocation350_spill] sm:$0xff]  ;;  %3454 = vmatpush.bf16.msra.mxu0 %v3751_v40  ;;  %v10148_v62 = vld [vmem:[#allocation91_spill] sm:$0xff]  ;;  %v10149_v16 = vld [vmem:[#allocation93_spill] sm:$0xff] }
 0x7f6   :  { %v3056_v29 = vsel %vm2167_vm7, %v3040_v11, %v2863_v46  ;;  %3312 = vst [vmem:[#allocation1 + $0x2] ss:$4 sm:$0xff] %v3232_v39  ;;  %v1975_v57 = vsel %vm1967_vm2, %v8255_v41, %v10146_v43  ;;  %v2253_v26 = vsel %vm2247_vm9, %v2213_v52, %v10147_v32  ;;  %3759 = vmatpush.bf16.msra.mxu1 %v3751_v40  ;;  %v10150_v42 = vld [vmem:[#allocation389_spill] sm:$0xff]  ;;  %v10151_v54 = vld [vmem:[#allocation94_spill] sm:$0xff]  ;;  %v10152_v30 = vld [vmem:[#allocation96_spill] sm:$0xff] }
 0x7f7   :  { %v8333_v10 = vpop.permute.xlu0 %2860  ;;  %v1974_v60 = vsel %vm1967_vm2, %v8262_v63, %v10148_v62  ;;  %v1978_v8 = vsel %vm1967_vm2, %v1938_v3, %v10149_v16  ;;  %v2293_v61 = vsel %vm2287_vm11, %v2253_v26, %v10150_v42  ;;  %3760 = vmatpush.bf16.msra.mxu2 %v3751_v40  ;;  %3761 = vmatpush.bf16.msra.mxu3 %v3751_v40  ;;  %v10153_v4 = vld [vmem:[#allocation428_spill] sm:$0xff]  ;;  %v10154_v38 = vld [vmem:[#allocation97_spill] sm:$0xff]  ;;  %v10158_v27 = vld [vmem:[#allocation506_spill] sm:$0xff] }
 0x7f8   :  { %v1977_v41 = vsel %vm1967_vm2, %v1937_v6, %v10151_v54  ;;  %v1981_v46 = vsel %vm1967_vm2, %v1941_v31, %v10152_v30  ;;  %v2333_v55 = vsel %vm2327_vm12, %v2293_v61, %v10153_v4  ;;  %v3072_v63 = vsel %vm2207_vm8, %v3056_v29, %v8266_v17  ;;  %v3750_v3 = vld [vmem:[%s9236_s1 + $0x18] sm:$0xff]  ;;  %v10156_v6 = vld [vmem:[#allocation467_spill] sm:$0xff]  ;;  %v10163_v42 = vld [vmem:[#allocation125_spill] sm:$0xff] }
 0x7f9   :  { %v1980_v12 = vsel %vm1967_vm2, %v1940_v15, %v10154_v38  ;;  %v10155_v11 = vld [vmem:[#allocation100_spill] sm:$0xff]  ;;  %v2373_v31 = vsel %vm2367_vm13, %v2333_v55, %v10156_v6  ;;  %v3035_v40 = vsel %vm2127_vm6, %v7412_v19, %v8073_v21  ;;  %v10157_v17 = vld [vmem:[#allocation119_spill] sm:$0xff]  ;;  %v3036_v15 = vsel %vm2127_vm6, %v7408_v35, %v7882_v49  ;;  %3455 = vmatpush.bf16.msra.mxu0 %v3750_v3  ;;  %v10164_v54 = vld [vmem:[#allocation126_spill] sm:$0xff] }
 0x7fa   :  { %v8377_v39 = vsel %vm1967_vm2, %v1943_v53, %v10155_v11  ;;  %v2016_v14 = vsel %vm2007_vm3, %v1976_v25, %v10157_v17  ;;  %v2413_v0 = vsel %vm2407_vm14, %v2373_v31, %v10158_v27  ;;  %3762 = vmatpush.bf16.msra.mxu1 %v3750_v3  ;;  %v10159_v53 = vld [vmem:[#allocation122_spill] sm:$0xff]  ;;  %v10160_v29 = vld [vmem:[#allocation551_spill] sm:$0xff]  ;;  %v3052_v21 = vsel %vm2167_vm7, %v3036_v15, %v8273_v37  ;;  %v10162_v62 = vld [vmem:[#allocation124_spill] sm:$0xff] }
 0x7fb   :  { %v2019_v52 = vsel %vm2007_vm3, %v1979_v59, %v10159_v53  ;;  %v2453_v19 = vsel %vm2447_vm15, %v2413_v0, %v10160_v29  ;;  %3763 = vmatpush.bf16.msra.mxu2 %v3750_v3  ;;  %3764 = vmatpush.bf16.msra.mxu3 %v3750_v3  ;;  %v10161_v43 = vld [vmem:[#allocation123_spill] sm:$0xff]  ;;  %v3051_v59 = vsel %vm2167_vm7, %v3035_v40, %v8033_v50  ;;  %v10166_v55 = vld [vmem:[#allocation129_spill] sm:$0xff]  ;;  %v10168_v3 = vld [vmem:[#allocation132_spill] sm:$0xff]  ;;  %vm3635_vm2 = vcmask 254976  }
 0x7fc   :  { %3188 = vrot.lane.b32.xlu2 %v3072_v63, %s3909_s16  ;;  %v3123_v25 = vpop.permute.xlu2 %3122  ;;  %v2009_v32 = vsel %vm2007_vm3, %v1969_v9, %v10161_v43  ;;  %v2008_v16 = vsel %vm2007_vm3, %v1968_v51, %v10162_v62  ;;  %v2022_v37 = vsel %vm2007_vm3, %v1982_v22, %v10163_v42  ;;  %v3749_v9 = vld [vmem:[%s9236_s1 + $0x10] sm:$0xff]  ;;  %v2012_v30 = vsel %vm2007_vm3, %v1972_v23, %v10164_v54  ;;  %v10167_v63 = vld [vmem:[#allocation130_spill] sm:$0xff]  ;;  %v10169_v11 = vld [vmem:[#allocation133_spill] sm:$0xff] }
 0x7fd   :  { %v2904_v45 = vpop.permute.xlu1 %2903  ;;  %v3235_v49 = vsel %vm3229_vm0, %v2453_v19, %v3123_v25  ;;  %v10165_v50 = vld [vmem:[#allocation127_spill] sm:$0xff]  ;;  %v2015_v51 = vsel %vm2007_vm3, %v1975_v57, %v10166_v55  ;;  %v2014_v22 = vsel %vm2007_vm3, %v1974_v60, %v10167_v63  ;;  %v2018_v38 = vsel %vm2007_vm3, %v1978_v8, %v10168_v3  ;;  %3456 = vmatpush.bf16.msra.mxu0 %v3749_v9  ;;  %v10171_v31 = vld [vmem:[#allocation136_spill] sm:$0xff]  ;;  %v10172_v40 = vld [vmem:[#allocation158_spill] sm:$0xff] }
 0x7fe   :  { %v3068_v35 = vsel %vm2207_vm8, %v3052_v21, %v2904_v45  ;;  %3318 = vst [vmem:[#allocation1 + $0x21] ss:$4 sm:$0xff] %v3235_v49  ;;  %v2011_v4 = vsel %vm2007_vm3, %v1971_v56, %v10165_v50  ;;  %v2017_v6 = vsel %vm2007_vm3, %v1977_v41, %v10169_v11  ;;  %v3023_v23 = vsel %vm2087_vm5, %v7359_v7, %v8035_v18  ;;  %v10170_v56 = vld [vmem:[#allocation135_spill] sm:$0xff]  ;;  %v10173_v8 = vld [vmem:[#allocation161_spill] sm:$0xff]  ;;  %v10174_v27 = vld [vmem:[#allocation162_spill] sm:$0xff] }
 0x7ff   :  { %v2902_v26 = vpop.permute.xlu0 %2901  ;;  %3180 = vrot.lane.b32.xlu1 %v3068_v35, %s3909_s16  ;;  %3765 = vmatpush.bf16.msra.mxu1 %v3749_v9  ;;  %v2021_v57 = vsel %vm2007_vm3, %v1981_v46, %v10170_v56  ;;  %v8433_v60 = vsel %vm2007_vm3, %v1980_v12, %v10171_v31  ;;  %v2056_v17 = vsel %vm2047_vm4, %v2016_v14, %v10172_v40  ;;  %v10175_v18 = vld [vmem:[#allocation163_spill] sm:$0xff]  ;;  %v3748_v12 = vld [vmem:[%s9236_s1 + $0x8] sm:$0xff]  ;;  %v10176_v14 = vld [vmem:[#allocation164_spill] sm:$0xff] }
 0x800   :  { %v3067_v61 = vsel %vm2207_vm8, %v3051_v59, %v2902_v26  ;;  %3766 = vmatpush.bf16.msra.mxu2 %v3749_v9  ;;  %3767 = vmatpush.bf16.msra.mxu3 %v3749_v9  ;;  %v8439_v41 = vsel %vm2047_vm4, %v2019_v52, %v10173_v8  ;;  %v2049_v7 = vsel %vm2047_vm4, %v2009_v32, %v10174_v27  ;;  %v10177_v53 = vld [vmem:[#allocation201_spill] sm:$0xff]  ;;  %v10178_v29 = vld [vmem:[#allocation202_spill] sm:$0xff]  ;;  %v10179_v45 = vld [vmem:[#allocation240_spill] sm:$0xff] }
 0x801   :  { %3178 = vrot.lane.b32.xlu0 %v3067_v61, %s3909_s16  ;;  %v2048_v0 = vsel %vm2047_vm4, %v2008_v16, %v10175_v18  ;;  %v3038_v46 = vsel %vm2127_vm6, %v7428_v47, %v8093_v34  ;;  %v8453_v15 = vsel %vm2047_vm4, %v2022_v37, %v10176_v14  ;;  %v2089_v52 = vsel %vm2087_vm5, %v2049_v7, %v10177_v53  ;;  %v10180_v34 = vld [vmem:[#allocation241_spill] sm:$0xff]  ;;  %v10181_v49 = vld [vmem:[#allocation279_spill] sm:$0xff]  ;;  %v10184_v61 = vld [vmem:[#allocation318_spill] sm:$0xff] }
 0x802   :  { %v2088_v19 = vsel %vm2087_vm5, %v2048_v0, %v10178_v29  ;;  %v3039_v21 = vsel %vm2127_vm6, %v3023_v23, %v7963_v33  ;;  %v2129_v47 = vsel %vm2127_vm6, %v2089_v52, %v10179_v45  ;;  %3457 = vmatpush.bf16.msra.mxu0 %v3748_v12  ;;  %v3054_v33 = vsel %vm2167_vm7, %v3038_v46, %v8071_v20  ;;  %v10182_v16 = vld [vmem:[#allocation165_spill] sm:$0xff]  ;;  %v10185_v50 = vld [vmem:[#allocation166_spill] sm:$0xff]  ;;  %v10186_v63 = vld [vmem:[#allocation168_spill] sm:$0xff] }
 0x803   :  { %v2128_v25 = vsel %vm2127_vm6, %v2088_v19, %v10180_v34  ;;  %v3055_v43 = vsel %vm2167_vm7, %v3039_v21, %v8333_v10  ;;  %3768 = vmatpush.bf16.msra.mxu1 %v3748_v12  ;;  %v2169_v59 = vsel %vm2167_vm7, %v2129_v47, %v10181_v49  ;;  %v2052_v42 = vsel %vm2047_vm4, %v2012_v30, %v10182_v16  ;;  %v10183_v10 = vld [vmem:[#allocation280_spill] sm:$0xff]  ;;  %v3747_v20 = vld [vmem:[%s9236_s1] sm:$0xff]  ;;  %v10187_v3 = vld [vmem:[#allocation319_spill] sm:$0xff] }
 0x804   :  { %v8467_v35 = vpop.permute.xlu2 %3128  ;;  %3769 = vmatpush.bf16.msra.mxu2 %v3748_v12  ;;  %3770 = vmatpush.bf16.msra.mxu3 %v3748_v12  ;;  %v2168_v37 = vsel %vm2167_vm7, %v2128_v25, %v10183_v10  ;;  %v2209_v9 = vsel %vm2207_vm8, %v2169_v59, %v10184_v61  ;;  %v2051_v55 = vsel %vm2047_vm4, %v2011_v4, %v10185_v50  ;;  %v10188_v23 = vld [vmem:[#allocation357_spill] sm:$0xff]  ;;  %v10190_v8 = vld [vmem:[#allocation358_spill] sm:$0xff]  ;;  %v10191_v7 = vld [vmem:[#allocation396_spill] sm:$0xff] }
 0x805   :  { %v2910_v32 = vpop.permute.xlu1 %2909  ;;  %v2055_v30 = vsel %vm2047_vm4, %v2015_v51, %v10186_v63  ;;  %v2208_v11 = vsel %vm2207_vm8, %v2168_v37, %v10187_v3  ;;  %v2249_v56 = vsel %vm2247_vm9, %v2209_v9, %v10188_v23  ;;  %v10189_v31 = vld [vmem:[#allocation169_spill] sm:$0xff]  ;;  %v10192_v51 = vld [vmem:[#allocation171_spill] sm:$0xff]  ;;  %v10196_v52 = vld [vmem:[#allocation174_spill] sm:$0xff] }
 0x806   :  { %v3071_v26 = vsel %vm2207_vm8, %v3055_v43, %v2910_v32  ;;  %v2054_v40 = vsel %vm2047_vm4, %v2014_v22, %v10189_v31  ;;  %v2248_v27 = vsel %vm2247_vm9, %v2208_v11, %v10190_v8  ;;  %v2289_v4 = vsel %vm2287_vm11, %v2249_v56, %v10191_v7  ;;  %3458 = vmatpush.bf16.msra.mxu0 %v3747_v20  ;;  %v10193_v0 = vld [vmem:[#allocation397_spill] sm:$0xff]  ;;  %v10194_v12 = vld [vmem:[#allocation435_spill] sm:$0xff]  ;;  %v10195_v22 = vld [vmem:[#allocation172_spill] sm:$0xff] }
 0x807   :  { %v2908_v62 = vpop.permute.xlu0 %2907  ;;  %3186 = vrot.lane.b32.xlu1 %v3071_v26, %s3909_s16  ;;  %3771 = vmatpush.bf16.msra.mxu1 %v3747_v20  ;;  %v2058_v18 = vsel %vm2047_vm4, %v2018_v38, %v10192_v51  ;;  %v2288_v46 = vsel %vm2287_vm11, %v2248_v27, %v10193_v0  ;;  %v2329_v14 = vsel %vm2327_vm12, %v2289_v4, %v10194_v12  ;;  %v10197_v19 = vld [vmem:[#allocation436_spill] sm:$0xff]  ;;  %v10198_v45 = vld [vmem:[#allocation474_spill] sm:$0xff]  ;;  %v10199_v47 = vld [vmem:[#allocation197_spill] sm:$0xff] }
 0x808   :  { %v3070_v54 = vsel %vm2207_vm8, %v3054_v33, %v2908_v62  ;;  %3772 = vmatpush.bf16.msra.mxu2 %v3747_v20  ;;  %3773 = vmatpush.bf16.msra.mxu3 %v3747_v20  ;;  %v2057_v53 = vsel %vm2047_vm4, %v2017_v6, %v10195_v22  ;;  %v8510_v29 = vsel %vm2047_vm4, %v2021_v57, %v10196_v52  ;;  %v10200_v25 = vld [vmem:[#allocation204_spill] sm:$0xff]  ;;  %v10201_v32 = vld [vmem:[#allocation475_spill] sm:$0xff]  ;;  %v10202_v6 = vld [vmem:[#allocation518_spill] sm:$0xff] }
 0x809   :  { %3184 = vrot.lane.b32.xlu0 %v3070_v54, %s3909_s16  ;;  %v2328_v21 = vsel %vm2327_vm12, %v2288_v46, %v10197_v19  ;;  %v2369_v38 = vsel %vm2367_vm13, %v2329_v14, %v10198_v45  ;;  %v2096_v34 = vsel %vm2087_vm5, %v2056_v17, %v10199_v47  ;;  %v2092_v43 = vsel %vm2087_vm5, %v2052_v42, %v10200_v25  ;;  %v10203_v57 = vld [vmem:[#allocation205_spill] sm:$0xff]  ;;  %v10204_v33 = vld [vmem:[#allocation243_spill] sm:$0xff]  ;;  %v10206_v37 = vld [vmem:[#allocation558_spill] sm:$0xff] }
 0x80a   :  { %v2368_v49 = vsel %vm2367_vm13, %v2328_v21, %v10201_v32  ;;  %v2409_v59 = vsel %vm2407_vm14, %v2369_v38, %v10202_v6  ;;  %v2091_v26 = vsel %vm2087_vm5, %v2051_v55, %v10203_v57  ;;  %v2132_v62 = vsel %vm2127_vm6, %v2092_v43, %v10204_v33  ;;  %v10205_v16 = vld [vmem:[#allocation519_spill] sm:$0xff]  ;;  %v10207_v9 = vld [vmem:[#allocation244_spill] sm:$0xff]  ;;  %v10208_v20 = vld [vmem:[#allocation282_spill] sm:$0xff] }
 0x80b   :  { %v2408_v10 = vsel %vm2407_vm14, %v2368_v49, %v10205_v16  ;;  %v2449_v17 = vsel %vm2447_vm15, %v2409_v59, %v10206_v37  ;;  %v2131_v54 = vsel %vm2127_vm6, %v2091_v26, %v10207_v9  ;;  %v2172_v50 = vsel %vm2167_vm7, %v2132_v62, %v10208_v20  ;;  %v10209_v63 = vld [vmem:[#allocation559_spill] sm:$0xff]  ;;  %v10210_v23 = vld [vmem:[#allocation200_spill] sm:$0xff]  ;;  %v10212_v27 = vld [vmem:[#allocation321_spill] sm:$0xff] }
 0x80c   :  { %v8532_v42 = vpop.permute.xlu2 %3134  ;;  %v2448_v55 = vsel %vm2447_vm15, %v2408_v10, %v10209_v63  ;;  %v2099_v56 = vsel %vm2087_vm5, %v8439_v41, %v10210_v23  ;;  %v10211_v31 = vld [vmem:[#allocation283_spill] sm:$0xff]  ;;  %v2212_v7 = vsel %vm2207_vm8, %v2172_v50, %v10212_v27  ;;  %v10215_v14 = vld [vmem:[#allocation322_spill] sm:$0xff]  ;;  %v10216_v22 = vld [vmem:[#allocation360_spill] sm:$0xff] }
 0x80d   :  { %v3115_v61 = vpop.permute.xlu1 %3114  ;;  %v2171_v8 = vsel %vm2167_vm7, %v2131_v54, %v10211_v31  ;;  %v10213_v51 = vld [vmem:[#allocation203_spill] sm:$0xff]  ;;  %v2252_v52 = vsel %vm2247_vm9, %v2212_v7, %v10216_v22  ;;  %v10217_v19 = vld [vmem:[#allocation208_spill] sm:$0xff]  ;;  %v10218_v45 = vld [vmem:[#allocation210_spill] sm:$0xff] }
 0x80e   :  { %v3231_v3 = vsel %vm3229_vm0, %v2449_v17, %v3115_v61  ;;  %v8552_v0 = vsel %vm2087_vm5, %v8453_v15, %v10213_v51  ;;  %v10214_v46 = vld [vmem:[#allocation207_spill] sm:$0xff]  ;;  %v2211_v41 = vsel %vm2207_vm8, %v2171_v8, %v10215_v14  ;;  %v2094_v21 = vsel %vm2087_vm5, %v2054_v40, %v10217_v19  ;;  %v10219_v47 = vld [vmem:[#allocation361_spill] sm:$0xff]  ;;  %v10222_v49 = vld [vmem:[#allocation236_spill] sm:$0xff] }
 0x80f   :  { %v3113_v11 = vpop.permute.xlu0 %3112  ;;  %3310 = vst [vmem:[#allocation1 + $0x1] ss:$4 sm:$0xff] %v3231_v3  ;;  %v2095_v12 = vsel %vm2087_vm5, %v2055_v30, %v10214_v46  ;;  %v2098_v38 = vsel %vm2087_vm5, %v2058_v18, %v10218_v45  ;;  %v2251_v15 = vsel %vm2247_vm9, %v2211_v41, %v10219_v47  ;;  %v10220_v25 = vld [vmem:[#allocation399_spill] sm:$0xff]  ;;  %v2136_v6 = vsel %vm2127_vm6, %v2096_v34, %v10222_v49  ;;  %v10223_v59 = vld [vmem:[#allocation400_spill] sm:$0xff]  ;;  %v10224_v26 = vld [vmem:[#allocation438_spill] sm:$0xff] }
 0x810   :  { %v3230_v4 = vsel %vm3229_vm0, %v2448_v55, %v3113_v11  ;;  %v2292_v43 = vsel %vm2287_vm11, %v2252_v52, %v10220_v25  ;;  %v10221_v30 = vld [vmem:[#allocation211_spill] sm:$0xff]  ;;  %v2291_v57 = vsel %vm2287_vm11, %v2251_v15, %v10223_v59  ;;  %v10226_v62 = vld [vmem:[#allocation246_spill] sm:$0xff]  ;;  %v10228_v17 = vld [vmem:[#allocation477_spill] sm:$0xff] }
 0x811   :  { %3308 = vst [vmem:[#allocation1] ss:$4 sm:$0xff] %v3230_v4  ;;  %v2097_v32 = vsel %vm2087_vm5, %v2057_v53, %v10221_v30  ;;  %v2332_v40 = vsel %vm2327_vm12, %v2292_v43, %v10224_v26  ;;  %v10225_v33 = vld [vmem:[#allocation239_spill] sm:$0xff]  ;;  %v2135_v16 = vsel %vm2127_vm6, %v2095_v12, %v10226_v62  ;;  %v10230_v9 = vld [vmem:[#allocation249_spill] sm:$0xff]  ;;  %v10231_v20 = vld [vmem:[#allocation478_spill] sm:$0xff] }
 0x812   :  { %v2139_v18 = vsel %vm2127_vm6, %v2099_v56, %v10225_v33  ;;  %v10227_v10 = vld [vmem:[#allocation439_spill] sm:$0xff]  ;;  %v2372_v53 = vsel %vm2367_vm13, %v2332_v40, %v10228_v17  ;;  %v2138_v54 = vsel %vm2127_vm6, %v2098_v38, %v10230_v9  ;;  %v10232_v63 = vld [vmem:[#allocation522_spill] sm:$0xff]  ;;  %v10236_v27 = vld [vmem:[#allocation561_spill] sm:$0xff] }
 0x813   :  { %v2331_v37 = vsel %vm2327_vm12, %v2291_v57, %v10227_v10  ;;  %v10229_v61 = vld [vmem:[#allocation247_spill] sm:$0xff]  ;;  %v2412_v55 = vsel %vm2407_vm14, %v2372_v53, %v10232_v63  ;;  %v10233_v3 = vld [vmem:[#allocation250_spill] sm:$0xff]  ;;  %v10238_v14 = vld [vmem:[#allocation285_spill] sm:$0xff] }
 0x814   :  { %v2134_v34 = vsel %vm2127_vm6, %v2094_v21, %v10229_v61  ;;  %v2371_v50 = vsel %vm2367_vm13, %v2331_v37, %v10231_v20  ;;  %v2137_v11 = vsel %vm2127_vm6, %v2097_v32, %v10233_v3  ;;  %v10234_v23 = vld [vmem:[#allocation275_spill] sm:$0xff]  ;;  %v2452_v7 = vsel %vm2447_vm15, %v2412_v55, %v10236_v27  ;;  %v8600_v51 = vpop.permute.xlu2 %3140  ;;  %v10237_v46 = vld [vmem:[#allocation278_spill] sm:$0xff]  ;;  %v10241_v47 = vld [vmem:[#allocation288_spill] sm:$0xff] }
 0x815   :  { %v2176_v56 = vsel %vm2167_vm7, %v2136_v6, %v10234_v23  ;;  %v10235_v31 = vld [vmem:[#allocation523_spill] sm:$0xff]  ;;  %v3121_v4 = vpop.permute.xlu1 %3120  ;;  %v2179_v12 = vsel %vm2167_vm7, %v2139_v18, %v10237_v46  ;;  %v2175_v41 = vsel %vm2167_vm7, %v2135_v16, %v10238_v14  ;;  %v10239_v22 = vld [vmem:[#allocation562_spill] sm:$0xff]  ;;  %v2178_v15 = vsel %vm2167_vm7, %v2138_v54, %v10241_v47  ;;  %v10242_v25 = vld [vmem:[#allocation324_spill] sm:$0xff] }
 0x816   :  { %v2411_v8 = vsel %vm2407_vm14, %v2371_v50, %v10235_v31  ;;  %v3234_v19 = vsel %vm3229_vm0, %v2452_v7, %v3121_v4  ;;  %v10240_v45 = vld [vmem:[#allocation286_spill] sm:$0xff]  ;;  %v2215_v43 = vsel %vm2207_vm8, %v2175_v41, %v10242_v25  ;;  %v10243_v32 = vld [vmem:[#allocation289_spill] sm:$0xff]  ;;  %v10246_v40 = vld [vmem:[#allocation363_spill] sm:$0xff] }
 0x817   :  { %v2451_v52 = vsel %vm2447_vm15, %v2411_v8, %v10239_v22  ;;  %v3119_v21 = vpop.permute.xlu0 %3118  ;;  %v2174_v38 = vsel %vm2167_vm7, %v2134_v34, %v10240_v45  ;;  %3316 = vst [vmem:[#allocation1 + $0x20] ss:$4 sm:$0xff] %v3234_v19  ;;  %v2177_v49 = vsel %vm2167_vm7, %v2137_v11, %v10243_v32  ;;  %v10244_v6 = vld [vmem:[#allocation317_spill] sm:$0xff]  ;;  %v2255_v33 = vsel %vm2247_vm9, %v2215_v43, %v10246_v40  ;;  %v10247_v18 = vld [vmem:[#allocation314_spill] sm:$0xff]  ;;  %v10248_v16 = vld [vmem:[#allocation356_spill] sm:$0xff] }
 0x818   :  { %v3233_v30 = vsel %vm3229_vm0, %v2451_v52, %v3119_v21  ;;  %v2219_v59 = vsel %vm2207_vm8, %v2179_v12, %v10244_v6  ;;  %v10245_v57 = vld [vmem:[#allocation325_spill] sm:$0xff]  ;;  %v2216_v62 = vsel %vm2207_vm8, %v2176_v56, %v10247_v18  ;;  %v10249_v37 = vld [vmem:[#allocation364_spill] sm:$0xff]  ;;  %v10250_v53 = vld [vmem:[#allocation402_spill] sm:$0xff] }
 0x819   :  { %v2214_v26 = vsel %vm2207_vm8, %v2174_v38, %v10245_v57  ;;  %3314 = vst [vmem:[#allocation1 + $0x3] ss:$4 sm:$0xff] %v3233_v30  ;;  %v2259_v10 = vsel %vm2247_vm9, %v2219_v59, %v10248_v16  ;;  %v2295_v61 = vsel %vm2287_vm11, %v2255_v33, %v10250_v53  ;;  %v10251_v34 = vld [vmem:[#allocation353_spill] sm:$0xff]  ;;  %v10252_v54 = vld [vmem:[#allocation395_spill] sm:$0xff]  ;;  %v10255_v11 = vld [vmem:[#allocation392_spill] sm:$0xff] }
 0x81a   :  { %v2254_v17 = vsel %vm2247_vm9, %v2214_v26, %v10249_v37  ;;  %v2256_v9 = vsel %vm2247_vm9, %v2216_v62, %v10251_v34  ;;  %v2299_v20 = vsel %vm2287_vm11, %v2259_v10, %v10252_v54  ;;  %v10253_v50 = vld [vmem:[#allocation403_spill] sm:$0xff]  ;;  %v10254_v55 = vld [vmem:[#allocation441_spill] sm:$0xff]  ;;  %v10256_v56 = vld [vmem:[#allocation434_spill] sm:$0xff] }
 0x81b   :  { %v2294_v63 = vsel %vm2287_vm11, %v2254_v17, %v10253_v50  ;;  %v2335_v3 = vsel %vm2327_vm12, %v2295_v61, %v10254_v55  ;;  %v2296_v23 = vsel %vm2287_vm11, %v2256_v9, %v10255_v11  ;;  %v2339_v31 = vsel %vm2327_vm12, %v2299_v20, %v10256_v56  ;;  %v10257_v8 = vld [vmem:[#allocation442_spill] sm:$0xff]  ;;  %v10258_v7 = vld [vmem:[#allocation480_spill] sm:$0xff]  ;;  %v10259_v46 = vld [vmem:[#allocation431_spill] sm:$0xff] }
 0x81c   :  { %v2334_v27 = vsel %vm2327_vm12, %v2294_v63, %v10257_v8  ;;  %v2375_v4 = vsel %vm2367_vm13, %v2335_v3, %v10258_v7  ;;  %v2336_v12 = vsel %vm2327_vm12, %v2296_v23, %v10259_v46  ;;  %v10260_v14 = vld [vmem:[#allocation473_spill] sm:$0xff]  ;;  %v10263_v45 = vld [vmem:[#allocation470_spill] sm:$0xff]  ;;  %v10266_v32 = vld [vmem:[#allocation564_spill] sm:$0xff] }
 0x81d   :  { %v2379_v41 = vsel %vm2367_vm13, %v2339_v31, %v10260_v14  ;;  %v10261_v22 = vld [vmem:[#allocation481_spill] sm:$0xff]  ;;  %v2376_v38 = vsel %vm2367_vm13, %v2336_v12, %v10263_v45  ;;  %v10265_v43 = vld [vmem:[#allocation526_spill] sm:$0xff]  ;;  %v3127_v59 = vpop.permute.xlu1 %3126  ;;  %v10267_v57 = vld [vmem:[#allocation511_spill] sm:$0xff] }
 0x81e   :  { %v2374_v52 = vsel %vm2367_vm13, %v2334_v27, %v10261_v22  ;;  %v10262_v19 = vld [vmem:[#allocation525_spill] sm:$0xff]  ;;  %v2416_v26 = vsel %vm2407_vm14, %v2376_v38, %v10267_v57  ;;  %v8671_v10 = vpop.permute.xlu2 %3146  ;;  %v10270_v17 = vld [vmem:[#allocation327_spill] sm:$0xff]  ;;  %v10271_v61 = vld [vmem:[#allocation554_spill] sm:$0xff] }
 0x81f   :  { %v2415_v21 = vsel %vm2407_vm14, %v2375_v4, %v10262_v19  ;;  %v10264_v47 = vld [vmem:[#allocation517_spill] sm:$0xff]  ;;  %v2414_v30 = vsel %vm2407_vm14, %v2374_v52, %v10265_v43  ;;  %v3125_v37 = vpop.permute.xlu0 %3124  ;;  %v2218_v53 = vsel %vm2207_vm8, %v2178_v15, %v10270_v17  ;;  %v2456_v34 = vsel %vm2447_vm15, %v2416_v26, %v10271_v61  ;;  %v10272_v50 = vld [vmem:[#allocation242_spill] sm:$0xff]  ;;  %v10273_v55 = vld [vmem:[#allocation328_spill] sm:$0xff] }
 0x820   :  { %v2419_v25 = vsel %vm2407_vm14, %v2379_v41, %v10264_v47  ;;  %v2455_v6 = vsel %vm2447_vm15, %v2415_v21, %v10266_v32  ;;  %v10268_v40 = vld [vmem:[#allocation557_spill] sm:$0xff]  ;;  %v2142_v63 = vsel %vm2127_vm6, %v8552_v0, %v10272_v50  ;;  %v2217_v3 = vsel %vm2207_vm8, %v2177_v49, %v10273_v55  ;;  %v10274_v11 = vld [vmem:[#allocation366_spill] sm:$0xff]  ;;  %v10277_v27 = vld [vmem:[#allocation367_spill] sm:$0xff] }
 0x821   :  { %v2459_v33 = vsel %vm2447_vm15, %v2419_v25, %v10268_v40  ;;  %v10269_v18 = vld [vmem:[#allocation565_spill] sm:$0xff]  ;;  %v3237_v16 = vsel %vm3229_vm0, %v2455_v6, %v3127_v59  ;;  %v2258_v15 = vsel %vm2247_vm9, %v2218_v53, %v10274_v11  ;;  %v3238_v23 = vsel %vm3229_vm0, %v2456_v34, %v8467_v35  ;;  %v10280_v35 = vld [vmem:[#allocation320_spill] sm:$0xff]  ;;  %v10281_v14 = vld [vmem:[#allocation406_spill] sm:$0xff] }
 0x822   :  { %v2454_v62 = vsel %vm2447_vm15, %v2414_v30, %v10269_v18  ;;  %v3241_v9 = vsel %vm3229_vm0, %v2459_v33, %v8532_v42  ;;  %v8679_v54 = vld.sshfl [vmem:[#allocation1] sm:$0xff pattern:$0x73625140]  ;;  %3322 = vst [vmem:[#allocation1 + $0x23] ss:$4 sm:$0xff] %v3237_v16  ;;  %v10275_v42 = vld [vmem:[#allocation175_spill] sm:$0xff]  ;;  %v2257_v0 = vsel %vm2247_vm9, %v2217_v3, %v10277_v27 }
 0x823   :  { %v3236_v20 = vsel %vm3229_vm0, %v2454_v62, %v3125_v37  ;;  %3328 = vst [vmem:[#allocation1 + $0x3] ss:$4 sm:$0xff] %v3241_v9  ;;  %v2060_v56 = vsel %vm2047_vm4, %v8433_v60, %v10275_v42  ;;  %v10276_v31 = vld [vmem:[#allocation281_spill] sm:$0xff]  ;;  %v2297_v60 = vsel %vm2287_vm11, %v2257_v0, %v10281_v14  ;;  %v10282_v41 = vld [vmem:[#allocation444_spill] sm:$0xff]  ;;  %v10283_v52 = vld [vmem:[#allocation214_spill] sm:$0xff] }
 0x824   :  { %v2182_v8 = vsel %vm2167_vm7, %v2142_v63, %v10276_v31  ;;  %v10278_v7 = vld [vmem:[#allocation405_spill] sm:$0xff]  ;;  %3325 = vst [vmem:[#allocation1] ss:$4 sm:$0xff] %v3238_v23  ;;  %v2100_v19 = vsel %vm2087_vm5, %v2060_v56, %v10283_v52  ;;  %v10284_v21 = vld [vmem:[#allocation359_spill] sm:$0xff]  ;;  %v10287_v43 = vld [vmem:[#allocation252_spill] sm:$0xff] }
 0x825   :  { %v2298_v49 = vsel %vm2287_vm11, %v2258_v15, %v10278_v7  ;;  %v10279_v4 = vld [vmem:[#allocation213_spill] sm:$0xff]  ;;  %v2222_v12 = vsel %vm2207_vm8, %v2182_v8, %v10280_v35  ;;  %3320 = vst [vmem:[#allocation1 + $0x22] ss:$4 sm:$0xff] %v3236_v20  ;;  %v10288_v32 = vld [vmem:[#allocation398_spill] sm:$0xff]  ;;  %v10289_v59 = vld [vmem:[#allocation484_spill] sm:$0xff]  ;;  %v3133_v34 = vpop.permute.xlu1 %3132 }
 0x826   :  { %v2101_v46 = vsel %vm2087_vm5, %v8510_v29, %v10279_v4  ;;  %v2338_v22 = vsel %vm2327_vm12, %v2298_v49, %v10282_v41  ;;  %v2262_v45 = vsel %vm2247_vm9, %v2222_v12, %v10284_v21  ;;  %v10285_v38 = vld [vmem:[#allocation445_spill] sm:$0xff]  ;;  %v10286_v29 = vld [vmem:[#allocation483_spill] sm:$0xff]  ;;  %v10290_v26 = vld [vmem:[#allocation528_spill] sm:$0xff]  ;;  %v8756_v41 = vpop.permute.xlu2 %3152 }
 0x827   :  { %v2337_v47 = vsel %vm2327_vm12, %v2297_v60, %v10285_v38  ;;  %v2378_v25 = vsel %vm2367_vm13, %v2338_v22, %v10286_v29  ;;  %v2141_v30 = vsel %vm2127_vm6, %v2101_v46, %v10287_v43  ;;  %v2302_v6 = vsel %vm2287_vm11, %v2262_v45, %v10288_v32  ;;  %v10291_v33 = vld [vmem:[#allocation253_spill] sm:$0xff]  ;;  %v10294_v53 = vld [vmem:[#allocation567_spill] sm:$0xff]  ;;  %v10296_v50 = vld [vmem:[#allocation476_spill] sm:$0xff]  ;;  %v3131_v15 = vpop.permute.xlu0 %3130 }
 0x828   :  { %v2377_v57 = vsel %vm2367_vm13, %v2337_v47, %v10289_v59  ;;  %v2418_v40 = vsel %vm2407_vm14, %v2378_v25, %v10290_v26  ;;  %v2140_v18 = vsel %vm2127_vm6, %v2100_v19, %v10291_v33  ;;  %v10292_v62 = vld [vmem:[#allocation437_spill] sm:$0xff]  ;;  %v10295_v9 = vld [vmem:[#allocation291_spill] sm:$0xff]  ;;  %v10297_v55 = vld [vmem:[#allocation568_spill] sm:$0xff] }
 0x829   :  { %v2342_v16 = vsel %vm2327_vm12, %v2302_v6, %v10292_v62  ;;  %v10293_v37 = vld [vmem:[#allocation529_spill] sm:$0xff]  ;;  %v2458_v61 = vsel %vm2447_vm15, %v2418_v40, %v10294_v53  ;;  %v2181_v20 = vsel %vm2167_vm7, %v2141_v30, %v10295_v9  ;;  %v10298_v23 = vld [vmem:[#allocation292_spill] sm:$0xff]  ;;  %v10299_v56 = vld [vmem:[#allocation330_spill] sm:$0xff] }
 0x82a   :  { %v2417_v17 = vsel %vm2407_vm14, %v2377_v57, %v10293_v37  ;;  %v2382_v63 = vsel %vm2367_vm13, %v2342_v16, %v10296_v50  ;;  %v3240_v11 = vsel %vm3229_vm0, %v2458_v61, %v3133_v34  ;;  %v2180_v42 = vsel %vm2167_vm7, %v2140_v18, %v10298_v23  ;;  %v10300_v8 = vld [vmem:[#allocation521_spill] sm:$0xff]  ;;  %v10301_v7 = vld [vmem:[#allocation331_spill] sm:$0xff]  ;;  %v10302_v4 = vld [vmem:[#allocation362_spill] sm:$0xff] }
 0x82b   :  { %v2457_v3 = vsel %vm2447_vm15, %v2417_v17, %v10297_v55  ;;  %v2221_v31 = vsel %vm2207_vm8, %v2181_v20, %v10299_v56  ;;  %v2422_v27 = vsel %vm2407_vm14, %v2382_v63, %v10300_v8  ;;  %3327 = vst [vmem:[#allocation1 + $0x2] ss:$4 sm:$0xff] %v3240_v11  ;;  %v2220_v49 = vsel %vm2207_vm8, %v2180_v42, %v10301_v7  ;;  %v10303_v35 = vld [vmem:[#allocation369_spill] sm:$0xff]  ;;  %v10304_v14 = vld [vmem:[#allocation560_spill] sm:$0xff]  ;;  %v10305_v22 = vld [vmem:[#allocation370_spill] sm:$0xff] }
 0x82c   :  { %v3239_v0 = vsel %vm3229_vm0, %v2457_v3, %v3131_v15  ;;  %v2265_v46 = vsel %vm2247_vm9, %v7519_v5, %v10302_v4  ;;  %v2261_v12 = vsel %vm2247_vm9, %v2221_v31, %v10303_v35  ;;  %v2462_v60 = vsel %vm2447_vm15, %v2422_v27, %v10304_v14  ;;  %v10306_v19 = vld [vmem:[#allocation408_spill] sm:$0xff]  ;;  %v3324_v38 = vld.sshfl [vmem:[#allocation1 + $0x20] sm:$0xff pattern:$0x73625140]  ;;  %v10309_v43 = vld [vmem:[#allocation447_spill] sm:$0xff] }
 0x82d   :  { %3326 = vst [vmem:[#allocation1 + $0x1] ss:$4 sm:$0xff] %v3239_v0  ;;  %v2260_v52 = vsel %vm2247_vm9, %v2220_v49, %v10305_v22  ;;  %v2301_v21 = vsel %vm2287_vm11, %v2261_v12, %v10306_v19  ;;  %v3244_v45 = vsel %vm3229_vm0, %v2462_v60, %v8600_v51  ;;  %v10307_v5 = vld [vmem:[#allocation401_spill] sm:$0xff]  ;;  %v3374_v32 = vpack.c.bf16 %v3324_v38, %v8679_v54  ;;  %v10310_v6 = vld [vmem:[#allocation139_spill] sm:$0xff]  ;;  %v10311_v57 = vld [vmem:[#allocation440_spill] sm:$0xff]  ;;  %v3139_v15 = vpop.permute.xlu1 %3138 }
 0x82e   :  { %v2305_v47 = vsel %vm2287_vm11, %v2265_v46, %v10307_v5  ;;  %v10308_v29 = vld [vmem:[#allocation409_spill] sm:$0xff]  ;;  %v2341_v30 = vsel %vm2327_vm12, %v2301_v21, %v10309_v43  ;;  %3331 = vst [vmem:[#allocation1 + $0x22] ss:$4 sm:$0xff] %v3244_v45  ;;  %v2023_v59 = vsel %vm2007_vm3, %v8377_v39, %v10310_v6  ;;  %v10312_v26 = vld [vmem:[#allocation448_spill] sm:$0xff]  ;;  %v10313_v33 = vld [vmem:[#allocation486_spill] sm:$0xff] }
 0x82f   :  { %v2300_v25 = vsel %vm2287_vm11, %v2260_v52, %v10308_v29  ;;  %v2345_v51 = vsel %vm2327_vm12, %v2305_v47, %v10311_v57  ;;  %v2381_v18 = vsel %vm2367_vm13, %v2341_v30, %v10313_v33  ;;  %v10314_v62 = vld [vmem:[#allocation178_spill] sm:$0xff]  ;;  %v10315_v37 = vld [vmem:[#allocation479_spill] sm:$0xff]  ;;  %3742 = vmatmul.msk.bf16.vlgmr.msra.gmra.mxu0 %vm3431_vm1, %v3374_v32  ;;  %v10318_v34 = vld [vmem:[#allocation217_spill] sm:$0xff]  ;;  %v3137_v7 = vpop.permute.xlu0 %3136 }
 0x830   :  { %v2340_v40 = vsel %vm2327_vm12, %v2300_v25, %v10312_v26  ;;  %v2063_v16 = vsel %vm2047_vm4, %v2023_v59, %v10314_v62  ;;  %v2385_v17 = vsel %vm2367_vm13, %v2345_v51, %v10315_v37  ;;  %v10316_v54 = vld [vmem:[#allocation487_spill] sm:$0xff]  ;;  %v10319_v20 = vld [vmem:[#allocation524_spill] sm:$0xff]  ;;  %v10321_v3 = vld [vmem:[#allocation570_spill] sm:$0xff]  ;;  %v3159_v25 = vpop.permute.xlu2 %3158 }
 0x831   :  { %v2380_v53 = vsel %vm2367_vm13, %v2340_v40, %v10316_v54  ;;  %v10317_v61 = vld [vmem:[#allocation531_spill] sm:$0xff]  ;;  %v2103_v9 = vsel %vm2087_vm5, %v2063_v16, %v10318_v34  ;;  %v2425_v50 = vsel %vm2407_vm14, %v2385_v17, %v10319_v20  ;;  %v10320_v63 = vld [vmem:[#allocation532_spill] sm:$0xff]  ;;  %v10326_v14 = vld [vmem:[#allocation334_spill] sm:$0xff] }
 0x832   :  { %v2421_v39 = vsel %vm2407_vm14, %v2381_v18, %v10317_v61  ;;  %v2420_v55 = vsel %vm2407_vm14, %v2380_v53, %v10320_v63  ;;  %v10322_v23 = vld [vmem:[#allocation256_spill] sm:$0xff]  ;;  %v10323_v56 = vld [vmem:[#allocation563_spill] sm:$0xff]  ;;  %v10328_v19 = vld [vmem:[#allocation373_spill] sm:$0xff] }
 0x833   :  { %v2461_v11 = vsel %vm2447_vm15, %v2421_v39, %v10321_v3  ;;  %v2143_v42 = vsel %vm2127_vm6, %v2103_v9, %v10322_v23  ;;  %v2465_v31 = vsel %vm2447_vm15, %v2425_v50, %v10323_v56  ;;  %v10324_v8 = vld [vmem:[#allocation571_spill] sm:$0xff]  ;;  %v10327_v22 = vld [vmem:[#allocation372_spill] sm:$0xff]  ;;  %v10331_v47 = vld [vmem:[#allocation450_spill] sm:$0xff] }
 0x834   :  { %v2460_v27 = vsel %vm2447_vm15, %v2420_v55, %v10324_v8  ;;  %v3243_v0 = vsel %vm3229_vm0, %v2461_v11, %v3139_v15  ;;  %v10325_v49 = vld [vmem:[#allocation295_spill] sm:$0xff]  ;;  %v3247_v46 = vsel %vm3229_vm0, %v2465_v31, %v8671_v10  ;;  %v8808_v35 = vld.sshfl [vmem:[#allocation1] sm:$0xff pattern:$0x73625140]  ;;  %v2264_v52 = vsel %vm2247_vm9, %v7531_v24, %v10327_v22  ;;  %v10330_v10 = vld [vmem:[#allocation412_spill] sm:$0xff] }
 0x835   :  { %v2183_v4 = vsel %vm2167_vm7, %v2143_v42, %v10325_v49  ;;  %3330 = vst [vmem:[#allocation1 + $0x21] ss:$4 sm:$0xff] %v3243_v0  ;;  %v3242_v12 = vsel %vm3229_vm0, %v2460_v27, %v3137_v7  ;;  %v10329_v45 = vld [vmem:[#allocation411_spill] sm:$0xff]  ;;  %v10333_v32 = vld [vmem:[#allocation489_spill] sm:$0xff]  ;;  %v10334_v6 = vld [vmem:[#allocation490_spill] sm:$0xff]  ;;  %v3145_v62 = vpop.permute.xlu1 %3144 }
 0x836   :  { %v2223_v60 = vsel %vm2207_vm8, %v2183_v4, %v10326_v14  ;;  %3336 = vst [vmem:[#allocation1 + $0x1] ss:$4 sm:$0xff] %v3247_v46  ;;  %v2304_v38 = vsel %vm2287_vm11, %v2264_v52, %v10329_v45  ;;  %v10332_v43 = vld [vmem:[#allocation451_spill] sm:$0xff]  ;;  %v10335_v57 = vld [vmem:[#allocation534_spill] sm:$0xff]  ;;  %v10337_v33 = vld [vmem:[#allocation573_spill] sm:$0xff] }
 0x837   :  { %v2263_v21 = vsel %vm2247_vm9, %v2223_v60, %v10328_v19  ;;  %3329 = vst [vmem:[#allocation1 + $0x20] ss:$4 sm:$0xff] %v3242_v12  ;;  %v2344_v29 = vsel %vm2327_vm12, %v2304_v38, %v10331_v47  ;;  %v10336_v26 = vld [vmem:[#allocation535_spill] sm:$0xff]  ;;  %v10338_v16 = vld [vmem:[#allocation574_spill] sm:$0xff]  ;;  %v10340_v34 = vld [vmem:[#allocation368_spill] sm:$0xff] }
 0x838   :  { %v2303_v5 = vsel %vm2287_vm11, %v2263_v21, %v10330_v10  ;;  %v2384_v24 = vsel %vm2367_vm13, %v2344_v29, %v10333_v32  ;;  %v3143_v54 = vpop.permute.xlu0 %3142  ;;  %v10339_v61 = vld [vmem:[#allocation375_spill] sm:$0xff]  ;;  %v2271_v9 = vsel %vm2247_vm9, %v7686_v58, %v10340_v34  ;;  %v10341_v20 = vld [vmem:[#allocation376_spill] sm:$0xff]  ;;  %v10342_v63 = vld [vmem:[#allocation414_spill] sm:$0xff]  ;;  %v3165_v21 = vpop.permute.xlu2 %3164 }
 0x839   :  { %v2343_v30 = vsel %vm2327_vm12, %v2303_v5, %v10332_v43  ;;  %v2424_v51 = vsel %vm2407_vm14, %v2384_v24, %v10335_v57  ;;  %v2267_v39 = vsel %vm2247_vm9, %v7617_v13, %v10339_v61  ;;  %v2266_v50 = vsel %vm2247_vm9, %v7523_v28, %v10341_v20  ;;  %v10343_v3 = vld [vmem:[#allocation365_spill] sm:$0xff]  ;;  %v10344_v15 = vld [vmem:[#allocation407_spill] sm:$0xff]  ;;  %v10347_v31 = vld [vmem:[#allocation404_spill] sm:$0xff] }
 0x83a   :  { %v2383_v59 = vsel %vm2367_vm13, %v2343_v30, %v10334_v6  ;;  %v2464_v18 = vsel %vm2447_vm15, %v2424_v51, %v10337_v33  ;;  %v2307_v55 = vsel %vm2287_vm11, %v2267_v39, %v10342_v63  ;;  %v2268_v11 = vsel %vm2247_vm9, %v7605_v1, %v10343_v3  ;;  %v10345_v13 = vld [vmem:[#allocation415_spill] sm:$0xff]  ;;  %v10346_v56 = vld [vmem:[#allocation453_spill] sm:$0xff]  ;;  %v10348_v28 = vld [vmem:[#allocation446_spill] sm:$0xff] }
 0x83b   :  { %v2423_v40 = vsel %vm2407_vm14, %v2383_v59, %v10336_v26  ;;  %v3246_v17 = vsel %vm3229_vm0, %v2464_v18, %v3145_v62  ;;  %v2311_v23 = vsel %vm2287_vm11, %v2271_v9, %v10344_v15  ;;  %v2306_v42 = vsel %vm2287_vm11, %v2266_v50, %v10345_v13  ;;  %v10349_v0 = vld [vmem:[#allocation454_spill] sm:$0xff]  ;;  %v10350_v49 = vld [vmem:[#allocation492_spill] sm:$0xff]  ;;  %v10351_v4 = vld [vmem:[#allocation443_spill] sm:$0xff] }
 0x83c   :  { %v2463_v37 = vsel %vm2447_vm15, %v2423_v40, %v10338_v16  ;;  %3335 = vst [vmem:[#allocation1] ss:$4 sm:$0xff] %v3246_v17  ;;  %v2347_v58 = vsel %vm2327_vm12, %v2307_v55, %v10346_v56  ;;  %v2308_v8 = vsel %vm2287_vm11, %v2268_v11, %v10347_v31  ;;  %v2351_v27 = vsel %vm2327_vm12, %v2311_v23, %v10348_v28  ;;  %v10352_v12 = vld [vmem:[#allocation485_spill] sm:$0xff]  ;;  %v10355_v45 = vld [vmem:[#allocation482_spill] sm:$0xff]  ;;  %v10358_v43 = vld [vmem:[#allocation576_spill] sm:$0xff] }
 0x83d   :  { %v3245_v53 = vsel %vm3229_vm0, %v2463_v37, %v3143_v54  ;;  %v2346_v7 = vsel %vm2327_vm12, %v2306_v42, %v10349_v0  ;;  %v2387_v1 = vsel %vm2367_vm13, %v2347_v58, %v10350_v49  ;;  %v2348_v46 = vsel %vm2327_vm12, %v2308_v8, %v10351_v4  ;;  %v10353_v60 = vld [vmem:[#allocation493_spill] sm:$0xff]  ;;  %v10356_v10 = vld [vmem:[#allocation530_spill] sm:$0xff]  ;;  %v10359_v24 = vld [vmem:[#allocation527_spill] sm:$0xff] }
 0x83e   :  { %3332 = vst [vmem:[#allocation1 + $0x23] ss:$4 sm:$0xff] %v3245_v53  ;;  %v2391_v14 = vsel %vm2367_vm13, %v2351_v27, %v10352_v12  ;;  %v2386_v22 = vsel %vm2367_vm13, %v2346_v7, %v10353_v60  ;;  %v10354_v52 = vld [vmem:[#allocation537_spill] sm:$0xff]  ;;  %v2388_v38 = vsel %vm2367_vm13, %v2348_v46, %v10355_v45  ;;  %v10357_v47 = vld [vmem:[#allocation538_spill] sm:$0xff]  ;;  %v3151_v32 = vpop.permute.xlu1 %3150  ;;  %v10364_v34 = vld [vmem:[#allocation379_spill] sm:$0xff] }
 0x83f   :  { %v2427_v19 = vsel %vm2407_vm14, %v2387_v1, %v10354_v52  ;;  %v2431_v5 = vsel %vm2407_vm14, %v2391_v14, %v10356_v10  ;;  %v2426_v29 = vsel %vm2407_vm14, %v2386_v22, %v10357_v47  ;;  %v2428_v6 = vsel %vm2407_vm14, %v2388_v38, %v10359_v24  ;;  %v10360_v59 = vld [vmem:[#allocation569_spill] sm:$0xff]  ;;  %v10362_v18 = vld [vmem:[#allocation566_spill] sm:$0xff]  ;;  %v10367_v55 = vld [vmem:[#allocation456_spill] sm:$0xff] }
 0x840   :  { %v2467_v30 = vsel %vm2447_vm15, %v2427_v19, %v10358_v43  ;;  %v2471_v57 = vsel %vm2447_vm15, %v2431_v5, %v10360_v59  ;;  %v10361_v51 = vld [vmem:[#allocation577_spill] sm:$0xff]  ;;  %v3149_v33 = vpop.permute.xlu0 %3148  ;;  %v2468_v62 = vsel %vm2447_vm15, %v2428_v6, %v10362_v18  ;;  %v10363_v54 = vld [vmem:[#allocation378_spill] sm:$0xff]  ;;  %v2269_v9 = vsel %vm2247_vm9, %v7609_v44, %v10364_v34  ;;  %v10370_v11 = vld [vmem:[#allocation495_spill] sm:$0xff]  ;;  %v3171_v14 = vpop.permute.xlu2 %3170 }
 0x841   :  { %v2466_v26 = vsel %vm2447_vm15, %v2426_v29, %v10361_v51  ;;  %v3249_v40 = vsel %vm3229_vm0, %v2467_v30, %v3151_v32  ;;  %v3253_v16 = vsel %vm3229_vm0, %v2471_v57, %v3159_v25  ;;  %v2270_v53 = vsel %vm2247_vm9, %v7698_v48, %v10363_v54  ;;  %v10365_v20 = vld [vmem:[#allocation417_spill] sm:$0xff]  ;;  %v10366_v50 = vld [vmem:[#allocation418_spill] sm:$0xff]  ;;  %v10372_v42 = vld [vmem:[#allocation496_spill] sm:$0xff] }
 0x842   :  { %3338 = vst [vmem:[#allocation1 + $0x3] ss:$4 sm:$0xff] %v3249_v40  ;;  %v3248_v17 = vsel %vm3229_vm0, %v2466_v26, %v3149_v33  ;;  %v3250_v61 = vsel %vm3229_vm0, %v2468_v62, %v8756_v41  ;;  %v2310_v25 = vsel %vm2287_vm11, %v2270_v53, %v10365_v20  ;;  %v2309_v63 = vsel %vm2287_vm11, %v2269_v9, %v10366_v50  ;;  %v10368_v41 = vld [vmem:[#allocation371_spill] sm:$0xff]  ;;  %v10369_v3 = vld [vmem:[#allocation457_spill] sm:$0xff]  ;;  %v10371_v23 = vld [vmem:[#allocation410_spill] sm:$0xff] }
 0x843   :  { %v2350_v48 = vsel %vm2327_vm12, %v2310_v25, %v10367_v55  ;;  %3337 = vst [vmem:[#allocation1 + $0x2] ss:$4 sm:$0xff] %v3248_v17  ;;  %v2349_v44 = vsel %vm2327_vm12, %v2309_v63, %v10369_v3  ;;  %v10373_v58 = vld [vmem:[#allocation540_spill] sm:$0xff]  ;;  %v10374_v8 = vld [vmem:[#allocation449_spill] sm:$0xff]  ;;  %v10376_v0 = vld [vmem:[#allocation579_spill] sm:$0xff] }
 0x844   :  { %v2390_v15 = vsel %vm2367_vm13, %v2350_v48, %v10370_v11  ;;  %v2389_v56 = vsel %vm2367_vm13, %v2349_v44, %v10372_v42  ;;  %v10375_v27 = vld [vmem:[#allocation541_spill] sm:$0xff]  ;;  %v10377_v1 = vld [vmem:[#allocation488_spill] sm:$0xff]  ;;  %v10382_v29 = vld [vmem:[#allocation374_spill] sm:$0xff] }
 0x845   :  { %v3334_v37 = vld.sshfl [vmem:[#allocation1 + $0x20] sm:$0xff pattern:$0x73625140]  ;;  %v2430_v31 = vsel %vm2407_vm14, %v2390_v15, %v10373_v58  ;;  %v10378_v46 = vld [vmem:[#allocation580_spill] sm:$0xff]  ;;  %v10383_v43 = vld [vmem:[#allocation595_spill] sm:$0xff] }
 0x846   :  { %3342 = vst [vmem:[#allocation1 + $0x23] ss:$4 sm:$0xff] %v3253_v16  ;;  %v3375_v39 = vpack.c.bf16 %v3334_v37, %v8808_v35  ;;  %v2274_v35 = vsel %vm2247_vm9, %v7767_v2, %v10368_v41  ;;  %v2429_v2 = vsel %vm2407_vm14, %v2389_v56, %v10375_v27  ;;  %v2470_v7 = vsel %vm2447_vm15, %v2430_v31, %v10376_v0  ;;  %v10379_v52 = vld [vmem:[#allocation533_spill] sm:$0xff]  ;;  %v10381_v5 = vld [vmem:[#allocation572_spill] sm:$0xff]  ;;  %v10384_v32 = vld [vmem:[#allocation382_spill] sm:$0xff] }
 0x847   :  { %3339 = vst [vmem:[#allocation1 + $0x20] ss:$4 sm:$0xff] %v3250_v61  ;;  %v2314_v13 = vsel %vm2287_vm11, %v2274_v35, %v10371_v23  ;;  %v3157_v49 = vpop.permute.xlu1 %3156  ;;  %v2469_v12 = vsel %vm2447_vm15, %v2429_v2, %v10378_v46  ;;  %v10380_v38 = vld [vmem:[#allocation381_spill] sm:$0xff]  ;;  %v2277_v30 = vsel %vm2247_vm9, %v10383_v43, %v10382_v29  ;;  %v10386_v59 = vld [vmem:[#allocation420_spill] sm:$0xff]  ;;  %v10389_v62 = vld [vmem:[#allocation459_spill] sm:$0xff] }
 0x848   :  { %3743 = vmatmul.msk.bf16.vlgmr.msra.gmra.mxu1 %vm3431_vm1, %v3375_v39  ;;  %v2354_v28 = vsel %vm2327_vm12, %v2314_v13, %v10374_v8  ;;  %v3252_v60 = vsel %vm3229_vm0, %v2470_v7, %v3157_v49  ;;  %v3155_v22 = vpop.permute.xlu0 %3154  ;;  %v2273_v10 = vsel %vm2247_vm9, %v7779_v36, %v10380_v38  ;;  %v10385_v24 = vld [vmem:[#allocation593_spill] sm:$0xff]  ;;  %v10390_v37 = vld [vmem:[#allocation452_spill] sm:$0xff]  ;;  %v10392_v61 = vld [vmem:[#allocation498_spill] sm:$0xff]  ;;  %v3177_v0 = vpop.permute.xlu2 %3176 }
 0x849   :  { %v2394_v4 = vsel %vm2367_vm13, %v2354_v28, %v10377_v1  ;;  %3341 = vst [vmem:[#allocation1 + $0x22] ss:$4 sm:$0xff] %v3252_v60  ;;  %v3251_v45 = vsel %vm3229_vm0, %v2469_v12, %v3155_v22  ;;  %v2272_v6 = vsel %vm2247_vm9, %v10385_v24, %v10384_v32  ;;  %v2313_v57 = vsel %vm2287_vm11, %v2273_v10, %v10386_v59  ;;  %v10387_v40 = vld [vmem:[#allocation413_spill] sm:$0xff]  ;;  %v10391_v54 = vld [vmem:[#allocation460_spill] sm:$0xff]  ;;  %v10393_v39 = vld [vmem:[#allocation491_spill] sm:$0xff] }
 0x84a   :  { %v2434_v19 = vsel %vm2407_vm14, %v2394_v4, %v10379_v52  ;;  %3340 = vst [vmem:[#allocation1 + $0x21] ss:$4 sm:$0xff] %v3251_v45  ;;  %v3343_v26 = vld.sshfl [vmem:[#allocation1] sm:$0xff pattern:$0x73625140]  ;;  %v2317_v36 = vsel %vm2287_vm11, %v2277_v30, %v10387_v40  ;;  %v2353_v16 = vsel %vm2327_vm12, %v2313_v57, %v10389_v62  ;;  %v10394_v9 = vld [vmem:[#allocation499_spill] sm:$0xff] }
 0x84b   :  { %v2474_v47 = vsel %vm2447_vm15, %v2434_v19, %v10381_v5  ;;  %v10388_v33 = vld [vmem:[#allocation421_spill] sm:$0xff]  ;;  %v2357_v17 = vsel %vm2327_vm12, %v2317_v36, %v10390_v37  ;;  %v10395_v25 = vld [vmem:[#allocation543_spill] sm:$0xff]  ;;  %v10396_v63 = vld [vmem:[#allocation536_spill] sm:$0xff] }
 0x84c   :  { %v3256_v51 = vsel %vm3229_vm0, %v2474_v47, %v3165_v21  ;;  %v2312_v18 = vsel %vm2287_vm11, %v2272_v6, %v10388_v33  ;;  %v2393_v21 = vsel %vm2367_vm13, %v2353_v16, %v10392_v61  ;;  %v2397_v34 = vsel %vm2367_vm13, %v2357_v17, %v10393_v39  ;;  %v10397_v48 = vld [vmem:[#allocation544_spill] sm:$0xff]  ;;  %v10398_v35 = vld [vmem:[#allocation582_spill] sm:$0xff]  ;;  %v10399_v11 = vld [vmem:[#allocation575_spill] sm:$0xff] }
 0x84d   :  { %3347 = vst [vmem:[#allocation1 + $0x2] ss:$4 sm:$0xff] %v3256_v51  ;;  %v2352_v53 = vsel %vm2327_vm12, %v2312_v18, %v10391_v54  ;;  %v2433_v50 = vsel %vm2407_vm14, %v2393_v21, %v10395_v25  ;;  %v2437_v55 = vsel %vm2407_vm14, %v2397_v34, %v10396_v63  ;;  %v10400_v23 = vld [vmem:[#allocation583_spill] sm:$0xff]  ;;  %v10401_v28 = vld [vmem:[#allocation384_spill] sm:$0xff]  ;;  %v10403_v49 = vld [vmem:[#allocation385_spill] sm:$0xff] }
 0x84e   :  { %v2392_v20 = vsel %vm2367_vm13, %v2352_v53, %v10394_v9  ;;  %v2473_v3 = vsel %vm2447_vm15, %v2433_v50, %v10398_v35  ;;  %v2477_v15 = vsel %vm2447_vm15, %v2437_v55, %v10399_v11  ;;  %v10402_v27 = vld [vmem:[#allocation596_spill] sm:$0xff]  ;;  %v10404_v1 = vld [vmem:[#allocation594_spill] sm:$0xff]  ;;  %v10405_v46 = vld [vmem:[#allocation423_spill] sm:$0xff] }
 0x84f   :  { %v2432_v41 = vsel %vm2407_vm14, %v2392_v20, %v10397_v48  ;;  %v3163_v44 = vpop.permute.xlu1 %3162  ;;  %v3259_v58 = vsel %vm3229_vm0, %v2477_v15, %v3171_v14  ;;  %v2276_v2 = vsel %vm2247_vm9, %v10402_v27, %v10401_v28  ;;  %v2275_v4 = vsel %vm2247_vm9, %v10404_v1, %v10403_v49  ;;  %v10406_v14 = vld [vmem:[#allocation424_spill] sm:$0xff]  ;;  %v10407_v22 = vld [vmem:[#allocation462_spill] sm:$0xff]  ;;  %v10408_v19 = vld [vmem:[#allocation463_spill] sm:$0xff] }
 0x850   :  { %v2472_v13 = vsel %vm2447_vm15, %v2432_v41, %v10400_v23  ;;  %v3255_v42 = vsel %vm3229_vm0, %v2473_v3, %v3163_v44  ;;  %v3161_v56 = vpop.permute.xlu0 %3160  ;;  %v2316_v12 = vsel %vm2287_vm11, %v2276_v2, %v10405_v46  ;;  %v2315_v60 = vsel %vm2287_vm11, %v2275_v4, %v10406_v14  ;;  %v10409_v38 = vld [vmem:[#allocation501_spill] sm:$0xff]  ;;  %v10410_v5 = vld [vmem:[#allocation502_spill] sm:$0xff]  ;;  %v10412_v30 = vld [vmem:[#allocation547_spill] sm:$0xff]  ;;  %v3183_v50 = vpop.permute.xlu2 %3182 }
 0x851   :  { %v3344_v31 = vld.sshfl [vmem:[#allocation1 + $0x20] sm:$0xff pattern:$0x73625140]  ;;  %3346 = vst [vmem:[#allocation1 + $0x1] ss:$4 sm:$0xff] %v3255_v42  ;;  %v3254_v8 = vsel %vm3229_vm0, %v2472_v13, %v3161_v56  ;;  %v2356_v52 = vsel %vm2327_vm12, %v2316_v12, %v10407_v22  ;;  %v2355_v45 = vsel %vm2327_vm12, %v2315_v60, %v10408_v19  ;;  %v10411_v29 = vld [vmem:[#allocation546_spill] sm:$0xff] }
 0x852   :  { %3350 = vst [vmem:[#allocation1 + $0x21] ss:$4 sm:$0xff] %v3259_v58  ;;  %v3376_v7 = vpack.c.bf16 %v3344_v31, %v3343_v26  ;;  %v2396_v10 = vsel %vm2367_vm13, %v2356_v52, %v10409_v38  ;;  %v2395_v47 = vsel %vm2367_vm13, %v2355_v45, %v10410_v5  ;;  %v10413_v24 = vld [vmem:[#allocation585_spill] sm:$0xff]  ;;  %v10414_v57 = vld [vmem:[#allocation586_spill] sm:$0xff]  ;;  %v10415_v33 = vld [vmem:[#allocation387_spill] sm:$0xff] }
 0x853   :  { %3345 = vst [vmem:[#allocation1] ss:$4 sm:$0xff] %v3254_v8  ;;  %v2436_v43 = vsel %vm2407_vm14, %v2396_v10, %v10411_v29  ;;  %v2435_v32 = vsel %vm2407_vm14, %v2395_v47, %v10412_v30  ;;  %v10416_v18 = vld [vmem:[#allocation25_spill] sm:$0xff]  ;;  %v10417_v16 = vld [vmem:[#allocation388_spill] sm:$0xff]  ;;  %v10419_v54 = vld [vmem:[#allocation426_spill] sm:$0xff] }
 0x854   :  { %3744 = vmatmul.msk.bf16.vlgmr.msra.gmra.mxu2 %vm3431_vm1, %v3376_v7  ;;  %v2476_v6 = vsel %vm2447_vm15, %v2436_v43, %v10413_v24  ;;  %v2475_v51 = vsel %vm2447_vm15, %v2435_v32, %v10414_v57  ;;  %v2279_v62 = vsel %vm2247_vm9, %v10416_v18, %v10415_v33  ;;  %v10418_v37 = vld [vmem:[#allocation597_spill] sm:$0xff]  ;;  %v10421_v21 = vld [vmem:[#allocation11_spill] sm:$0xff]  ;;  %v10424_v63 = vld [vmem:[#allocation380_spill] sm:$0xff] }
 0x855   :  { %v2278_v17 = vsel %vm2247_vm9, %v10418_v37, %v10417_v16  ;;  %v2319_v53 = vsel %vm2287_vm11, %v2279_v62, %v10419_v54  ;;  %v10420_v61 = vld [vmem:[#allocation377_spill] sm:$0xff]  ;;  %v10422_v34 = vld [vmem:[#allocation427_spill] sm:$0xff]  ;;  %v10425_v55 = vld [vmem:[#allocation516_spill] sm:$0xff] }
 0x856   :  { %v2280_v39 = vsel %vm2247_vm9, %v10421_v21, %v10420_v61  ;;  %v2318_v9 = vsel %vm2287_vm11, %v2278_v17, %v10422_v34  ;;  %v10423_v20 = vld [vmem:[#allocation465_spill] sm:$0xff]  ;;  %v2283_v48 = vsel %vm2247_vm9, %v10425_v55, %v10424_v63  ;;  %v10426_v41 = vld [vmem:[#allocation416_spill] sm:$0xff]  ;;  %v10427_v3 = vld [vmem:[#allocation466_spill] sm:$0xff] }
 0x857   :  { %v3169_v59 = vpop.permute.xlu1 %3168  ;;  %v2359_v25 = vsel %vm2327_vm12, %v2319_v53, %v10423_v20  ;;  %v2320_v35 = vsel %vm2287_vm11, %v2280_v39, %v10426_v41  ;;  %v2358_v44 = vsel %vm2327_vm12, %v2318_v9, %v10427_v3  ;;  %v10428_v11 = vld [vmem:[#allocation504_spill] sm:$0xff]  ;;  %v10429_v23 = vld [vmem:[#allocation419_spill] sm:$0xff]  ;;  %v10431_v58 = vld [vmem:[#allocation505_spill] sm:$0xff] }
 0x858   :  { %v3258_v26 = vsel %vm3229_vm0, %v2476_v6, %v3169_v59  ;;  %v3167_v40 = vpop.permute.xlu0 %3166  ;;  %v2399_v15 = vsel %vm2367_vm13, %v2359_v25, %v10428_v11  ;;  %v2323_v13 = vsel %vm2287_vm11, %v2283_v48, %v10429_v23  ;;  %v10430_v42 = vld [vmem:[#allocation455_spill] sm:$0xff]  ;;  %v2398_v31 = vsel %vm2367_vm13, %v2358_v44, %v10431_v58  ;;  %v10432_v8 = vld [vmem:[#allocation549_spill] sm:$0xff]  ;;  %v10433_v27 = vld [vmem:[#allocation458_spill] sm:$0xff]  ;;  %v3189_v54 = vpop.permute.xlu2 %3188 }
 0x859   :  { %3349 = vst [vmem:[#allocation1 + $0x20] ss:$4 sm:$0xff] %v3258_v26  ;;  %v3257_v36 = vsel %vm3229_vm0, %v2475_v51, %v3167_v40  ;;  %v2360_v56 = vsel %vm2327_vm12, %v2320_v35, %v10430_v42  ;;  %v2439_v28 = vsel %vm2407_vm14, %v2399_v15, %v10432_v8  ;;  %v2363_v2 = vsel %vm2327_vm12, %v2323_v13, %v10433_v27  ;;  %v10434_v7 = vld [vmem:[#allocation494_spill] sm:$0xff]  ;;  %v10436_v46 = vld [vmem:[#allocation587_spill] sm:$0xff]  ;;  %v10437_v60 = vld [vmem:[#allocation497_spill] sm:$0xff] }
 0x85a   :  { %3348 = vst [vmem:[#allocation1 + $0x3] ss:$4 sm:$0xff] %v3257_v36  ;;  %v2400_v49 = vsel %vm2367_vm13, %v2360_v56, %v10434_v7  ;;  %v10435_v1 = vld [vmem:[#allocation550_spill] sm:$0xff]  ;;  %v2479_v12 = vsel %vm2447_vm15, %v2439_v28, %v10436_v46  ;;  %v2403_v22 = vsel %vm2367_vm13, %v2363_v2, %v10437_v60  ;;  %v10438_v52 = vld [vmem:[#allocation539_spill] sm:$0xff]  ;;  %v10439_v45 = vld [vmem:[#allocation588_spill] sm:$0xff] }
 0x85b   :  { %v2438_v4 = vsel %vm2407_vm14, %v2398_v31, %v10435_v1  ;;  %v2440_v19 = vsel %vm2407_vm14, %v2400_v49, %v10438_v52  ;;  %v10440_v47 = vld [vmem:[#allocation542_spill] sm:$0xff]  ;;  %v10442_v6 = vld [vmem:[#allocation581_spill] sm:$0xff]  ;;  %v10443_v51 = vld [vmem:[#allocation383_spill] sm:$0xff] }
 0x85c   :  { %v2478_v38 = vsel %vm2447_vm15, %v2438_v4, %v10439_v45  ;;  %v2443_v29 = vsel %vm2407_vm14, %v2403_v22, %v10440_v47  ;;  %v10441_v43 = vld [vmem:[#allocation578_spill] sm:$0xff]  ;;  %v10446_v62 = vld [vmem:[#allocation461_spill] sm:$0xff]  ;;  %v10447_v37 = vld [vmem:[#allocation500_spill] sm:$0xff] }
 0x85d   :  { %v2480_v30 = vsel %vm2447_vm15, %v2440_v19, %v10441_v43  ;;  %v2483_v59 = vsel %vm2447_vm15, %v2443_v29, %v10442_v6  ;;  %v10444_v26 = vld [vmem:[#allocation50_spill] sm:$0xff]  ;;  %v10449_v61 = vld [vmem:[#allocation584_spill] sm:$0xff]  ;;  %v10452_v63 = vld [vmem:[#allocation391_spill] sm:$0xff] }
 0x85e   :  { %v3262_v57 = vsel %vm3229_vm0, %v2480_v30, %v3177_v0  ;;  %v2286_v40 = vsel %vm2247_vm9, %v10444_v26, %v10443_v51  ;;  %v3265_v36 = vsel %vm3229_vm0, %v2483_v59, %v3183_v50  ;;  %v10445_v33 = vld [vmem:[#allocation422_spill] sm:$0xff]  ;;  %v10448_v0 = vld [vmem:[#allocation545_spill] sm:$0xff]  ;;  %v10456_v11 = vld [vmem:[#allocation468_spill] sm:$0xff] }
 0x85f   :  { %v3175_v14 = vpop.permute.xlu1 %3174  ;;  %v2326_v18 = vsel %vm2287_vm11, %v2286_v40, %v10445_v33  ;;  %v10450_v20 = vld [vmem:[#allocation390_spill] sm:$0xff]  ;;  %v10453_v55 = vld [vmem:[#allocation509_spill] sm:$0xff]  ;;  %v10458_v42 = vld [vmem:[#allocation507_spill] sm:$0xff] }
 0x860   :  { %v3261_v10 = vsel %vm3229_vm0, %v2479_v12, %v3175_v14  ;;  %v3173_v5 = vpop.permute.xlu0 %3172  ;;  %v2366_v16 = vsel %vm2327_vm12, %v2326_v18, %v10446_v62  ;;  %v10451_v25 = vld [vmem:[#allocation510_spill] sm:$0xff]  ;;  %v2281_v48 = vsel %vm2247_vm9, %v10453_v55, %v10452_v63  ;;  %v10454_v41 = vld [vmem:[#allocation429_spill] sm:$0xff]  ;;  %v10459_v58 = vld [vmem:[#allocation508_spill] sm:$0xff] }
 0x861   :  { %3352 = vst [vmem:[#allocation1 + $0x23] ss:$4 sm:$0xff] %v3261_v10  ;;  %v3260_v32 = vsel %vm3229_vm0, %v2478_v38, %v3173_v5  ;;  %v3353_v24 = vld.sshfl [vmem:[#allocation1] sm:$0xff pattern:$0x73625140]  ;;  %v2406_v17 = vsel %vm2367_vm13, %v2366_v16, %v10447_v37  ;;  %v2282_v50 = vsel %vm2247_vm9, %v10451_v25, %v10450_v20  ;;  %v10455_v3 = vld [vmem:[#allocation430_spill] sm:$0xff] }
 0x862   :  { %3351 = vst [vmem:[#allocation1 + $0x22] ss:$4 sm:$0xff] %v3260_v32  ;;  %v2446_v53 = vsel %vm2407_vm14, %v2406_v17, %v10448_v0  ;;  %v2322_v35 = vsel %vm2287_vm11, %v2282_v50, %v10454_v41  ;;  %v2321_v44 = vsel %vm2287_vm11, %v2281_v48, %v10455_v3  ;;  %v10457_v23 = vld [vmem:[#allocation469_spill] sm:$0xff]  ;;  %v10460_v8 = vld [vmem:[#allocation552_spill] sm:$0xff]  ;;  %v10463_v4 = vld [vmem:[#allocation590_spill] sm:$0xff] }
 0x863   :  { %3355 = vst [vmem:[#allocation1] ss:$4 sm:$0xff] %v3262_v57  ;;  %v2486_v21 = vsel %vm2447_vm15, %v2446_v53, %v10449_v61  ;;  %v2362_v15 = vsel %vm2327_vm12, %v2322_v35, %v10456_v11  ;;  %v2361_v13 = vsel %vm2327_vm12, %v2321_v44, %v10457_v23  ;;  %v10461_v27 = vld [vmem:[#allocation553_spill] sm:$0xff]  ;;  %v10465_v52 = vld [vmem:[#allocation64_spill] sm:$0xff]  ;;  %v10466_v45 = vld [vmem:[#allocation394_spill] sm:$0xff] }
 0x864   :  { %3358 = vst [vmem:[#allocation1 + $0x3] ss:$4 sm:$0xff] %v3265_v36  ;;  %v3268_v39 = vsel %vm3229_vm0, %v2486_v21, %v3189_v54  ;;  %v2402_v56 = vsel %vm2367_vm13, %v2362_v15, %v10458_v42  ;;  %v2401_v31 = vsel %vm2367_vm13, %v2361_v13, %v10459_v58  ;;  %v10462_v7 = vld [vmem:[#allocation589_spill] sm:$0xff]  ;;  %v10468_v5 = vld [vmem:[#allocation432_spill] sm:$0xff]  ;;  %v10470_v30 = vld [vmem:[#allocation471_spill] sm:$0xff] }
 0x865   :  { %v2442_v28 = vsel %vm2407_vm14, %v2402_v56, %v10460_v8  ;;  %v2441_v2 = vsel %vm2407_vm14, %v2401_v31, %v10461_v27  ;;  %v10464_v22 = vld [vmem:[#allocation393_spill] sm:$0xff]  ;;  %v10472_v59 = vld [vmem:[#allocation512_spill] sm:$0xff]  ;;  %v10474_v40 = vld [vmem:[#allocation555_spill] sm:$0xff] }
 0x866   :  { %v2482_v49 = vsel %vm2447_vm15, %v2442_v28, %v10462_v7  ;;  %v2481_v46 = vsel %vm2447_vm15, %v2441_v2, %v10463_v4  ;;  %v2285_v19 = vsel %vm2247_vm9, %v10465_v52, %v10464_v22  ;;  %v10467_v38 = vld [vmem:[#allocation21_spill] sm:$0xff]  ;;  %v10475_v33 = vld [vmem:[#allocation556_spill] sm:$0xff]  ;;  %v10476_v62 = vld [vmem:[#allocation591_spill] sm:$0xff] }
 0x867   :  { %v2284_v10 = vsel %vm2247_vm9, %v10467_v38, %v10466_v45  ;;  %v2325_v47 = vsel %vm2287_vm11, %v2285_v19, %v10468_v5  ;;  %v10469_v29 = vld [vmem:[#allocation433_spill] sm:$0xff]  ;;  %v10477_v17 = vld [vmem:[#allocation592_spill] sm:$0xff] }
 0x868   :  { %v2324_v43 = vsel %vm2287_vm11, %v2284_v10, %v10469_v29  ;;  %v2365_v32 = vsel %vm2327_vm12, %v2325_v47, %v10470_v30  ;;  %v10473_v51 = vld [vmem:[#allocation513_spill] sm:$0xff] }
 0x869   :  { %v3354_v34 = vld.sshfl [vmem:[#allocation1 + $0x20] sm:$0xff pattern:$0x73625140]  ;;  %v2405_v57 = vsel %vm2367_vm13, %v2365_v32, %v10472_v59 }
 0x86a   :  { %3361 = vst [vmem:[#allocation1 + $0x22] ss:$4 sm:$0xff] %v3268_v39  ;;  %v3377_v9 = vpack.c.bf16 %v3354_v34, %v3353_v24  ;;  %v10471_v24 = vld [vmem:[#allocation472_spill] sm:$0xff]  ;;  %v2445_v36 = vsel %vm2407_vm14, %v2405_v57, %v10474_v40  ;;  %v9143_v25 = vld [vmem:[%s9237_s2] ss:$0 sm:$0xff] }
 0x86b   :  { %v2364_v6 = vsel %vm2327_vm12, %v2324_v43, %v10471_v24  ;;  %v2485_v16 = vsel %vm2447_vm15, %v2445_v36, %v10476_v62 }
 0x86c   :  { %3745 = vmatmul.msk.bf16.vlgmr.msra.gmra.mxu3 %vm3431_vm1, %v3377_v9  ;;  %v2404_v26 = vsel %vm2367_vm13, %v2364_v6, %v10473_v51 }
 0x86d   :  { %v2444_v18 = vsel %vm2407_vm14, %v2404_v26, %v10475_v33 }
 0x86e   :  { %v2484_v54 = vsel %vm2447_vm15, %v2444_v18, %v10477_v17 }
 0x871   :  { %v3181_v1 = vpop.permute.xlu1 %3180 }
 0x872   :  { %v3264_v12 = vsel %vm3229_vm0, %v2482_v49, %v3181_v1 }
 0x873   :  { %v3179_v14 = vpop.permute.xlu0 %3178  ;;  %3357 = vst [vmem:[#allocation1 + $0x2] ss:$4 sm:$0xff] %v3264_v12 }
 0x874   :  { %v3263_v60 = vsel %vm3229_vm0, %v2481_v46, %v3179_v14 }
 0x875   :  { %3356 = vst [vmem:[#allocation1 + $0x1] ss:$4 sm:$0xff] %v3263_v60 }
 0x879   :  { %v3187_v37 = vpop.permute.xlu1 %3186 }
 0x87a   :  { %v3267_v0 = vsel %vm3229_vm0, %v2485_v16, %v3187_v37 }
 0x87b   :  { %v3185_v53 = vpop.permute.xlu0 %3184  ;;  %3360 = vst [vmem:[#allocation1 + $0x21] ss:$4 sm:$0xff] %v3267_v0 }
 0x87c   :  { %v3266_v61 = vsel %vm3229_vm0, %v2484_v54, %v3185_v53  ;;  %v3362_v21 = vld.sshfl [vmem:[#allocation1] sm:$0xff pattern:$0x73625140] }
 0x87d   :  { %3359 = vst [vmem:[#allocation1 + $0x20] ss:$4 sm:$0xff] %v3266_v61 }
 0x884   :  { %v3363_v39 = vld.sshfl [vmem:[#allocation1 + $0x20] sm:$0xff pattern:$0x73625140] }
 0x885   :  { %v3378_v34 = vpack.c.bf16 %v3363_v39, %v3362_v21 }
 0x887   :  { %3746 = vmatmul.msk.bf16.gmra.mxu3 %vm3431_vm1, %v3378_v34 }
 0x8ac   :  { %v3460_v9 = vpop.f32.mrf.mxu0 }
 0x8ad   :  { %v3496_v20 = vrot.slane %v3460_v9, 4  ;;  %v3495_v63 = vrot.slane %v3460_v9, 2  ;;  %v3497_v55 = vrot.slane %v3460_v9, 6  ;;  %v3557_v35 = vadd.f32 %v9143_v25, %v3460_v9 }
 0x8af   :  { %v3559_v41 = vadd.f32 %v9143_v25, %v3496_v20  ;;  %v3558_v3 = vadd.f32 %v9143_v25, %v3495_v63  ;;  %v3560_v44 = vadd.f32 %v9143_v25, %v3497_v55  ;;  %v3596_v42 = vmax.f32 %v3557_v35, 0.0 }
 0x8b1   :  { %v3598_v13 = vmax.f32 %v3559_v41, 0.0  ;;  %v3597_v58 = vmax.f32 %v3558_v3, 0.0  ;;  %v3599_v31 = vmax.f32 %v3560_v44, 0.0  ;;  %v3636_v7 = vsel %vm3635_vm2, %v3596_v42, -inf }
 0x8b3   :  { %v3638_v2 = vsel %vm3635_vm2, %v3598_v13, -inf  ;;  %v3637_v1 = vsel %vm3635_vm2, %v3597_v58, -inf  ;;  %v3640_v4 = vsel %vm3635_vm2, %v3599_v31, -inf }
 0x8b4   :  { %v3462_v50 = vpop.f32.mrf.mxu0  ;;  %v3639_v14 = vmax.f32 %v3636_v7, %v3638_v2  ;;  %v3641_v5 = vmax.f32 %v3637_v1, %v3640_v4 }
 0x8b5   :  { %v3498_v48 = vrot.slane %v3462_v50, 2  ;;  %v3499_v11 = vrot.slane %v3462_v50, 4  ;;  %v3561_v15 = vadd.f32 %v9143_v25, %v3462_v50  ;;  %v3500_v56 = vrot.slane %v3462_v50, 6 }
 0x8b7   :  { %v3562_v23 = vadd.f32 %v9143_v25, %v3498_v48  ;;  %v3563_v8 = vadd.f32 %v9143_v25, %v3499_v11  ;;  %v3600_v28 = vmax.f32 %v3561_v15, 0.0  ;;  %v3564_v49 = vadd.f32 %v9143_v25, %v3500_v56 }
 0x8b9   :  { %v3601_v27 = vmax.f32 %v3562_v23, 0.0  ;;  %v3602_v46 = vmax.f32 %v3563_v8, 0.0  ;;  %v3642_v12 = vsel %vm3635_vm2, %v3600_v28, -inf  ;;  %v3603_v10 = vmax.f32 %v3564_v49, 0.0 }
 0x8ba   :  { %v3643_v47 = vmax.f32 %v3639_v14, %v3642_v12 }
 0x8bb   :  { %v3644_v60 = vsel %vm3635_vm2, %v3601_v27, -inf  ;;  %v3646_v29 = vsel %vm3635_vm2, %v3602_v46, -inf  ;;  %v3648_v40 = vsel %vm3635_vm2, %v3603_v10, -inf }
 0x8bc   :  { %v3645_v24 = vmax.f32 %v3641_v5, %v3644_v60  ;;  %v3647_v26 = vmax.f32 %v3643_v47, %v3646_v29 }
 0x8be   :  { %v3649_v33 = vmax.f32 %v3645_v24, %v3648_v40 }
 0x8c5   :  { %v3465_v22 = vpop.f32.mrf.mxu1 }
 0x8c6   :  { %v3501_v52 = vrot.slane %v3465_v22, 2  ;;  %v3502_v19 = vrot.slane %v3465_v22, 4  ;;  %v3503_v45 = vrot.slane %v3465_v22, 6  ;;  %v3565_v38 = vadd.f32 %v9143_v25, %v3465_v22 }
 0x8c8   :  { %v3566_v43 = vadd.f32 %v9143_v25, %v3501_v52  ;;  %v3567_v30 = vadd.f32 %v9143_v25, %v3502_v19  ;;  %v3604_v32 = vmax.f32 %v3565_v38, 0.0  ;;  %v3568_v6 = vadd.f32 %v9143_v25, %v3503_v45 }
 0x8ca   :  { %v3605_v59 = vmax.f32 %v3566_v43, 0.0  ;;  %v3606_v57 = vmax.f32 %v3567_v30, 0.0  ;;  %v3650_v51 = vsel %vm3635_vm2, %v3604_v32, -inf  ;;  %v3607_v16 = vmax.f32 %v3568_v6, 0.0 }
 0x8cb   :  { %v3651_v18 = vmax.f32 %v3647_v26, %v3650_v51 }
 0x8cc   :  { %v3652_v36 = vsel %vm3635_vm2, %v3605_v59, -inf  ;;  %v3654_v17 = vsel %vm3635_vm2, %v3606_v57, -inf  ;;  %v3656_v61 = vsel %vm3635_vm2, %v3607_v16, -inf }
 0x8cd   :  { %v3467_v62 = vpop.f32.mrf.mxu1  ;;  %v3653_v54 = vmax.f32 %v3649_v33, %v3652_v36  ;;  %v3655_v53 = vmax.f32 %v3651_v18, %v3654_v17 }
 0x8ce   :  { %v3569_v37 = vadd.f32 %v9143_v25, %v3467_v62  ;;  %v3504_v50 = vrot.slane %v3467_v62, 2  ;;  %v3506_v63 = vrot.slane %v3467_v62, 6  ;;  %v3505_v48 = vrot.slane %v3467_v62, 4 }
 0x8cf   :  { %v3657_v39 = vmax.f32 %v3653_v54, %v3656_v61 }
 0x8d0   :  { %v3608_v0 = vmax.f32 %v3569_v37, 0.0  ;;  %v3570_v41 = vadd.f32 %v9143_v25, %v3504_v50  ;;  %v3572_v35 = vadd.f32 %v9143_v25, %v3506_v63  ;;  %v3571_v23 = vadd.f32 %v9143_v25, %v3505_v48 }
 0x8d2   :  { %v3658_v21 = vsel %vm3635_vm2, %v3608_v0, -inf  ;;  %v3609_v13 = vmax.f32 %v3570_v41, 0.0  ;;  %v3611_v42 = vmax.f32 %v3572_v35, 0.0  ;;  %v3610_v27 = vmax.f32 %v3571_v23, 0.0 }
 0x8d3   :  { %v3659_v34 = vmax.f32 %v3655_v53, %v3658_v21 }
 0x8d4   :  { %v3661_v2 = vsel %vm3635_vm2, %v3609_v13, -inf  ;;  %v3663_v7 = vsel %vm3635_vm2, %v3611_v42, -inf  ;;  %v3662_v52 = vsel %vm3635_vm2, %v3610_v27, -inf }
 0x8d5   :  { %v3660_v9 = vmax.f32 %v3659_v34, %v3657_v39  ;;  %v3664_v19 = vmax.f32 %v3661_v2, %v3663_v7 }
 0x8d7   :  { %3711 = vst.msk [vmem:[%s9238_s3] sm:$0x3] %vm3635_vm2, %v3660_v9  ;;  %v3470_v20 = vpop.f32.mrf.mxu2 }
 0x8d8   :  { %v3507_v55 = vrot.slane %v3470_v20, 2  ;;  %v3508_v44 = vrot.slane %v3470_v20, 4  ;;  %v3573_v11 = vadd.f32 %v9143_v25, %v3470_v20  ;;  %v3509_v56 = vrot.slane %v3470_v20, 6 }
 0x8da   :  { %v3574_v15 = vadd.f32 %v9143_v25, %v3507_v55  ;;  %v3575_v31 = vadd.f32 %v9143_v25, %v3508_v44  ;;  %v3612_v8 = vmax.f32 %v3573_v11, 0.0  ;;  %v3576_v49 = vadd.f32 %v9143_v25, %v3509_v56 }
 0x8dc   :  { %v3613_v28 = vmax.f32 %v3574_v15, 0.0  ;;  %v3614_v12 = vmax.f32 %v3575_v31, 0.0  ;;  %v3665_v14 = vsel %vm3635_vm2, %v3612_v8, -inf  ;;  %v3615_v45 = vmax.f32 %v3576_v49, 0.0 }
 0x8dd   :  { %v3666_v47 = vmax.f32 %v3662_v52, %v3665_v14 }
 0x8de   :  { %v3667_v60 = vsel %vm3635_vm2, %v3613_v28, -inf  ;;  %v3669_v30 = vsel %vm3635_vm2, %v3614_v12, -inf  ;;  %v3671_v32 = vsel %vm3635_vm2, %v3615_v45, -inf }
 0x8df   :  { %v3472_v3 = vpop.f32.mrf.mxu2  ;;  %v3668_v29 = vmax.f32 %v3664_v19, %v3667_v60  ;;  %v3670_v57 = vmax.f32 %v3666_v47, %v3669_v30 }
 0x8e0   :  { %v3510_v58 = vrot.slane %v3472_v3, 2  ;;  %v3511_v1 = vrot.slane %v3472_v3, 4  ;;  %v3577_v4 = vadd.f32 %v9143_v25, %v3472_v3  ;;  %v3512_v22 = vrot.slane %v3472_v3, 6 }
 0x8e1   :  { %v3672_v51 = vmax.f32 %v3668_v29, %v3671_v32 }
 0x8e2   :  { %v3578_v46 = vadd.f32 %v9143_v25, %v3510_v58  ;;  %v3579_v38 = vadd.f32 %v9143_v25, %v3511_v1  ;;  %v3616_v10 = vmax.f32 %v3577_v4, 0.0  ;;  %v3580_v43 = vadd.f32 %v9143_v25, %v3512_v22 }
 0x8e4   :  { %v3617_v5 = vmax.f32 %v3578_v46, 0.0  ;;  %v3618_v24 = vmax.f32 %v3579_v38, 0.0  ;;  %v3673_v6 = vsel %vm3635_vm2, %v3616_v10, -inf  ;;  %v3619_v40 = vmax.f32 %v3580_v43, 0.0 }
 0x8e5   :  { %v3674_v18 = vmax.f32 %v3670_v57, %v3673_v6 }
 0x8e6   :  { %v3675_v59 = vsel %vm3635_vm2, %v3617_v5, -inf  ;;  %v3677_v16 = vsel %vm3635_vm2, %v3618_v24, -inf  ;;  %v3679_v54 = vsel %vm3635_vm2, %v3619_v40, -inf }
 0x8e7   :  { %v3676_v62 = vmax.f32 %v3672_v51, %v3675_v59  ;;  %v3678_v61 = vmax.f32 %v3674_v18, %v3677_v16 }
 0x8e9   :  { %v3680_v21 = vmax.f32 %v3676_v62, %v3679_v54 }
 0x8ef   :  { %v3475_v26 = vpop.f32.mrf.mxu3 }
 0x8f0   :  { %v3513_v36 = vrot.slane %v3475_v26, 2  ;;  %v3581_v33 = vadd.f32 %v9143_v25, %v3475_v26  ;;  %v3514_v63 = vrot.slane %v3475_v26, 4  ;;  %v3515_v48 = vrot.slane %v3475_v26, 6 }
 0x8f2   :  { %v3582_v37 = vadd.f32 %v9143_v25, %v3513_v36  ;;  %v3620_v17 = vmax.f32 %v3581_v33, 0.0  ;;  %v3583_v3 = vadd.f32 %v9143_v25, %v3514_v63  ;;  %v3584_v11 = vadd.f32 %v9143_v25, %v3515_v48 }
 0x8f4   :  { %v3621_v0 = vmax.f32 %v3582_v37, 0.0  ;;  %v3681_v53 = vsel %vm3635_vm2, %v3620_v17, -inf  ;;  %v3622_v42 = vmax.f32 %v3583_v3, 0.0  ;;  %v3623_v58 = vmax.f32 %v3584_v11, 0.0 }
 0x8f5   :  { %v3682_v34 = vmax.f32 %v3678_v61, %v3681_v53 }
 0x8f6   :  { %v3683_v39 = vsel %vm3635_vm2, %v3621_v0, -inf  ;;  %v3686_v27 = vsel %vm3635_vm2, %v3622_v42, -inf  ;;  %v3687_v12 = vsel %vm3635_vm2, %v3623_v58, -inf }
 0x8f7   :  { %v3684_v9 = vmax.f32 %v3680_v21, %v3683_v39  ;;  %v3477_v50 = vpop.f32.mrf.mxu3 }
 0x8f8   :  { %v3516_v55 = vrot.slane %v3477_v50, 2  ;;  %v3517_v41 = vrot.slane %v3477_v50, 4  ;;  %v3585_v35 = vadd.f32 %v9143_v25, %v3477_v50  ;;  %v3518_v15 = vrot.slane %v3477_v50, 6 }
 0x8f9   :  { %v3685_v20 = vmax.f32 %v3684_v9, %v3682_v34 }
 0x8fa   :  { %v3586_v44 = vadd.f32 %v9143_v25, %v3516_v55  ;;  %v3587_v23 = vadd.f32 %v9143_v25, %v3517_v41  ;;  %v3624_v13 = vmax.f32 %v3585_v35, 0.0  ;;  %v3588_v31 = vadd.f32 %v9143_v25, %v3518_v15 }
 0x8fb   :  { %3712 = vst.msk [vmem:[%s9238_s3 + $0x2] sm:$0x3] %vm3635_vm2, %v3685_v20 }
 0x8fc   :  { %v3625_v56 = vmax.f32 %v3586_v44, 0.0  ;;  %v3626_v8 = vmax.f32 %v3587_v23, 0.0  ;;  %v3688_v28 = vsel %vm3635_vm2, %v3624_v13, -inf  ;;  %v3627_v14 = vmax.f32 %v3588_v31, 0.0 }
 0x8fd   :  { %v3689_v60 = vmax.f32 %v3686_v27, %v3688_v28 }
 0x8fe   :  { %v3690_v2 = vsel %vm3635_vm2, %v3625_v56, -inf  ;;  %v3692_v22 = vsel %vm3635_vm2, %v3626_v8, -inf  ;;  %v3694_v30 = vsel %vm3635_vm2, %v3627_v14, -inf }
 0x8ff   :  { %v3691_v38 = vmax.f32 %v3687_v12, %v3690_v2  ;;  %v3693_v43 = vmax.f32 %v3689_v60, %v3692_v22 }
 0x901   :  { %v3695_v24 = vmax.f32 %v3691_v38, %v3694_v30 }
 0x90a   :  { %v3480_v7 = vpop.f32.mrf.mxu3 }
 0x90b   :  { %v3519_v49 = vrot.slane %v3480_v7, 2  ;;  %v3520_v1 = vrot.slane %v3480_v7, 4  ;;  %v3521_v4 = vrot.slane %v3480_v7, 6  ;;  %v3589_v46 = vadd.f32 %v9143_v25, %v3480_v7 }
 0x90d   :  { %v3590_v52 = vadd.f32 %v9143_v25, %v3519_v49  ;;  %v3591_v19 = vadd.f32 %v9143_v25, %v3520_v1  ;;  %v3628_v45 = vmax.f32 %v3589_v46, 0.0  ;;  %v3592_v10 = vadd.f32 %v9143_v25, %v3521_v4 }
 0x90f   :  { %v3629_v5 = vmax.f32 %v3590_v52, 0.0  ;;  %v3630_v47 = vmax.f32 %v3591_v19, 0.0  ;;  %v3696_v29 = vsel %vm3635_vm2, %v3628_v45, -inf  ;;  %v3631_v6 = vmax.f32 %v3592_v10, 0.0 }
 0x910   :  { %v3697_v57 = vmax.f32 %v3693_v43, %v3696_v29 }
 0x911   :  { %v3698_v32 = vsel %vm3635_vm2, %v3629_v5, -inf  ;;  %v3700_v36 = vsel %vm3635_vm2, %v3630_v47, -inf  ;;  %v3702_v0 = vsel %vm3635_vm2, %v3631_v6, -inf }
 0x912   :  { %v3482_v59 = vpop.f32.mrf.mxu3  ;;  %v3699_v33 = vmax.f32 %v3695_v24, %v3698_v32  ;;  %v3701_v37 = vmax.f32 %v3697_v57, %v3700_v36 }
 0x913   :  { %v3522_v51 = vrot.slane %v3482_v59, 2  ;;  %v3523_v26 = vrot.slane %v3482_v59, 4  ;;  %v3593_v40 = vadd.f32 %v9143_v25, %v3482_v59 }
 0x914   :  { %v3703_v61 = vmax.f32 %v3699_v33, %v3702_v0 }
 0x915   :  { %v3594_v18 = vadd.f32 %v9143_v25, %v3522_v51  ;;  %v3595_v62 = vadd.f32 %v9143_v25, %v3523_v26  ;;  %v3632_v16 = vmax.f32 %v3593_v40, 0.0 }
 0x917   :  { %v3633_v17 = vmax.f32 %v3594_v18, 0.0  ;;  %v3634_v54 = vmax.f32 %v3595_v62, 0.0  ;;  %v3704_v53 = vsel %vm3635_vm2, %v3632_v16, -inf }
 0x918   :  { %v3705_v21 = vmax.f32 %v3701_v37, %v3704_v53 }
 0x919   :  { %v3706_v39 = vsel %vm3635_vm2, %v3633_v17, -inf  ;;  %v3708_v34 = vsel %vm3635_vm2, %v3634_v54, -inf }
 0x91a   :  { %v3707_v9 = vmax.f32 %v3703_v61, %v3706_v39  ;;  %v3709_v20 = vmax.f32 %v3705_v21, %v3708_v34 }
 0x91c   :  { %v3710_v50 = vmax.f32 %v3709_v20, %v3707_v9 }
 0x91e   :  { %3713 = vst.msk [vmem:[%s9238_s3 + $0x4] sm:$0x3] %vm3635_vm2, %v3710_v50 }

</bundles_post_ra>
